<compile_context>
chip_gen: v6e
topology: v6e:2x2x1
jax: 0.10.0
libtpu: 0.0.40
codegen_flags: <defaults>
</compile_context>

<pallas_src>
import functools

import jax
import jax.numpy as jnp
from jax.experimental import pallas as pl
from jax.experimental.pallas import tpu as pltpu


# ---------------------------------------------------------------------------
# Kernel 1: fused  (im2col rows) @ W + bias -> ReLU -> 4x4 pool
# Rows of `a_ref` are grouped so each pooling window's pool*pool pixels are
# contiguous; pooling is then a reduction over aligned 16-row groups.
# ---------------------------------------------------------------------------
def _conv_mm_pool_kernel(a_ref, w_ref, b_ref, o_ref, *, pool, op):
    c = w_ref.shape[1]
    win = pool * pool
    nwin = a_ref.shape[0] // win

    y = jnp.dot(a_ref[...], w_ref[...], preferred_element_type=jnp.float32)
    y = jnp.maximum(y + b_ref[...], 0.0)            # conv + bias + ReLU (f32)

    y = y.reshape(nwin, win, c)                     # aligned: win=16 = 2 tiles
    if op == "avg":
        y = jnp.sum(y, axis=1) * (1.0 / win)
    else:
        y = jnp.max(y, axis=1)
    o_ref[...] = y.astype(o_ref.dtype)


def conv_relu_pool(cols, w, b, *, batch, height, width, pool, windows_per_step,
                   op, out_dtype):
    """cols: (batch*height*width, K) im2col rows (window-grouped order).
    Returns pool(relu(conv(x)+b)) as (batch, height//pool, width//pool, Cout)."""
    k = cols.shape[1]
    c = w.shape[1]
    ho, wo = height // pool, width // pool
    nwin = ho * wo
    assert nwin % windows_per_step == 0
    steps = nwin // windows_per_step
    m_blk = windows_per_step * pool * pool

    kernel = functools.partial(_conv_mm_pool_kernel, pool=pool, op=op)
    out = pl.pallas_call(
        kernel,
        out_shape=jax.ShapeDtypeStruct((batch, nwin, c), out_dtype),
        grid=(batch, steps),
        in_specs=[
            pl.BlockSpec((m_blk, k), lambda n, i: (n * steps + i, 0)),
            pl.BlockSpec((k, c), lambda n, i: (0, 0)),      # resident weight
            pl.BlockSpec((1, c), lambda n, i: (0, 0)),      # resident bias
        ],
        out_specs=pl.BlockSpec((None, windows_per_step, c),
                               lambda n, i: (n, i, 0)),
        compiler_params=pltpu.CompilerParams(
            dimension_semantics=("parallel", "parallel"),
            vmem_limit_bytes=32 * 1024 * 1024),
    )(cols, w, b)
    return out.reshape(batch, ho, wo, c)


# ---------------------------------------------------------------------------
# Kernel 2: fused  Linear(4608->512) -> ReLU -> Linear(512->512)
# Grid streams FC1's K in 512-chunks; hidden stays in VMEM scratch; the
# resident 512x512 FC2 weight is applied in the final step.
# ---------------------------------------------------------------------------
def _fc_fused_kernel(x_ref, w1_ref, b1_ref, w2_ref, b2_ref, o_ref, h_acc):
    @pl.when(pl.program_id(0) == 0)
    def _():
        h_acc[...] = jnp.zeros_like(h_acc)

    h_acc[...] += jnp.dot(x_ref[...], w1_ref[...],
                          preferred_element_type=jnp.float32)

    @pl.when(pl.program_id(0) == pl.num_programs(0) - 1)
    def _():
        h = jnp.maximum(h_acc[...] + b1_ref[...], 0.0)          # (M, 512) f32
        out = jnp.dot(h.astype(w2_ref.dtype), w2_ref[...],
                      preferred_element_type=jnp.float32) + b2_ref[...]
        o_ref[...] = out.astype(o_ref.dtype)


def fc1_relu_fc2(x, w1, b1, w2, b2, *, tk=512):
    m, k1 = x.shape
    h = w1.shape[1]
    n = w2.shape[1]
    assert k1 % tk == 0 and w1.shape[0] == k1 and w2.shape[0] == h
    return pl.pallas_call(
        _fc_fused_kernel,
        out_shape=jax.ShapeDtypeStruct((m, n), jnp.float32),
        grid=(k1 // tk,),
        in_specs=[
            pl.BlockSpec((m, tk), lambda i: (0, i)),
            pl.BlockSpec((tk, h), lambda i: (i, 0)),
            pl.BlockSpec((1, h), lambda i: (0, 0)),
            pl.BlockSpec((h, n), lambda i: (0, 0)),     # resident FC2 weight
            pl.BlockSpec((1, n), lambda i: (0, 0)),
        ],
        out_specs=pl.BlockSpec((m, n), lambda i: (0, 0)),
        scratch_shapes=[pltpu.VMEM((m, h), jnp.float32)],
        compiler_params=pltpu.CompilerParams(
            dimension_semantics=("arbitrary",),
            vmem_limit_bytes=32 * 1024 * 1024),
    )(x, w1, b1, w2, b2)


# ---------------------------------------------------------------------------
# XLA glue: 3x3/pad=1 im2col (NHWC), rows reordered so the pool*pool pixels of
# every pooling window are contiguous (feature order = (kh, kw, cin)).
# ---------------------------------------------------------------------------
def _im2col_3x3_pool_rows(x, pool):
    n, h, w, c = x.shape
    xp = jnp.pad(x, ((0, 0), (1, 1), (1, 1), (0, 0)))
    cols = jnp.concatenate(
        [xp[:, dh:dh + h, dw:dw + w, :] for dh in range(3) for dw in range(3)],
        axis=-1)                                          # (N, H, W, 9C)
    cols = cols.reshape(n, h // pool, pool, w // pool, pool, 9 * c)
    cols = jnp.transpose(cols, (0, 1, 3, 2, 4, 5))        # (N, Hp, Wp, p, p, 9C)
    return cols.reshape(n * h * w, 9 * c)


# ---------------------------------------------------------------------------
# Full forward pass (torch semantics; NHWC internally)
# ---------------------------------------------------------------------------
def conv_model_forward(x_nchw, kp):
    n = x_nchw.shape[0]
    x = jnp.transpose(x_nchw, (0, 2, 3, 1)).astype(jnp.bfloat16)     # NHWC bf16

    # conv1 -> ReLU -> AvgPool(4)   (one fused kernel)
    cols1 = _im2col_3x3_pool_rows(x, 4)                              # (n*9216, 27)
    y1 = conv_relu_pool(cols1, kp["conv1_w"], kp["conv1_b"],
                        batch=n, height=96, width=96, pool=4,
                        windows_per_step=192, op="avg",
                        out_dtype=jnp.bfloat16)                      # (n,24,24,64)

    # conv2 -> ReLU -> MaxPool(4)   (one fused kernel)
    cols2 = _im2col_3x3_pool_rows(y1, 4)                             # (n*576, 576)
    y2 = conv_relu_pool(cols2, kp["conv2_w"], kp["conv2_b"],
                        batch=n, height=24, width=24, pool=4,
                        windows_per_step=36, op="max",
                        out_dtype=jnp.bfloat16)                      # (n,6,6,128)

    # flatten in NHWC order (fc1_w was pre-permuted to match torch.flatten on
    # NCHW), pad batch rows to a multiple of 8 for full sublanes.
    f = y2.reshape(n, 6 * 6 * 128)
    m_pad = max(8, -(-n // 8) * 8)
    f = jnp.pad(f, ((0, m_pad - n), (0, 0)))

    # projection: Linear -> ReLU -> Linear   (one fused kernel)
    out = fc1_relu_fc2(f, kp["fc1_w"], kp["fc1_b"], kp["fc2_w"], kp["fc2_b"])
    return out[:n]


# ---------------------------------------------------------------------------
# Parameters: torch layout init + one-time conversion to kernel layout.
# ---------------------------------------------------------------------------
def init_params(key):
    ks = jax.random.split(key, 8)
    s = 0.05
    return {
        "conv1_w": s * jax.random.normal(ks[0], (64, 3, 3, 3), jnp.float32),
        "conv1_b": s * jax.random.normal(ks[1], (64,), jnp.float32),
        "conv2_w": s * jax.random.normal(ks[2], (128, 64, 3, 3), jnp.float32),
        "conv2_b": s * jax.random.normal(ks[3], (128,), jnp.float32),
        "fc1_w":   s * jax.random.normal(ks[4], (512, 128 * 6 * 6), jnp.float32),
        "fc1_b":   s * jax.random.normal(ks[5], (512,), jnp.float32),
        "fc2_w":   s * jax.random.normal(ks[6], (512, 512), jnp.float32),
        "fc2_b":   s * jax.random.normal(ks[7], (512,), jnp.float32),
    }


def prepare_params(p):
    """One-time conversion: bf16 matmul weights in (K,N) layout, f32 biases."""
    def conv_w(w_oihw):  # (Cout,Cin,3,3) -> (9*Cin, Cout), row order (kh,kw,cin)
        cout = w_oihw.shape[0]
        return jnp.transpose(w_oihw, (2, 3, 1, 0)).reshape(-1, cout) \
                  .astype(jnp.bfloat16)

    # torch flattens NCHW (c,h,w); our features are NHWC-flattened (h,w,c):
    fc1 = jnp.transpose(p["fc1_w"].reshape(512, 128, 6, 6), (2, 3, 1, 0))
    return {
        "conv1_w": conv_w(p["conv1_w"]),
        "conv1_b": p["conv1_b"].reshape(1, 64).astype(jnp.float32),
        "conv2_w": conv_w(p["conv2_w"]),
        "conv2_b": p["conv2_b"].reshape(1, 128).astype(jnp.float32),
        "fc1_w": fc1.reshape(6 * 6 * 128, 512).astype(jnp.bfloat16),
        "fc1_b": p["fc1_b"].reshape(1, 512).astype(jnp.float32),
        "fc2_w": jnp.transpose(p["fc2_w"]).astype(jnp.bfloat16),
        "fc2_b": p["fc2_b"].reshape(1, 512).astype(jnp.float32),
    }


if __name__ == "__main__":
    key = jax.random.PRNGKey(0)
    pkey, xkey = jax.random.split(key)
    params = prepare_params(init_params(pkey))
    # Input implied by Linear(128*6*6, 512): 96x96 spatial, NCHW like PyTorch.
    x = jax.random.normal(xkey, (2, 3, 96, 96), jnp.float32)

    out = jax.jit(conv_model_forward)(x, params)
    out = jax.block_until_ready(out)

    assert out.shape == (2, 512), out.shape
    assert out.dtype == jnp.float32
    assert bool(jnp.all(jnp.isfinite(out)))
    print("KERNEL_OK")
</pallas_src>

<mosaic_0001>
module attributes {stable_mosaic.version = 11 : i64} {
  func.func @_conv_mm_pool_kernel(%arg0: i32, %arg1: i32, %arg2: memref<3072x27xbf16, #tpu.memory_space<vmem>>, %arg3: memref<27x64xbf16, #tpu.memory_space<vmem>>, %arg4: memref<1x64xf32, #tpu.memory_space<vmem>>, %arg5: memref<1x192x64xbf16, #tpu.memory_space<vmem>>) attributes {dimension_semantics = [#tpu.dimension_semantics<parallel>, #tpu.dimension_semantics<parallel>], iteration_bounds = array<i64: 2, 3>, scalar_prefetch = 0 : i64, scratch_operands = 0 : i64, tpu.core_type = #tpu.core_type<tc>, window_params = [{transform_indices = @transform_0, window_bounds = array<i64: 3072, 27>}, {pipeline_mode = #tpu.pipeline_mode<synchronous>, transform_indices = @transform_1, window_bounds = array<i64: 27, 64>}, {pipeline_mode = #tpu.pipeline_mode<synchronous>, transform_indices = @transform_2, window_bounds = array<i64: 1, 64>}, {transform_indices = @transform_3, window_bounds = array<i64: 1, 192, 64>}]} {
    %c0 = arith.constant 0 : index
    %c0_0 = arith.constant 0 : index
    %0 = vector.load %arg2[%c0, %c0_0] : memref<3072x27xbf16, #tpu.memory_space<vmem>>, vector<3072x27xbf16>
    %c0_1 = arith.constant 0 : index
    %c0_2 = arith.constant 0 : index
    %1 = vector.load %arg3[%c0_1, %c0_2] : memref<27x64xbf16, #tpu.memory_space<vmem>>, vector<27x64xbf16>
    %cst = arith.constant dense<0.000000e+00> : vector<3072x64xf32>
    %2 = tpu.matmul %0, %1, %cst {dimension_numbers = #tpu.dot_dimension_numbers<[1], [0], [0], [1], [0, 0, 1, 1], [], []>} : vector<3072x27xbf16>, vector<27x64xbf16>, vector<3072x64xf32> -> vector<3072x64xf32>
    %c0_3 = arith.constant 0 : index
    %c0_4 = arith.constant 0 : index
    %3 = vector.load %arg4[%c0_3, %c0_4] : memref<1x64xf32, #tpu.memory_space<vmem>>, vector<1x64xf32>
    %4 = vector.broadcast %3 : vector<1x64xf32> to vector<3072x64xf32>
    %5 = arith.addf %2, %4 : vector<3072x64xf32>
    %cst_5 = arith.constant 0.000000e+00 : f32
    %6 = vector.broadcast %cst_5 : f32 to vector<3072x64xf32>
    %7 = arith.maximumf %5, %6 : vector<3072x64xf32>
    %8 = vector.shape_cast %7 : vector<3072x64xf32> to vector<192x16x64xf32>
    %cst_6 = arith.constant dense<0.000000e+00> : vector<192x64xf32>
    %9 = vector.multi_reduction <add>, %8, %cst_6 [1] : vector<192x16x64xf32> to vector<192x64xf32>
    %cst_7 = arith.constant 6.250000e-02 : f32
    %10 = vector.broadcast %cst_7 : f32 to vector<192x64xf32>
    %11 = arith.mulf %9, %10 : vector<192x64xf32>
    %12 = arith.truncf %11 : vector<192x64xf32> to vector<192x64xbf16>
    %c0_8 = arith.constant 0 : index
    %c0_9 = arith.constant 0 : index
    %c0_10 = arith.constant 0 : index
    %13 = vector.load %arg5[%c0_8, %c0_9, %c0_10] : memref<1x192x64xbf16, #tpu.memory_space<vmem>>, vector<1x192x64xbf16>
    %14 = vector.shape_cast %13 : vector<1x192x64xbf16> to vector<192x64xbf16>
    %15 = vector.shape_cast %12 : vector<192x64xbf16> to vector<1x192x64xbf16>
    tpu.vector_store %arg5[%c0_8, %c0_9, %c0_10], %15 {strides = array<i32>} : memref<1x192x64xbf16, #tpu.memory_space<vmem>>, vector<1x192x64xbf16>,
    return
  }
  func.func @transform_0(%arg0: i32, %arg1: i32) -> (i32, i32) {
    %c3_i32 = arith.constant 3 : i32
    %0 = arith.muli %arg0, %c3_i32 : i32
    %1 = arith.addi %0, %arg1 : i32
    %c0_i32 = arith.constant 0 : i32
    %c0_i32_0 = arith.constant 0 : i32
    return %1, %c0_i32 : i32, i32
  }
  func.func @transform_1(%arg0: i32, %arg1: i32) -> (i32, i32) {
    %c0_i32 = arith.constant 0 : i32
    %c0_i32_0 = arith.constant 0 : i32
    %c0_i32_1 = arith.constant 0 : i32
    return %c0_i32, %c0_i32_0 : i32, i32
  }
  func.func @transform_2(%arg0: i32, %arg1: i32) -> (i32, i32) {
    %c0_i32 = arith.constant 0 : i32
    %c0_i32_0 = arith.constant 0 : i32
    %c0_i32_1 = arith.constant 0 : i32
    return %c0_i32, %c0_i32_0 : i32, i32
  }
  func.func @transform_3(%arg0: i32, %arg1: i32) -> (i32, i32, i32) {
    %c0_i32 = arith.constant 0 : i32
    %c0_i32_0 = arith.constant 0 : i32
    return %arg0, %arg1, %c0_i32 : i32, i32, i32
  }
}

module attributes {stable_mosaic.version = 11 : i64} {
  func.func @_conv_mm_pool_kernel(%arg0: i32, %arg1: i32, %arg2: memref<576x576xbf16, #tpu.memory_space<vmem>>, %arg3: memref<576x128xbf16, #tpu.memory_space<vmem>>, %arg4: memref<1x128xf32, #tpu.memory_space<vmem>>, %arg5: memref<1x36x128xbf16, #tpu.memory_space<vmem>>) attributes {dimension_semantics = [#tpu.dimension_semantics<parallel>, #tpu.dimension_semantics<parallel>], iteration_bounds = array<i64: 2, 1>, scalar_prefetch = 0 : i64, scratch_operands = 0 : i64, tpu.core_type = #tpu.core_type<tc>, window_params = [{transform_indices = @transform_0, window_bounds = array<i64: 576, 576>}, {pipeline_mode = #tpu.pipeline_mode<synchronous>, transform_indices = @transform_1, window_bounds = array<i64: 576, 128>}, {pipeline_mode = #tpu.pipeline_mode<synchronous>, transform_indices = @transform_2, window_bounds = array<i64: 1, 128>}, {transform_indices = @transform_3, window_bounds = array<i64: 1, 36, 128>}]} {
    %c0 = arith.constant 0 : index
    %c0_0 = arith.constant 0 : index
    %0 = vector.load %arg2[%c0, %c0_0] : memref<576x576xbf16, #tpu.memory_space<vmem>>, vector<576x576xbf16>
    %c0_1 = arith.constant 0 : index
    %c0_2 = arith.constant 0 : index
    %1 = vector.load %arg3[%c0_1, %c0_2] : memref<576x128xbf16, #tpu.memory_space<vmem>>, vector<576x128xbf16>
    %cst = arith.constant dense<0.000000e+00> : vector<576x128xf32>
    %2 = tpu.matmul %0, %1, %cst {dimension_numbers = #tpu.dot_dimension_numbers<[1], [0], [0], [1], [0, 0, 1, 1], [], []>} : vector<576x576xbf16>, vector<576x128xbf16>, vector<576x128xf32> -> vector<576x128xf32>
    %c0_3 = arith.constant 0 : index
    %c0_4 = arith.constant 0 : index
    %3 = vector.load %arg4[%c0_3, %c0_4] : memref<1x128xf32, #tpu.memory_space<vmem>>, vector<1x128xf32>
    %4 = vector.broadcast %3 : vector<1x128xf32> to vector<576x128xf32>
    %5 = arith.addf %2, %4 : vector<576x128xf32>
    %cst_5 = arith.constant 0.000000e+00 : f32
    %6 = vector.broadcast %cst_5 : f32 to vector<576x128xf32>
    %7 = arith.maximumf %5, %6 : vector<576x128xf32>
    %8 = vector.shape_cast %7 : vector<576x128xf32> to vector<36x16x128xf32>
    %cst_6 = arith.constant dense<0xFF800000> : vector<36x128xf32>
    %9 = vector.multi_reduction <maximumf>, %8, %cst_6 [1] : vector<36x16x128xf32> to vector<36x128xf32>
    %10 = arith.truncf %9 : vector<36x128xf32> to vector<36x128xbf16>
    %c0_7 = arith.constant 0 : index
    %c0_8 = arith.constant 0 : index
    %c0_9 = arith.constant 0 : index
    %11 = vector.load %arg5[%c0_7, %c0_8, %c0_9] : memref<1x36x128xbf16, #tpu.memory_space<vmem>>, vector<1x36x128xbf16>
    %12 = vector.shape_cast %11 : vector<1x36x128xbf16> to vector<36x128xbf16>
    %13 = vector.shape_cast %10 : vector<36x128xbf16> to vector<1x36x128xbf16>
    tpu.vector_store %arg5[%c0_7, %c0_8, %c0_9], %13 {strides = array<i32>} : memref<1x36x128xbf16, #tpu.memory_space<vmem>>, vector<1x36x128xbf16>,
    return
  }
  func.func @transform_0(%arg0: i32, %arg1: i32) -> (i32, i32) {
    %c1_i32 = arith.constant 1 : i32
    %0 = arith.muli %arg0, %c1_i32 : i32
    %1 = arith.addi %0, %arg1 : i32
    %c0_i32 = arith.constant 0 : i32
    %c0_i32_0 = arith.constant 0 : i32
    return %1, %c0_i32 : i32, i32
  }
  func.func @transform_1(%arg0: i32, %arg1: i32) -> (i32, i32) {
    %c0_i32 = arith.constant 0 : i32
    %c0_i32_0 = arith.constant 0 : i32
    %c0_i32_1 = arith.constant 0 : i32
    return %c0_i32, %c0_i32_0 : i32, i32
  }
  func.func @transform_2(%arg0: i32, %arg1: i32) -> (i32, i32) {
    %c0_i32 = arith.constant 0 : i32
    %c0_i32_0 = arith.constant 0 : i32
    %c0_i32_1 = arith.constant 0 : i32
    return %c0_i32, %c0_i32_0 : i32, i32
  }
  func.func @transform_3(%arg0: i32, %arg1: i32) -> (i32, i32, i32) {
    %c0_i32 = arith.constant 0 : i32
    %c0_i32_0 = arith.constant 0 : i32
    return %arg0, %arg1, %c0_i32 : i32, i32, i32
  }
}

module attributes {stable_mosaic.version = 11 : i64} {
  func.func @_fc_fused_kernel(%arg0: i32, %arg1: memref<8x512xbf16, #tpu.memory_space<vmem>>, %arg2: memref<512x512xbf16, #tpu.memory_space<vmem>>, %arg3: memref<1x512xf32, #tpu.memory_space<vmem>>, %arg4: memref<512x512xbf16, #tpu.memory_space<vmem>>, %arg5: memref<1x512xf32, #tpu.memory_space<vmem>>, %arg6: memref<8x512xf32, #tpu.memory_space<vmem>>, %arg7: memref<8x512xf32, #tpu.memory_space<vmem>>) attributes {dimension_semantics = [#tpu.dimension_semantics<arbitrary>], iteration_bounds = array<i64: 9>, scalar_prefetch = 0 : i64, scratch_operands = 1 : i64, tpu.core_type = #tpu.core_type<tc>, window_params = [{transform_indices = @transform_0, window_bounds = array<i64: 8, 512>}, {transform_indices = @transform_1, window_bounds = array<i64: 512, 512>}, {pipeline_mode = #tpu.pipeline_mode<synchronous>, transform_indices = @transform_2, window_bounds = array<i64: 1, 512>}, {pipeline_mode = #tpu.pipeline_mode<synchronous>, transform_indices = @transform_3, window_bounds = array<i64: 512, 512>}, {pipeline_mode = #tpu.pipeline_mode<synchronous>, transform_indices = @transform_4, window_bounds = array<i64: 1, 512>}, {pipeline_mode = #tpu.pipeline_mode<synchronous>, transform_indices = @transform_5, window_bounds = array<i64: 8, 512>}]} {
    %c0_i32 = arith.constant 0 : i32
    %0 = arith.cmpi eq, %arg0, %c0_i32 : i32
    %1 = arith.extui %0 : i1 to i32
    %c0_i32_0 = arith.constant 0 : i32
    %2 = arith.cmpi ne, %1, %c0_i32_0 : i32
    scf.if %2 {
      %cst_9 = arith.constant 0.000000e+00 : f32
      %12 = vector.broadcast %cst_9 : f32 to vector<8x512xf32>
      %c0_10 = arith.constant 0 : index
      %c0_11 = arith.constant 0 : index
      %13 = vector.load %arg7[%c0_10, %c0_11] : memref<8x512xf32, #tpu.memory_space<vmem>>, vector<8x512xf32>
      tpu.vector_store %arg7[%c0_10, %c0_11], %12 {strides = array<i32>} : memref<8x512xf32, #tpu.memory_space<vmem>>, vector<8x512xf32>,
    } else {
    }
    %c0 = arith.constant 0 : index
    %c0_1 = arith.constant 0 : index
    %3 = vector.load %arg7[%c0, %c0_1] : memref<8x512xf32, #tpu.memory_space<vmem>>, vector<8x512xf32>
    %c0_2 = arith.constant 0 : index
    %c0_3 = arith.constant 0 : index
    %4 = vector.load %arg1[%c0_2, %c0_3] : memref<8x512xbf16, #tpu.memory_space<vmem>>, vector<8x512xbf16>
    %c0_4 = arith.constant 0 : index
    %c0_5 = arith.constant 0 : index
    %5 = vector.load %arg2[%c0_4, %c0_5] : memref<512x512xbf16, #tpu.memory_space<vmem>>, vector<512x512xbf16>
    %cst = arith.constant dense<0.000000e+00> : vector<8x512xf32>
    %6 = tpu.matmul %4, %5, %cst {dimension_numbers = #tpu.dot_dimension_numbers<[1], [0], [0], [1], [0, 0, 1, 1], [], []>} : vector<8x512xbf16>, vector<512x512xbf16>, vector<8x512xf32> -> vector<8x512xf32>
    %7 = arith.addf %3, %6 : vector<8x512xf32>
    %c0_6 = arith.constant 0 : index
    %c0_7 = arith.constant 0 : index
    %8 = vector.load %arg7[%c0_6, %c0_7] : memref<8x512xf32, #tpu.memory_space<vmem>>, vector<8x512xf32>
    tpu.vector_store %arg7[%c0_6, %c0_7], %7 {strides = array<i32>} : memref<8x512xf32, #tpu.memory_space<vmem>>, vector<8x512xf32>,
    %c8_i32 = arith.constant 8 : i32
    %9 = arith.cmpi eq, %arg0, %c8_i32 : i32
    %10 = arith.extui %9 : i1 to i32
    %c0_i32_8 = arith.constant 0 : i32
    %11 = arith.cmpi ne, %10, %c0_i32_8 : i32
    scf.if %11 {
      %c0_9 = arith.constant 0 : index
      %c0_10 = arith.constant 0 : index
      %12 = vector.load %arg7[%c0_9, %c0_10] : memref<8x512xf32, #tpu.memory_space<vmem>>, vector<8x512xf32>
      %c0_11 = arith.constant 0 : index
      %c0_12 = arith.constant 0 : index
      %13 = vector.load %arg3[%c0_11, %c0_12] : memref<1x512xf32, #tpu.memory_space<vmem>>, vector<1x512xf32>
      %14 = vector.broadcast %13 : vector<1x512xf32> to vector<8x512xf32>
      %15 = arith.addf %12, %14 : vector<8x512xf32>
      %cst_13 = arith.constant 0.000000e+00 : f32
      %16 = vector.broadcast %cst_13 : f32 to vector<8x512xf32>
      %17 = arith.maximumf %15, %16 : vector<8x512xf32>
      %18 = arith.truncf %17 : vector<8x512xf32> to vector<8x512xbf16>
      %c0_14 = arith.constant 0 : index
      %c0_15 = arith.constant 0 : index
      %19 = vector.load %arg4[%c0_14, %c0_15] : memref<512x512xbf16, #tpu.memory_space<vmem>>, vector<512x512xbf16>
      %cst_16 = arith.constant dense<0.000000e+00> : vector<8x512xf32>
      %20 = tpu.matmul %18, %19, %cst_16 {dimension_numbers = #tpu.dot_dimension_numbers<[1], [0], [0], [1], [0, 0, 1, 1], [], []>} : vector<8x512xbf16>, vector<512x512xbf16>, vector<8x512xf32> -> vector<8x512xf32>
      %c0_17 = arith.constant 0 : index
      %c0_18 = arith.constant 0 : index
      %21 = vector.load %arg5[%c0_17, %c0_18] : memref<1x512xf32, #tpu.memory_space<vmem>>, vector<1x512xf32>
      %22 = vector.broadcast %21 : vector<1x512xf32> to vector<8x512xf32>
      %23 = arith.addf %20, %22 : vector<8x512xf32>
      %c0_19 = arith.constant 0 : index
      %c0_20 = arith.constant 0 : index
      %24 = vector.load %arg6[%c0_19, %c0_20] : memref<8x512xf32, #tpu.memory_space<vmem>>, vector<8x512xf32>
      tpu.vector_store %arg6[%c0_19, %c0_20], %23 {strides = array<i32>} : memref<8x512xf32, #tpu.memory_space<vmem>>, vector<8x512xf32>,
    } else {
    }
    return
  }
  func.func @transform_0(%arg0: i32) -> (i32, i32) {
    %c0_i32 = arith.constant 0 : i32
    %c0_i32_0 = arith.constant 0 : i32
    return %c0_i32, %arg0 : i32, i32
  }
  func.func @transform_1(%arg0: i32) -> (i32, i32) {
    %c0_i32 = arith.constant 0 : i32
    %c0_i32_0 = arith.constant 0 : i32
    return %arg0, %c0_i32 : i32, i32
  }
  func.func @transform_2(%arg0: i32) -> (i32, i32) {
    %c0_i32 = arith.constant 0 : i32
    %c0_i32_0 = arith.constant 0 : i32
    %c0_i32_1 = arith.constant 0 : i32
    return %c0_i32, %c0_i32_0 : i32, i32
  }
  func.func @transform_3(%arg0: i32) -> (i32, i32) {
    %c0_i32 = arith.constant 0 : i32
    %c0_i32_0 = arith.constant 0 : i32
    %c0_i32_1 = arith.constant 0 : i32
    return %c0_i32, %c0_i32_0 : i32, i32
  }
  func.func @transform_4(%arg0: i32) -> (i32, i32) {
    %c0_i32 = arith.constant 0 : i32
    %c0_i32_0 = arith.constant 0 : i32
    %c0_i32_1 = arith.constant 0 : i32
    return %c0_i32, %c0_i32_0 : i32, i32
  }
  func.func @transform_5(%arg0: i32) -> (i32, i32) {
    %c0_i32 = arith.constant 0 : i32
    %c0_i32_0 = arith.constant 0 : i32
    %c0_i32_1 = arith.constant 0 : i32
    return %c0_i32, %c0_i32_0 : i32, i32
  }
}

</mosaic_0001>

<bundles_post_ra>
// kernel: conv_model_forward.3
= control target key start
LH: loop header
LB: loop body
LE: loop exit
PB: predicated region body
PF: predicated region fallthrough
CT: control target
= control target key end

     0   :  { %s8997_s12 = smov 0   ;;  %s8999_s13 = smov 0   ;;  %s11111_s0 = inlined_call_operand.vmem [shape: bf16[18432,27], index: 0, kind: input, shape index: {}]   ;;  %s11112_s1 = inlined_call_operand.vmem [shape: bf16[27,64], index: 1, kind: input, shape index: {}]   ;;  %s11113_s2 = inlined_call_operand.vmem [shape: f32[1,64], index: 2, kind: input, shape index: {}]   ;;  %s11114_s3 = inlined_call_operand.vmem [shape: bf16[2,576,64], index: 3, kind: output, shape index: {}]  }
   0x1   :  { %s9001_s14 = smov 0   ;;  %s9003_s15 = smov 0  }
   0x2   :  { %s9005_s16 = smov 0  }
   0x3 LB: > { %s22_s17 = sadd.s32 1, %s8966_s14  ;;  %s25_s18 = sadd.s32 1, %s8970_s15  ;;  %s8974_s16 = sphi %s9005_s16, %s13_s16   ;;  %s8970_s15 = sphi %s9003_s15, %s11135_s15   ;;  %s8966_s14 = sphi %s9001_s14, %s11134_s14   ;;  %s8962_s13 = sphi %s8999_s13, %s11133_s13   ;;  %s8958_s12 = sphi %s8997_s12, %s11132_s12  }
   0x4   : > { %p23_p0 = scmp.ge.s32.totalorder %s22_s17, 3  ;;  %p7331_p1 = scmp.ge.s32.totalorder %s8974_s16, 1 }
   0x5   : > { %p160_p2 = scmp.lt.s32.totalorder %s8974_s16, 7 }
   0x6   : > { %s11137_s17 = smov (%p23_p0, %s22_s17), 0  ;;  %s11139_s18 = smov (!%p23_p0, %s25_s18), %s8970_s15 }
   0x7   : > { %p161_p3 = pnand %p7331_p1, %p160_p2  ;;  %p27_p4 = scmp.ge.s32.totalorder %s11139_s18, 2 }
   0x9   : > { %s11141_s18 = smov (%p27_p4, %s11139_s18), 0  ;;  %164 = sbr.rel (%p161_p3) target bundleno = 1045 (0x415), region = 32 }
   0xe   : > { %v8735_v0 = vld [vmem:[%s11112_s1 + $0x8] sm:$0x3f]   ;;  %vm2154_vm0 = vcmask 1044480   ;;  %vm2155_vm1 = vcmask 1045504   ;;  %v8976_v1 = vmov 65535   ;;  %s190_s21 = smul.u32 3, %s8962_s13 }
   0xf   : > { %v2156_v2 = vsel %vm2154_vm0, 4294967295, %v8976_v1  ;;  %v8736_v5 = vld [vmem:[%s11112_s1] sm:$0xff]   ;;  %vm1577_vm2 = vcmask 220160   ;;  %vm4114_vm3 = vcmask 523264   ;;  %vm6995_vm4 = vcmask 1041409   ;;  %p201_p6 = scmp.lt.s32.totalorder %s8962_s13, 1 }
  0x10   : > { %v2157_v3 = vsel %vm2155_vm1, %v2156_v2, 0  ;;  %s191_s24 = sadd.s32 %s8958_s12, %s190_s21  ;;  %vm6997_vm5 = vcmask 1042434   ;;  %vm6999_vm6 = vcmask 1043459   ;;  %vm7001_vm7 = vcmask 1044484   ;;  %s200_s5 = smul.u32 24, %s8958_s12 }
  0x11   : > { %v2159_v4 = vand.u32 %v8735_v0, %v2157_v3  ;;  %s192_s25 = smul.u32 384, %s191_s24  ;;  %vm7003_vm8 = vcmask 1045509   ;;  %s11145_s13 = smov (!%p201_p6, %s8962_s13), 1  ;;  %vm7005_vm9 = vcmask 1046534   ;;  %vm7007_vm10 = vcmask 1047559  }
  0x12   : > { %p9533_p7 = scmp.lt.s32.totalorder %s200_s5, 71  ;;  %s8693_s7 = smul.u32 72, %s11145_s13  ;;  %vm7218_vm11 = vcmask 519168  }
  0x13   : > { %8301 = vmatprep.subr.bf16.mxu0 %v2159_v4  ;;  %8689 = vmatprep.subr.bf16.mxu1 %v2159_v4  ;;  %p193_p5 = scmp.lt.s32.totalorder %s192_s25, 2303 }
  0x14   : > { %8302 = vmatpush3.bf16.msra.mxu0 %v2159_v4  ;;  %8691 = vmatpush3.bf16.msra.mxu1 %v2159_v4  ;;  %s11147_s5 = smov (!%p9533_p7, %s200_s5), 71 }
  0x15   : > { %8303 = vmatprep.subr.bf16.mxu0 %v8736_v5  ;;  %8690 = vmatprep.subr.bf16.mxu1 %v8736_v5  ;;  %s11143_s25 = smov (!%p193_p5, %s192_s25), 2303  ;;  %s9582_s8 = sadd.s32 %s8693_s7, %s11147_s5 }
  0x16   : > { %s7332_s26 = sshll.u32 %s11143_s25, 2  ;;  %s7333_s9 = sshll.u32 %s9582_s8, 2 }
  0x17   : > { %s9042_s29 = scalar_lea.vmem %s11111_s0, %s7332_s26  ;;  %s9614_s12 = scalar_lea.vmem %s11114_s3, %s7333_s9 }
  0x18   : > { %8304 = vmatpush3.bf16.msra.mxu0 %v8736_v5  ;;  %8692 = vmatpush3.bf16.msra.mxu1 %v8736_v5  ;;  %v8737_v6 = vld [vmem:[%s9042_s29] sm:$0xff]   ;;  %v8739_v8 = vld [vmem:[%s9042_s29 + $0x8] sm:$0xff]   ;;  %v8741_v10 = vld [vmem:[%s9042_s29 + $0x10] sm:$0xff]  }
  0x19   : > { %v8738_v7 = vld [vmem:[%s9042_s29 + $0x300] sm:$0xff]   ;;  %8305 = vmatprep.mubr.msk.bf16.mxu0 %vm1577_vm2, %v8737_v6  ;;  %v8740_v9 = vld [vmem:[%s9042_s29 + $0x308] sm:$0xff]   ;;  %v8742_v11 = vld [vmem:[%s9042_s29 + $0x310] sm:$0xff]  }
  0x1a   : > { %8497 = vmatprep.mubr.msk.bf16.mxu1 %vm1577_vm2, %v8738_v7  ;;  %v8743_v12 = vld [vmem:[%s9042_s29 + $0x18] sm:$0xff]   ;;  %v8745_v14 = vld [vmem:[%s9042_s29 + $0x20] sm:$0xff]   ;;  %v8747_v16 = vld [vmem:[%s9042_s29 + $0x28] sm:$0xff]  }
  0x1b   : > { %8306 = vmatmul.mubr.msk.bf16.vlgmr.msra.gmra.mxu0 %vm1577_vm2, %v8739_v8  ;;  %8498 = vmatmul.mubr.msk.bf16.vlgmr.msra.gmra.mxu1 %vm1577_vm2, %v8740_v9  ;;  %v8744_v13 = vld [vmem:[%s9042_s29 + $0x318] sm:$0xff]   ;;  %v8746_v15 = vld [vmem:[%s9042_s29 + $0x320] sm:$0xff]   ;;  %v8748_v17 = vld [vmem:[%s9042_s29 + $0x328] sm:$0xff]  }
  0x1c   : > { %8309 = vmatprep.mubr.msk.bf16.mxu0 %vm1577_vm2, %v8741_v10  ;;  %8501 = vmatprep.mubr.msk.bf16.mxu1 %vm1577_vm2, %v8742_v11  ;;  %v8749_v18 = vld [vmem:[%s9042_s29 + $0x30] sm:$0xff]   ;;  %v8751_v20 = vld [vmem:[%s9042_s29 + $0x38] sm:$0xff]   ;;  %v8753_v22 = vld [vmem:[%s9042_s29 + $0x40] sm:$0xff]  }
  0x1d   : > { %v8750_v19 = vld [vmem:[%s9042_s29 + $0x330] sm:$0xff]   ;;  %v8752_v21 = vld [vmem:[%s9042_s29 + $0x338] sm:$0xff]   ;;  %v8754_v23 = vld [vmem:[%s9042_s29 + $0x340] sm:$0xff]  }
  0x1e   : > { %v8755_v24 = vld [vmem:[%s9042_s29 + $0x48] sm:$0xff]   ;;  %v8757_v26 = vld [vmem:[%s9042_s29 + $0x50] sm:$0xff]   ;;  %v8759_v28 = vld [vmem:[%s9042_s29 + $0x58] sm:$0xff]  }
  0x1f   : > { %v8756_v25 = vld [vmem:[%s9042_s29 + $0x348] sm:$0xff]   ;;  %v8758_v27 = vld [vmem:[%s9042_s29 + $0x350] sm:$0xff]   ;;  %v8760_v29 = vld [vmem:[%s9042_s29 + $0x358] sm:$0xff]  }
  0x20   : > { %v8761_v30 = vld [vmem:[%s9042_s29 + $0x60] sm:$0xff]   ;;  %v8763_v32 = vld [vmem:[%s9042_s29 + $0x68] sm:$0xff]   ;;  %v8765_v34 = vld [vmem:[%s9042_s29 + $0x70] sm:$0xff]  }
  0x21   : > { %v8762_v31 = vld [vmem:[%s9042_s29 + $0x360] sm:$0xff]   ;;  %v8764_v33 = vld [vmem:[%s9042_s29 + $0x368] sm:$0xff]   ;;  %v8766_v35 = vld [vmem:[%s9042_s29 + $0x370] sm:$0xff]  }
  0x22   : > { %v8767_v36 = vld [vmem:[%s9042_s29 + $0x78] sm:$0xff]   ;;  %v8769_v38 = vld [vmem:[%s9042_s29 + $0x80] sm:$0xff]   ;;  %v8771_v40 = vld [vmem:[%s9042_s29 + $0x88] sm:$0xff]  }
  0x23   : > { %8310 = vmatmul.mubr.msk.bf16.gmra.mxu0 %vm1577_vm2, %v8743_v12  ;;  %8502 = vmatmul.mubr.msk.bf16.gmra.mxu1 %vm1577_vm2, %v8744_v13  ;;  %v8768_v37 = vld [vmem:[%s9042_s29 + $0x378] sm:$0xff]   ;;  %v8770_v39 = vld [vmem:[%s9042_s29 + $0x380] sm:$0xff]   ;;  %v8772_v41 = vld [vmem:[%s9042_s29 + $0x388] sm:$0xff]  }
  0x24   : > { %8313 = vmatprep.mubr.msk.bf16.mxu0 %vm1577_vm2, %v8745_v14  ;;  %8505 = vmatprep.mubr.msk.bf16.mxu1 %vm1577_vm2, %v8746_v15  ;;  %v8773_v42 = vld [vmem:[%s9042_s29 + $0x90] sm:$0xff]   ;;  %v8775_v44 = vld [vmem:[%s9042_s29 + $0x98] sm:$0xff]   ;;  %v8777_v46 = vld [vmem:[%s9042_s29 + $0xa0] sm:$0xff]  }
  0x25   : > { %v8774_v43 = vld [vmem:[%s9042_s29 + $0x390] sm:$0xff]   ;;  %v8776_v45 = vld [vmem:[%s9042_s29 + $0x398] sm:$0xff]   ;;  %v8778_v47 = vld [vmem:[%s9042_s29 + $0x3a0] sm:$0xff]  }
  0x26   : > { %v8779_v48 = vld [vmem:[%s9042_s29 + $0xa8] sm:$0xff]   ;;  %v8781_v50 = vld [vmem:[%s9042_s29 + $0xb0] sm:$0xff]   ;;  %v8783_v52 = vld [vmem:[%s9042_s29 + $0xb8] sm:$0xff]  }
  0x27   : > { %v8780_v49 = vld [vmem:[%s9042_s29 + $0x3a8] sm:$0xff]   ;;  %v8782_v51 = vld [vmem:[%s9042_s29 + $0x3b0] sm:$0xff]   ;;  %v8784_v53 = vld [vmem:[%s9042_s29 + $0x3b8] sm:$0xff]  }
  0x28   : > { %v8785_v54 = vld [vmem:[%s9042_s29 + $0xc0] sm:$0xff]   ;;  %v8787_v56 = vld [vmem:[%s9042_s29 + $0xc8] sm:$0xff]   ;;  %v8789_v58 = vld [vmem:[%s9042_s29 + $0xd0] sm:$0xff]  }
  0x29   : > { %v8786_v55 = vld [vmem:[%s9042_s29 + $0x3c0] sm:$0xff]   ;;  %v8788_v57 = vld [vmem:[%s9042_s29 + $0x3c8] sm:$0xff]   ;;  %v8790_v59 = vld [vmem:[%s9042_s29 + $0x3d0] sm:$0xff]  }
  0x2a   : > { %v8791_v60 = vld [vmem:[%s9042_s29 + $0xd8] sm:$0xff]   ;;  %v8793_v62 = vld [vmem:[%s9042_s29 + $0xe0] sm:$0xff]   ;;  %v8795_v0 = vld [vmem:[%s9042_s29 + $0xe8] sm:$0xff]  }
  0x2b   : > { %8314 = vmatmul.mubr.msk.bf16.gmra.mxu0 %vm1577_vm2, %v8747_v16  ;;  %8506 = vmatmul.mubr.msk.bf16.gmra.mxu1 %vm1577_vm2, %v8748_v17  ;;  %v8792_v61 = vld [vmem:[%s9042_s29 + $0x3d8] sm:$0xff]   ;;  %v8794_v63 = vld [vmem:[%s9042_s29 + $0x3e0] sm:$0xff]   ;;  %v8796_v1 = vld [vmem:[%s9042_s29 + $0x3e8] sm:$0xff]  }
  0x2c   : > { %8317 = vmatprep.mubr.msk.bf16.mxu0 %vm1577_vm2, %v8749_v18  ;;  %8509 = vmatprep.mubr.msk.bf16.mxu1 %vm1577_vm2, %v8750_v19  ;;  %v8797_v2 = vld [vmem:[%s9042_s29 + $0xf0] sm:$0xff]   ;;  %v8799_v4 = vld [vmem:[%s9042_s29 + $0xf8] sm:$0xff]   ;;  %v8801_v6 = vld [vmem:[%s9042_s29 + $0x100] sm:$0xff]  }
  0x2d   : > { %v8798_v3 = vld [vmem:[%s9042_s29 + $0x3f0] sm:$0xff]   ;;  %v8800_v5 = vld [vmem:[%s9042_s29 + $0x3f8] sm:$0xff]   ;;  %v8802_v7 = vld [vmem:[%s9042_s29 + $0x400] sm:$0xff]  }
  0x2e   : > { %v8803_v8 = vld [vmem:[%s9042_s29 + $0x108] sm:$0xff]   ;;  %v8805_v10 = vld [vmem:[%s9042_s29 + $0x110] sm:$0xff]   ;;  %v8807_v12 = vld [vmem:[%s9042_s29 + $0x118] sm:$0xff]  }
  0x2f   : > { %v8804_v9 = vld [vmem:[%s9042_s29 + $0x408] sm:$0xff]   ;;  %v8806_v11 = vld [vmem:[%s9042_s29 + $0x410] sm:$0xff]   ;;  %v8808_v13 = vld [vmem:[%s9042_s29 + $0x418] sm:$0xff]  }
  0x30   : > { %v8809_v14 = vld [vmem:[%s9042_s29 + $0x120] sm:$0xff]   ;;  %v8811_v16 = vld [vmem:[%s9042_s29 + $0x128] sm:$0xff]   ;;  %v8813_v18 = vld [vmem:[%s9042_s29 + $0x130] sm:$0xff]  }
  0x31   : > { %v8810_v15 = vld [vmem:[%s9042_s29 + $0x420] sm:$0xff]   ;;  %v8812_v17 = vld [vmem:[%s9042_s29 + $0x428] sm:$0xff]   ;;  %v8814_v19 = vld [vmem:[%s9042_s29 + $0x430] sm:$0xff]  }
  0x33   : > { %8318 = vmatmul.mubr.msk.bf16.gmra.mxu0 %vm1577_vm2, %v8751_v20  ;;  %8510 = vmatmul.mubr.msk.bf16.gmra.mxu1 %vm1577_vm2, %v8752_v21  ;;  %v8815_v20 = vld [vmem:[%s9042_s29 + $0x138] sm:$0xff]  }
  0x34   : > { %8321 = vmatprep.mubr.msk.bf16.mxu0 %vm1577_vm2, %v8753_v22  ;;  %8513 = vmatprep.mubr.msk.bf16.mxu1 %vm1577_vm2, %v8754_v23  ;;  %v8816_v21 = vld [vmem:[%s9042_s29 + $0x438] sm:$0xff]   ;;  %v8817_v22 = vld [vmem:[%s9042_s29 + $0x140] sm:$0xff]  }
  0x35   : > { %v8818_v23 = vld [vmem:[%s9042_s29 + $0x440] sm:$0xff]  }
  0x3b   : > { %8322 = vmatmul.mubr.msk.bf16.gmra.mxu0 %vm1577_vm2, %v8755_v24  ;;  %8514 = vmatmul.mubr.msk.bf16.gmra.mxu1 %vm1577_vm2, %v8756_v25  ;;  %v8819_v24 = vld [vmem:[%s9042_s29 + $0x148] sm:$0xff]  }
  0x3c   : > { %8325 = vmatprep.mubr.msk.bf16.mxu0 %vm1577_vm2, %v8757_v26  ;;  %8517 = vmatprep.mubr.msk.bf16.mxu1 %vm1577_vm2, %v8758_v27  ;;  %v8820_v25 = vld [vmem:[%s9042_s29 + $0x448] sm:$0xff]   ;;  %v8821_v26 = vld [vmem:[%s9042_s29 + $0x150] sm:$0xff]  }
  0x3d   : > { %v8822_v27 = vld [vmem:[%s9042_s29 + $0x450] sm:$0xff]  }
  0x43   : > { %8326 = vmatmul.mubr.msk.bf16.gmra.mxu0 %vm1577_vm2, %v8759_v28  ;;  %8518 = vmatmul.mubr.msk.bf16.gmra.mxu1 %vm1577_vm2, %v8760_v29  ;;  %v8823_v28 = vld [vmem:[%s9042_s29 + $0x158] sm:$0xff]  }
  0x44   : > { %8329 = vmatprep.mubr.msk.bf16.mxu0 %vm1577_vm2, %v8761_v30  ;;  %8521 = vmatprep.mubr.msk.bf16.mxu1 %vm1577_vm2, %v8762_v31  ;;  %v8824_v29 = vld [vmem:[%s9042_s29 + $0x458] sm:$0xff]   ;;  %v8825_v30 = vld [vmem:[%s9042_s29 + $0x160] sm:$0xff]  }
  0x45   : > { %v8826_v31 = vld [vmem:[%s9042_s29 + $0x460] sm:$0xff]  }
  0x4b   : > { %8330 = vmatmul.mubr.msk.bf16.gmra.mxu0 %vm1577_vm2, %v8763_v32  ;;  %8522 = vmatmul.mubr.msk.bf16.gmra.mxu1 %vm1577_vm2, %v8764_v33  ;;  %v8827_v32 = vld [vmem:[%s9042_s29 + $0x168] sm:$0xff]  }
  0x4c   : > { %8333 = vmatprep.mubr.msk.bf16.mxu0 %vm1577_vm2, %v8765_v34  ;;  %8525 = vmatprep.mubr.msk.bf16.mxu1 %vm1577_vm2, %v8766_v35  ;;  %v8828_v33 = vld [vmem:[%s9042_s29 + $0x468] sm:$0xff]   ;;  %v8829_v34 = vld [vmem:[%s9042_s29 + $0x170] sm:$0xff]  }
  0x4d   : > { %v8830_v35 = vld [vmem:[%s9042_s29 + $0x470] sm:$0xff]  }
  0x53   : > { %8334 = vmatmul.mubr.msk.bf16.gmra.mxu0 %vm1577_vm2, %v8767_v36  ;;  %8526 = vmatmul.mubr.msk.bf16.gmra.mxu1 %vm1577_vm2, %v8768_v37  ;;  %v8831_v36 = vld [vmem:[%s9042_s29 + $0x178] sm:$0xff]  }
  0x54   : > { %8337 = vmatprep.mubr.msk.bf16.mxu0 %vm1577_vm2, %v8769_v38  ;;  %8529 = vmatprep.mubr.msk.bf16.mxu1 %vm1577_vm2, %v8770_v39  ;;  %v8832_v37 = vld [vmem:[%s9042_s29 + $0x478] sm:$0xff]   ;;  %v8833_v38 = vld [vmem:[%s9042_s29 + $0x180] sm:$0xff]  }
  0x55   : > { %v8834_v39 = vld [vmem:[%s9042_s29 + $0x480] sm:$0xff]  }
  0x5b   : > { %8338 = vmatmul.mubr.msk.bf16.gmra.mxu0 %vm1577_vm2, %v8771_v40  ;;  %8530 = vmatmul.mubr.msk.bf16.gmra.mxu1 %vm1577_vm2, %v8772_v41  ;;  %v8835_v40 = vld [vmem:[%s9042_s29 + $0x188] sm:$0xff]  }
  0x5c   : > { %8341 = vmatprep.mubr.msk.bf16.mxu0 %vm1577_vm2, %v8773_v42  ;;  %8533 = vmatprep.mubr.msk.bf16.mxu1 %vm1577_vm2, %v8774_v43  ;;  %v8836_v41 = vld [vmem:[%s9042_s29 + $0x488] sm:$0xff]   ;;  %v8837_v42 = vld [vmem:[%s9042_s29 + $0x190] sm:$0xff]   ;;  %v9246_v43 = vld [vmem:[%s11113_s2] ss:$0 sm:$0xff] }
  0x63   : > { %8342 = vmatmul.mubr.msk.bf16.gmra.mxu0 %vm1577_vm2, %v8775_v44  ;;  %8534 = vmatmul.mubr.msk.bf16.gmra.mxu1 %vm1577_vm2, %v8776_v45  ;;  %v8838_v44 = vld [vmem:[%s9042_s29 + $0x490] sm:$0xff]  }
  0x64   : > { %8345 = vmatprep.mubr.msk.bf16.mxu0 %vm1577_vm2, %v8777_v46  ;;  %8537 = vmatprep.mubr.msk.bf16.mxu1 %vm1577_vm2, %v8778_v47 }
  0x6b   : > { %8346 = vmatmul.mubr.msk.bf16.gmra.mxu0 %vm1577_vm2, %v8779_v48  ;;  %8538 = vmatmul.mubr.msk.bf16.gmra.mxu1 %vm1577_vm2, %v8780_v49 }
  0x6c   : > { %8349 = vmatprep.mubr.msk.bf16.mxu0 %vm1577_vm2, %v8781_v50  ;;  %8541 = vmatprep.mubr.msk.bf16.mxu1 %vm1577_vm2, %v8782_v51 }
  0x73   : > { %8350 = vmatmul.mubr.msk.bf16.gmra.mxu0 %vm1577_vm2, %v8783_v52  ;;  %8542 = vmatmul.mubr.msk.bf16.gmra.mxu1 %vm1577_vm2, %v8784_v53 }
  0x74   : > { %8353 = vmatprep.mubr.msk.bf16.mxu0 %vm1577_vm2, %v8785_v54  ;;  %8545 = vmatprep.mubr.msk.bf16.mxu1 %vm1577_vm2, %v8786_v55 }
  0x7b   : > { %8354 = vmatmul.mubr.msk.bf16.gmra.mxu0 %vm1577_vm2, %v8787_v56  ;;  %8546 = vmatmul.mubr.msk.bf16.gmra.mxu1 %vm1577_vm2, %v8788_v57  ;;  %v8839_v56 = vld [vmem:[%s9042_s29 + $0x198] sm:$0xff]  }
  0x7c   : > { %8357 = vmatprep.mubr.msk.bf16.mxu0 %vm1577_vm2, %v8789_v58  ;;  %8549 = vmatprep.mubr.msk.bf16.mxu1 %vm1577_vm2, %v8790_v59 }
  0x83   : > { %8358 = vmatmul.mubr.msk.bf16.gmra.mxu0 %vm1577_vm2, %v8791_v60  ;;  %8550 = vmatmul.mubr.msk.bf16.gmra.mxu1 %vm1577_vm2, %v8792_v61  ;;  %v8840_v60 = vld [vmem:[%s9042_s29 + $0x498] sm:$0xff]   ;;  %v8841_v61 = vld [vmem:[%s9042_s29 + $0x1a0] sm:$0xff]  }
  0x84   : > { %8361 = vmatprep.mubr.msk.bf16.mxu0 %vm1577_vm2, %v8793_v62  ;;  %8553 = vmatprep.mubr.msk.bf16.mxu1 %vm1577_vm2, %v8794_v63 }
  0x8b   : > { %8362 = vmatmul.mubr.msk.bf16.gmra.mxu0 %vm1577_vm2, %v8795_v0  ;;  %8554 = vmatmul.mubr.msk.bf16.gmra.mxu1 %vm1577_vm2, %v8796_v1  ;;  %v8842_v1 = vld [vmem:[%s9042_s29 + $0x4a0] sm:$0xff]  }
  0x8c   : > { %8365 = vmatprep.mubr.msk.bf16.mxu0 %vm1577_vm2, %v8797_v2  ;;  %8557 = vmatprep.mubr.msk.bf16.mxu1 %vm1577_vm2, %v8798_v3 }
  0x93   : > { %8366 = vmatmul.mubr.msk.bf16.gmra.mxu0 %vm1577_vm2, %v8799_v4  ;;  %8558 = vmatmul.mubr.msk.bf16.gmra.mxu1 %vm1577_vm2, %v8800_v5 }
  0x94   : > { %8369 = vmatprep.mubr.msk.bf16.mxu0 %vm1577_vm2, %v8801_v6  ;;  %8561 = vmatprep.mubr.msk.bf16.mxu1 %vm1577_vm2, %v8802_v7 }
  0x9b   : > { %8370 = vmatmul.mubr.msk.bf16.gmra.mxu0 %vm1577_vm2, %v8803_v8  ;;  %8562 = vmatmul.mubr.msk.bf16.gmra.mxu1 %vm1577_vm2, %v8804_v9 }
  0x9c   : > { %8373 = vmatprep.mubr.msk.bf16.mxu0 %vm1577_vm2, %v8805_v10  ;;  %8565 = vmatprep.mubr.msk.bf16.mxu1 %vm1577_vm2, %v8806_v11 }
  0xa3   : > { %8374 = vmatmul.mubr.msk.bf16.gmra.mxu0 %vm1577_vm2, %v8807_v12  ;;  %8566 = vmatmul.mubr.msk.bf16.gmra.mxu1 %vm1577_vm2, %v8808_v13 }
  0xa4   : > { %8377 = vmatprep.mubr.msk.bf16.mxu0 %vm1577_vm2, %v8809_v14  ;;  %8569 = vmatprep.mubr.msk.bf16.mxu1 %vm1577_vm2, %v8810_v15 }
  0xab   : > { %8378 = vmatmul.mubr.msk.bf16.gmra.mxu0 %vm1577_vm2, %v8811_v16  ;;  %8570 = vmatmul.mubr.msk.bf16.gmra.mxu1 %vm1577_vm2, %v8812_v17 }
  0xac   : > { %8381 = vmatprep.mubr.msk.bf16.mxu0 %vm1577_vm2, %v8813_v18  ;;  %8573 = vmatprep.mubr.msk.bf16.mxu1 %vm1577_vm2, %v8814_v19 }
  0xb3   : > { %8382 = vmatmul.mubr.msk.bf16.gmra.mxu0 %vm1577_vm2, %v8815_v20  ;;  %8574 = vmatmul.mubr.msk.bf16.gmra.mxu1 %vm1577_vm2, %v8816_v21 }
  0xb4   : > { %8385 = vmatprep.mubr.msk.bf16.mxu0 %vm1577_vm2, %v8817_v22  ;;  %8577 = vmatprep.mubr.msk.bf16.mxu1 %vm1577_vm2, %v8818_v23 }
  0xbb   : > { %8386 = vmatmul.mubr.msk.bf16.gmra.mxu0 %vm1577_vm2, %v8819_v24  ;;  %8578 = vmatmul.mubr.msk.bf16.gmra.mxu1 %vm1577_vm2, %v8820_v25 }
  0xbc   : > { %8389 = vmatprep.mubr.msk.bf16.mxu0 %vm1577_vm2, %v8821_v26  ;;  %8581 = vmatprep.mubr.msk.bf16.mxu1 %vm1577_vm2, %v8822_v27 }
  0xc3   : > { %8390 = vmatmul.mubr.msk.bf16.gmra.mxu0 %vm1577_vm2, %v8823_v28  ;;  %8582 = vmatmul.mubr.msk.bf16.gmra.mxu1 %vm1577_vm2, %v8824_v29 }
  0xc4   : > { %8393 = vmatprep.mubr.msk.bf16.mxu0 %vm1577_vm2, %v8825_v30  ;;  %8585 = vmatprep.mubr.msk.bf16.mxu1 %vm1577_vm2, %v8826_v31  ;;  %v8843_v31 = vld [vmem:[%s9042_s29 + $0x1a8] sm:$0xff]  }
  0xcb   : > { %8394 = vmatmul.mubr.msk.bf16.gmra.mxu0 %vm1577_vm2, %v8827_v32  ;;  %8586 = vmatmul.mubr.msk.bf16.gmra.mxu1 %vm1577_vm2, %v8828_v33 }
  0xcc   : > { %8397 = vmatprep.mubr.msk.bf16.mxu0 %vm1577_vm2, %v8829_v34  ;;  %8589 = vmatprep.mubr.msk.bf16.mxu1 %vm1577_vm2, %v8830_v35 }
  0xd3   : > { %8398 = vmatmul.mubr.msk.bf16.gmra.mxu0 %vm1577_vm2, %v8831_v36  ;;  %8590 = vmatmul.mubr.msk.bf16.gmra.mxu1 %vm1577_vm2, %v8832_v37  ;;  %v8844_v36 = vld [vmem:[%s9042_s29 + $0x4a8] sm:$0xff]   ;;  %v8845_v37 = vld [vmem:[%s9042_s29 + $0x1b0] sm:$0xff]  }
  0xd4   : > { %8401 = vmatprep.mubr.msk.bf16.mxu0 %vm1577_vm2, %v8833_v38  ;;  %8593 = vmatprep.mubr.msk.bf16.mxu1 %vm1577_vm2, %v8834_v39 }
  0xdb   : > { %v8307_v45 = vpop.f32.mrf.mxu0  ;;  %8402 = vmatmul.mubr.msk.bf16.gmra.mxu0 %vm1577_vm2, %v8835_v40  ;;  %v8499_v47 = vpop.f32.mrf.mxu1  ;;  %8594 = vmatmul.mubr.msk.bf16.gmra.mxu1 %vm1577_vm2, %v8836_v41 }
  0xdc   : > { %v2204_v46 = vadd.f32 %v8307_v45, %v9246_v43  ;;  %8405 = vmatprep.mubr.msk.bf16.mxu0 %vm1577_vm2, %v8837_v42  ;;  %v2972_v48 = vadd.f32 %v8499_v47, %v9246_v43  ;;  %8597 = vmatprep.mubr.msk.bf16.mxu1 %vm1577_vm2, %v8838_v44  ;;  %v8846_v44 = vld [vmem:[%s9042_s29 + $0x4b0] sm:$0xff]  }
  0xdd   : > { %v2195_v49 = vpop.f32.mrf.mxu0  ;;  %v2963_v52 = vpop.f32.mrf.mxu1 }
  0xde   : > { %v3732_v50 = vmax.f32 %v2204_v46, 0.0  ;;  %v2196_v51 = vadd.f32 %v9246_v43, %v2195_v49  ;;  %v3924_v53 = vmax.f32 %v2972_v48, 0.0  ;;  %v2964_v54 = vadd.f32 %v9246_v43, %v2963_v52 }
  0xdf   : > { %v8308_v55 = vpop.f32.mrf.mxu0  ;;  %v8500_v59 = vpop.f32.mrf.mxu1 }
  0xe0   : > { %v3730_v57 = vmax.f32 %v2196_v51, 0.0  ;;  %v2207_v58 = vadd.f32 %v8308_v55, %v9246_v43  ;;  %v3922_v62 = vmax.f32 %v2964_v54, 0.0  ;;  %v2975_v63 = vadd.f32 %v8500_v59, %v9246_v43 }
  0xe1   : > { %v2198_v0 = vpop.f32.mrf.mxu0  ;;  %v4124_v2 = vsel %vm4114_vm3, %v3732_v50, 0.0  ;;  %v2966_v5 = vpop.f32.mrf.mxu1  ;;  %v4988_v6 = vsel %vm4114_vm3, %v3924_v53, 0.0 }
  0xe2   : > { %v3733_v3 = vmax.f32 %v2207_v58, 0.0  ;;  %v2199_v4 = vadd.f32 %v9246_v43, %v2198_v0  ;;  %v4115_v7 = vsel %vm4114_vm3, %v3730_v57, 0.0  ;;  %v3925_v8 = vmax.f32 %v2975_v63, 0.0 }
  0xe3   : > { %v2967_v9 = vadd.f32 %v9246_v43, %v2966_v5  ;;  %v8311_v10 = vpop.f32.mrf.mxu0  ;;  %8406 = vmatmul.mubr.msk.bf16.gmra.mxu0 %vm1577_vm2, %v8839_v56  ;;  %v4979_v11 = vsel %vm4114_vm3, %v3922_v62, 0.0  ;;  %v8503_v15 = vpop.f32.mrf.mxu1  ;;  %8598 = vmatmul.mubr.msk.bf16.gmra.mxu1 %vm1577_vm2, %v8840_v60 }
  0xe4   : > { %v4125_v12 = vsel %vm4114_vm3, %v3733_v3, 0.0  ;;  %v3731_v13 = vmax.f32 %v2199_v4, 0.0  ;;  %v2220_v14 = vadd.f32 %v8311_v10, %v9246_v43  ;;  %8409 = vmatprep.mubr.msk.bf16.mxu0 %vm1577_vm2, %v8841_v61  ;;  %v4989_v17 = vsel %vm4114_vm3, %v3925_v8, 0.0  ;;  %8601 = vmatprep.mubr.msk.bf16.mxu1 %vm1577_vm2, %v8842_v1 }
  0xe5   : > { %v4126_v16 = vadd.f32 %v4125_v12, %v4124_v2  ;;  %v3923_v18 = vmax.f32 %v2967_v9, 0.0  ;;  %v2988_v19 = vadd.f32 %v8503_v15, %v9246_v43  ;;  %v2211_v20 = vpop.f32.mrf.mxu0  ;;  %v4990_v21 = vadd.f32 %v4989_v17, %v4988_v6  ;;  %v2979_v25 = vpop.f32.mrf.mxu1  ;;  %v8848_v17 = vld [vmem:[%s9042_s29 + $0x4b8] sm:$0xff]  }
  0xe6   : > { %v4116_v22 = vsel %vm4114_vm3, %v3731_v13, 0.0  ;;  %v3736_v23 = vmax.f32 %v2220_v14, 0.0  ;;  %v2212_v24 = vadd.f32 %v9246_v43, %v2211_v20  ;;  %v9285_v41 = vadd.f32 %v9246_v43, %v2979_v25 }
  0xe7   : > { %v4127_v26 = vrot.slane %v4126_v16, 4  ;;  %v4117_v27 = vadd.f32 %v4116_v22, %v4115_v7  ;;  %v4980_v28 = vsel %vm4114_vm3, %v3923_v18, 0.0  ;;  %v3928_v29 = vmax.f32 %v2988_v19, 0.0  ;;  %v8312_v30 = vpop.f32.mrf.mxu0  ;;  %v8504_v35 = vpop.f32.mrf.mxu1  ;;  %v8849_v18 = vld [vmem:[%s9042_s29 + $0x1c0] sm:$0xff]  }
  0xe8   : > { %v4991_v32 = vrot.slane %v4990_v21, 4  ;;  %v4981_v33 = vadd.f32 %v4980_v28, %v4979_v11  ;;  %v3734_v34 = vmax.f32 %v2212_v24, 0.0  ;;  %v4142_v40 = vsel %vm4114_vm3, %v3736_v23, 0.0  ;;  %v8847_v11 = vld [vmem:[%s9042_s29 + $0x1b8] sm:$0xff]   ;;  %v8850_v24 = vld [vmem:[%s9042_s29 + $0x4c0] sm:$0xff]  }
  0xe9   : > { %v4128_v38 = vadd.f32 %v4127_v26, %v4126_v16  ;;  %v4118_v39 = vrot.slane %v4117_v27, 4  ;;  %v2214_v42 = vpop.f32.mrf.mxu0  ;;  %v5006_v47 = vsel %vm4114_vm3, %v3928_v29, 0.0  ;;  %v2223_v48 = vadd.f32 %v8312_v30, %v9246_v43  ;;  %v2982_v49 = vpop.f32.mrf.mxu1 }
  0xea   : > { %v4992_v45 = vadd.f32 %v4991_v32, %v4990_v21  ;;  %v4982_v46 = vrot.slane %v4981_v33, 4  ;;  %v4133_v52 = vsel %vm4114_vm3, %v3734_v34, 0.0  ;;  %v2991_v53 = vadd.f32 %v8504_v35, %v9246_v43 }
  0xeb   : > { %v4129_v50 = vrot.slane %v4128_v38, 2  ;;  %v4119_v51 = vadd.f32 %v4118_v39, %v4117_v27  ;;  %v9292_v54 = vpop.f32.mrf.mxu0  ;;  %8410 = vmatmul.mubr.msk.bf16.gmra.mxu0 %vm1577_vm2, %v8843_v31  ;;  %v3737_v57 = vmax.f32 %v2223_v48, 0.0  ;;  %v2215_v58 = vadd.f32 %v9246_v43, %v2214_v42  ;;  %v9296_v59 = vpop.f32.mrf.mxu1  ;;  %8602 = vmatmul.mubr.msk.bf16.gmra.mxu1 %vm1577_vm2, %v8844_v36 }
  0xec   : > { %v4993_v55 = vrot.slane %v4992_v45, 2  ;;  %v4983_v56 = vadd.f32 %v4982_v46, %v4981_v33  ;;  %8413 = vmatprep.mubr.msk.bf16.mxu0 %vm1577_vm2, %v8845_v37  ;;  %v3926_v62 = vmax.f32 %v9285_v41, 0.0  ;;  %v3929_v63 = vmax.f32 %v2991_v53, 0.0  ;;  %8605 = vmatprep.mubr.msk.bf16.mxu1 %vm1577_vm2, %v8846_v44 }
  0xed   : > { %v4130_v60 = vadd.f32 %v4129_v50, %v4128_v38  ;;  %v4120_v61 = vrot.slane %v4119_v51, 2  ;;  %v9301_v0 = vpop.f32.mrf.mxu0  ;;  %v4143_v3 = vsel %vm4114_vm3, %v3737_v57, 0.0  ;;  %v3735_v4 = vmax.f32 %v2215_v58, 0.0  ;;  %v9305_v5 = vpop.f32.mrf.mxu1  ;;  %v8851_v57 = vld [vmem:[%s9042_s29 + $0x1c8] sm:$0xff]  }
  0xee   : > { %v4994_v1 = vadd.f32 %v4993_v55, %v4992_v45  ;;  %v4984_v2 = vrot.slane %v4983_v56, 2  ;;  %v4144_v8 = vadd.f32 %v4143_v3, %v4142_v40  ;;  %v5007_v9 = vsel %vm4114_vm3, %v3929_v63, 0.0 }
  0xef   : > { %v4131_v6 = vrot.slane %v4130_v60, 1  ;;  %v4121_v7 = vadd.f32 %v4120_v61, %v4119_v51  ;;  %v9308_v10 = vpop.f32.mrf.mxu0  ;;  %v5008_v14 = vadd.f32 %v5007_v9, %v5006_v47  ;;  %v4134_v15 = vsel %vm4114_vm3, %v3735_v4, 0.0  ;;  %v9312_v16 = vpop.f32.mrf.mxu1  ;;  %v8854_v9 = vld [vmem:[%s9042_s29 + $0x4d0] sm:$0xff]  }
  0xf0   : > { %v4995_v12 = vrot.slane %v4994_v1, 1  ;;  %v4985_v13 = vadd.f32 %v4984_v2, %v4983_v56  ;;  %v4145_v21 = vrot.slane %v4144_v8, 4  ;;  %v4135_v22 = vadd.f32 %v4134_v15, %v4133_v52  ;;  %v8853_v2 = vld [vmem:[%s9042_s29 + $0x1d0] sm:$0xff]  }
  0xf1   : > { %v4132_v19 = vadd.f32 %v4131_v6, %v4130_v60  ;;  %v4122_v20 = vrot.slane %v4121_v7, 1  ;;  %v9316_v23 = vpop.f32.mrf.mxu0  ;;  %v5009_v27 = vrot.slane %v5008_v14, 4  ;;  %v2983_v28 = vadd.f32 %v9246_v43, %v2982_v49  ;;  %v9320_v29 = vpop.f32.mrf.mxu1 }
  0xf2   : > { %v4996_v25 = vadd.f32 %v4995_v12, %v4994_v1  ;;  %v4986_v26 = vrot.slane %v4985_v13, 1  ;;  %v4146_v32 = vadd.f32 %v4145_v21, %v4144_v8  ;;  %v4136_v33 = vrot.slane %v4135_v22, 4 }
  0xf3   : > { %v5844_v30 = vmul.f32 0.0625, %v4132_v19  ;;  %v4123_v31 = vadd.f32 %v4122_v20, %v4121_v7  ;;  %v9322_v34 = vpop.f32.mrf.mxu0  ;;  %8414 = vmatmul.mubr.msk.bf16.gmra.mxu0 %vm1577_vm2, %v8847_v11  ;;  %v5010_v37 = vadd.f32 %v5009_v27, %v5008_v14  ;;  %v3927_v38 = vmax.f32 %v2983_v28, 0.0  ;;  %v9325_v39 = vpop.f32.mrf.mxu1  ;;  %8606 = vmatmul.mubr.msk.bf16.gmra.mxu1 %vm1577_vm2, %v8848_v17 }
  0xf4   : > { %v5940_v35 = vmul.f32 0.0625, %v4996_v25  ;;  %v4987_v36 = vadd.f32 %v4986_v26, %v4985_v13  ;;  %8417 = vmatprep.mubr.msk.bf16.mxu0 %vm1577_vm2, %v8849_v18  ;;  %v4147_v42 = vrot.slane %v4146_v32, 2  ;;  %v4137_v44 = vadd.f32 %v4136_v33, %v4135_v22  ;;  %8609 = vmatprep.mubr.msk.bf16.mxu1 %vm1577_vm2, %v8850_v24 }
  0xf5   : > { %v7916_v40 = vpack.c.bf16 %v5844_v30, %v5844_v30  ;;  %v5843_v41 = vmul.f32 0.0625, %v4123_v31  ;;  %v9329_v45 = vpop.f32.mrf.mxu0  ;;  %v4997_v47 = vsel %vm4114_vm3, %v3926_v62, 0.0  ;;  %v5011_v48 = vrot.slane %v5010_v37, 2  ;;  %v9334_v50 = vpop.f32.mrf.mxu1  ;;  %v8852_v62 = vld [vmem:[%s9042_s29 + $0x4c8] sm:$0xff]  }
  0xf6   : > { %v5939_v46 = vmul.f32 0.0625, %v4987_v36  ;;  %v4998_v49 = vsel %vm4114_vm3, %v3927_v38, 0.0  ;;  %v8012_v51 = vpack.c.bf16 %v5940_v35, %v5940_v35  ;;  %v4148_v53 = vadd.f32 %v4147_v42, %v4146_v32 }
  0xf7   : > { %v7915_v52 = vpack.c.bf16 %v5843_v41, %v5843_v41  ;;  %v4138_v55 = vrot.slane %v4137_v44, 2  ;;  %v9336_v56 = vpop.f32.mrf.mxu0  ;;  %v6804_v58 = vunpack.c.l.b16 %v7916_v40  ;;  %v5012_v61 = vadd.f32 %v5011_v48, %v5010_v37  ;;  %v9339_v1 = vpop.f32.mrf.mxu1 }
  0xf8   : > { %v8011_v60 = vpack.c.bf16 %v5939_v46, %v5939_v46  ;;  %v4999_v63 = vadd.f32 %v4998_v49, %v4997_v47  ;;  %v4149_v4 = vrot.slane %v4148_v53, 1  ;;  %v2236_v7 = vadd.f32 %v9292_v54, %v9246_v43 }
  0xf9   : > { %v6803_v3 = vunpack.c.l.b16 %v7915_v52  ;;  %v4139_v6 = vadd.f32 %v4138_v55, %v4137_v44  ;;  %v9345_v8 = vpop.f32.mrf.mxu0  ;;  %v5013_v12 = vrot.slane %v5012_v61, 1  ;;  %v3004_v14 = vadd.f32 %v9296_v59, %v9246_v43  ;;  %v9350_v15 = vpop.f32.mrf.mxu1  ;;  %v8855_v44 = vld [vmem:[%s9042_s29 + $0x1d8] sm:$0xff]   ;;  %v8857_v52 = vld [vmem:[%s9042_s29 + $0x1e0] sm:$0xff]  }
  0xfa   : > { %v6899_v11 = vunpack.c.l.b16 %v8011_v60  ;;  %v5000_v13 = vrot.slane %v4999_v63, 4  ;;  %v6900_v17 = vunpack.c.l.b16 %v8012_v51  ;;  %v4150_v18 = vadd.f32 %v4149_v4, %v4148_v53  ;;  %v8856_v51 = vld [vmem:[%s9042_s29 + $0x4d8] sm:$0xff]  }
  0xfb   : > { %v4140_v19 = vrot.slane %v4139_v6, 1  ;;  %v3740_v20 = vmax.f32 %v2236_v7, 0.0  ;;  %v9352_v21 = vpop.f32.mrf.mxu0  ;;  %8418 = vmatmul.mubr.msk.bf16.gmra.mxu0 %vm1577_vm2, %v8851_v57  ;;  %v9356_v54 = vsel %vm6995_vm4, %v6804_v58, %v6803_v3  ;;  %v5014_v22 = vadd.f32 %v5013_v12, %v5012_v61  ;;  %v9358_v26 = vpop.f32.mrf.mxu1  ;;  %8610 = vmatmul.mubr.msk.bf16.gmra.mxu1 %vm1577_vm2, %v8852_v62 }
  0xfc   : > { %v5001_v24 = vadd.f32 %v5000_v13, %v4999_v63  ;;  %v3932_v25 = vmax.f32 %v3004_v14, 0.0  ;;  %8421 = vmatprep.mubr.msk.bf16.mxu0 %vm1577_vm2, %v8853_v2  ;;  %v9363_v59 = vsel %vm6995_vm4, %v6900_v17, %v6899_v11  ;;  %v5846_v27 = vmul.f32 0.0625, %v4150_v18  ;;  %8613 = vmatprep.mubr.msk.bf16.mxu1 %vm1577_vm2, %v8854_v9 }
  0xfd   : > { %v4141_v28 = vadd.f32 %v4140_v19, %v4139_v6  ;;  %v2228_v30 = vadd.f32 %v9246_v43, %v9301_v0  ;;  %v9367_v31 = vpop.f32.mrf.mxu0  ;;  %v5942_v32 = vmul.f32 0.0625, %v5014_v22  ;;  %v4160_v35 = vsel %vm4114_vm3, %v3740_v20, 0.0  ;;  %v9373_v37 = vpop.f32.mrf.mxu1 }
  0xfe   : > { %v5002_v33 = vrot.slane %v5001_v24, 2  ;;  %v2996_v36 = vadd.f32 %v9246_v43, %v9305_v5  ;;  %v7918_v38 = vpack.c.bf16 %v5846_v27, %v5846_v27  ;;  %v2239_v0 = vadd.f32 %v9308_v10, %v9246_v43  ;;  %v8858_v10 = vld [vmem:[%s9042_s29 + $0x4e0] sm:$0xff]  }
  0xff   : > { %v5845_v40 = vmul.f32 0.0625, %v4141_v28  ;;  %v3738_v41 = vmax.f32 %v2228_v30, 0.0  ;;  %v9377_v42 = vpop.f32.mrf.mxu0  ;;  %v8014_v46 = vpack.c.bf16 %v5942_v32, %v5942_v32  ;;  %v5024_v48 = vsel %vm4114_vm3, %v3932_v25, 0.0  ;;  %v9383_v49 = vpop.f32.mrf.mxu1 }
 0x100   : > { %v5003_v47 = vadd.f32 %v5002_v33, %v5001_v24  ;;  %v3007_v5 = vadd.f32 %v9312_v16, %v9246_v43  ;;  %v6806_v53 = vunpack.c.l.b16 %v7918_v38  ;;  %v3930_v57 = vmax.f32 %v2996_v36, 0.0  ;;  %v8859_v36 = vld [vmem:[%s9042_s29 + $0x1e8] sm:$0xff]  }
 0x101   : > { %v7917_v55 = vpack.c.bf16 %v5845_v40, %v5845_v40  ;;  %v3741_v58 = vmax.f32 %v2239_v0, 0.0  ;;  %v9387_v60 = vpop.f32.mrf.mxu0  ;;  %v9390_v61 = vunpack.c.l.b16 %v8014_v46  ;;  %v4151_v62 = vsel %vm4114_vm3, %v3738_v41, 0.0  ;;  %v9393_v3 = vpop.f32.mrf.mxu1 }
 0x102   : > { %v5004_v63 = vrot.slane %v5003_v47, 1  ;;  %v3933_v2 = vmax.f32 %v3007_v5, 0.0  ;;  %v2231_v6 = vadd.f32 %v9246_v43, %v9316_v23  ;;  %v2999_v7 = vadd.f32 %v9246_v43, %v9320_v29 }
 0x103   : > { %v6805_v16 = vunpack.c.l.b16 %v7917_v55  ;;  %v4161_v4 = vsel %vm4114_vm3, %v3741_v58, 0.0  ;;  %v9400_v9 = vpop.f32.mrf.mxu0  ;;  %8422 = vmatmul.mubr.msk.bf16.gmra.mxu0 %vm1577_vm2, %v8855_v44  ;;  %v2252_v14 = vadd.f32 %v9322_v34, %v9246_v43  ;;  %v9406_v17 = vpop.f32.mrf.mxu1  ;;  %8614 = vmatmul.mubr.msk.bf16.gmra.mxu1 %vm1577_vm2, %v8856_v51  ;;  %v5015_v23 = vsel %vm4114_vm3, %v3930_v57, 0.0  ;;  %v8860_v44 = vld [vmem:[%s9042_s29 + $0x4e8] sm:$0xff]  }
 0x104   : > { %v5005_v11 = vadd.f32 %v5004_v63, %v5003_v47  ;;  %v4162_v12 = vadd.f32 %v4161_v4, %v4160_v35  ;;  %v5025_v13 = vsel %vm4114_vm3, %v3933_v2, 0.0  ;;  %8425 = vmatprep.mubr.msk.bf16.mxu0 %vm1577_vm2, %v8857_v52  ;;  %v3739_v18 = vmax.f32 %v2231_v6, 0.0  ;;  %8617 = vmatprep.mubr.msk.bf16.mxu1 %vm1577_vm2, %v8858_v10  ;;  %v8862_v52 = vld [vmem:[%s9042_s29 + $0x4f0] sm:$0xff]  }
 0x105   : > { %v5026_v29 = vadd.f32 %v5025_v13, %v5024_v48  ;;  %v3931_v19 = vmax.f32 %v2999_v7, 0.0  ;;  %v9411_v20 = vpop.f32.mrf.mxu0  ;;  %v6998_v22 = vsel %vm6997_vm5, %v6805_v16, %v9356_v54  ;;  %v3744_v25 = vmax.f32 %v2252_v14, 0.0  ;;  %v9416_v27 = vpop.f32.mrf.mxu1 }
 0x106   : > { %v5941_v34 = vmul.f32 0.0625, %v5005_v11  ;;  %v4163_v24 = vrot.slane %v4162_v12, 4  ;;  %v4152_v30 = vsel %vm4114_vm3, %v3739_v18, 0.0  ;;  %v3020_v33 = vadd.f32 %v9325_v39, %v9246_v43  ;;  %v8861_v39 = vld [vmem:[%s9042_s29 + $0x1f0] sm:$0xff]  }
 0x107   : > { %v5027_v28 = vrot.slane %v5026_v29, 4  ;;  %v5016_v32 = vsel %vm4114_vm3, %v3931_v19, 0.0  ;;  %v9422_v35 = vpop.f32.mrf.mxu0  ;;  %v4153_v40 = vadd.f32 %v4152_v30, %v4151_v62  ;;  %v9425_v0 = vpop.f32.mrf.mxu1  ;;  %v9429_v47 = vsel %vm6999_vm6, %v6806_v53, %v6998_v22 }
 0x108   : > { %v8013_v54 = vpack.c.bf16 %v5941_v34, %v5941_v34  ;;  %v4164_v38 = vadd.f32 %v4163_v24, %v4162_v12  ;;  %v5017_v41 = vadd.f32 %v5016_v32, %v5015_v23  ;;  %v3936_v48 = vmax.f32 %v3020_v33, 0.0  ;;  %v8863_v32 = vld [vmem:[%s9042_s29 + $0x1f8] sm:$0xff]  }
 0x109   : > { %v5028_v46 = vadd.f32 %v5027_v28, %v5026_v29  ;;  %v2244_v5 = vadd.f32 %v9246_v43, %v9329_v45  ;;  %v9433_v51 = vpop.f32.mrf.mxu0  ;;  %v4154_v58 = vrot.slane %v4153_v40, 4  ;;  %v9437_v63 = vpop.f32.mrf.mxu1  ;;  %v4178_v2 = vsel %vm4114_vm3, %v3744_v25, 0.0 }
 0x10a   : > { %v6901_v55 = vunpack.c.l.b16 %v8013_v54  ;;  %v4165_v57 = vrot.slane %v4164_v38, 2  ;;  %v5018_v10 = vrot.slane %v5017_v41, 4  ;;  %v3012_v53 = vadd.f32 %v9246_v43, %v9334_v50 }
 0x10b   : > { %v5029_v62 = vrot.slane %v5028_v46, 2  ;;  %v3742_v16 = vmax.f32 %v2244_v5, 0.0  ;;  %v9442_v4 = vpop.f32.mrf.mxu0  ;;  %8426 = vmatmul.mubr.msk.bf16.gmra.mxu0 %vm1577_vm2, %v8859_v36  ;;  %v4155_v7 = vadd.f32 %v4154_v58, %v4153_v40  ;;  %v9447_v12 = vpop.f32.mrf.mxu1  ;;  %8618 = vmatmul.mubr.msk.bf16.gmra.mxu1 %vm1577_vm2, %v8860_v44  ;;  %v5042_v50 = vsel %vm4114_vm3, %v3936_v48, 0.0  ;;  %v8864_v40 = vld [vmem:[%s9042_s29 + $0x4f8] sm:$0xff]   ;;  %v8866_v5 = vld [vmem:[%s9042_s29 + $0x500] sm:$0xff]  }
 0x10c   : > { %v7087_v45 = vsel %vm6997_vm5, %v6901_v55, %v9363_v59  ;;  %v4166_v6 = vadd.f32 %v4165_v57, %v4164_v38  ;;  %v5019_v11 = vadd.f32 %v5018_v10, %v5017_v41  ;;  %8429 = vmatprep.mubr.msk.bf16.mxu0 %vm1577_vm2, %v8861_v39  ;;  %8621 = vmatprep.mubr.msk.bf16.mxu1 %vm1577_vm2, %v8862_v52  ;;  %v3934_v24 = vmax.f32 %v3012_v53, 0.0 }
 0x10d   : > { %v5030_v13 = vadd.f32 %v5029_v62, %v5028_v46  ;;  %v9452_v14 = vsel %vm6999_vm6, %v9390_v61, %v7087_v45  ;;  %v4169_v23 = vsel %vm4114_vm3, %v3742_v16, 0.0  ;;  %v9456_v29 = vpop.f32.mrf.mxu0  ;;  %v4156_v18 = vrot.slane %v4155_v7, 2  ;;  %v9462_v61 = vpop.f32.mrf.mxu1 }
 0x10e   : > { %v4167_v59 = vrot.slane %v4166_v6, 1  ;;  %v5020_v19 = vrot.slane %v5019_v11, 2  ;;  %v2255_v22 = vadd.f32 %v9336_v56, %v9246_v43  ;;  %v3023_v25 = vadd.f32 %v9339_v1, %v9246_v43 }
 0x10f   : > { %v5031_v34 = vrot.slane %v5030_v13, 1  ;;  %v2247_v28 = vadd.f32 %v9246_v43, %v9345_v8  ;;  %v9468_v30 = vpop.f32.mrf.mxu0  ;;  %v4157_v36 = vadd.f32 %v4156_v18, %v4155_v7  ;;  %v9471_v56 = vpop.f32.mrf.mxu1  ;;  %v3015_v1 = vadd.f32 %v9246_v43, %v9350_v15  ;;  %v8865_v8 = vld [vmem:[%s9042_s29 + $0x200] sm:$0xff]  }
 0x110   : > { %v4168_v33 = vadd.f32 %v4167_v59, %v4166_v6  ;;  %v5021_v54 = vadd.f32 %v5020_v19, %v5019_v11  ;;  %v3745_v38 = vmax.f32 %v2255_v22, 0.0  ;;  %v3937_v44 = vmax.f32 %v3023_v25, 0.0 }
 0x111   : > { %v5032_v41 = vadd.f32 %v5031_v34, %v5030_v13  ;;  %v3743_v46 = vmax.f32 %v2247_v28, 0.0  ;;  %v9476_v48 = vpop.f32.mrf.mxu0  ;;  %v4158_v52 = vrot.slane %v4157_v36, 1  ;;  %v9481_v58 = vpop.f32.mrf.mxu1  ;;  %v5033_v59 = vsel %vm4114_vm3, %v3934_v24, 0.0 }
 0x112   : > { %v5848_v39 = vmul.f32 0.0625, %v4168_v33  ;;  %v5022_v55 = vrot.slane %v5021_v54, 1  ;;  %v4179_v57 = vsel %vm4114_vm3, %v3745_v38, 0.0  ;;  %v5043_v16 = vsel %vm4114_vm3, %v3937_v44, 0.0  ;;  %v8867_v38 = vld [vmem:[%s9042_s29 + $0x208] sm:$0xff]  }
 0x113   : > { %v5944_v10 = vmul.f32 0.0625, %v5032_v41  ;;  %v4180_v62 = vadd.f32 %v4179_v57, %v4178_v2  ;;  %v4170_v53 = vsel %vm4114_vm3, %v3743_v46, 0.0  ;;  %v9485_v45 = vpop.f32.mrf.mxu0  ;;  %8430 = vmatmul.mubr.msk.bf16.gmra.mxu0 %vm1577_vm2, %v8863_v32  ;;  %v4159_v6 = vadd.f32 %v4158_v52, %v4157_v36  ;;  %v9488_v13 = vpop.f32.mrf.mxu1  ;;  %8622 = vmatmul.mubr.msk.bf16.gmra.mxu1 %vm1577_vm2, %v8864_v40 }
 0x114   : > { %v7920_v15 = vpack.c.bf16 %v5848_v39, %v5848_v39  ;;  %v5023_v7 = vadd.f32 %v5022_v55, %v5021_v54  ;;  %v5044_v11 = vadd.f32 %v5043_v16, %v5042_v50  ;;  %v4171_v18 = vadd.f32 %v4170_v53, %v4169_v23  ;;  %8433 = vmatprep.mubr.msk.bf16.mxu0 %vm1577_vm2, %v8865_v8  ;;  %v8868_v8 = vld [vmem:[%s9042_s29 + $0x508] sm:$0xff]  }
 0x115   : > { %v4181_v2 = vrot.slane %v4180_v62, 4  ;;  %v3935_v19 = vmax.f32 %v3015_v1, 0.0  ;;  %v9492_v22 = vpop.f32.mrf.mxu0  ;;  %8625 = vmatprep.mubr.msk.bf16.mxu1 %vm1577_vm2, %v8866_v5  ;;  %v8016_v34 = vpack.c.bf16 %v5944_v10, %v5944_v10  ;;  %v5847_v50 = vmul.f32 0.0625, %v4159_v6  ;;  %v9496_v32 = vpop.f32.mrf.mxu1  ;;  %v8869_v10 = vld [vmem:[%s9042_s29 + $0x210] sm:$0xff]  }
 0x116   : > { %v5943_v25 = vmul.f32 0.0625, %v5023_v7  ;;  %v5045_v28 = vrot.slane %v5044_v11, 4  ;;  %v6808_v33 = vunpack.c.l.b16 %v7920_v15  ;;  %v4172_v23 = vrot.slane %v4171_v18, 4 }
 0x117   : > { %v4182_v24 = vadd.f32 %v4181_v2, %v4180_v62  ;;  %v5034_v36 = vsel %vm4114_vm3, %v3935_v19, 0.0  ;;  %v9500_v54 = vpop.f32.mrf.mxu0  ;;  %v7919_v40 = vpack.c.bf16 %v5847_v50, %v5847_v50  ;;  %v9504_v1 = vpop.f32.mrf.mxu1  ;;  %v2268_v52 = vadd.f32 %v9352_v21, %v9246_v43  ;;  %v8870_v62 = vld [vmem:[%s9042_s29 + $0x510] sm:$0xff]  }
 0x118   : > { %v8015_v41 = vpack.c.bf16 %v5943_v25, %v5943_v25  ;;  %v5046_v44 = vadd.f32 %v5045_v28, %v5044_v11  ;;  %v5035_v46 = vadd.f32 %v5034_v36, %v5033_v59  ;;  %v4173_v39 = vadd.f32 %v4172_v23, %v4171_v18 }
 0x119   : > { %v4183_v5 = vrot.slane %v4182_v24, 2  ;;  %v9511_v55 = vadd.f32 %v9358_v26, %v9246_v43  ;;  %v9513_v57 = vpop.f32.mrf.mxu0  ;;  %v6807_v16 = vunpack.c.l.b16 %v7919_v40  ;;  %v9517_v7 = vpop.f32.mrf.mxu1  ;;  %v6904_v11 = vunpack.c.l.b16 %v8016_v34 }
 0x11a   : > { %v6903_v53 = vunpack.c.l.b16 %v8015_v41  ;;  %v5047_v15 = vrot.slane %v5046_v44, 2  ;;  %v5036_v6 = vrot.slane %v5035_v46, 4  ;;  %v4174_v21 = vrot.slane %v4173_v39, 2 }
 0x11b   : > { %v4184_v59 = vadd.f32 %v4183_v5, %v4182_v24  ;;  %v3748_v2 = vmax.f32 %v2268_v52, 0.0  ;;  %v9524_v26 = vpop.f32.mrf.mxu0  ;;  %8434 = vmatmul.mubr.msk.bf16.gmra.mxu0 %vm1577_vm2, %v8867_v38  ;;  %v7002_v18 = vsel %vm7001_vm7, %v6807_v16, %v9429_v47  ;;  %v9537_v25 = vpop.f32.mrf.mxu1  ;;  %8626 = vmatmul.mubr.msk.bf16.gmra.mxu1 %vm1577_vm2, %v8868_v8  ;;  %v3940_v47 = vmax.f32 %v9511_v55, 0.0  ;;  %v8871_v52 = vld [vmem:[%s9042_s29 + $0x218] sm:$0xff]  }
 0x11c   : > { %v7089_v19 = vsel %vm7001_vm7, %v6903_v53, %v9452_v14  ;;  %v5048_v50 = vadd.f32 %v5047_v15, %v5046_v44  ;;  %v5037_v34 = vadd.f32 %v5036_v6, %v5035_v46  ;;  %v4175_v24 = vadd.f32 %v4174_v21, %v4173_v39  ;;  %8437 = vmatprep.mubr.msk.bf16.mxu0 %vm1577_vm2, %v8869_v10  ;;  %v8873_v15 = vld [vmem:[%s9042_s29 + $0x220] sm:$0xff]  }
 0x11d   : > { %v4185_v28 = vrot.slane %v4184_v59, 1  ;;  %v9541_v23 = vsel %vm7003_vm8, %v6808_v33, %v7002_v18  ;;  %v9544_v14 = vpop.f32.mrf.mxu0  ;;  %8629 = vmatprep.mubr.msk.bf16.mxu1 %vm1577_vm2, %v8870_v62  ;;  %v9549_v40 = vsel %vm7003_vm8, %v6904_v11, %v7089_v19  ;;  %v4196_v33 = vsel %vm4114_vm3, %v3748_v2, 0.0  ;;  %v9552_v41 = vpop.f32.mrf.mxu1  ;;  %v8874_v21 = vld [vmem:[%s9042_s29 + $0x520] sm:$0xff]  }
 0x11e   : > { %v5049_v36 = vrot.slane %v5048_v50, 1  ;;  %v5038_v38 = vrot.slane %v5037_v34, 2  ;;  %v4176_v46 = vrot.slane %v4175_v24, 1  ;;  %v2260_v8 = vadd.f32 %v9246_v43, %v9367_v31  ;;  %v8872_v31 = vld [vmem:[%s9042_s29 + $0x518] sm:$0xff]  }
 0x11f   : > { %v4186_v44 = vadd.f32 %v4185_v28, %v4184_v59  ;;  %v3028_v5 = vadd.f32 %v9246_v43, %v9373_v37  ;;  %v9559_v39 = vpop.f32.mrf.mxu0  ;;  %v2271_v62 = vadd.f32 %v9377_v42, %v9246_v43  ;;  %v3039_v16 = vadd.f32 %v9383_v49, %v9246_v43  ;;  %v9570_v53 = vpop.f32.mrf.mxu1 }
 0x120   : > { %v5050_v55 = vadd.f32 %v5049_v36, %v5048_v50  ;;  %v5039_v10 = vadd.f32 %v5038_v38, %v5037_v34  ;;  %v4177_v37 = vadd.f32 %v4176_v46, %v4175_v24  ;;  %v3746_v11 = vmax.f32 %v2260_v8, 0.0 }
 0x121   : > { %v5850_v6 = vmul.f32 0.0625, %v4186_v44  ;;  %v3938_v59 = vmax.f32 %v3028_v5, 0.0  ;;  %v3749_v19 = vmax.f32 %v2271_v62, 0.0  ;;  %v3941_v50 = vmax.f32 %v3039_v16, 0.0  ;;  %v9575_v34 = vpop.f32.mrf.mxu0  ;;  %v9586_v8 = vpop.f32.mrf.mxu1 }
 0x122   : > { %v5946_v2 = vmul.f32 0.0625, %v5050_v55  ;;  %v5040_v18 = vrot.slane %v5039_v10, 1  ;;  %v5849_v28 = vmul.f32 0.0625, %v4177_v37  ;;  %v5060_v49 = vsel %vm4114_vm3, %v3940_v47, 0.0 }
 0x123   : > { %v7922_v42 = vpack.c.bf16 %v5850_v6, %v5850_v6  ;;  %v4187_v36 = vsel %vm4114_vm3, %v3746_v11, 0.0  ;;  %8438 = vmatmul.mubr.msk.bf16.gmra.mxu0 %vm1577_vm2, %v8871_v52  ;;  %v4197_v44 = vsel %vm4114_vm3, %v3749_v19, 0.0  ;;  %v5061_v46 = vsel %vm4114_vm3, %v3941_v50, 0.0  ;;  %8630 = vmatmul.mubr.msk.bf16.gmra.mxu1 %vm1577_vm2, %v8872_v31  ;;  %v9596_v6 = vpop.f32.mrf.mxu0  ;;  %v9602_v50 = vpop.f32.mrf.mxu1 }
 0x124   : > { %v8018_v24 = vpack.c.bf16 %v5946_v2, %v5946_v2  ;;  %v5041_v38 = vadd.f32 %v5040_v18, %v5039_v10  ;;  %8441 = vmatprep.mubr.msk.bf16.mxu0 %vm1577_vm2, %v8873_v15  ;;  %v7921_v47 = vpack.c.bf16 %v5849_v28, %v5849_v28  ;;  %v5051_v5 = vsel %vm4114_vm3, %v3938_v59, 0.0  ;;  %8633 = vmatprep.mubr.msk.bf16.mxu1 %vm1577_vm2, %v8874_v21  ;;  %v8875_v59 = vld [vmem:[%s9042_s29 + $0x228] sm:$0xff]  }
 0x125   : > { %v4198_v52 = vadd.f32 %v4197_v44, %v4196_v33  ;;  %v5062_v55 = vadd.f32 %v5061_v46, %v5060_v49  ;;  %v6810_v10 = vunpack.c.l.b16 %v7922_v42  ;;  %v2263_v16 = vadd.f32 %v9246_v43, %v9387_v60  ;;  %v8876_v60 = vld [vmem:[%s9042_s29 + $0x528] sm:$0xff]   ;;  %v8877_v42 = vld [vmem:[%s9042_s29 + $0x230] sm:$0xff]  }
 0x126   : > { %v5945_v62 = vmul.f32 0.0625, %v5041_v38  ;;  %v3031_v31 = vadd.f32 %v9246_v43, %v9393_v3  ;;  %v6906_v15 = vunpack.c.l.b16 %v8018_v24  ;;  %v6809_v37 = vunpack.c.l.b16 %v7921_v47  ;;  %v8878_v38 = vld [vmem:[%s9042_s29 + $0x530] sm:$0xff]  }
 0x127   : > { %v4199_v33 = vrot.slane %v4198_v52, 4  ;;  %v5063_v11 = vrot.slane %v5062_v55, 4  ;;  %v3747_v2 = vmax.f32 %v2263_v16, 0.0  ;;  %v2284_v19 = vadd.f32 %v9400_v9, %v9246_v43 }
 0x128   : > { %v8017_v21 = vpack.c.bf16 %v5945_v62, %v5945_v62  ;;  %v3939_v18 = vmax.f32 %v3031_v31, 0.0  ;;  %v7006_v3 = vsel %vm7005_vm9, %v6809_v37, %v9541_v23  ;;  %v3052_v24 = vadd.f32 %v9406_v17, %v9246_v43  ;;  %v9619_v23 = vpop.f32.mrf.mxu0 }
 0x129   : > { %v4200_v28 = vadd.f32 %v4199_v33, %v4198_v52  ;;  %v5064_v49 = vadd.f32 %v5063_v11, %v5062_v55  ;;  %v7008_v9 = vsel %vm7007_vm10, %v6810_v10, %v7006_v3  ;;  %v4188_v46 = vsel %vm4114_vm3, %v3747_v2, 0.0  ;;  %v9624_v10 = vpop.f32.mrf.mxu1  ;;  %v8879_v3 = vld [vmem:[%s9042_s29 + $0x238] sm:$0xff]  }
 0x12a   : > { %v6905_v44 = vunpack.c.l.b16 %v8017_v21  ;;  %v5052_v47 = vsel %vm4114_vm3, %v3939_v18, 0.0  ;;  %v7170_v52 = vpack.c.b16 %v7008_v9, %v7008_v9  ;;  %v4189_v17 = vadd.f32 %v4188_v46, %v4187_v36  ;;  %v9634_v18 = vpop.f32.mrf.mxu0  ;;  %v8880_v9 = vld [vmem:[%s9042_s29 + $0x538] sm:$0xff]  }
 0x12b   : > { %v4201_v55 = vrot.slane %v4200_v28, 2  ;;  %v5065_v62 = vrot.slane %v5064_v49, 2  ;;  %8442 = vmatmul.mubr.msk.bf16.gmra.mxu0 %vm1577_vm2, %v8875_v59  ;;  %v5053_v31 = vadd.f32 %v5052_v47, %v5051_v5  ;;  %v3752_v37 = vmax.f32 %v2284_v19, 0.0  ;;  %8634 = vmatmul.mubr.msk.bf16.gmra.mxu1 %vm1577_vm2, %v8876_v60 }
 0x12c   : > { %v7091_v16 = vsel %vm7005_vm9, %v6905_v44, %v9549_v40  ;;  %8445 = vmatprep.mubr.msk.bf16.mxu0 %vm1577_vm2, %v8877_v42  ;;  %7219 = vst.msk [vmem:[%s9614_s12] sm:$0xf] %vm7218_vm11, %v7170_v52  ;;  %v4190_v59 = vrot.slane %v4189_v17, 4  ;;  %8637 = vmatprep.mubr.msk.bf16.mxu1 %vm1577_vm2, %v8878_v38  ;;  %v3944_v21 = vmax.f32 %v3052_v24, 0.0  ;;  %v2276_v2 = vadd.f32 %v9246_v43, %v9411_v20  ;;  %v9645_v38 = vpop.f32.mrf.mxu1  ;;  %v8881_v44 = vld [vmem:[%s9042_s29 + $0x240] sm:$0xff]  }
 0x12d   : > { %v7092_v33 = vsel %vm7007_vm10, %v6906_v15, %v7091_v16  ;;  %v4202_v36 = vadd.f32 %v4201_v55, %v4200_v28  ;;  %v5066_v11 = vadd.f32 %v5065_v62, %v5064_v49  ;;  %v5054_v5 = vrot.slane %v5053_v31, 4 }
 0x12e   : > { %v7182_v40 = vpack.c.b16 %v7092_v33, %v7092_v33  ;;  %v4191_v42 = vadd.f32 %v4190_v59, %v4189_v17  ;;  %v3044_v15 = vadd.f32 %v9246_v43, %v9416_v27  ;;  %v3750_v49 = vmax.f32 %v2276_v2, 0.0  ;;  %v8882_v27 = vld [vmem:[%s9042_s29 + $0x540] sm:$0xff]   ;;  %v9651_v33 = vpop.f32.mrf.mxu0  ;;  %v9664_v2 = vpop.f32.mrf.mxu1 }
 0x12f   : > { %v4203_v19 = vrot.slane %v4202_v36, 1  ;;  %v5067_v60 = vrot.slane %v5066_v11, 1  ;;  %v5055_v28 = vadd.f32 %v5054_v5, %v5053_v31  ;;  %v2287_v24 = vadd.f32 %v9422_v35, %v9246_v43 }
 0x130   : > { %7231 = vst.msk [vmem:[%s9614_s12 + $0x30] sm:$0xf] %vm7218_vm11, %v7182_v40  ;;  %v3055_v20 = vadd.f32 %v9425_v0, %v9246_v43  ;;  %v4192_v52 = vrot.slane %v4191_v42, 2  ;;  %v3942_v55 = vmax.f32 %v3044_v15, 0.0  ;;  %v4214_v17 = vsel %vm4114_vm3, %v3752_v37, 0.0 }
 0x131   : > { %v4204_v46 = vadd.f32 %v4203_v19, %v4202_v36  ;;  %v5068_v47 = vadd.f32 %v5067_v60, %v5066_v11  ;;  %v5056_v62 = vrot.slane %v5055_v28, 2  ;;  %v3753_v16 = vmax.f32 %v2287_v24, 0.0  ;;  %v9660_v37 = vld [vmem:[%s11113_s2] ss:$0 sm:$0xff]  ;;  %v9673_v24 = vpop.f32.mrf.mxu0 }
 0x132   : > { %v3945_v31 = vmax.f32 %v3055_v20, 0.0  ;;  %v4193_v40 = vadd.f32 %v4192_v52, %v4191_v42  ;;  %v5078_v43 = vsel %vm4114_vm3, %v3944_v21, 0.0  ;;  %v2279_v5 = vadd.f32 %v9660_v37, %v9433_v51 }
 0x133   : > { %v5852_v35 = vmul.f32 0.0625, %v4204_v46  ;;  %v5948_v59 = vmul.f32 0.0625, %v5068_v47  ;;  %8446 = vmatmul.mubr.msk.bf16.gmra.mxu0 %vm1577_vm2, %v8879_v3  ;;  %v5057_v0 = vadd.f32 %v5056_v62, %v5055_v28  ;;  %v4215_v36 = vsel %vm4114_vm3, %v3753_v16, 0.0  ;;  %8638 = vmatmul.mubr.msk.bf16.gmra.mxu1 %vm1577_vm2, %v8880_v9  ;;  %v8883_v46 = vld [vmem:[%s9042_s29 + $0x248] sm:$0xff]   ;;  %v9677_v62 = vpop.f32.mrf.mxu1  ;;  %v8885_v16 = vld [vmem:[%s9042_s29 + $0x250] sm:$0xff]  }
 0x134   : > { %v5079_v11 = vsel %vm4114_vm3, %v3945_v31, 0.0  ;;  %8449 = vmatprep.mubr.msk.bf16.mxu0 %vm1577_vm2, %v8881_v44  ;;  %v4194_v21 = vrot.slane %v4193_v40, 1  ;;  %v4205_v19 = vsel %vm4114_vm3, %v3750_v49, 0.0  ;;  %v5069_v60 = vsel %vm4114_vm3, %v3942_v55, 0.0  ;;  %8641 = vmatprep.mubr.msk.bf16.mxu1 %vm1577_vm2, %v8882_v27 }
 0x135   : > { %v4216_v42 = vadd.f32 %v4215_v36, %v4214_v17  ;;  %v5058_v15 = vrot.slane %v5057_v0, 1  ;;  %v5080_v3 = vadd.f32 %v5079_v11, %v5078_v43  ;;  %v3751_v51 = vmax.f32 %v2279_v5, 0.0  ;;  %v8884_v17 = vld [vmem:[%s9042_s29 + $0x548] sm:$0xff]   ;;  %v8886_v36 = vld [vmem:[%s9042_s29 + $0x550] sm:$0xff]   ;;  %v9687_v5 = vpop.f32.mrf.mxu0 }
 0x136   : > { %v3047_v28 = vadd.f32 %v9660_v37, %v9437_v63  ;;  %v7924_v20 = vpack.c.bf16 %v5852_v35, %v5852_v35  ;;  %v8020_v9 = vpack.c.bf16 %v5948_v59, %v5948_v59  ;;  %v4195_v44 = vadd.f32 %v4194_v21, %v4193_v40 }
 0x137   : > { %v4217_v49 = vrot.slane %v4216_v42, 4  ;;  %v5059_v47 = vadd.f32 %v5058_v15, %v5057_v0  ;;  %v5081_v52 = vrot.slane %v5080_v3, 4  ;;  %v4206_v55 = vsel %vm4114_vm3, %v3751_v51, 0.0 }
 0x138   : > { %v3943_v27 = vmax.f32 %v3047_v28, 0.0  ;;  %v5851_v31 = vmul.f32 0.0625, %v4195_v44  ;;  %v4207_v63 = vadd.f32 %v4206_v55, %v4205_v19  ;;  %v2300_v35 = vadd.f32 %v9660_v37, %v9442_v4 }
 0x139   : > { %v4218_v43 = vadd.f32 %v4217_v49, %v4216_v42  ;;  %v5947_v59 = vmul.f32 0.0625, %v5059_v47  ;;  %v5082_v40 = vadd.f32 %v5081_v52, %v5080_v3  ;;  %v3068_v0 = vadd.f32 %v9660_v37, %v9447_v12  ;;  %v9690_v49 = vpop.f32.mrf.mxu1 }
 0x13a   : > { %v5070_v11 = vsel %vm4114_vm3, %v3943_v27, 0.0  ;;  %v7923_v21 = vpack.c.bf16 %v5851_v31, %v5851_v31  ;;  %v4208_v51 = vrot.slane %v4207_v63, 4  ;;  %v3756_v44 = vmax.f32 %v2300_v35, 0.0  ;;  %11116 = vst [vmem:[#allocation2_spill] sm:$0xff] %v9690_v49  ;;  %v9695_v31 = vpop.f32.mrf.mxu0 }
 0x13b   : > { %v4219_v15 = vrot.slane %v4218_v43, 2  ;;  %v5071_v28 = vadd.f32 %v5070_v11, %v5069_v60  ;;  %8450 = vmatmul.mubr.msk.bf16.gmra.mxu0 %vm1577_vm2, %v8883_v46  ;;  %v8019_v19 = vpack.c.bf16 %v5947_v59, %v5947_v59  ;;  %v5083_v42 = vrot.slane %v5082_v40, 2  ;;  %8642 = vmatmul.mubr.msk.bf16.gmra.mxu1 %vm1577_vm2, %v8884_v17  ;;  %11117 = vst [vmem:[#allocation3_spill] sm:$0xff] %v9695_v31  ;;  %v9704_v11 = vpop.f32.mrf.mxu1 }
 0x13c   : > { %v3948_v4 = vmax.f32 %v3068_v0, 0.0  ;;  %8453 = vmatprep.mubr.msk.bf16.mxu0 %vm1577_vm2, %v8885_v16  ;;  %v6812_v12 = vunpack.c.l.b16 %v7924_v20  ;;  %v4209_v47 = vadd.f32 %v4208_v51, %v4207_v63  ;;  %8645 = vmatprep.mubr.msk.bf16.mxu1 %vm1577_vm2, %v8886_v36  ;;  %v6908_v60 = vunpack.c.l.b16 %v8020_v9  ;;  %v8887_v20 = vld [vmem:[%s9042_s29 + $0x258] sm:$0xff]   ;;  %11118 = vst [vmem:[#allocation4_spill] sm:$0xff] %v9704_v11  ;;  %v8889_v0 = vld [vmem:[%s9042_s29 + $0x260] sm:$0xff]  }
 0x13d   : > { %v4220_v3 = vadd.f32 %v4219_v15, %v4218_v43  ;;  %v5072_v52 = vrot.slane %v5071_v28, 4  ;;  %v6811_v46 = vunpack.c.l.b16 %v7923_v21  ;;  %v6907_v55 = vunpack.c.l.b16 %v8019_v19  ;;  %v8890_v19 = vld [vmem:[%s9042_s29 + $0x560] sm:$0xff]  }
 0x13e   : > { %v5084_v27 = vadd.f32 %v5083_v42, %v5082_v40  ;;  %v4210_v17 = vrot.slane %v4209_v47, 2  ;;  %v4232_v16 = vsel %vm4114_vm3, %v3756_v44, 0.0  ;;  %v5096_v63 = vsel %vm4114_vm3, %v3948_v4, 0.0  ;;  %v8888_v40 = vld [vmem:[%s9042_s29 + $0x558] sm:$0xff]  }
 0x13f   : > { %v4221_v35 = vrot.slane %v4220_v3, 1  ;;  %v5073_v59 = vadd.f32 %v5072_v52, %v5071_v28  ;;  %v2292_v36 = vadd.f32 %v9660_v37, %v9456_v29  ;;  %v3060_v9 = vadd.f32 %v9660_v37, %v9462_v61  ;;  %v9713_v52 = vpop.f32.mrf.mxu0 }
 0x140   : > { %v5085_v43 = vrot.slane %v5084_v27, 1  ;;  %v4211_v15 = vadd.f32 %v4210_v17, %v4209_v47  ;;  %v2303_v28 = vadd.f32 %v9660_v37, %v9468_v30  ;;  %v3071_v29 = vadd.f32 %v9660_v37, %v9471_v56 }
 0x141   : > { %v4222_v21 = vadd.f32 %v4221_v35, %v4220_v3  ;;  %v5074_v51 = vrot.slane %v5073_v59, 2  ;;  %v3754_v44 = vmax.f32 %v2292_v36, 0.0  ;;  %v3946_v4 = vmax.f32 %v3060_v9, 0.0  ;;  %v9720_v35 = vpop.f32.mrf.mxu1 }
 0x142   : > { %v5086_v42 = vadd.f32 %v5085_v43, %v5084_v27  ;;  %v4212_v31 = vrot.slane %v4211_v15, 1  ;;  %v3757_v49 = vmax.f32 %v2303_v28, 0.0  ;;  %v7009_v3 = vsel %vm6995_vm4, %v6812_v12, %v6811_v46  ;;  %v9731_v43 = vpop.f32.mrf.mxu0 }
 0x143   : > { %v5854_v61 = vmul.f32 0.0625, %v4222_v21  ;;  %v5075_v11 = vadd.f32 %v5074_v51, %v5073_v59  ;;  %8454 = vmatmul.mubr.msk.bf16.gmra.mxu0 %vm1577_vm2, %v8887_v20  ;;  %v9718_v47 = vsel %vm6995_vm4, %v6908_v60, %v6907_v55  ;;  %v3949_v27 = vmax.f32 %v3071_v29, 0.0  ;;  %8646 = vmatmul.mubr.msk.bf16.gmra.mxu1 %vm1577_vm2, %v8888_v40  ;;  %v9736_v28 = vpop.f32.mrf.mxu1 }
 0x144   : > { %v5950_v30 = vmul.f32 0.0625, %v5086_v42  ;;  %8457 = vmatprep.mubr.msk.bf16.mxu0 %vm1577_vm2, %v8889_v0  ;;  %v4213_v56 = vadd.f32 %v4212_v31, %v4211_v15  ;;  %v4223_v59 = vsel %vm4114_vm3, %v3754_v44, 0.0  ;;  %v4233_v20 = vsel %vm4114_vm3, %v3757_v49, 0.0  ;;  %8649 = vmatprep.mubr.msk.bf16.mxu1 %vm1577_vm2, %v8890_v19  ;;  %v8891_v0 = vld [vmem:[%s9042_s29 + $0x268] sm:$0xff]  }
 0x145   : > { %v5076_v17 = vrot.slane %v5075_v11, 1  ;;  %v5087_v12 = vsel %vm4114_vm3, %v3946_v4, 0.0  ;;  %v4234_v60 = vadd.f32 %v4233_v20, %v4232_v16  ;;  %v5097_v46 = vsel %vm4114_vm3, %v3949_v27, 0.0  ;;  %v8892_v16 = vld [vmem:[%s9042_s29 + $0x568] sm:$0xff]  }
 0x146   : > { %v2295_v55 = vadd.f32 %v9660_v37, %v9476_v48  ;;  %v7926_v36 = vpack.c.bf16 %v5854_v61, %v5854_v61  ;;  %v5853_v31 = vmul.f32 0.0625, %v4213_v56  ;;  %v5098_v40 = vadd.f32 %v5097_v46, %v5096_v63  ;;  %v9744_v61 = vpop.f32.mrf.mxu0  ;;  %v9748_v46 = vpop.f32.mrf.mxu1 }
 0x147   : > { %v5077_v9 = vadd.f32 %v5076_v17, %v5075_v11  ;;  %v8022_v21 = vpack.c.bf16 %v5950_v30, %v5950_v30  ;;  %v4235_v49 = vrot.slane %v4234_v60, 4  ;;  %v3063_v51 = vadd.f32 %v9660_v37, %v9481_v58 }
 0x148   : > { %v3755_v15 = vmax.f32 %v2295_v55, 0.0  ;;  %v7925_v19 = vpack.c.bf16 %v5853_v31, %v5853_v31  ;;  %v5099_v44 = vrot.slane %v5098_v40, 4  ;;  %v2316_v48 = vadd.f32 %v9660_v37, %v9485_v45  ;;  %v8893_v55 = vld [vmem:[%s9042_s29 + $0x270] sm:$0xff]  }
 0x149   : > { %v5949_v42 = vmul.f32 0.0625, %v5077_v9  ;;  %v4236_v4 = vadd.f32 %v4235_v49, %v4234_v60  ;;  %v3947_v11 = vmax.f32 %v3063_v51, 0.0  ;;  %v3084_v29 = vadd.f32 %v9660_v37, %v9488_v13  ;;  %v8894_v31 = vld [vmem:[%s9042_s29 + $0x570] sm:$0xff]   ;;  %v9754_v51 = vpop.f32.mrf.mxu0 }
 0x14a   : > { %v4224_v63 = vsel %vm4114_vm3, %v3755_v15, 0.0  ;;  %v6813_v58 = vunpack.c.l.b16 %v7925_v19  ;;  %v5100_v27 = vadd.f32 %v5099_v44, %v5098_v40  ;;  %v6814_v17 = vunpack.c.l.b16 %v7926_v36 }
 0x14b   : > { %v8021_v30 = vpack.c.bf16 %v5949_v42, %v5949_v42  ;;  %v4225_v56 = vadd.f32 %v4224_v63, %v4223_v59  ;;  %8458 = vmatmul.mubr.msk.bf16.gmra.mxu0 %vm1577_vm2, %v8891_v0  ;;  %v4237_v20 = vrot.slane %v4236_v4, 2  ;;  %v5088_v45 = vsel %vm4114_vm3, %v3947_v11, 0.0  ;;  %8650 = vmatmul.mubr.msk.bf16.gmra.mxu1 %vm1577_vm2, %v8892_v16  ;;  %v8895_v63 = vld [vmem:[%s9042_s29 + $0x278] sm:$0xff]  }
 0x14c   : > { %v3760_v60 = vmax.f32 %v2316_v48, 0.0  ;;  %v7010_v13 = vsel %vm6997_vm5, %v6813_v58, %v7009_v3  ;;  %v5101_v49 = vrot.slane %v5100_v27, 2  ;;  %v6910_v40 = vunpack.c.l.b16 %v8022_v21  ;;  %8461 = vmatprep.mubr.msk.bf16.mxu0 %vm1577_vm2, %v8893_v55  ;;  %8653 = vmatprep.mubr.msk.bf16.mxu1 %vm1577_vm2, %v8894_v31  ;;  %v8896_v11 = vld [vmem:[%s9042_s29 + $0x578] sm:$0xff]  }
 0x14d   : > { %v6909_v9 = vunpack.c.l.b16 %v8021_v30  ;;  %v4226_v15 = vrot.slane %v4225_v56, 4  ;;  %v4238_v59 = vadd.f32 %v4237_v20, %v4236_v4  ;;  %v5089_v36 = vadd.f32 %v5088_v45, %v5087_v12  ;;  %v9766_v4 = vpop.f32.mrf.mxu1  ;;  %v9776_v45 = vpop.f32.mrf.mxu0 }
 0x14e   : > { %v3952_v0 = vmax.f32 %v3084_v29, 0.0  ;;  %v5102_v16 = vadd.f32 %v5101_v49, %v5100_v27  ;;  %v9759_v42 = vsel %vm6999_vm6, %v6814_v17, %v7010_v13  ;;  %v4250_v3 = vsel %vm4114_vm3, %v3760_v60, 0.0 }
 0x14f   : > { %v4227_v19 = vadd.f32 %v4226_v15, %v4225_v56  ;;  %v7094_v21 = vsel %vm6997_vm5, %v6909_v9, %v9718_v47  ;;  %v4239_v44 = vrot.slane %v4238_v59, 1  ;;  %v5090_v48 = vrot.slane %v5089_v36, 4 }
 0x150   : > { %v2308_v12 = vadd.f32 %v9660_v37, %v9492_v22  ;;  %v5103_v29 = vrot.slane %v5102_v16, 1  ;;  %v3076_v30 = vadd.f32 %v9660_v37, %v9496_v32  ;;  %v2319_v27 = vadd.f32 %v9660_v37, %v9500_v54  ;;  %v9780_v54 = vpop.f32.mrf.mxu1 }
 0x151   : > { %v4228_v58 = vrot.slane %v4227_v19, 2  ;;  %v4240_v56 = vadd.f32 %v4239_v44, %v4238_v59  ;;  %v5091_v17 = vadd.f32 %v5090_v48, %v5089_v36  ;;  %v3087_v20 = vadd.f32 %v9660_v37, %v9504_v1 }
 0x152   : > { %v3758_v47 = vmax.f32 %v2308_v12, 0.0  ;;  %v5104_v22 = vadd.f32 %v5103_v29, %v5102_v16  ;;  %v3950_v55 = vmax.f32 %v3076_v30, 0.0  ;;  %v3761_v31 = vmax.f32 %v2319_v27, 0.0  ;;  %v9789_v12 = vpop.f32.mrf.mxu0  ;;  %v9796_v27 = vpop.f32.mrf.mxu1 }
 0x153   : > { %v4229_v60 = vadd.f32 %v4228_v58, %v4227_v19  ;;  %8462 = vmatmul.mubr.msk.bf16.gmra.mxu0 %vm1577_vm2, %v8895_v63  ;;  %v5856_v13 = vmul.f32 0.0625, %v4240_v56  ;;  %v5092_v9 = vrot.slane %v5091_v17, 2  ;;  %v5114_v32 = vsel %vm4114_vm3, %v3952_v0, 0.0  ;;  %8654 = vmatmul.mubr.msk.bf16.gmra.mxu1 %vm1577_vm2, %v8896_v11 }
 0x154   : > { %v3953_v49 = vmax.f32 %v3087_v20, 0.0  ;;  %v5952_v15 = vmul.f32 0.0625, %v5104_v22  ;;  %v9784_v1 = vsel %vm6999_vm6, %v6910_v40, %v7094_v21  ;;  %v4251_v36 = vsel %vm4114_vm3, %v3761_v31, 0.0  ;;  %v9800_v31 = vpop.f32.mrf.mxu0 }
 0x155   : > { %v4230_v59 = vrot.slane %v4229_v60, 1  ;;  %v5093_v16 = vadd.f32 %v5092_v9, %v5091_v17  ;;  %v4241_v19 = vsel %vm4114_vm3, %v3758_v47, 0.0  ;;  %v4252_v44 = vadd.f32 %v4251_v36, %v4250_v3  ;;  %v9806_v36 = vpop.f32.mrf.mxu1 }
 0x156   : > { %v5115_v48 = vsel %vm4114_vm3, %v3953_v49, 0.0  ;;  %v5105_v63 = vsel %vm4114_vm3, %v3950_v55, 0.0  ;;  %v2311_v11 = vadd.f32 %v9660_v37, %v9513_v57  ;;  %v7928_v58 = vpack.c.bf16 %v5856_v13, %v5856_v13 }
 0x157   : > { %v4231_v0 = vadd.f32 %v4230_v59, %v4229_v60  ;;  %v5116_v29 = vadd.f32 %v5115_v48, %v5114_v32  ;;  %v5094_v40 = vrot.slane %v5093_v16, 1  ;;  %v4253_v21 = vrot.slane %v4252_v44, 4 }
 0x158   : > { %v3079_v30 = vadd.f32 %v9660_v37, %v9517_v7  ;;  %v8024_v3 = vpack.c.bf16 %v5952_v15, %v5952_v15  ;;  %v3759_v47 = vmax.f32 %v2311_v11, 0.0  ;;  %v2332_v55 = vadd.f32 %v9660_v37, %v9524_v26 }
 0x159   : > { %v5855_v56 = vmul.f32 0.0625, %v4231_v0  ;;  %v5117_v17 = vrot.slane %v5116_v29, 4  ;;  %v5095_v20 = vadd.f32 %v5094_v40, %v5093_v16  ;;  %v4254_v22 = vadd.f32 %v4253_v21, %v4252_v44  ;;  %v9808_v21 = vpop.f32.mrf.mxu0 }
 0x15a   : > { %v3951_v60 = vmax.f32 %v3079_v30, 0.0  ;;  %v4242_v9 = vsel %vm4114_vm3, %v3759_v47, 0.0  ;;  %v3100_v7 = vadd.f32 %v9660_v37, %v9537_v25  ;;  %v3764_v48 = vmax.f32 %v2332_v55, 0.0  ;;  %v8898_v47 = vld [vmem:[%s9042_s29 + $0x580] sm:$0xff]   ;;  %v8899_v55 = vld [vmem:[%s9042_s29 + $0x288] sm:$0xff]  }
 0x15b   : > { %v7927_v57 = vpack.c.bf16 %v5855_v56, %v5855_v56  ;;  %v5118_v13 = vadd.f32 %v5117_v17, %v5116_v29  ;;  %v5951_v32 = vmul.f32 0.0625, %v5095_v20  ;;  %v4255_v49 = vrot.slane %v4254_v22, 2  ;;  %v8897_v17 = vld [vmem:[%s9042_s29 + $0x280] sm:$0xff]   ;;  %8657 = vmatprep.mubr.msk.bf16.mxu1 %vm1577_vm2, %v8898_v47 }
 0x15c   : > { %v4243_v15 = vadd.f32 %v4242_v9, %v4241_v19  ;;  %v5106_v59 = vsel %vm4114_vm3, %v3951_v60, 0.0  ;;  %v6816_v0 = vunpack.c.l.b16 %v7928_v58  ;;  %v6912_v25 = vunpack.c.l.b16 %v8024_v3  ;;  %v9814_v58 = vpop.f32.mrf.mxu1  ;;  %8465 = vmatprep.mubr.msk.bf16.mxu0 %vm1577_vm2, %v8897_v17 }
 0x15d   : > { %v6815_v16 = vunpack.c.l.b16 %v7927_v57  ;;  %v5119_v26 = vrot.slane %v5118_v13, 2  ;;  %v5107_v44 = vadd.f32 %v5106_v59, %v5105_v63  ;;  %v8023_v29 = vpack.c.bf16 %v5951_v32, %v5951_v32  ;;  %v8900_v59 = vld [vmem:[%s9042_s29 + $0x588] sm:$0xff]  }
 0x15e   : > { %v4256_v11 = vadd.f32 %v4255_v49, %v4254_v22  ;;  %v4244_v40 = vrot.slane %v4243_v15, 4  ;;  %v3956_v63 = vmax.f32 %v3100_v7, 0.0  ;;  %v4268_v32 = vsel %vm4114_vm3, %v3764_v48, 0.0 }
 0x15f   : > { %v7012_v19 = vsel %vm7001_vm7, %v6815_v16, %v9759_v42  ;;  %v5120_v30 = vadd.f32 %v5119_v26, %v5118_v13  ;;  %v5108_v56 = vrot.slane %v5107_v44, 4  ;;  %v6911_v20 = vunpack.c.l.b16 %v8023_v29 }
 0x160   : > { %v4257_v60 = vrot.slane %v4256_v11, 1  ;;  %v4245_v57 = vadd.f32 %v4244_v40, %v4243_v15  ;;  %v2324_v3 = vadd.f32 %v9660_v37, %v9544_v14  ;;  %v9823_v49 = vsel %vm7003_vm8, %v6816_v0, %v7012_v19  ;;  %v9827_v15 = vpop.f32.mrf.mxu0  ;;  %8466 = vmatmul.mubr.msk.bf16.gmra.mxu0 %vm1577_vm2, %v8899_v55  ;;  %v9835_v40 = vpop.f32.mrf.mxu1  ;;  %8658 = vmatmul.mubr.msk.bf16.gmra.mxu1 %vm1577_vm2, %v8900_v59 }
 0x161   : > { %v5121_v22 = vrot.slane %v5120_v30, 1  ;;  %v5109_v9 = vadd.f32 %v5108_v56, %v5107_v44  ;;  %v3092_v7 = vadd.f32 %v9660_v37, %v9552_v41  ;;  %v7096_v14 = vsel %vm7001_vm7, %v6911_v20, %v9784_v1 }
 0x162   : > { %v4258_v42 = vadd.f32 %v4257_v60, %v4256_v11  ;;  %v4246_v13 = vrot.slane %v4245_v57, 2  ;;  %v3762_v44 = vmax.f32 %v2324_v3, 0.0  ;;  %v2335_v0 = vadd.f32 %v9660_v37, %v9559_v39  ;;  %v9849_v3 = vpop.f32.mrf.mxu0 }
 0x163   : > { %v5122_v16 = vadd.f32 %v5121_v22, %v5120_v30  ;;  %v5110_v26 = vrot.slane %v5109_v9, 2  ;;  %v3954_v11 = vmax.f32 %v3092_v7, 0.0  ;;  %v5132_v56 = vsel %vm4114_vm3, %v3956_v63, 0.0 }
 0x164   : > { %v5858_v48 = vmul.f32 0.0625, %v4258_v42  ;;  %v4247_v29 = vadd.f32 %v4246_v13, %v4245_v57  ;;  %v3103_v1 = vadd.f32 %v9660_v37, %v9570_v53  ;;  %v7097_v17 = vsel %vm7003_vm8, %v6912_v25, %v7096_v14  ;;  %v9851_v25 = vpop.f32.mrf.mxu1 }
 0x165   : > { %v5954_v41 = vmul.f32 0.0625, %v5122_v16  ;;  %v5111_v19 = vadd.f32 %v5110_v26, %v5109_v9  ;;  %v4259_v47 = vsel %vm4114_vm3, %v3762_v44, 0.0  ;;  %v3765_v20 = vmax.f32 %v2335_v0, 0.0 }
 0x166   : > { %v4248_v30 = vrot.slane %v4247_v29, 1  ;;  %v7930_v60 = vpack.c.bf16 %v5858_v48, %v5858_v48  ;;  %v3957_v39 = vmax.f32 %v3103_v1, 0.0  ;;  %v2327_v55 = vadd.f32 %v9660_v37, %v9575_v34 }
 0x167   : > { %v5112_v57 = vrot.slane %v5111_v19, 1  ;;  %v5123_v9 = vsel %vm4114_vm3, %v3954_v11, 0.0  ;;  %v4269_v63 = vsel %vm4114_vm3, %v3765_v20, 0.0  ;;  %v3095_v53 = vadd.f32 %v9660_v37, %v9586_v8 }
 0x168   : > { %v4249_v22 = vadd.f32 %v4248_v30, %v4247_v29  ;;  %v8026_v42 = vpack.c.bf16 %v5954_v41, %v5954_v41  ;;  %v4270_v7 = vadd.f32 %v4269_v63, %v4268_v32  ;;  %v5133_v59 = vsel %vm4114_vm3, %v3957_v39, 0.0 }
 0x169   : > { %v5113_v13 = vadd.f32 %v5112_v57, %v5111_v19  ;;  %v5134_v16 = vadd.f32 %v5133_v59, %v5132_v56  ;;  %v3763_v34 = vmax.f32 %v2327_v55, 0.0  ;;  %v3955_v26 = vmax.f32 %v3095_v53, 0.0  ;;  %v9864_v19 = vpop.f32.mrf.mxu0  ;;  %v9866_v56 = vpop.f32.mrf.mxu1 }
 0x16a   : > { %v5857_v14 = vmul.f32 0.0625, %v4249_v22  ;;  %v4271_v48 = vrot.slane %v4270_v7, 4  ;;  %v9856_v29 = vadd.f32 %v9660_v37, %v9596_v6  ;;  %v9860_v8 = vadd.f32 %v9660_v37, %v9602_v50 }
 0x16b   : > { %v5953_v44 = vmul.f32 0.0625, %v5113_v13  ;;  %v5135_v0 = vrot.slane %v5134_v16, 4  ;;  %v4260_v32 = vsel %vm4114_vm3, %v3763_v34, 0.0  ;;  %v5124_v41 = vsel %vm4114_vm3, %v3955_v26, 0.0 }
 0x16c   : > { %v7929_v11 = vpack.c.bf16 %v5857_v14, %v5857_v14  ;;  %v4272_v30 = vadd.f32 %v4271_v48, %v4270_v7  ;;  %v4261_v20 = vadd.f32 %v4260_v32, %v4259_v47  ;;  %v5125_v6 = vadd.f32 %v5124_v41, %v5123_v9  ;;  %v9872_v9 = vpop.f32.mrf.mxu0  ;;  %v8902_v7 = vld [vmem:[%s9042_s29 + $0x590] sm:$0xff]   ;;  %v8904_v32 = vld [vmem:[%s9042_s29 + $0x598] sm:$0xff]  }
 0x16d   : > { %v8025_v1 = vpack.c.bf16 %v5953_v44, %v5953_v44  ;;  %v6818_v57 = vunpack.c.l.b16 %v7930_v60  ;;  %v6914_v39 = vunpack.c.l.b16 %v8026_v42  ;;  %v5136_v55 = vadd.f32 %v5135_v0, %v5134_v16  ;;  %v9874_v60 = vpop.f32.mrf.mxu1  ;;  %v8901_v42 = vld [vmem:[%s9042_s29 + $0x290] sm:$0xff]   ;;  %8661 = vmatprep.mubr.msk.bf16.mxu1 %vm1577_vm2, %v8902_v7 }
 0x16e   : > { %v6817_v50 = vunpack.c.l.b16 %v7929_v11  ;;  %v4273_v63 = vrot.slane %v4272_v30, 2  ;;  %v4262_v53 = vrot.slane %v4261_v20, 4  ;;  %v5126_v13 = vrot.slane %v5125_v6, 4  ;;  %8469 = vmatprep.mubr.msk.bf16.mxu0 %vm1577_vm2, %v8901_v42 }
 0x16f   : > { %v6913_v22 = vunpack.c.l.b16 %v8025_v1  ;;  %v5137_v14 = vrot.slane %v5136_v55, 2  ;;  %v3768_v34 = vmax.f32 %v9856_v29, 0.0  ;;  %v3960_v47 = vmax.f32 %v9860_v8, 0.0  ;;  %v8903_v8 = vld [vmem:[%s9042_s29 + $0x298] sm:$0xff]  }
 0x170   : > { %v7014_v59 = vsel %vm7005_vm9, %v6817_v50, %v9823_v49  ;;  %v4274_v44 = vadd.f32 %v4273_v63, %v4272_v30  ;;  %v4263_v49 = vadd.f32 %v4262_v53, %v4261_v20  ;;  %v5127_v0 = vadd.f32 %v5126_v13, %v5125_v6 }
 0x171   : > { %v7015_v16 = vsel %vm7007_vm10, %v6818_v57, %v7014_v59  ;;  %v7098_v26 = vsel %vm7005_vm9, %v6913_v22, %v7097_v17  ;;  %v5138_v29 = vadd.f32 %v5137_v14, %v5136_v55  ;;  %v2340_v57 = vadd.f32 %v9660_v37, %v9619_v23  ;;  %v9895_v55 = vpop.f32.mrf.mxu1  ;;  %8662 = vmatmul.mubr.msk.bf16.gmra.mxu1 %vm1577_vm2, %v8904_v32 }
 0x172   : > { %v7171_v48 = vpack.c.b16 %v7015_v16, %v7015_v16  ;;  %v7099_v11 = vsel %vm7007_vm10, %v6914_v39, %v7098_v26  ;;  %v4275_v1 = vrot.slane %v4274_v44, 1  ;;  %v4264_v50 = vrot.slane %v4263_v49, 2  ;;  %v9893_v39 = vpop.f32.mrf.mxu0  ;;  %8470 = vmatmul.mubr.msk.bf16.gmra.mxu0 %vm1577_vm2, %v8903_v8 }
 0x173   : > { %v7183_v41 = vpack.c.b16 %v7099_v11, %v7099_v11  ;;  %v5139_v17 = vrot.slane %v5138_v29, 1  ;;  %v5128_v30 = vrot.slane %v5127_v0, 2  ;;  %v3108_v20 = vadd.f32 %v9660_v37, %v9624_v10  ;;  %v9908_v8 = vpop.f32.mrf.mxu1 }
 0x174   : > { %7220 = vst.msk [vmem:[%s9614_s12 + $0x4] sm:$0xf] %vm7218_vm11, %v7171_v48  ;;  %v2351_v6 = vadd.f32 %v9660_v37, %v9634_v18  ;;  %v4276_v23 = vadd.f32 %v4275_v1, %v4274_v44  ;;  %v4265_v22 = vadd.f32 %v4264_v50, %v4263_v49  ;;  %v3766_v63 = vmax.f32 %v2340_v57, 0.0  ;;  %v9906_v49 = vpop.f32.mrf.mxu0 }
 0x175   : > { %7232 = vst.msk [vmem:[%s9614_s12 + $0x34] sm:$0xf] %vm7218_vm11, %v7183_v41  ;;  %v3119_v53 = vadd.f32 %v9660_v37, %v9645_v38  ;;  %v5140_v10 = vadd.f32 %v5139_v17, %v5138_v29  ;;  %v5129_v13 = vadd.f32 %v5128_v30, %v5127_v0  ;;  %v3958_v59 = vmax.f32 %v3108_v20, 0.0 }
 0x176   : > { %v3769_v18 = vmax.f32 %v2351_v6, 0.0  ;;  %v5860_v14 = vmul.f32 0.0625, %v4276_v23  ;;  %v4266_v42 = vrot.slane %v4265_v22, 1  ;;  %v4286_v7 = vsel %vm4114_vm3, %v3768_v34, 0.0 }
 0x177   : > { %v3961_v16 = vmax.f32 %v3119_v53, 0.0  ;;  %v5956_v26 = vmul.f32 0.0625, %v5140_v10  ;;  %v5130_v48 = vrot.slane %v5129_v13, 1  ;;  %v5150_v11 = vsel %vm4114_vm3, %v3960_v47, 0.0  ;;  %v9919_v53 = vpop.f32.mrf.mxu1 }
 0x178   : > { %v4287_v44 = vsel %vm4114_vm3, %v3769_v18, 0.0  ;;  %v4267_v38 = vadd.f32 %v4266_v42, %v4265_v22  ;;  %v4277_v29 = vsel %vm4114_vm3, %v3766_v63, 0.0  ;;  %v5141_v34 = vsel %vm4114_vm3, %v3958_v59, 0.0  ;;  %v9917_v63 = vpop.f32.mrf.mxu0 }
 0x179   : > { %v4288_v0 = vadd.f32 %v4287_v44, %v4286_v7  ;;  %v5151_v32 = vsel %vm4114_vm3, %v3961_v16, 0.0  ;;  %v5131_v41 = vadd.f32 %v5130_v48, %v5129_v13  ;;  %v2343_v50 = vadd.f32 %v9660_v37, %v9651_v33 }
 0x17a   : > { %v5152_v1 = vadd.f32 %v5151_v32, %v5150_v11  ;;  %v7932_v47 = vpack.c.bf16 %v5860_v14, %v5860_v14  ;;  %v5859_v57 = vmul.f32 0.0625, %v4267_v38  ;;  %v3111_v30 = vadd.f32 %v9660_v37, %v9664_v2  ;;  %v9929_v32 = vpop.f32.mrf.mxu1 }
 0x17b   : > { %v4289_v17 = vrot.slane %v4288_v0, 4  ;;  %v8028_v20 = vpack.c.bf16 %v5956_v26, %v5956_v26  ;;  %v5955_v6 = vmul.f32 0.0625, %v5131_v41  ;;  %v3767_v22 = vmax.f32 %v2343_v50, 0.0 }
 0x17c   : > { %v5153_v23 = vrot.slane %v5152_v1, 4  ;;  %v7931_v10 = vpack.c.bf16 %v5859_v57, %v5859_v57  ;;  %v3959_v59 = vmax.f32 %v3111_v30, 0.0  ;;  %v2364_v33 = vadd.f32 %v9660_v37, %v9673_v24  ;;  %v8905_v57 = vld [vmem:[%s9042_s29 + $0x2a0] sm:$0xff]  }
 0x17d   : > { %v4290_v13 = vadd.f32 %v4289_v17, %v4288_v0  ;;  %v8027_v18 = vpack.c.bf16 %v5955_v6, %v5955_v6  ;;  %v4278_v42 = vsel %vm4114_vm3, %v3767_v22, 0.0  ;;  %v3132_v2 = vadd.f32 %v9660_v37, %v9677_v62  ;;  %v9927_v0 = vpop.f32.mrf.mxu0  ;;  %v8906_v17 = vld [vmem:[%s9042_s29 + $0x5a0] sm:$0xff]   ;;  %v8908_v22 = vld [vmem:[%s9042_s29 + $0x5a8] sm:$0xff]   ;;  %8473 = vmatprep.mubr.msk.bf16.mxu0 %vm1577_vm2, %v8905_v57 }
 0x17e   : > { %v5154_v14 = vadd.f32 %v5153_v23, %v5152_v1  ;;  %v6819_v7 = vunpack.c.l.b16 %v7931_v10  ;;  %v4279_v26 = vadd.f32 %v4278_v42, %v4277_v29  ;;  %v5142_v48 = vsel %vm4114_vm3, %v3959_v59, 0.0  ;;  %v8907_v23 = vld [vmem:[%s9042_s29 + $0x2a8] sm:$0xff]   ;;  %8665 = vmatprep.mubr.msk.bf16.mxu1 %vm1577_vm2, %v8906_v17 }
 0x17f   : > { %v4291_v16 = vrot.slane %v4290_v13, 2  ;;  %v6820_v11 = vunpack.c.l.b16 %v7932_v47  ;;  %v6915_v44 = vunpack.c.l.b16 %v8027_v18  ;;  %v5143_v24 = vadd.f32 %v5142_v48, %v5141_v34  ;;  %v11119_v18 = vld [vmem:[#allocation2_spill] sm:$0xff]  ;;  %v11120_v42 = vld [vmem:[#allocation3_spill] sm:$0xff] }
 0x180   : > { %v5155_v38 = vrot.slane %v5154_v14, 2  ;;  %v6916_v41 = vunpack.c.l.b16 %v8028_v20  ;;  %v4280_v50 = vrot.slane %v4279_v26, 4  ;;  %v3772_v62 = vmax.f32 %v2364_v33, 0.0 }
 0x181   : > { %v4292_v1 = vadd.f32 %v4291_v16, %v4290_v13  ;;  %v9934_v29 = vsel %vm6995_vm4, %v6820_v11, %v6819_v7  ;;  %v5144_v47 = vrot.slane %v5143_v24, 4  ;;  %v3964_v6 = vmax.f32 %v3132_v2, 0.0  ;;  %v9949_v7 = vpop.f32.mrf.mxu0  ;;  %v9951_v16 = vpop.f32.mrf.mxu1  ;;  %8474 = vmatmul.mubr.msk.bf16.gmra.mxu0 %vm1577_vm2, %v8907_v23  ;;  %8666 = vmatmul.mubr.msk.bf16.gmra.mxu1 %vm1577_vm2, %v8908_v22  ;;  %v11122_v11 = vld [vmem:[#allocation4_spill] sm:$0xff] }
 0x182   : > { %v5156_v30 = vadd.f32 %v5155_v38, %v5154_v14  ;;  %v9939_v34 = vsel %vm6995_vm4, %v6916_v41, %v6915_v44  ;;  %v4281_v59 = vadd.f32 %v4280_v50, %v4279_v26  ;;  %v2356_v20 = vadd.f32 %v9660_v37, %v9687_v5  ;;  %11121 = vst [vmem:[#allocation2_spill] sm:$0xff] %v9951_v16 }
 0x183   : > { %v4293_v10 = vrot.slane %v4292_v1, 1  ;;  %v5145_v33 = vadd.f32 %v5144_v47, %v5143_v24  ;;  %v3124_v14 = vadd.f32 %v9660_v37, %v11119_v18  ;;  %v2367_v2 = vadd.f32 %v9660_v37, %v11120_v42 }
 0x184   : > { %v5157_v13 = vrot.slane %v5156_v30, 1  ;;  %v4282_v26 = vrot.slane %v4281_v59, 2  ;;  %v3770_v48 = vmax.f32 %v2356_v20, 0.0  ;;  %v3135_v44 = vadd.f32 %v9660_v37, %v11122_v11 }
 0x185   : > { %v4294_v5 = vadd.f32 %v4293_v10, %v4292_v1  ;;  %v5146_v24 = vrot.slane %v5145_v33, 2  ;;  %v3962_v41 = vmax.f32 %v3124_v14, 0.0  ;;  %v3773_v50 = vmax.f32 %v2367_v2, 0.0 }
 0x186   : > { %v5158_v38 = vadd.f32 %v5157_v13, %v5156_v30  ;;  %v4283_v17 = vadd.f32 %v4282_v26, %v4281_v59  ;;  %v4304_v47 = vsel %vm4114_vm3, %v3772_v62, 0.0  ;;  %v3965_v18 = vmax.f32 %v3135_v44, 0.0  ;;  %v9965_v59 = vpop.f32.mrf.mxu0 }
 0x187   : > { %v5862_v57 = vmul.f32 0.0625, %v4294_v5  ;;  %v5147_v16 = vadd.f32 %v5146_v24, %v5145_v33  ;;  %v5168_v23 = vsel %vm4114_vm3, %v3964_v6, 0.0  ;;  %v4305_v1 = vsel %vm4114_vm3, %v3773_v50, 0.0  ;;  %v9967_v33 = vpop.f32.mrf.mxu1 }
 0x188   : > { %v5958_v42 = vmul.f32 0.0625, %v5158_v38  ;;  %v4284_v22 = vrot.slane %v4283_v17, 1  ;;  %v4295_v10 = vsel %vm4114_vm3, %v3770_v48, 0.0  ;;  %v4306_v20 = vadd.f32 %v4305_v1, %v4304_v47 }
 0x189   : > { %v5169_v30 = vsel %vm4114_vm3, %v3965_v18, 0.0  ;;  %v5148_v13 = vrot.slane %v5147_v16, 1  ;;  %v5159_v14 = vsel %vm4114_vm3, %v3962_v41, 0.0  ;;  %v2359_v62 = vadd.f32 %v9660_v37, %v9713_v52 }
 0x18a   : > { %v5170_v2 = vadd.f32 %v5169_v30, %v5168_v23  ;;  %v7934_v6 = vpack.c.bf16 %v5862_v57, %v5862_v57  ;;  %v4285_v5 = vadd.f32 %v4284_v22, %v4283_v17  ;;  %v4307_v26 = vrot.slane %v4306_v20, 4 }
 0x18b   : > { %v3127_v48 = vadd.f32 %v9660_v37, %v9720_v35  ;;  %v8030_v11 = vpack.c.bf16 %v5958_v42, %v5958_v42  ;;  %v5149_v44 = vadd.f32 %v5148_v13, %v5147_v16  ;;  %v3771_v24 = vmax.f32 %v2359_v62, 0.0  ;;  %v9976_v35 = vpop.f32.mrf.mxu0  ;;  %v9978_v16 = vpop.f32.mrf.mxu1 }
 0x18c   : > { %v5171_v38 = vrot.slane %v5170_v2, 4  ;;  %v5861_v50 = vmul.f32 0.0625, %v4285_v5  ;;  %v4308_v41 = vadd.f32 %v4307_v26, %v4306_v20  ;;  %v2380_v52 = vadd.f32 %v9660_v37, %v9731_v43  ;;  %11123 = vst [vmem:[#allocation3_spill] sm:$0xff] %v9976_v35  ;;  %11124 = vst [vmem:[#allocation4_spill] sm:$0xff] %v9978_v16  ;;  %v8909_v5 = vld [vmem:[%s9042_s29 + $0x2b0] sm:$0xff]  }
 0x18d   : > { %v3963_v47 = vmax.f32 %v3127_v48, 0.0  ;;  %v5957_v18 = vmul.f32 0.0625, %v5149_v44  ;;  %v4296_v57 = vsel %vm4114_vm3, %v3771_v24, 0.0  ;;  %v3148_v17 = vadd.f32 %v9660_v37, %v9736_v28  ;;  %v9983_v35 = vpop.f32.mrf.mxu0  ;;  %8477 = vmatprep.mubr.msk.bf16.mxu0 %vm1577_vm2, %v8909_v5 }
 0x18e   : > { %v5172_v23 = vadd.f32 %v5171_v38, %v5170_v2  ;;  %v7933_v42 = vpack.c.bf16 %v5861_v50, %v5861_v50  ;;  %v4309_v1 = vrot.slane %v4308_v41, 2  ;;  %v4297_v22 = vadd.f32 %v4296_v57, %v4295_v10  ;;  %v8910_v2 = vld [vmem:[%s9042_s29 + $0x5b0] sm:$0xff]   ;;  %v9985_v10 = vpop.f32.mrf.mxu1 }
 0x18f   : > { %v5160_v20 = vsel %vm4114_vm3, %v3963_v47, 0.0  ;;  %v8029_v30 = vpack.c.bf16 %v5957_v18, %v5957_v18  ;;  %v3776_v62 = vmax.f32 %v2380_v52, 0.0  ;;  %v3968_v38 = vmax.f32 %v3148_v17, 0.0  ;;  %8669 = vmatprep.mubr.msk.bf16.mxu1 %vm1577_vm2, %v8910_v2  ;;  %v8911_v17 = vld [vmem:[%s9042_s29 + $0x2b8] sm:$0xff]  }
 0x190   : > { %v5173_v13 = vrot.slane %v5172_v23, 2  ;;  %v5161_v43 = vadd.f32 %v5160_v20, %v5159_v14  ;;  %v6821_v26 = vunpack.c.l.b16 %v7933_v42  ;;  %v4310_v48 = vadd.f32 %v4309_v1, %v4308_v41  ;;  %v8912_v42 = vld [vmem:[%s9042_s29 + $0x5b8] sm:$0xff]   ;;  %v10005_v5 = vpop.f32.mrf.mxu1 }
 0x191   : > { %v4298_v44 = vrot.slane %v4297_v22, 4  ;;  %v6822_v28 = vunpack.c.l.b16 %v7934_v6  ;;  %v6917_v24 = vunpack.c.l.b16 %v8029_v30  ;;  %v6918_v14 = vunpack.c.l.b16 %v8030_v11  ;;  %8670 = vmatmul.mubr.msk.bf16.gmra.mxu1 %vm1577_vm2, %v8912_v42 }
 0x192   : > { %v5174_v16 = vadd.f32 %v5173_v13, %v5172_v23  ;;  %v5162_v50 = vrot.slane %v5161_v43, 4  ;;  %v4311_v47 = vrot.slane %v4310_v48, 1  ;;  %v4322_v41 = vsel %vm4114_vm3, %v3776_v62, 0.0 }
 0x193   : > { %v4299_v52 = vadd.f32 %v4298_v44, %v4297_v22  ;;  %v7017_v6 = vsel %vm6997_vm5, %v6821_v26, %v9934_v29  ;;  %v5186_v23 = vsel %vm4114_vm3, %v3968_v38, 0.0  ;;  %v7101_v1 = vsel %vm6997_vm5, %v6917_v24, %v9939_v34 }
 0x194   : > { %v5175_v18 = vrot.slane %v5174_v16, 1  ;;  %v5163_v57 = vadd.f32 %v5162_v50, %v5161_v43  ;;  %v4312_v20 = vadd.f32 %v4311_v47, %v4310_v48  ;;  %v2372_v11 = vadd.f32 %v9660_v37, %v9744_v61  ;;  %v10003_v43 = vpop.f32.mrf.mxu0  ;;  %8478 = vmatmul.mubr.msk.bf16.gmra.mxu0 %vm1577_vm2, %v8911_v17 }
 0x195   : > { %v4300_v30 = vrot.slane %v4299_v52, 2  ;;  %v3140_v62 = vadd.f32 %v9660_v37, %v9748_v46  ;;  %v2383_v29 = vadd.f32 %v9660_v37, %v9754_v51  ;;  %v3151_v61 = vadd.f32 %v9660_v37, %v9766_v4 }
 0x196   : > { %v5176_v22 = vadd.f32 %v5175_v18, %v5174_v16  ;;  %v5164_v13 = vrot.slane %v5163_v57, 2  ;;  %v5864_v34 = vmul.f32 0.0625, %v4312_v20  ;;  %v3774_v26 = vmax.f32 %v2372_v11, 0.0  ;;  %v10015_v42 = vpop.f32.mrf.mxu0 }
 0x197   : > { %v4301_v2 = vadd.f32 %v4300_v30, %v4299_v52  ;;  %v3966_v46 = vmax.f32 %v3140_v62, 0.0  ;;  %v3777_v44 = vmax.f32 %v2383_v29, 0.0  ;;  %v7018_v51 = vsel %vm6999_vm6, %v6822_v28, %v7017_v6 }
 0x198   : > { %v5960_v16 = vmul.f32 0.0625, %v5176_v22  ;;  %v5165_v48 = vadd.f32 %v5164_v13, %v5163_v57  ;;  %v7102_v24 = vsel %vm6999_vm6, %v6918_v14, %v7101_v1  ;;  %v3969_v50 = vmax.f32 %v3151_v61, 0.0  ;;  %v10022_v14 = vld [vmem:[%s11113_s2] ss:$0 sm:$0xff]  ;;  %v10026_v1 = vpop.f32.mrf.mxu1 }
 0x199   : > { %v4302_v38 = vrot.slane %v4301_v2, 1  ;;  %v7936_v47 = vpack.c.bf16 %v5864_v34, %v5864_v34  ;;  %v4313_v17 = vsel %vm4114_vm3, %v3774_v26, 0.0  ;;  %v4323_v52 = vsel %vm4114_vm3, %v3777_v44, 0.0  ;;  %v10034_v26 = vpop.f32.mrf.mxu0 }
 0x19a   : > { %v5166_v18 = vrot.slane %v5165_v48, 1  ;;  %v8032_v20 = vpack.c.bf16 %v5960_v16, %v5960_v16  ;;  %v4324_v4 = vadd.f32 %v4323_v52, %v4322_v41  ;;  %v5187_v57 = vsel %vm4114_vm3, %v3969_v50, 0.0 }
 0x19b   : > { %v4303_v37 = vadd.f32 %v4302_v38, %v4301_v2  ;;  %v5177_v11 = vsel %vm4114_vm3, %v3966_v46, 0.0  ;;  %v5188_v28 = vadd.f32 %v5187_v57, %v5186_v23  ;;  %v2375_v6 = vadd.f32 %v10022_v14, %v9776_v45 }
 0x19c   : > { %v5167_v30 = vadd.f32 %v5166_v18, %v5165_v48  ;;  %v4325_v13 = vrot.slane %v4324_v4, 4  ;;  %v3143_v41 = vadd.f32 %v10022_v14, %v9780_v54  ;;  %v2396_v62 = vadd.f32 %v10022_v14, %v9789_v12  ;;  %v10037_v12 = vpop.f32.mrf.mxu1 }
 0x19d   : > { %v5863_v22 = vmul.f32 0.0625, %v4303_v37  ;;  %v5189_v23 = vrot.slane %v5188_v28, 4  ;;  %v3775_v34 = vmax.f32 %v2375_v6, 0.0  ;;  %v3164_v2 = vadd.f32 %v10022_v14, %v9796_v27  ;;  %v10040_v6 = vpop.f32.mrf.mxu0 }
 0x19e   : > { %v5959_v29 = vmul.f32 0.0625, %v5167_v30  ;;  %v4326_v45 = vadd.f32 %v4325_v13, %v4324_v4  ;;  %v3967_v16 = vmax.f32 %v3143_v41, 0.0  ;;  %v3780_v48 = vmax.f32 %v2396_v62, 0.0  ;;  %v8913_v62 = vld [vmem:[%s9042_s29 + $0x2c0] sm:$0xff]  }
 0x19f   : > { %v7935_v61 = vpack.c.bf16 %v5863_v22, %v5863_v22  ;;  %v5190_v44 = vadd.f32 %v5189_v23, %v5188_v28  ;;  %v4314_v38 = vsel %vm4114_vm3, %v3775_v34, 0.0  ;;  %v3972_v54 = vmax.f32 %v3164_v2, 0.0  ;;  %v10047_v2 = vpop.f32.mrf.mxu1  ;;  %8481 = vmatprep.mubr.msk.bf16.mxu0 %vm1577_vm2, %v8913_v62 }
 0x1a0   : > { %v8031_v46 = vpack.c.bf16 %v5959_v29, %v5959_v29  ;;  %v4327_v18 = vrot.slane %v4326_v45, 2  ;;  %v4315_v52 = vadd.f32 %v4314_v38, %v4313_v17  ;;  %v5178_v27 = vsel %vm4114_vm3, %v3967_v16, 0.0  ;;  %v8914_v29 = vld [vmem:[%s9042_s29 + $0x5c0] sm:$0xff]   ;;  %v10059_v38 = vpop.f32.mrf.mxu0 }
 0x1a1   : > { %v6823_v50 = vunpack.c.l.b16 %v7935_v61  ;;  %v6824_v37 = vunpack.c.l.b16 %v7936_v47  ;;  %v5191_v4 = vrot.slane %v5190_v44, 2  ;;  %v5179_v30 = vadd.f32 %v5178_v27, %v5177_v11  ;;  %v8915_v61 = vld [vmem:[%s9042_s29 + $0x2c8] sm:$0xff]   ;;  %8673 = vmatprep.mubr.msk.bf16.mxu1 %vm1577_vm2, %v8914_v29 }
 0x1a2   : > { %v6919_v57 = vunpack.c.l.b16 %v8031_v46  ;;  %v6920_v28 = vunpack.c.l.b16 %v8032_v20  ;;  %v4328_v22 = vadd.f32 %v4327_v18, %v4326_v45  ;;  %v4316_v13 = vrot.slane %v4315_v52, 4  ;;  %8482 = vmatmul.mubr.msk.bf16.gmra.mxu0 %vm1577_vm2, %v8915_v61 }
 0x1a3   : > { %v4340_v41 = vsel %vm4114_vm3, %v3780_v48, 0.0  ;;  %v7019_v23 = vsel %vm7001_vm7, %v6823_v50, %v7018_v51  ;;  %v5192_v34 = vadd.f32 %v5191_v4, %v5190_v44  ;;  %v5180_v17 = vrot.slane %v5179_v30, 4 }
 0x1a4   : > { %v5204_v47 = vsel %vm4114_vm3, %v3972_v54, 0.0  ;;  %v7103_v11 = vsel %vm7001_vm7, %v6919_v57, %v7102_v24  ;;  %v4329_v16 = vrot.slane %v4328_v22, 1  ;;  %v4317_v20 = vadd.f32 %v4316_v13, %v4315_v52  ;;  %v8916_v24 = vld [vmem:[%s9042_s29 + $0x5c8] sm:$0xff]  }
 0x1a5   : > { %v2388_v45 = vadd.f32 %v10022_v14, %v9800_v31  ;;  %v5193_v51 = vrot.slane %v5192_v34, 1  ;;  %v5181_v48 = vadd.f32 %v5180_v17, %v5179_v30  ;;  %v3156_v46 = vadd.f32 %v10022_v14, %v9806_v36  ;;  %v10065_v30 = vpop.f32.mrf.mxu1  ;;  %8674 = vmatmul.mubr.msk.bf16.gmra.mxu1 %vm1577_vm2, %v8916_v24 }
 0x1a6   : > { %v2399_v44 = vadd.f32 %v10022_v14, %v9808_v21  ;;  %v4330_v54 = vadd.f32 %v4329_v16, %v4328_v22  ;;  %v4318_v50 = vrot.slane %v4317_v20, 2  ;;  %v3167_v18 = vadd.f32 %v10022_v14, %v9814_v58 }
 0x1a7   : > { %v3778_v31 = vmax.f32 %v2388_v45, 0.0  ;;  %v5194_v52 = vadd.f32 %v5193_v51, %v5192_v34  ;;  %v5182_v27 = vrot.slane %v5181_v48, 2  ;;  %v3970_v57 = vmax.f32 %v3156_v46, 0.0 }
 0x1a8   : > { %v3781_v4 = vmax.f32 %v2399_v44, 0.0  ;;  %v5866_v36 = vmul.f32 0.0625, %v4330_v54  ;;  %v4319_v21 = vadd.f32 %v4318_v50, %v4317_v20  ;;  %v7020_v13 = vsel %vm7003_vm8, %v6824_v37, %v7019_v23  ;;  %v10076_v23 = vpop.f32.mrf.mxu0  ;;  %v10078_v20 = vpop.f32.mrf.mxu1 }
 0x1a9   : > { %v3973_v62 = vmax.f32 %v3167_v18, 0.0  ;;  %v5962_v29 = vmul.f32 0.0625, %v5194_v52  ;;  %v5183_v22 = vadd.f32 %v5182_v27, %v5181_v48  ;;  %v7104_v17 = vsel %vm7003_vm8, %v6920_v28, %v7103_v11 }
 0x1aa   : > { %v4341_v61 = vsel %vm4114_vm3, %v3781_v4, 0.0  ;;  %v4320_v58 = vrot.slane %v4319_v21, 1  ;;  %v4331_v34 = vsel %vm4114_vm3, %v3778_v31, 0.0  ;;  %v5195_v46 = vsel %vm4114_vm3, %v3970_v57, 0.0 }
 0x1ab   : > { %v4342_v16 = vadd.f32 %v4341_v61, %v4340_v41  ;;  %v5205_v45 = vsel %vm4114_vm3, %v3973_v62, 0.0  ;;  %v5184_v51 = vrot.slane %v5183_v22, 1  ;;  %v2391_v37 = vadd.f32 %v10022_v14, %v9827_v15 }
 0x1ac   : > { %v5206_v44 = vadd.f32 %v5205_v45, %v5204_v47  ;;  %v7938_v28 = vpack.c.bf16 %v5866_v36, %v5866_v36  ;;  %v4321_v11 = vadd.f32 %v4320_v58, %v4319_v21  ;;  %v3159_v24 = vadd.f32 %v10022_v14, %v9835_v40  ;;  %v10091_v40 = vpop.f32.mrf.mxu0  ;;  %v10093_v21 = vpop.f32.mrf.mxu1 }
 0x1ad   : > { %v4343_v48 = vrot.slane %v4342_v16, 4  ;;  %v8034_v41 = vpack.c.bf16 %v5962_v29, %v5962_v29  ;;  %v5185_v54 = vadd.f32 %v5184_v51, %v5183_v22  ;;  %v3779_v31 = vmax.f32 %v2391_v37, 0.0 }
 0x1ae   : > { %v5207_v50 = vrot.slane %v5206_v44, 4  ;;  %v5865_v18 = vmul.f32 0.0625, %v4321_v11  ;;  %v3971_v47 = vmax.f32 %v3159_v24, 0.0  ;;  %v10084_v15 = vadd.f32 %v10022_v14, %v9849_v3 }
 0x1af   : > { %v4344_v52 = vadd.f32 %v4343_v48, %v4342_v16  ;;  %v5961_v27 = vmul.f32 0.0625, %v5185_v54  ;;  %v4332_v4 = vsel %vm4114_vm3, %v3779_v31, 0.0  ;;  %v10089_v36 = vadd.f32 %v10022_v14, %v9851_v25  ;;  %v8917_v31 = vld [vmem:[%s9042_s29 + $0x2d0] sm:$0xff]  }
 0x1b0   : > { %v5208_v57 = vadd.f32 %v5207_v50, %v5206_v44  ;;  %v7937_v62 = vpack.c.bf16 %v5865_v18, %v5865_v18  ;;  %v4333_v22 = vadd.f32 %v4332_v4, %v4331_v34  ;;  %v5196_v61 = vsel %vm4114_vm3, %v3971_v47, 0.0  ;;  %v10097_v34 = vpop.f32.mrf.mxu0  ;;  %v10099_v50 = vpop.f32.mrf.mxu1  ;;  %8485 = vmatprep.mubr.msk.bf16.mxu0 %vm1577_vm2, %v8917_v31 }
 0x1b1   : > { %v4345_v29 = vrot.slane %v4344_v52, 2  ;;  %v6826_v3 = vunpack.c.l.b16 %v7938_v28  ;;  %v8033_v58 = vpack.c.bf16 %v5961_v27, %v5961_v27  ;;  %v5197_v45 = vadd.f32 %v5196_v61, %v5195_v46  ;;  %v8918_v28 = vld [vmem:[%s9042_s29 + $0x5d0] sm:$0xff]  }
 0x1b2   : > { %v5209_v16 = vrot.slane %v5208_v57, 2  ;;  %v6922_v51 = vunpack.c.l.b16 %v8034_v41  ;;  %v6825_v44 = vunpack.c.l.b16 %v7937_v62  ;;  %v4334_v25 = vrot.slane %v4333_v22, 4  ;;  %8677 = vmatprep.mubr.msk.bf16.mxu1 %vm1577_vm2, %v8918_v28  ;;  %v8920_v62 = vld [vmem:[%s9042_s29 + $0x5d8] sm:$0xff]  }
 0x1b3   : > { %v4346_v37 = vadd.f32 %v4345_v29, %v4344_v52  ;;  %v6921_v11 = vunpack.c.l.b16 %v8033_v58  ;;  %v5198_v24 = vrot.slane %v5197_v45, 4  ;;  %v3784_v54 = vmax.f32 %v10084_v15, 0.0  ;;  %v8919_v15 = vld [vmem:[%s9042_s29 + $0x2d8] sm:$0xff]  }
 0x1b4   : > { %v5210_v48 = vadd.f32 %v5209_v16, %v5208_v57  ;;  %v7021_v18 = vsel %vm7005_vm9, %v6825_v44, %v7020_v13  ;;  %v4335_v41 = vadd.f32 %v4334_v25, %v4333_v22  ;;  %v3976_v52 = vmax.f32 %v10089_v36, 0.0  ;;  %v10114_v16 = vpop.f32.mrf.mxu0  ;;  %8486 = vmatmul.mubr.msk.bf16.gmra.mxu0 %vm1577_vm2, %v8919_v15 }
 0x1b5   : > { %v4347_v46 = vrot.slane %v4346_v37, 1  ;;  %v7022_v47 = vsel %vm7007_vm10, %v6826_v3, %v7021_v18  ;;  %v7105_v27 = vsel %vm7005_vm9, %v6921_v11, %v7104_v17  ;;  %v5199_v4 = vadd.f32 %v5198_v24, %v5197_v45  ;;  %v10116_v45 = vpop.f32.mrf.mxu1  ;;  %8678 = vmatmul.mubr.msk.bf16.gmra.mxu1 %vm1577_vm2, %v8920_v62 }
 0x1b6   : > { %v5211_v57 = vrot.slane %v5210_v48, 1  ;;  %v7172_v29 = vpack.c.b16 %v7022_v47, %v7022_v47  ;;  %v7106_v13 = vsel %vm7007_vm10, %v6922_v51, %v7105_v27  ;;  %v4336_v61 = vrot.slane %v4335_v41, 2 }
 0x1b7   : > { %v4348_v22 = vadd.f32 %v4347_v46, %v4346_v37  ;;  %v7184_v36 = vpack.c.b16 %v7106_v13, %v7106_v13  ;;  %v5200_v3 = vrot.slane %v5199_v4, 2  ;;  %v2404_v17 = vadd.f32 %v10022_v14, %v9864_v19 }
 0x1b8   : > { %v5212_v58 = vadd.f32 %v5211_v57, %v5210_v48  ;;  %7221 = vst.msk [vmem:[%s9614_s12 + $0x8] sm:$0xf] %vm7218_vm11, %v7172_v29  ;;  %v4337_v44 = vadd.f32 %v4336_v61, %v4335_v41  ;;  %v3172_v37 = vadd.f32 %v10022_v14, %v9866_v56  ;;  %v2415_v25 = vadd.f32 %v10022_v14, %v9872_v9  ;;  %v10132_v57 = vpop.f32.mrf.mxu0  ;;  %v10136_v29 = vpop.f32.mrf.mxu1 }
 0x1b9   : > { %v5868_v51 = vmul.f32 0.0625, %v4348_v22  ;;  %7233 = vst.msk [vmem:[%s9614_s12 + $0x38] sm:$0xf] %vm7218_vm11, %v7184_v36  ;;  %v5201_v11 = vadd.f32 %v5200_v3, %v5199_v4  ;;  %v3782_v48 = vmax.f32 %v2404_v17, 0.0  ;;  %v3183_v24 = vadd.f32 %v10022_v14, %v9874_v60 }
 0x1ba   : > { %v5964_v19 = vmul.f32 0.0625, %v5212_v58  ;;  %v4338_v28 = vrot.slane %v4337_v44, 1  ;;  %v4358_v18 = vsel %vm4114_vm3, %v3784_v54, 0.0  ;;  %v3785_v46 = vmax.f32 %v2415_v25, 0.0 }
 0x1bb   : > { %v7940_v31 = vpack.c.bf16 %v5868_v51, %v5868_v51  ;;  %v5202_v41 = vrot.slane %v5201_v11, 1  ;;  %v5222_v47 = vsel %vm4114_vm3, %v3976_v52, 0.0  ;;  %v3974_v56 = vmax.f32 %v3172_v37, 0.0  ;;  %v10147_v37 = vpop.f32.mrf.mxu0 }
 0x1bc   : > { %v3977_v27 = vmax.f32 %v3183_v24, 0.0  ;;  %v8036_v9 = vpack.c.bf16 %v5964_v19, %v5964_v19  ;;  %v4339_v15 = vadd.f32 %v4338_v28, %v4337_v44  ;;  %v4349_v4 = vsel %vm4114_vm3, %v3782_v48, 0.0  ;;  %v10149_v24 = vpop.f32.mrf.mxu1 }
 0x1bd   : > { %v4359_v62 = vsel %vm4114_vm3, %v3785_v46, 0.0  ;;  %v6828_v60 = vunpack.c.l.b16 %v7940_v31  ;;  %v5203_v13 = vadd.f32 %v5202_v41, %v5201_v11  ;;  %v2407_v52 = vadd.f32 %v10022_v14, %v9893_v39 }
 0x1be   : > { %v4360_v22 = vadd.f32 %v4359_v62, %v4358_v18  ;;  %v5223_v54 = vsel %vm4114_vm3, %v3977_v27, 0.0  ;;  %v5867_v61 = vmul.f32 0.0625, %v4339_v15  ;;  %v3175_v58 = vadd.f32 %v10022_v14, %v9895_v55  ;;  %v10154_v62 = vpop.f32.mrf.mxu0 }
 0x1bf   : > { %v5224_v36 = vadd.f32 %v5223_v54, %v5222_v47  ;;  %v5963_v3 = vmul.f32 0.0625, %v5203_v13  ;;  %v2428_v51 = vadd.f32 %v10022_v14, %v9906_v49  ;;  %v3196_v44 = vadd.f32 %v10022_v14, %v9908_v8 }
 0x1c0   : > { %v4361_v17 = vrot.slane %v4360_v22, 4  ;;  %v7939_v25 = vpack.c.bf16 %v5867_v61, %v5867_v61  ;;  %v3783_v11 = vmax.f32 %v2407_v52, 0.0  ;;  %v3975_v48 = vmax.f32 %v3175_v58, 0.0  ;;  %v10159_v61 = vpop.f32.mrf.mxu1  ;;  %v8922_v52 = vld [vmem:[%s9042_s29 + $0x5e0] sm:$0xff]  }
 0x1c1   : > { %v5225_v19 = vrot.slane %v5224_v36, 4  ;;  %v8035_v39 = vpack.c.bf16 %v5963_v3, %v5963_v3  ;;  %v5213_v31 = vsel %vm4114_vm3, %v3974_v56, 0.0  ;;  %v3788_v28 = vmax.f32 %v2428_v51, 0.0  ;;  %v8923_v51 = vld [vmem:[%s9042_s29 + $0x2e8] sm:$0xff]   ;;  %8681 = vmatprep.mubr.msk.bf16.mxu1 %vm1577_vm2, %v8922_v52 }
 0x1c2   : > { %v4362_v55 = vadd.f32 %v4361_v17, %v4360_v22  ;;  %v6827_v18 = vunpack.c.l.b16 %v7939_v25  ;;  %v4350_v46 = vsel %vm4114_vm3, %v3783_v11, 0.0  ;;  %v5214_v8 = vsel %vm4114_vm3, %v3975_v48, 0.0 }
 0x1c3   : > { %v5226_v49 = vadd.f32 %v5225_v19, %v5224_v36  ;;  %v6924_v41 = vunpack.c.l.b16 %v8036_v9  ;;  %v4351_v27 = vadd.f32 %v4350_v46, %v4349_v4  ;;  %v5215_v15 = vadd.f32 %v5214_v8, %v5213_v31  ;;  %v8921_v36 = vld [vmem:[%s9042_s29 + $0x2e0] sm:$0xff]   ;;  %v8924_v4 = vld [vmem:[%s9042_s29 + $0x5e8] sm:$0xff]  }
 0x1c4   : > { %v4363_v47 = vrot.slane %v4362_v55, 2  ;;  %v10157_v56 = vsel %vm6995_vm4, %v6828_v60, %v6827_v18  ;;  %v6923_v13 = vunpack.c.l.b16 %v8035_v39  ;;  %v3980_v54 = vmax.f32 %v3196_v44, 0.0  ;;  %8489 = vmatprep.mubr.msk.bf16.mxu0 %vm1577_vm2, %v8921_v36 }
 0x1c5   : > { %v5227_v22 = vrot.slane %v5226_v49, 2  ;;  %v4352_v3 = vrot.slane %v4351_v27, 4  ;;  %v5216_v9 = vrot.slane %v5215_v15, 4  ;;  %v4376_v17 = vsel %vm4114_vm3, %v3788_v28, 0.0 }
 0x1c6   : > { %v4364_v58 = vadd.f32 %v4363_v47, %v4362_v55  ;;  %v2420_v19 = vadd.f32 %v10022_v14, %v9917_v63  ;;  %v3188_v60 = vadd.f32 %v10022_v14, %v9919_v53  ;;  %v2431_v44 = vadd.f32 %v10022_v14, %v9927_v0  ;;  %v10175_v55 = vpop.f32.mrf.mxu0  ;;  %8490 = vmatmul.mubr.msk.bf16.gmra.mxu0 %vm1577_vm2, %v8923_v51  ;;  %v10180_v0 = vpop.f32.mrf.mxu1 }
 0x1c7   : > { %v5228_v25 = vadd.f32 %v5227_v22, %v5226_v49  ;;  %v4353_v48 = vadd.f32 %v4352_v3, %v4351_v27  ;;  %v5217_v39 = vadd.f32 %v5216_v9, %v5215_v15  ;;  %v3199_v31 = vadd.f32 %v10022_v14, %v9929_v32  ;;  %8682 = vmatmul.mubr.msk.bf16.gmra.mxu1 %vm1577_vm2, %v8924_v4  ;;  %v11125_v4 = vld [vmem:[#allocation2_spill] sm:$0xff] }
 0x1c8   : > { %v4365_v11 = vrot.slane %v4364_v58, 1  ;;  %v5240_v53 = vsel %vm4114_vm3, %v3980_v54, 0.0  ;;  %v3786_v28 = vmax.f32 %v2420_v19, 0.0  ;;  %v3789_v18 = vmax.f32 %v2431_v44, 0.0 }
 0x1c9   : > { %v5229_v63 = vrot.slane %v5228_v25, 1  ;;  %v4354_v46 = vrot.slane %v4353_v48, 2  ;;  %v5218_v8 = vrot.slane %v5217_v39, 2  ;;  %v3981_v47 = vmax.f32 %v3199_v31, 0.0 }
 0x1ca   : > { %v4366_v49 = vadd.f32 %v4365_v11, %v4364_v58  ;;  %v10184_v32 = vsel %vm6995_vm4, %v6924_v41, %v6923_v13  ;;  %v3978_v15 = vmax.f32 %v3188_v60, 0.0  ;;  %v4377_v22 = vsel %vm4114_vm3, %v3789_v18, 0.0  ;;  %v10193_v60 = vpop.f32.mrf.mxu0  ;;  %v10195_v11 = vpop.f32.mrf.mxu1 }
 0x1cb   : > { %v5230_v27 = vadd.f32 %v5229_v63, %v5228_v25  ;;  %v4355_v52 = vadd.f32 %v4354_v46, %v4353_v48  ;;  %v5219_v54 = vadd.f32 %v5218_v8, %v5217_v39  ;;  %v4378_v3 = vadd.f32 %v4377_v22, %v4376_v17  ;;  %11126 = vst [vmem:[#allocation2_spill] sm:$0xff] %v10195_v11 }
 0x1cc   : > { %v5870_v36 = vmul.f32 0.0625, %v4366_v49  ;;  %v5241_v51 = vsel %vm4114_vm3, %v3981_v47, 0.0  ;;  %v2423_v58 = vadd.f32 %v10022_v14, %v9949_v7  ;;  %v3191_v19 = vadd.f32 %v10022_v14, %v11125_v4 }
 0x1cd   : > { %v5966_v9 = vmul.f32 0.0625, %v5230_v27  ;;  %v4356_v44 = vrot.slane %v4355_v52, 1  ;;  %v5220_v41 = vrot.slane %v5219_v54, 1  ;;  %v4367_v13 = vsel %vm4114_vm3, %v3786_v28, 0.0 }
 0x1ce   : > { %v4379_v25 = vrot.slane %v4378_v3, 4  ;;  %v5231_v17 = vsel %vm4114_vm3, %v3978_v15, 0.0  ;;  %v5242_v48 = vadd.f32 %v5241_v51, %v5240_v53  ;;  %v3787_v39 = vmax.f32 %v2423_v58, 0.0  ;;  %v10200_v15 = vpop.f32.mrf.mxu0  ;;  %v10202_v53 = vpop.f32.mrf.mxu1 }
 0x1cf   : > { %v3979_v31 = vmax.f32 %v3191_v19, 0.0  ;;  %v7942_v63 = vpack.c.bf16 %v5870_v36, %v5870_v36  ;;  %v4357_v18 = vadd.f32 %v4356_v44, %v4355_v52  ;;  %v5221_v7 = vadd.f32 %v5220_v41, %v5219_v54  ;;  %v8925_v44 = vld [vmem:[%s9042_s29 + $0x2f0] sm:$0xff]  }
 0x1d0   : > { %v4380_v49 = vadd.f32 %v4379_v25, %v4378_v3  ;;  %v8038_v46 = vpack.c.bf16 %v5966_v9, %v5966_v9  ;;  %v5243_v8 = vrot.slane %v5242_v48, 4  ;;  %v4368_v47 = vsel %vm4114_vm3, %v3787_v39, 0.0  ;;  %v8926_v41 = vld [vmem:[%s9042_s29 + $0x5f0] sm:$0xff]   ;;  %8493 = vmatprep.mubr.msk.bf16.mxu0 %vm1577_vm2, %v8925_v44 }
 0x1d1   : > { %v5232_v28 = vsel %vm4114_vm3, %v3979_v31, 0.0  ;;  %v5869_v27 = vmul.f32 0.0625, %v4357_v18  ;;  %v5965_v22 = vmul.f32 0.0625, %v5221_v7  ;;  %v4369_v11 = vadd.f32 %v4368_v47, %v4367_v13  ;;  %8685 = vmatprep.mubr.msk.bf16.mxu1 %vm1577_vm2, %v8926_v41 }
 0x1d2   : > { %v4381_v4 = vrot.slane %v4380_v49, 2  ;;  %v5244_v36 = vadd.f32 %v5243_v8, %v5242_v48  ;;  %v5233_v52 = vadd.f32 %v5232_v28, %v5231_v17  ;;  %v2444_v54 = vadd.f32 %v10022_v14, %v9965_v59  ;;  %v10210_v59 = vpop.f32.mrf.mxu0  ;;  %v10212_v8 = vpop.f32.mrf.mxu1 }
 0x1d3   : > { %v3212_v3 = vadd.f32 %v10022_v14, %v9967_v33  ;;  %v7941_v9 = vpack.c.bf16 %v5869_v27, %v5869_v27  ;;  %v8037_v51 = vpack.c.bf16 %v5965_v22, %v5965_v22  ;;  %v4370_v19 = vrot.slane %v4369_v11, 4 }
 0x1d4   : > { %v4382_v58 = vadd.f32 %v4381_v4, %v4380_v49  ;;  %v5245_v25 = vrot.slane %v5244_v36, 2  ;;  %v5234_v13 = vrot.slane %v5233_v52, 4  ;;  %v3792_v39 = vmax.f32 %v2444_v54, 0.0 }
 0x1d5   : > { %v3984_v31 = vmax.f32 %v3212_v3, 0.0  ;;  %v6829_v18 = vunpack.c.l.b16 %v7941_v9  ;;  %v6925_v48 = vunpack.c.l.b16 %v8037_v51  ;;  %v4371_v7 = vadd.f32 %v4370_v19, %v4369_v11  ;;  %v8927_v3 = vld [vmem:[%s9042_s29 + $0x2f8] sm:$0xff]  }
 0x1d6   : > { %v4383_v17 = vrot.slane %v4382_v58, 1  ;;  %v6830_v33 = vunpack.c.l.b16 %v7942_v63  ;;  %v6926_v49 = vunpack.c.l.b16 %v8038_v46  ;;  %v5246_v47 = vadd.f32 %v5245_v25, %v5244_v36  ;;  %v8928_v11 = vld [vmem:[%s9042_s29 + $0x5f8] sm:$0xff]   ;;  %v11127_v36 = vld [vmem:[#allocation3_spill] sm:$0xff]  ;;  %v10228_v25 = vpop.f32.mrf.mxu0  ;;  %8494 = vmatmul.mubr.msk.bf16.gmra.mxu0 %vm1577_vm2, %v8927_v3 }
 0x1d7   : > { %v5235_v28 = vadd.f32 %v5234_v13, %v5233_v52  ;;  %v4372_v22 = vrot.slane %v4371_v7, 2  ;;  %v4394_v4 = vsel %vm4114_vm3, %v3792_v39, 0.0  ;;  %v5258_v54 = vsel %vm4114_vm3, %v3984_v31, 0.0  ;;  %v10230_v13 = vpop.f32.mrf.mxu1  ;;  %8686 = vmatmul.mubr.msk.bf16.gmra.mxu1 %vm1577_vm2, %v8928_v11 }
 0x1d8   : > { %v4384_v27 = vadd.f32 %v4383_v17, %v4382_v58  ;;  %v7024_v9 = vsel %vm6997_vm5, %v6829_v18, %v10157_v56  ;;  %v7108_v51 = vsel %vm6997_vm5, %v6925_v48, %v10184_v32  ;;  %v5247_v19 = vrot.slane %v5246_v47, 1  ;;  %v11128_v58 = vld [vmem:[#allocation4_spill] sm:$0xff]  ;;  %11129 = vst [vmem:[#allocation3_spill] sm:$0xff] %v10230_v13 }
 0x1d9   : > { %v5236_v44 = vrot.slane %v5235_v28, 2  ;;  %v4373_v46 = vadd.f32 %v4372_v22, %v4371_v7  ;;  %v2436_v52 = vadd.f32 %v10022_v14, %v11127_v36  ;;  %v3204_v41 = vadd.f32 %v10022_v14, %v11128_v58 }
 0x1da   : > { %v5872_v63 = vmul.f32 0.0625, %v4384_v27  ;;  %v5248_v56 = vadd.f32 %v5247_v19, %v5246_v47  ;;  %v2447_v39 = vadd.f32 %v10022_v14, %v9983_v35  ;;  %v3215_v31 = vadd.f32 %v10022_v14, %v9985_v10 }
 0x1db   : > { %v5237_v32 = vadd.f32 %v5236_v44, %v5235_v28  ;;  %v4374_v48 = vrot.slane %v4373_v46, 1  ;;  %v7025_v17 = vsel %vm6999_vm6, %v6830_v33, %v7024_v9  ;;  %v3790_v7 = vmax.f32 %v2436_v52, 0.0 }
 0x1dc   : > { %v7944_v18 = vpack.c.bf16 %v5872_v63, %v5872_v63  ;;  %v3982_v22 = vmax.f32 %v3204_v41, 0.0  ;;  %v3793_v36 = vmax.f32 %v2447_v39, 0.0  ;;  %v3985_v58 = vmax.f32 %v3215_v31, 0.0 }
 0x1dd   : > { %v5238_v27 = vrot.slane %v5237_v32, 1  ;;  %v5968_v13 = vmul.f32 0.0625, %v5248_v56  ;;  %v4375_v11 = vadd.f32 %v4374_v48, %v4373_v46  ;;  %v7109_v47 = vsel %vm6999_vm6, %v6926_v49, %v7108_v51 }
 0x1de   : > { %v6832_v3 = vunpack.c.l.b16 %v7944_v18  ;;  %v4385_v35 = vsel %vm4114_vm3, %v3790_v7, 0.0  ;;  %v4395_v19 = vsel %vm4114_vm3, %v3793_v36, 0.0  ;;  %v5259_v10 = vsel %vm4114_vm3, %v3985_v58, 0.0 }
 0x1df   : > { %v5239_v28 = vadd.f32 %v5238_v27, %v5237_v32  ;;  %v5871_v44 = vmul.f32 0.0625, %v4375_v11  ;;  %v4396_v63 = vadd.f32 %v4395_v19, %v4394_v4  ;;  %v5260_v33 = vadd.f32 %v5259_v10, %v5258_v54 }
 0x1e0   : > { %v2439_v9 = vadd.f32 %v10022_v14, %v10003_v43  ;;  %v5249_v41 = vsel %vm4114_vm3, %v3982_v22, 0.0  ;;  %v3207_v46 = vadd.f32 %v10022_v14, %v10005_v5  ;;  %v2460_v49 = vadd.f32 %v10022_v14, %v10015_v42 }
 0x1e1   : > { %v5967_v52 = vmul.f32 0.0625, %v5239_v28  ;;  %v7943_v51 = vpack.c.bf16 %v5871_v44, %v5871_v44  ;;  %v4397_v56 = vrot.slane %v4396_v63, 4  ;;  %v5261_v32 = vrot.slane %v5260_v33, 4 }
 0x1e2   : > { %v3791_v39 = vmax.f32 %v2439_v9, 0.0  ;;  %v8040_v31 = vpack.c.bf16 %v5968_v13, %v5968_v13  ;;  %v3983_v4 = vmax.f32 %v3207_v46, 0.0  ;;  %v3796_v54 = vmax.f32 %v2460_v49, 0.0 }
 0x1e3   : > { %v8039_v18 = vpack.c.bf16 %v5967_v52, %v5967_v52  ;;  %v6831_v48 = vunpack.c.l.b16 %v7943_v51  ;;  %v4398_v7 = vadd.f32 %v4397_v56, %v4396_v63  ;;  %v5262_v43 = vadd.f32 %v5261_v32, %v5260_v33 }
 0x1e4   : > { %v4386_v27 = vsel %vm4114_vm3, %v3791_v39, 0.0  ;;  %v5250_v5 = vsel %vm4114_vm3, %v3983_v4, 0.0  ;;  %v3228_v42 = vadd.f32 %v10022_v14, %v10026_v1  ;;  %v6928_v19 = vunpack.c.l.b16 %v8040_v31 }
 0x1e5   : > { %v6927_v22 = vunpack.c.l.b16 %v8039_v18  ;;  %v4387_v36 = vadd.f32 %v4386_v27, %v4385_v35  ;;  %v7026_v58 = vsel %vm7001_vm7, %v6831_v48, %v7025_v17  ;;  %v4399_v11 = vrot.slane %v4398_v7, 2 }
 0x1e6   : > { %v5263_v28 = vrot.slane %v5262_v43, 2  ;;  %v5251_v13 = vadd.f32 %v5250_v5, %v5249_v41  ;;  %v4412_v63 = vsel %vm4114_vm3, %v3796_v54, 0.0  ;;  %v10258_v35 = vsel %vm7003_vm8, %v6832_v3, %v7026_v58 }
 0x1e7   : > { %v7110_v10 = vsel %vm7001_vm7, %v6927_v22, %v7109_v47  ;;  %v4388_v44 = vrot.slane %v4387_v36, 4  ;;  %v4400_v33 = vadd.f32 %v4399_v11, %v4398_v7  ;;  %v3988_v49 = vmax.f32 %v3228_v42, 0.0 }
 0x1e8   : > { %v5264_v9 = vadd.f32 %v5263_v28, %v5262_v43  ;;  %v5252_v52 = vrot.slane %v5251_v13, 4  ;;  %v2452_v1 = vadd.f32 %v10022_v14, %v10034_v26  ;;  %v3220_v17 = vadd.f32 %v10022_v14, %v10037_v12 }
 0x1e9   : > { %v4389_v46 = vadd.f32 %v4388_v44, %v4387_v36  ;;  %v4401_v41 = vrot.slane %v4400_v33, 1  ;;  %v2463_v56 = vadd.f32 %v10022_v14, %v10040_v6  ;;  %v3231_v3 = vadd.f32 %v10022_v14, %v10047_v2 }
 0x1ea   : > { %v5265_v51 = vrot.slane %v5264_v9, 1  ;;  %v5253_v47 = vadd.f32 %v5252_v52, %v5251_v13  ;;  %v3794_v39 = vmax.f32 %v2452_v1, 0.0  ;;  %v3986_v31 = vmax.f32 %v3220_v17, 0.0 }
 0x1eb   : > { %v4390_v32 = vrot.slane %v4389_v46, 2  ;;  %v4402_v18 = vadd.f32 %v4401_v41, %v4400_v33  ;;  %v3797_v48 = vmax.f32 %v2463_v56, 0.0  ;;  %v7111_v7 = vsel %vm7003_vm8, %v6928_v19, %v7110_v10 }
 0x1ec   : > { %v5266_v4 = vadd.f32 %v5265_v51, %v5264_v9  ;;  %v5254_v54 = vrot.slane %v5253_v47, 2  ;;  %v5276_v12 = vsel %vm4114_vm3, %v3988_v49, 0.0  ;;  %v3989_v43 = vmax.f32 %v3231_v3, 0.0 }
 0x1ed   : > { %v4391_v26 = vadd.f32 %v4390_v32, %v4389_v46  ;;  %v5874_v27 = vmul.f32 0.0625, %v4402_v18  ;;  %v4413_v6 = vsel %vm4114_vm3, %v3797_v48, 0.0  ;;  %v2455_v2 = vadd.f32 %v10022_v14, %v10059_v38 }
 0x1ee   : > { %v5970_v22 = vmul.f32 0.0625, %v5266_v4  ;;  %v5255_v36 = vadd.f32 %v5254_v54, %v5253_v47  ;;  %v4414_v42 = vadd.f32 %v4413_v6, %v4412_v63  ;;  %v5277_v58 = vsel %vm4114_vm3, %v3989_v43, 0.0 }
 0x1ef   : > { %v4392_v5 = vrot.slane %v4391_v26, 1  ;;  %v4403_v28 = vsel %vm4114_vm3, %v3794_v39, 0.0  ;;  %v5267_v13 = vsel %vm4114_vm3, %v3986_v31, 0.0  ;;  %v5278_v19 = vadd.f32 %v5277_v58, %v5276_v12 }
 0x1f0   : > { %v5256_v11 = vrot.slane %v5255_v36, 1  ;;  %v4415_v44 = vrot.slane %v4414_v42, 4  ;;  %v3795_v33 = vmax.f32 %v2455_v2, 0.0  ;;  %v3223_v9 = vadd.f32 %v10022_v14, %v10065_v30 }
 0x1f1   : > { %v4393_v10 = vadd.f32 %v4392_v5, %v4391_v26  ;;  %v7946_v52 = vpack.c.bf16 %v5874_v27, %v5874_v27  ;;  %v8042_v46 = vpack.c.bf16 %v5970_v22, %v5970_v22  ;;  %v5279_v49 = vrot.slane %v5278_v19, 4 }
 0x1f2   : > { %v5257_v63 = vadd.f32 %v5256_v11, %v5255_v36  ;;  %v4416_v17 = vadd.f32 %v4415_v44, %v4414_v42  ;;  %v4404_v38 = vsel %vm4114_vm3, %v3795_v33, 0.0  ;;  %v3987_v41 = vmax.f32 %v3223_v9, 0.0 }
 0x1f3   : > { %v5873_v1 = vmul.f32 0.0625, %v4393_v10  ;;  %v5280_v47 = vadd.f32 %v5279_v49, %v5278_v19  ;;  %v4405_v56 = vadd.f32 %v4404_v38, %v4403_v28  ;;  %v2476_v32 = vadd.f32 %v10022_v14, %v10076_v23 }
 0x1f4   : > { %v5969_v51 = vmul.f32 0.0625, %v5257_v63  ;;  %v4417_v31 = vrot.slane %v4416_v17, 2  ;;  %v5268_v3 = vsel %vm4114_vm3, %v3987_v41, 0.0  ;;  %v3244_v30 = vadd.f32 %v10022_v14, %v10078_v20 }
 0x1f5   : > { %v7945_v39 = vpack.c.bf16 %v5873_v1, %v5873_v1  ;;  %v5281_v4 = vrot.slane %v5280_v47, 2  ;;  %v4406_v54 = vrot.slane %v4405_v56, 4  ;;  %v5269_v48 = vadd.f32 %v5268_v3, %v5267_v13 }
 0x1f6   : > { %v8041_v18 = vpack.c.bf16 %v5969_v51, %v5969_v51  ;;  %v6834_v26 = vunpack.c.l.b16 %v7946_v52  ;;  %v6930_v12 = vunpack.c.l.b16 %v8042_v46  ;;  %v4418_v27 = vadd.f32 %v4417_v31, %v4416_v17 }
 0x1f7   : > { %v6833_v43 = vunpack.c.l.b16 %v7945_v39  ;;  %v5282_v36 = vadd.f32 %v5281_v4, %v5280_v47  ;;  %v4407_v6 = vadd.f32 %v4406_v54, %v4405_v56  ;;  %v5270_v5 = vrot.slane %v5269_v48, 4 }
 0x1f8   : > { %v6929_v22 = vunpack.c.l.b16 %v8041_v18  ;;  %v4419_v42 = vrot.slane %v4418_v27, 1  ;;  %v3800_v58 = vmax.f32 %v2476_v32, 0.0  ;;  %v3992_v2 = vmax.f32 %v3244_v30, 0.0 }
 0x1f9   : > { %v7028_v23 = vsel %vm7005_vm9, %v6833_v43, %v10258_v35  ;;  %v5283_v28 = vrot.slane %v5282_v36, 1  ;;  %v4408_v13 = vrot.slane %v4407_v6, 2  ;;  %v5271_v33 = vadd.f32 %v5270_v5, %v5269_v48 }
 0x1fa   : > { %v7029_v20 = vsel %vm7007_vm10, %v6834_v26, %v7028_v23  ;;  %v7112_v11 = vsel %vm7005_vm9, %v6929_v22, %v7111_v7  ;;  %v4420_v44 = vadd.f32 %v4419_v42, %v4418_v27  ;;  %v2468_v35 = vadd.f32 %v10022_v14, %v10091_v40 }
 0x1fb   : > { %v7173_v19 = vpack.c.b16 %v7029_v20, %v7029_v20  ;;  %v7113_v10 = vsel %vm7007_vm10, %v6930_v12, %v7112_v11  ;;  %v5284_v52 = vadd.f32 %v5283_v28, %v5282_v36  ;;  %v4409_v46 = vadd.f32 %v4408_v13, %v4407_v6 }
 0x1fc   : > { %v7185_v9 = vpack.c.b16 %v7113_v10, %v7113_v10  ;;  %v5876_v63 = vmul.f32 0.0625, %v4420_v44  ;;  %v5272_v49 = vrot.slane %v5271_v33, 2  ;;  %v3236_v7 = vadd.f32 %v10022_v14, %v10093_v21 }
 0x1fd   : > { %7222 = vst.msk [vmem:[%s9614_s12 + $0xc] sm:$0xf] %vm7218_vm11, %v7173_v19  ;;  %v2479_v1 = vadd.f32 %v10022_v14, %v10097_v34  ;;  %v5972_v17 = vmul.f32 0.0625, %v5284_v52  ;;  %v4410_v38 = vrot.slane %v4409_v46, 1  ;;  %v3798_v41 = vmax.f32 %v2468_v35, 0.0 }
 0x1fe   : > { %7234 = vst.msk [vmem:[%s9614_s12 + $0x3c] sm:$0xf] %vm7218_vm11, %v7185_v9  ;;  %v3247_v51 = vadd.f32 %v10022_v14, %v10099_v50  ;;  %v7948_v47 = vpack.c.bf16 %v5876_v63, %v5876_v63  ;;  %v5273_v40 = vadd.f32 %v5272_v49, %v5271_v33  ;;  %v4430_v56 = vsel %vm4114_vm3, %v3800_v58, 0.0 }
 0x1ff   : > { %v3801_v32 = vmax.f32 %v2479_v1, 0.0  ;;  %v4411_v39 = vadd.f32 %v4410_v38, %v4409_v46  ;;  %v5294_v31 = vsel %vm4114_vm3, %v3992_v2, 0.0  ;;  %v3990_v21 = vmax.f32 %v3236_v7, 0.0 }
 0x200   : > { %v3993_v3 = vmax.f32 %v3247_v51, 0.0  ;;  %v8044_v30 = vpack.c.bf16 %v5972_v17, %v5972_v17  ;;  %v5274_v34 = vrot.slane %v5273_v40, 1  ;;  %v4421_v18 = vsel %vm4114_vm3, %v3798_v41, 0.0 }
 0x201   : > { %v4431_v4 = vsel %vm4114_vm3, %v3801_v32, 0.0  ;;  %v6836_v54 = vunpack.c.l.b16 %v7948_v47  ;;  %v5875_v48 = vmul.f32 0.0625, %v4411_v39  ;;  %v2471_v27 = vadd.f32 %v10022_v14, %v10114_v16 }
 0x202   : > { %v4432_v26 = vadd.f32 %v4431_v4, %v4430_v56  ;;  %v5295_v50 = vsel %vm4114_vm3, %v3993_v3, 0.0  ;;  %v5275_v12 = vadd.f32 %v5274_v34, %v5273_v40  ;;  %v3239_v22 = vadd.f32 %v10022_v14, %v10116_v45 }
 0x203   : > { %v5296_v43 = vadd.f32 %v5295_v50, %v5294_v31  ;;  %v7947_v36 = vpack.c.bf16 %v5875_v48, %v5875_v48  ;;  %v2492_v5 = vadd.f32 %v10022_v14, %v10132_v57  ;;  %v3260_v23 = vadd.f32 %v10022_v14, %v10136_v29 }
 0x204   : > { %v4433_v6 = vrot.slane %v4432_v26, 4  ;;  %v5971_v42 = vmul.f32 0.0625, %v5275_v12  ;;  %v3799_v2 = vmax.f32 %v2471_v27, 0.0  ;;  %v3991_v20 = vmax.f32 %v3239_v22, 0.0 }
 0x205   : > { %v5297_v58 = vrot.slane %v5296_v43, 4  ;;  %v6835_v11 = vunpack.c.l.b16 %v7947_v36  ;;  %v5285_v28 = vsel %vm4114_vm3, %v3990_v21, 0.0  ;;  %v3804_v16 = vmax.f32 %v2492_v5, 0.0 }
 0x206   : > { %v4434_v13 = vadd.f32 %v4433_v6, %v4432_v26  ;;  %v8043_v19 = vpack.c.bf16 %v5971_v42, %v5971_v42  ;;  %v4422_v45 = vsel %vm4114_vm3, %v3799_v2, 0.0  ;;  %v5286_v44 = vsel %vm4114_vm3, %v3991_v20, 0.0 }
 0x207   : > { %v5298_v10 = vadd.f32 %v5297_v58, %v5296_v43  ;;  %v4423_v57 = vadd.f32 %v4422_v45, %v4421_v18  ;;  %v5287_v9 = vadd.f32 %v5286_v44, %v5285_v28  ;;  %v3996_v52 = vmax.f32 %v3260_v23, 0.0 }
 0x208   : > { %v4435_v33 = vrot.slane %v4434_v13, 2  ;;  %v6932_v29 = vunpack.c.l.b16 %v8044_v30  ;;  %v10318_v46 = vsel %vm6995_vm4, %v6836_v54, %v6835_v11  ;;  %v6931_v35 = vunpack.c.l.b16 %v8043_v19 }
 0x209   : > { %v5299_v63 = vrot.slane %v5298_v10, 2  ;;  %v4424_v7 = vrot.slane %v4423_v57, 4  ;;  %v5288_v1 = vrot.slane %v5287_v9, 4  ;;  %v2484_v17 = vadd.f32 %v10022_v14, %v10147_v37  ;;  %v10334_v37 = vld [vmem:[%s11113_s2] ss:$0 sm:$0xff] }
 0x20a   : > { %v4436_v49 = vadd.f32 %v4435_v33, %v4434_v13  ;;  %v4448_v41 = vsel %vm4114_vm3, %v3804_v16, 0.0  ;;  %v3252_v51 = vadd.f32 %v10022_v14, %v10149_v24  ;;  %v2495_v47 = vadd.f32 %v10022_v14, %v10154_v62 }
 0x20b   : > { %v5300_v38 = vadd.f32 %v5299_v63, %v5298_v10  ;;  %v4425_v56 = vadd.f32 %v4424_v7, %v4423_v57  ;;  %v5289_v32 = vadd.f32 %v5288_v1, %v5287_v9  ;;  %v5312_v39 = vsel %vm4114_vm3, %v3996_v52, 0.0  ;;  %v11130_v63 = vld [vmem:[#allocation2_spill] sm:$0xff] }
 0x20c   : > { %v4437_v40 = vrot.slane %v4436_v49, 1  ;;  %v10329_v31 = vsel %vm6995_vm4, %v6932_v29, %v6931_v35  ;;  %v3805_v3 = vmax.f32 %v2495_v47, 0.0  ;;  %v3263_v24 = vadd.f32 %v10334_v37, %v10159_v61 }
 0x20d   : > { %v5301_v21 = vrot.slane %v5300_v38, 1  ;;  %v4426_v14 = vrot.slane %v4425_v56, 2  ;;  %v5290_v62 = vrot.slane %v5289_v32, 2  ;;  %v3802_v34 = vmax.f32 %v2484_v17, 0.0 }
 0x20e   : > { %v4438_v30 = vadd.f32 %v4437_v40, %v4436_v49  ;;  %v3994_v4 = vmax.f32 %v3252_v51, 0.0  ;;  %v4449_v54 = vsel %vm4114_vm3, %v3805_v3, 0.0  ;;  %v3997_v48 = vmax.f32 %v3263_v24, 0.0 }
 0x20f   : > { %v5302_v18 = vadd.f32 %v5301_v21, %v5300_v38  ;;  %v4427_v50 = vadd.f32 %v4426_v14, %v4425_v56  ;;  %v5291_v12 = vadd.f32 %v5290_v62, %v5289_v32  ;;  %v4450_v43 = vadd.f32 %v4449_v54, %v4448_v41 }
 0x210   : > { %v5878_v26 = vmul.f32 0.0625, %v4438_v30  ;;  %v5313_v22 = vsel %vm4114_vm3, %v3997_v48, 0.0  ;;  %v2487_v36 = vadd.f32 %v10334_v37, %v10175_v55  ;;  %v3255_v61 = vadd.f32 %v10334_v37, %v10180_v0 }
 0x211   : > { %v5974_v27 = vmul.f32 0.0625, %v5302_v18  ;;  %v4428_v6 = vrot.slane %v4427_v50, 1  ;;  %v5292_v5 = vrot.slane %v5291_v12, 1  ;;  %v4439_v23 = vsel %vm4114_vm3, %v3802_v34, 0.0 }
 0x212   : > { %v4451_v42 = vrot.slane %v4450_v43, 4  ;;  %v5303_v58 = vsel %vm4114_vm3, %v3994_v4, 0.0  ;;  %v5314_v2 = vadd.f32 %v5313_v22, %v5312_v39  ;;  %v3803_v20 = vmax.f32 %v2487_v36, 0.0 }
 0x213   : > { %v3995_v11 = vmax.f32 %v3255_v61, 0.0  ;;  %v7950_v28 = vpack.c.bf16 %v5878_v26, %v5878_v26  ;;  %v4429_v13 = vadd.f32 %v4428_v6, %v4427_v50  ;;  %v5293_v16 = vadd.f32 %v5292_v5, %v5291_v12 }
 0x214   : > { %v4452_v19 = vadd.f32 %v4451_v42, %v4450_v43  ;;  %v8046_v10 = vpack.c.bf16 %v5974_v27, %v5974_v27  ;;  %v5315_v45 = vrot.slane %v5314_v2, 4  ;;  %v4440_v55 = vsel %vm4114_vm3, %v3803_v20, 0.0 }
 0x215   : > { %v5304_v0 = vsel %vm4114_vm3, %v3995_v11, 0.0  ;;  %v5877_v44 = vmul.f32 0.0625, %v4429_v13  ;;  %v5973_v33 = vmul.f32 0.0625, %v5293_v16  ;;  %v4441_v9 = vadd.f32 %v4440_v55, %v4439_v23  ;;  %v8387_v13 = vpop.f32.mrf.mxu0 }
 0x216   : > { %v4453_v57 = vrot.slane %v4452_v19, 2  ;;  %v5316_v52 = vadd.f32 %v5315_v45, %v5314_v2  ;;  %v5305_v29 = vadd.f32 %v5304_v0, %v5303_v58  ;;  %v2508_v35 = vadd.f32 %v10334_v37, %v10193_v60 }
 0x217   : > { %v3276_v49 = vadd.f32 %v10334_v37, %v11130_v63  ;;  %v7949_v7 = vpack.c.bf16 %v5877_v44, %v5877_v44  ;;  %v8045_v1 = vpack.c.bf16 %v5973_v33, %v5973_v33  ;;  %v4442_v38 = vrot.slane %v4441_v9, 4  ;;  %v8579_v44 = vpop.f32.mrf.mxu1 }
 0x218   : > { %v4454_v17 = vadd.f32 %v4453_v57, %v4452_v19  ;;  %v5317_v41 = vrot.slane %v5316_v52, 2  ;;  %v5306_v51 = vrot.slane %v5305_v29, 4  ;;  %v3808_v47 = vmax.f32 %v2508_v35, 0.0 }
 0x219   : > { %v4000_v40 = vmax.f32 %v3276_v49, 0.0  ;;  %v6837_v56 = vunpack.c.l.b16 %v7949_v7  ;;  %v6933_v32 = vunpack.c.l.b16 %v8045_v1  ;;  %v4443_v21 = vadd.f32 %v4442_v38, %v4441_v9  ;;  %v11131_v9 = vld [vmem:[#allocation3_spill] sm:$0xff] }
 0x21a   : > { %v4455_v39 = vrot.slane %v4454_v17, 1  ;;  %v6838_v3 = vunpack.c.l.b16 %v7950_v28  ;;  %v6934_v24 = vunpack.c.l.b16 %v8046_v10  ;;  %v5318_v30 = vadd.f32 %v5317_v41, %v5316_v52 }
 0x21b   : > { %v5307_v14 = vadd.f32 %v5306_v51, %v5305_v29  ;;  %v4444_v62 = vrot.slane %v4443_v21, 2  ;;  %v4466_v34 = vsel %vm4114_vm3, %v3808_v47, 0.0  ;;  %v5330_v18 = vsel %vm4114_vm3, %v4000_v40, 0.0  ;;  %v2515_v51 = vpop.f32.mrf.mxu0 }
 0x21c   : > { %v4456_v60 = vadd.f32 %v4455_v39, %v4454_v17  ;;  %v7031_v4 = vsel %vm6997_vm5, %v6837_v56, %v10318_v46  ;;  %v7115_v54 = vsel %vm6997_vm5, %v6933_v32, %v10329_v31  ;;  %v5319_v48 = vrot.slane %v5318_v30, 1  ;;  %v3283_v32 = vpop.f32.mrf.mxu1 }
 0x21d   : > { %v5308_v26 = vrot.slane %v5307_v14, 2  ;;  %v4445_v12 = vadd.f32 %v4444_v62, %v4443_v21  ;;  %v2500_v43 = vadd.f32 %v10334_v37, %v10200_v15  ;;  %v3268_v27 = vadd.f32 %v10334_v37, %v10202_v53 }
 0x21e   : > { %v5880_v50 = vmul.f32 0.0625, %v4456_v60  ;;  %v5320_v22 = vadd.f32 %v5319_v48, %v5318_v30  ;;  %v2511_v61 = vadd.f32 %v10334_v37, %v10210_v59  ;;  %v3279_v46 = vadd.f32 %v10334_v37, %v10212_v8  ;;  %v8388_v48 = vpop.f32.mrf.mxu0 }
 0x21f   : > { %v5309_v36 = vadd.f32 %v5308_v26, %v5307_v14  ;;  %v4446_v31 = vrot.slane %v4445_v12, 1  ;;  %v7032_v5 = vsel %vm6999_vm6, %v6838_v3, %v7031_v4  ;;  %v3806_v23 = vmax.f32 %v2500_v43, 0.0 }
 0x220   : > { %v7952_v6 = vpack.c.bf16 %v5880_v50, %v5880_v50  ;;  %v3998_v58 = vmax.f32 %v3268_v27, 0.0  ;;  %v3809_v2 = vmax.f32 %v2511_v61, 0.0  ;;  %v4001_v15 = vmax.f32 %v3279_v46, 0.0  ;;  %v8580_v27 = vpop.f32.mrf.mxu1 }
 0x221   : > { %v5310_v42 = vrot.slane %v5309_v36, 1  ;;  %v5976_v11 = vmul.f32 0.0625, %v5320_v22  ;;  %v4447_v53 = vadd.f32 %v4446_v31, %v4445_v12  ;;  %v7116_v28 = vsel %vm6999_vm6, %v6934_v24, %v7115_v54 }
 0x222   : > { %v6840_v20 = vunpack.c.l.b16 %v7952_v6  ;;  %v4457_v59 = vsel %vm4114_vm3, %v3806_v23, 0.0  ;;  %v4467_v8 = vsel %vm4114_vm3, %v3809_v2, 0.0  ;;  %v5331_v19 = vsel %vm4114_vm3, %v4001_v15, 0.0 }
 0x223   : > { %v5311_v16 = vadd.f32 %v5310_v42, %v5309_v36  ;;  %v5879_v10 = vmul.f32 0.0625, %v4447_v53  ;;  %v4468_v45 = vadd.f32 %v4467_v8, %v4466_v34  ;;  %v5332_v55 = vadd.f32 %v5331_v19, %v5330_v18 }
 0x224   : > { %v2503_v0 = vadd.f32 %v10334_v37, %v10228_v25  ;;  %v5321_v57 = vsel %vm4114_vm3, %v3998_v58, 0.0  ;;  %v3271_v52 = vadd.f32 %v10334_v37, %v11131_v9  ;;  %v2524_v29 = vadd.f32 %v10334_v37, %v8387_v13  ;;  %v2518_v13 = vpop.f32.mrf.mxu0 }
 0x225   : > { %v5975_v33 = vmul.f32 0.0625, %v5311_v16  ;;  %v7951_v35 = vpack.c.bf16 %v5879_v10, %v5879_v10  ;;  %v4469_v63 = vrot.slane %v4468_v45, 4  ;;  %v5333_v49 = vrot.slane %v5332_v55, 4  ;;  %v3286_v10 = vpop.f32.mrf.mxu1 }
 0x226   : > { %v3807_v7 = vmax.f32 %v2503_v0, 0.0  ;;  %v8048_v1 = vpack.c.bf16 %v5976_v11, %v5976_v11  ;;  %v3999_v38 = vmax.f32 %v3271_v52, 0.0  ;;  %v3812_v41 = vmax.f32 %v2524_v29, 0.0 }
 0x227   : > { %v8047_v17 = vpack.c.bf16 %v5975_v33, %v5975_v33  ;;  %v6839_v47 = vunpack.c.l.b16 %v7951_v35  ;;  %v4470_v25 = vadd.f32 %v4469_v63, %v4468_v45  ;;  %v5334_v40 = vadd.f32 %v5333_v49, %v5332_v55 }
 0x228   : > { %v4458_v56 = vsel %vm4114_vm3, %v3807_v7, 0.0  ;;  %v5322_v3 = vsel %vm4114_vm3, %v3999_v38, 0.0  ;;  %v3292_v24 = vadd.f32 %v10334_v37, %v8579_v44  ;;  %v6936_v34 = vunpack.c.l.b16 %v8048_v1  ;;  %v8391_v7 = vpop.f32.mrf.mxu0 }
 0x229   : > { %v6935_v39 = vunpack.c.l.b16 %v8047_v17  ;;  %v4459_v21 = vadd.f32 %v4458_v56, %v4457_v59  ;;  %v7033_v30 = vsel %vm7001_vm7, %v6839_v47, %v7032_v5  ;;  %v4471_v14 = vrot.slane %v4470_v25, 2 }
 0x22a   : > { %v5335_v60 = vrot.slane %v5334_v40, 2  ;;  %v5323_v62 = vadd.f32 %v5322_v3, %v5321_v57  ;;  %v4484_v54 = vsel %vm4114_vm3, %v3812_v41, 0.0  ;;  %v10384_v12 = vsel %vm7003_vm8, %v6840_v20, %v7033_v30 }
 0x22b   : > { %v7117_v18 = vsel %vm7001_vm7, %v6935_v39, %v7116_v28  ;;  %v4460_v4 = vrot.slane %v4459_v21, 4  ;;  %v4472_v26 = vadd.f32 %v4471_v14, %v4470_v25  ;;  %v4004_v36 = vmax.f32 %v3292_v24, 0.0 }
 0x22c   : > { %v5336_v50 = vadd.f32 %v5335_v60, %v5334_v40  ;;  %v5324_v43 = vrot.slane %v5323_v62, 4  ;;  %v2516_v61 = vadd.f32 %v10334_v37, %v2515_v51  ;;  %v3284_v46 = vadd.f32 %v10334_v37, %v3283_v32  ;;  %v8583_v51 = vpop.f32.mrf.mxu1 }
 0x22d   : > { %v4461_v22 = vadd.f32 %v4460_v4, %v4459_v21  ;;  %v4473_v6 = vrot.slane %v4472_v26, 1  ;;  %v2527_v23 = vadd.f32 %v10334_v37, %v8388_v48  ;;  %v3295_v15 = vadd.f32 %v10334_v37, %v8580_v27 }
 0x22e   : > { %v5337_v31 = vrot.slane %v5336_v50, 1  ;;  %v5325_v5 = vadd.f32 %v5324_v43, %v5323_v62  ;;  %v3810_v58 = vmax.f32 %v2516_v61, 0.0  ;;  %v4002_v2 = vmax.f32 %v3284_v46, 0.0  ;;  %v2531_v62 = vpop.f32.mrf.mxu0  ;;  %v3299_v48 = vpop.f32.mrf.mxu1 }
 0x22f   : > { %v4462_v42 = vrot.slane %v4461_v22, 2  ;;  %v4474_v20 = vadd.f32 %v4473_v6, %v4472_v26  ;;  %v3813_v28 = vmax.f32 %v2527_v23, 0.0  ;;  %v7118_v59 = vsel %vm7003_vm8, %v6936_v34, %v7117_v18 }
 0x230   : > { %v5338_v11 = vadd.f32 %v5337_v31, %v5336_v50  ;;  %v5326_v53 = vrot.slane %v5325_v5, 2  ;;  %v5348_v8 = vsel %vm4114_vm3, %v4004_v36, 0.0  ;;  %v4005_v19 = vmax.f32 %v3295_v15, 0.0 }
 0x231   : > { %v4463_v16 = vadd.f32 %v4462_v42, %v4461_v22  ;;  %v5882_v45 = vmul.f32 0.0625, %v4474_v20  ;;  %v4485_v44 = vsel %vm4114_vm3, %v3813_v28, 0.0  ;;  %v2519_v52 = vadd.f32 %v10334_v37, %v2518_v13  ;;  %v8392_v42 = vpop.f32.mrf.mxu0 }
 0x232   : > { %v5978_v55 = vmul.f32 0.0625, %v5338_v11  ;;  %v5327_v0 = vadd.f32 %v5326_v53, %v5325_v5  ;;  %v4486_v57 = vadd.f32 %v4485_v44, %v4484_v54  ;;  %v5349_v9 = vsel %vm4114_vm3, %v4005_v19, 0.0  ;;  %v8584_v11 = vpop.f32.mrf.mxu1 }
 0x233   : > { %v4464_v33 = vrot.slane %v4463_v16, 1  ;;  %v4475_v35 = vsel %vm4114_vm3, %v3810_v58, 0.0  ;;  %v5339_v63 = vsel %vm4114_vm3, %v4002_v2, 0.0  ;;  %v5350_v49 = vadd.f32 %v5349_v9, %v5348_v8 }
 0x234   : > { %v5328_v29 = vrot.slane %v5327_v0, 1  ;;  %v4487_v17 = vrot.slane %v4486_v57, 4  ;;  %v3811_v38 = vmax.f32 %v2519_v52, 0.0  ;;  %v3287_v41 = vadd.f32 %v10334_v37, %v3286_v10 }
 0x235   : > { %v4465_v1 = vadd.f32 %v4464_v33, %v4463_v16  ;;  %v7954_v47 = vpack.c.bf16 %v5882_v45, %v5882_v45  ;;  %v8050_v25 = vpack.c.bf16 %v5978_v55, %v5978_v55  ;;  %v5351_v56 = vrot.slane %v5350_v49, 4  ;;  %v2534_v33 = vpop.f32.mrf.mxu0 }
 0x236   : > { %v5329_v40 = vadd.f32 %v5328_v29, %v5327_v0  ;;  %v4488_v39 = vadd.f32 %v4487_v17, %v4486_v57  ;;  %v4476_v21 = vsel %vm4114_vm3, %v3811_v38, 0.0  ;;  %v4003_v3 = vmax.f32 %v3287_v41, 0.0  ;;  %v3302_v29 = vpop.f32.mrf.mxu1 }
 0x237   : > { %v5881_v32 = vmul.f32 0.0625, %v4465_v1  ;;  %v5352_v30 = vadd.f32 %v5351_v56, %v5350_v49  ;;  %v4477_v14 = vadd.f32 %v4476_v21, %v4475_v35  ;;  %v2540_v60 = vadd.f32 %v10334_v37, %v8391_v7  ;;  %v8395_v56 = vpop.f32.mrf.mxu0 }
 0x238   : > { %v5977_v24 = vmul.f32 0.0625, %v5329_v40  ;;  %v4489_v18 = vrot.slane %v4488_v39, 2  ;;  %v5340_v4 = vsel %vm4114_vm3, %v4003_v3, 0.0  ;;  %v3308_v54 = vadd.f32 %v10334_v37, %v8583_v51 }
 0x239   : > { %v7953_v34 = vpack.c.bf16 %v5881_v32, %v5881_v32  ;;  %v5353_v50 = vrot.slane %v5352_v30, 2  ;;  %v4478_v43 = vrot.slane %v4477_v14, 4  ;;  %v5341_v27 = vadd.f32 %v5340_v4, %v5339_v63 }
 0x23a   : > { %v8049_v26 = vpack.c.bf16 %v5977_v24, %v5977_v24  ;;  %v6842_v22 = vunpack.c.l.b16 %v7954_v47  ;;  %v6938_v36 = vunpack.c.l.b16 %v8050_v25  ;;  %v4490_v46 = vadd.f32 %v4489_v18, %v4488_v39  ;;  %v8587_v24 = vpop.f32.mrf.mxu1 }
 0x23b   : > { %v6841_v61 = vunpack.c.l.b16 %v7953_v34  ;;  %v5354_v31 = vadd.f32 %v5353_v50, %v5352_v30  ;;  %v4479_v5 = vadd.f32 %v4478_v43, %v4477_v14  ;;  %v5342_v23 = vrot.slane %v5341_v27, 4 }
 0x23c   : > { %v6937_v6 = vunpack.c.l.b16 %v8049_v26  ;;  %v4491_v2 = vrot.slane %v4490_v46, 1  ;;  %v3816_v15 = vmax.f32 %v2540_v60, 0.0  ;;  %v4008_v20 = vmax.f32 %v3308_v54, 0.0 }
 0x23d   : > { %v7035_v58 = vsel %vm7005_vm9, %v6841_v61, %v10384_v12  ;;  %v5355_v13 = vrot.slane %v5354_v31, 1  ;;  %v4480_v16 = vrot.slane %v4479_v5, 2  ;;  %v5343_v45 = vadd.f32 %v5342_v23, %v5341_v27  ;;  %v2547_v27 = vpop.f32.mrf.mxu0 }
 0x23e   : > { %v7036_v53 = vsel %vm7007_vm10, %v6842_v22, %v7035_v58  ;;  %v7119_v28 = vsel %vm7005_vm9, %v6937_v6, %v7118_v59  ;;  %v4492_v10 = vadd.f32 %v4491_v2, %v4490_v46  ;;  %v2532_v44 = vadd.f32 %v10334_v37, %v2531_v62 }
 0x23f   : > { %v7174_v8 = vpack.c.b16 %v7036_v53, %v7036_v53  ;;  %v7120_v19 = vsel %vm7007_vm10, %v6938_v36, %v7119_v28  ;;  %v5356_v0 = vadd.f32 %v5355_v13, %v5354_v31  ;;  %v4481_v12 = vadd.f32 %v4480_v16, %v4479_v5  ;;  %v8396_v16 = vpop.f32.mrf.mxu0 }
 0x240   : > { %v7186_v55 = vpack.c.b16 %v7120_v19, %v7120_v19  ;;  %v5884_v57 = vmul.f32 0.0625, %v4492_v10  ;;  %v5344_v9 = vrot.slane %v5343_v45, 2  ;;  %v3300_v59 = vadd.f32 %v10334_v37, %v3299_v48 }
 0x241   : > { %7223 = vst.msk [vmem:[%s9614_s12 + $0x10] sm:$0xf] %vm7218_vm11, %v7174_v8  ;;  %v2543_v52 = vadd.f32 %v10334_v37, %v8392_v42  ;;  %v5980_v35 = vmul.f32 0.0625, %v5356_v0  ;;  %v4482_v63 = vrot.slane %v4481_v12, 1  ;;  %v3814_v49 = vmax.f32 %v2532_v44, 0.0  ;;  %v3315_v42 = vpop.f32.mrf.mxu1 }
 0x242   : > { %7235 = vst.msk [vmem:[%s9614_s12 + $0x40] sm:$0xf] %vm7218_vm11, %v7186_v55  ;;  %v3311_v7 = vadd.f32 %v10334_v37, %v8584_v11  ;;  %v7956_v1 = vpack.c.bf16 %v5884_v57, %v5884_v57  ;;  %v5345_v17 = vadd.f32 %v5344_v9, %v5343_v45  ;;  %v4502_v38 = vsel %vm4114_vm3, %v3816_v15, 0.0 }
 0x243   : > { %v3817_v41 = vmax.f32 %v2543_v52, 0.0  ;;  %v4483_v51 = vadd.f32 %v4482_v63, %v4481_v12  ;;  %v5366_v47 = vsel %vm4114_vm3, %v4008_v20, 0.0  ;;  %v4006_v25 = vmax.f32 %v3300_v59, 0.0 }
 0x244   : > { %v4009_v40 = vmax.f32 %v3311_v7, 0.0  ;;  %v8052_v32 = vpack.c.bf16 %v5980_v35, %v5980_v35  ;;  %v5346_v39 = vrot.slane %v5345_v17, 1  ;;  %v4493_v21 = vsel %vm4114_vm3, %v3814_v49, 0.0 }
 0x245   : > { %v4503_v3 = vsel %vm4114_vm3, %v3817_v41, 0.0  ;;  %v6844_v30 = vunpack.c.l.b16 %v7956_v1  ;;  %v5883_v14 = vmul.f32 0.0625, %v4483_v51  ;;  %v2535_v4 = vadd.f32 %v10334_v37, %v2534_v33  ;;  %v8588_v33 = vpop.f32.mrf.mxu1 }
 0x246   : > { %v4504_v60 = vadd.f32 %v4503_v3, %v4502_v38  ;;  %v5367_v62 = vsel %vm4114_vm3, %v4009_v40, 0.0  ;;  %v5347_v34 = vadd.f32 %v5346_v39, %v5345_v17  ;;  %v3303_v54 = vadd.f32 %v10334_v37, %v3302_v29  ;;  %v2550_v40 = vpop.f32.mrf.mxu0 }
 0x247   : > { %v5368_v18 = vadd.f32 %v5367_v62, %v5366_v47  ;;  %v7955_v48 = vpack.c.bf16 %v5883_v14, %v5883_v14  ;;  %v2556_v50 = vadd.f32 %v10334_v37, %v8395_v56  ;;  %v3324_v43 = vadd.f32 %v10334_v37, %v8587_v24  ;;  %v3318_v56 = vpop.f32.mrf.mxu1 }
 0x248   : > { %v4505_v26 = vrot.slane %v4504_v60, 4  ;;  %v5979_v22 = vmul.f32 0.0625, %v5347_v34  ;;  %v3815_v61 = vmax.f32 %v2535_v4, 0.0  ;;  %v4007_v46 = vmax.f32 %v3303_v54, 0.0 }
 0x249   : > { %v5369_v36 = vrot.slane %v5368_v18, 4  ;;  %v6843_v6 = vunpack.c.l.b16 %v7955_v48  ;;  %v5357_v31 = vsel %vm4114_vm3, %v4006_v25, 0.0  ;;  %v3820_v23 = vmax.f32 %v2556_v50, 0.0 }
 0x24a   : > { %v4506_v5 = vadd.f32 %v4505_v26, %v4504_v60  ;;  %v8051_v58 = vpack.c.bf16 %v5979_v22, %v5979_v22  ;;  %v4494_v15 = vsel %vm4114_vm3, %v3815_v61, 0.0  ;;  %v5358_v20 = vsel %vm4114_vm3, %v4007_v46, 0.0 }
 0x24b   : > { %v5370_v2 = vadd.f32 %v5369_v36, %v5368_v18  ;;  %v4495_v53 = vadd.f32 %v4494_v15, %v4493_v21  ;;  %v5359_v28 = vadd.f32 %v5358_v20, %v5357_v31  ;;  %v4012_v13 = vmax.f32 %v3324_v43, 0.0  ;;  %v8399_v43 = vpop.f32.mrf.mxu0 }
 0x24c   : > { %v4507_v11 = vrot.slane %v4506_v5, 2  ;;  %v6940_v8 = vunpack.c.l.b16 %v8052_v32  ;;  %v10428_v19 = vsel %vm6995_vm4, %v6844_v30, %v6843_v6  ;;  %v6939_v10 = vunpack.c.l.b16 %v8051_v58 }
 0x24d   : > { %v5371_v45 = vrot.slane %v5370_v2, 2  ;;  %v4496_v0 = vrot.slane %v4495_v53, 4  ;;  %v5360_v12 = vrot.slane %v5359_v28, 4  ;;  %v2548_v44 = vadd.f32 %v10334_v37, %v2547_v27 }
 0x24e   : > { %v4508_v55 = vadd.f32 %v4507_v11, %v4506_v5  ;;  %v4520_v9 = vsel %vm4114_vm3, %v3820_v23, 0.0  ;;  %v3316_v59 = vadd.f32 %v10334_v37, %v3315_v42  ;;  %v2559_v52 = vadd.f32 %v10334_v37, %v8396_v16  ;;  %v8591_v23 = vpop.f32.mrf.mxu1 }
 0x24f   : > { %v5372_v57 = vadd.f32 %v5371_v45, %v5370_v2  ;;  %v4497_v35 = vadd.f32 %v4496_v0, %v4495_v53  ;;  %v5361_v63 = vadd.f32 %v5360_v12, %v5359_v28  ;;  %v5384_v49 = vsel %vm4114_vm3, %v4012_v13, 0.0  ;;  %v2563_v13 = vpop.f32.mrf.mxu0 }
 0x250   : > { %v4509_v29 = vrot.slane %v4508_v55, 1  ;;  %v10436_v7 = vsel %vm6995_vm4, %v6940_v8, %v6939_v10  ;;  %v3821_v17 = vmax.f32 %v2559_v52, 0.0  ;;  %v3327_v38 = vadd.f32 %v10334_v37, %v8588_v33  ;;  %v3331_v33 = vpop.f32.mrf.mxu1 }
 0x251   : > { %v5373_v1 = vrot.slane %v5372_v57, 1  ;;  %v4498_v51 = vrot.slane %v4497_v35, 2  ;;  %v5362_v47 = vrot.slane %v5361_v63, 2  ;;  %v3818_v25 = vmax.f32 %v2548_v44, 0.0 }
 0x252   : > { %v4510_v41 = vadd.f32 %v4509_v29, %v4508_v55  ;;  %v4010_v39 = vmax.f32 %v3316_v59, 0.0  ;;  %v4521_v21 = vsel %vm4114_vm3, %v3821_v17, 0.0  ;;  %v4013_v3 = vmax.f32 %v3327_v38, 0.0 }
 0x253   : > { %v5374_v32 = vadd.f32 %v5373_v1, %v5372_v57  ;;  %v4499_v30 = vadd.f32 %v4498_v51, %v4497_v35  ;;  %v5363_v14 = vadd.f32 %v5362_v47, %v5361_v63  ;;  %v4522_v60 = vadd.f32 %v4521_v21, %v4520_v9  ;;  %v8400_v1 = vpop.f32.mrf.mxu0 }
 0x254   : > { %v5886_v24 = vmul.f32 0.0625, %v4510_v41  ;;  %v5385_v34 = vsel %vm4114_vm3, %v4013_v3, 0.0  ;;  %v2551_v18 = vadd.f32 %v10334_v37, %v2550_v40  ;;  %v3319_v4 = vadd.f32 %v10334_v37, %v3318_v56 }
 0x255   : > { %v5982_v62 = vmul.f32 0.0625, %v5374_v32  ;;  %v4500_v54 = vrot.slane %v4499_v30, 1  ;;  %v5364_v48 = vrot.slane %v5363_v14, 1  ;;  %v4511_v26 = vsel %vm4114_vm3, %v3818_v25, 0.0  ;;  %v8592_v32 = vpop.f32.mrf.mxu1 }
 0x256   : > { %v4523_v50 = vrot.slane %v4522_v60, 4  ;;  %v5375_v27 = vsel %vm4114_vm3, %v4010_v39, 0.0  ;;  %v5386_v22 = vadd.f32 %v5385_v34, %v5384_v49  ;;  %v3819_v36 = vmax.f32 %v2551_v18, 0.0  ;;  %v2566_v34 = vpop.f32.mrf.mxu0 }
 0x257   : > { %v4011_v61 = vmax.f32 %v3319_v4, 0.0  ;;  %v7958_v46 = vpack.c.bf16 %v5886_v24, %v5886_v24  ;;  %v4501_v6 = vadd.f32 %v4500_v54, %v4499_v30  ;;  %v5365_v31 = vadd.f32 %v5364_v48, %v5363_v14 }
 0x258   : > { %v4524_v5 = vadd.f32 %v4523_v50, %v4522_v60  ;;  %v8054_v42 = vpack.c.bf16 %v5982_v62, %v5982_v62  ;;  %v5387_v58 = vrot.slane %v5386_v22, 4  ;;  %v4512_v2 = vsel %vm4114_vm3, %v3819_v36, 0.0 }
 0x259   : > { %v5376_v15 = vsel %vm4114_vm3, %v4011_v61, 0.0  ;;  %v5885_v20 = vmul.f32 0.0625, %v4501_v6  ;;  %v5981_v11 = vmul.f32 0.0625, %v5365_v31  ;;  %v4513_v28 = vadd.f32 %v4512_v2, %v4511_v26 }
 0x25a   : > { %v4525_v53 = vrot.slane %v4524_v5, 2  ;;  %v5388_v16 = vadd.f32 %v5387_v58, %v5386_v22  ;;  %v5377_v8 = vadd.f32 %v5376_v15, %v5375_v27  ;;  %v2572_v10 = vadd.f32 %v10334_v37, %v8399_v43  ;;  %v3334_v43 = vpop.f32.mrf.mxu1 }
 0x25b   : > { %v3340_v45 = vadd.f32 %v10334_v37, %v8591_v23  ;;  %v7957_v55 = vpack.c.bf16 %v5885_v20, %v5885_v20  ;;  %v8053_v0 = vpack.c.bf16 %v5981_v11, %v5981_v11  ;;  %v4514_v44 = vrot.slane %v4513_v28, 4  ;;  %v8403_v23 = vpop.f32.mrf.mxu0 }
 0x25c   : > { %v4526_v12 = vadd.f32 %v4525_v53, %v4524_v5  ;;  %v5389_v57 = vrot.slane %v5388_v16, 2  ;;  %v5378_v9 = vrot.slane %v5377_v8, 4  ;;  %v3824_v59 = vmax.f32 %v2572_v10, 0.0 }
 0x25d   : > { %v4016_v52 = vmax.f32 %v3340_v45, 0.0  ;;  %v6845_v29 = vunpack.c.l.b16 %v7957_v55  ;;  %v6941_v35 = vunpack.c.l.b16 %v8053_v0  ;;  %v4515_v49 = vadd.f32 %v4514_v44, %v4513_v28 }
 0x25e   : > { %v4527_v63 = vrot.slane %v4526_v12, 1  ;;  %v6846_v17 = vunpack.c.l.b16 %v7958_v46  ;;  %v6942_v38 = vunpack.c.l.b16 %v8054_v42  ;;  %v5390_v41 = vadd.f32 %v5389_v57, %v5388_v16 }
 0x25f   : > { %v5379_v51 = vadd.f32 %v5378_v9, %v5377_v8  ;;  %v4516_v25 = vrot.slane %v4515_v49, 2  ;;  %v4538_v40 = vsel %vm4114_vm3, %v3824_v59, 0.0  ;;  %v5402_v56 = vsel %vm4114_vm3, %v4016_v52, 0.0  ;;  %v2579_v52 = vpop.f32.mrf.mxu0 }
 0x260   : > { %v4528_v47 = vadd.f32 %v4527_v63, %v4526_v12  ;;  %v7038_v39 = vsel %vm6997_vm5, %v6845_v29, %v10428_v19  ;;  %v7122_v21 = vsel %vm6997_vm5, %v6941_v35, %v10436_v7  ;;  %v5391_v3 = vrot.slane %v5390_v41, 1 }
 0x261   : > { %v5380_v24 = vrot.slane %v5379_v51, 2  ;;  %v4517_v14 = vadd.f32 %v4516_v25, %v4515_v49  ;;  %v2564_v60 = vadd.f32 %v10334_v37, %v2563_v13  ;;  %v3332_v62 = vadd.f32 %v10334_v37, %v3331_v33  ;;  %v8595_v13 = vpop.f32.mrf.mxu1 }
 0x262   : > { %v5888_v30 = vmul.f32 0.0625, %v4528_v47  ;;  %v5392_v18 = vadd.f32 %v5391_v3, %v5390_v41  ;;  %v2575_v54 = vadd.f32 %v10334_v37, %v8400_v1  ;;  %v3343_v48 = vadd.f32 %v10334_v37, %v8592_v32 }
 0x263   : > { %v5381_v4 = vadd.f32 %v5380_v24, %v5379_v51  ;;  %v4518_v19 = vrot.slane %v4517_v14, 1  ;;  %v7039_v50 = vsel %vm6999_vm6, %v6846_v17, %v7038_v39  ;;  %v3822_v7 = vmax.f32 %v2564_v60, 0.0  ;;  %v3347_v1 = vpop.f32.mrf.mxu1  ;;  %v8404_v24 = vpop.f32.mrf.mxu0 }
 0x264   : > { %v7960_v26 = vpack.c.bf16 %v5888_v30, %v5888_v30  ;;  %v4014_v22 = vmax.f32 %v3332_v62, 0.0  ;;  %v3825_v36 = vmax.f32 %v2575_v54, 0.0  ;;  %v4017_v61 = vmax.f32 %v3343_v48, 0.0 }
 0x265   : > { %v5382_v27 = vrot.slane %v5381_v4, 1  ;;  %v5984_v6 = vmul.f32 0.0625, %v5392_v18  ;;  %v4519_v31 = vadd.f32 %v4518_v19, %v4517_v14  ;;  %v7123_v5 = vsel %vm6999_vm6, %v6942_v38, %v7122_v21 }
 0x266   : > { %v6848_v46 = vunpack.c.l.b16 %v7960_v26  ;;  %v4529_v58 = vsel %vm4114_vm3, %v3822_v7, 0.0  ;;  %v4539_v2 = vsel %vm4114_vm3, %v3825_v36, 0.0  ;;  %v5403_v15 = vsel %vm4114_vm3, %v4017_v61, 0.0 }
 0x267   : > { %v5383_v42 = vadd.f32 %v5382_v27, %v5381_v4  ;;  %v5887_v20 = vmul.f32 0.0625, %v4519_v31  ;;  %v4540_v11 = vadd.f32 %v4539_v2, %v4538_v40  ;;  %v5404_v53 = vadd.f32 %v5403_v15, %v5402_v56 }
 0x268   : > { %v2567_v28 = vadd.f32 %v10334_v37, %v2566_v34  ;;  %v5393_v8 = vsel %vm4114_vm3, %v4014_v22, 0.0  ;;  %v3335_v10 = vadd.f32 %v10334_v37, %v3334_v43  ;;  %v2588_v45 = vadd.f32 %v10334_v37, %v8403_v23  ;;  %v8596_v34 = vpop.f32.mrf.mxu1 }
 0x269   : > { %v5983_v16 = vmul.f32 0.0625, %v5383_v42  ;;  %v7959_v55 = vpack.c.bf16 %v5887_v20, %v5887_v20  ;;  %v4541_v0 = vrot.slane %v4540_v11, 4  ;;  %v5405_v12 = vrot.slane %v5404_v53, 4 }
 0x26a   : > { %v3823_v44 = vmax.f32 %v2567_v28, 0.0  ;;  %v8056_v33 = vpack.c.bf16 %v5984_v6, %v5984_v6  ;;  %v4015_v9 = vmax.f32 %v3335_v10, 0.0  ;;  %v3828_v59 = vmax.f32 %v2588_v45, 0.0  ;;  %v3350_v15 = vpop.f32.mrf.mxu1 }
 0x26b   : > { %v8055_v57 = vpack.c.bf16 %v5983_v16, %v5983_v16  ;;  %v6847_v29 = vunpack.c.l.b16 %v7959_v55  ;;  %v4542_v35 = vadd.f32 %v4541_v0, %v4540_v11  ;;  %v5406_v63 = vadd.f32 %v5405_v12, %v5404_v53 }
 0x26c   : > { %v4530_v49 = vsel %vm4114_vm3, %v3823_v44, 0.0  ;;  %v5394_v41 = vsel %vm4114_vm3, %v4015_v9, 0.0  ;;  %v3356_v51 = vadd.f32 %v10334_v37, %v8595_v13  ;;  %v6944_v32 = vunpack.c.l.b16 %v8056_v33 }
 0x26d   : > { %v6943_v17 = vunpack.c.l.b16 %v8055_v57  ;;  %v4531_v38 = vadd.f32 %v4530_v49, %v4529_v58  ;;  %v7040_v47 = vsel %vm7001_vm7, %v6847_v29, %v7039_v50  ;;  %v4543_v25 = vrot.slane %v4542_v35, 2 }
 0x26e   : > { %v5407_v40 = vrot.slane %v5406_v63, 2  ;;  %v5395_v56 = vadd.f32 %v5394_v41, %v5393_v8  ;;  %v4556_v3 = vsel %vm4114_vm3, %v3828_v59, 0.0  ;;  %v10475_v60 = vsel %vm7003_vm8, %v6848_v46, %v7040_v47 }
 0x26f   : > { %v7124_v39 = vsel %vm7001_vm7, %v6943_v17, %v7123_v5  ;;  %v4532_v21 = vrot.slane %v4531_v38, 4  ;;  %v4544_v30 = vadd.f32 %v4543_v25, %v4542_v35  ;;  %v4020_v4 = vmax.f32 %v3356_v51, 0.0  ;;  %v2582_v5 = vpop.f32.mrf.mxu0 }
 0x270   : > { %v5408_v14 = vadd.f32 %v5407_v40, %v5406_v63  ;;  %v5396_v62 = vrot.slane %v5395_v56, 4  ;;  %v2580_v54 = vadd.f32 %v10334_v37, %v2579_v52  ;;  %v3348_v48 = vadd.f32 %v10334_v37, %v3347_v1  ;;  %v8599_v52 = vpop.f32.mrf.mxu1 }
 0x271   : > { %v4533_v18 = vadd.f32 %v4532_v21, %v4531_v38  ;;  %v4545_v26 = vrot.slane %v4544_v30, 1  ;;  %v2591_v7 = vadd.f32 %v10334_v37, %v8404_v24  ;;  %v3359_v36 = vadd.f32 %v10334_v37, %v8596_v34  ;;  %v8407_v44 = vpop.f32.mrf.mxu0 }
 0x272   : > { %v5409_v19 = vrot.slane %v5408_v14, 1  ;;  %v5397_v50 = vadd.f32 %v5396_v62, %v5395_v56  ;;  %v3826_v27 = vmax.f32 %v2580_v54, 0.0  ;;  %v4018_v22 = vmax.f32 %v3348_v48, 0.0  ;;  %v3363_v24 = vpop.f32.mrf.mxu1 }
 0x273   : > { %v4534_v43 = vrot.slane %v4533_v18, 2  ;;  %v4546_v61 = vadd.f32 %v4545_v26, %v4544_v30  ;;  %v3829_v31 = vmax.f32 %v2591_v7, 0.0  ;;  %v7125_v42 = vsel %vm7003_vm8, %v6944_v32, %v7124_v39  ;;  %v2595_v56 = vpop.f32.mrf.mxu0 }
 0x274   : > { %v5410_v46 = vadd.f32 %v5409_v19, %v5408_v14  ;;  %v5398_v6 = vrot.slane %v5397_v50, 2  ;;  %v5420_v58 = vsel %vm4114_vm3, %v4020_v4, 0.0  ;;  %v4021_v2 = vmax.f32 %v3359_v36, 0.0 }
 0x275   : > { %v4535_v23 = vadd.f32 %v4534_v43, %v4533_v18  ;;  %v5890_v20 = vmul.f32 0.0625, %v4546_v61  ;;  %v4557_v28 = vsel %vm4114_vm3, %v3829_v31, 0.0  ;;  %v2583_v10 = vadd.f32 %v10334_v37, %v2582_v5  ;;  %v8408_v43 = vpop.f32.mrf.mxu0  ;;  %v8600_v61 = vpop.f32.mrf.mxu1 }
 0x276   : > { %v5986_v11 = vmul.f32 0.0625, %v5410_v46  ;;  %v5399_v53 = vadd.f32 %v5398_v6, %v5397_v50  ;;  %v4558_v16 = vadd.f32 %v4557_v28, %v4556_v3  ;;  %v5421_v8 = vsel %vm4114_vm3, %v4021_v2, 0.0 }
 0x277   : > { %v4536_v13 = vrot.slane %v4535_v23, 1  ;;  %v4547_v55 = vsel %vm4114_vm3, %v3826_v27, 0.0  ;;  %v5411_v0 = vsel %vm4114_vm3, %v4018_v22, 0.0  ;;  %v5422_v12 = vadd.f32 %v5421_v8, %v5420_v58 }
 0x278   : > { %v5400_v45 = vrot.slane %v5399_v53, 1  ;;  %v4559_v57 = vrot.slane %v4558_v16, 4  ;;  %v3827_v9 = vmax.f32 %v2583_v10, 0.0  ;;  %v3351_v59 = vadd.f32 %v10334_v37, %v3350_v15 }
 0x279   : > { %v4537_v33 = vadd.f32 %v4536_v13, %v4535_v23  ;;  %v7962_v29 = vpack.c.bf16 %v5890_v20, %v5890_v20  ;;  %v8058_v35 = vpack.c.bf16 %v5986_v11, %v5986_v11  ;;  %v5423_v49 = vrot.slane %v5422_v12, 4  ;;  %v2598_v13 = vpop.f32.mrf.mxu0 }
 0x27a   : > { %v5401_v63 = vadd.f32 %v5400_v45, %v5399_v53  ;;  %v4560_v17 = vadd.f32 %v4559_v57, %v4558_v16  ;;  %v4548_v38 = vsel %vm4114_vm3, %v3827_v9, 0.0  ;;  %v4019_v41 = vmax.f32 %v3351_v59, 0.0  ;;  %v10501_v53 = vld [vmem:[%s11113_s2] ss:$0 sm:$0xff]  ;;  %v3366_v45 = vpop.f32.mrf.mxu1 }
 0x27b   : > { %v5889_v1 = vmul.f32 0.0625, %v4537_v33  ;;  %v5424_v47 = vadd.f32 %v5423_v49, %v5422_v12  ;;  %v4549_v25 = vadd.f32 %v4548_v38, %v4547_v55  ;;  %v2604_v40 = vadd.f32 %v10334_v37, %v8407_v44  ;;  %v8411_v49 = vpop.f32.mrf.mxu0 }
 0x27c   : > { %v5985_v51 = vmul.f32 0.0625, %v5401_v63  ;;  %v4561_v39 = vrot.slane %v4560_v17, 2  ;;  %v5412_v21 = vsel %vm4114_vm3, %v4019_v41, 0.0  ;;  %v3372_v3 = vadd.f32 %v10334_v37, %v8599_v52 }
 0x27d   : > { %v7961_v32 = vpack.c.bf16 %v5889_v1, %v5889_v1  ;;  %v5425_v14 = vrot.slane %v5424_v47, 2  ;;  %v4550_v62 = vrot.slane %v4549_v25, 4  ;;  %v5413_v34 = vadd.f32 %v5412_v21, %v5411_v0 }
 0x27e   : > { %v8057_v30 = vpack.c.bf16 %v5985_v51, %v5985_v51  ;;  %v6850_v18 = vunpack.c.l.b16 %v7962_v29  ;;  %v6946_v4 = vunpack.c.l.b16 %v8058_v35  ;;  %v4562_v48 = vadd.f32 %v4561_v39, %v4560_v17  ;;  %v8603_v51 = vpop.f32.mrf.mxu1 }
 0x27f   : > { %v6849_v54 = vunpack.c.l.b16 %v7961_v32  ;;  %v5426_v19 = vadd.f32 %v5425_v14, %v5424_v47  ;;  %v4551_v50 = vadd.f32 %v4550_v62, %v4549_v25  ;;  %v5414_v7 = vrot.slane %v5413_v34, 4 }
 0x280   : > { %v6945_v26 = vunpack.c.l.b16 %v8057_v30  ;;  %v4563_v22 = vrot.slane %v4562_v48, 1  ;;  %v3832_v36 = vmax.f32 %v2604_v40, 0.0  ;;  %v4024_v37 = vmax.f32 %v3372_v3, 0.0 }
 0x281   : > { %v7042_v27 = vsel %vm7005_vm9, %v6849_v54, %v10475_v60  ;;  %v5427_v31 = vrot.slane %v5426_v19, 1  ;;  %v4552_v5 = vrot.slane %v4551_v50, 2  ;;  %v5415_v15 = vadd.f32 %v5414_v7, %v5413_v34  ;;  %v2611_v34 = vpop.f32.mrf.mxu0 }
 0x282   : > { %v7043_v46 = vsel %vm7007_vm10, %v6850_v18, %v7042_v27  ;;  %v7126_v6 = vsel %vm7005_vm9, %v6945_v26, %v7125_v42  ;;  %v4564_v2 = vadd.f32 %v4563_v22, %v4562_v48  ;;  %v2596_v28 = vadd.f32 %v10501_v53, %v2595_v56 }
 0x283   : > { %v7175_v23 = vpack.c.b16 %v7043_v46, %v7043_v46  ;;  %v7127_v58 = vsel %vm7007_vm10, %v6946_v4, %v7126_v6  ;;  %v5428_v11 = vadd.f32 %v5427_v31, %v5426_v19  ;;  %v4553_v60 = vadd.f32 %v4552_v5, %v4551_v50  ;;  %v8412_v5 = vpop.f32.mrf.mxu0 }
 0x284   : > { %v7187_v20 = vpack.c.b16 %v7127_v58, %v7127_v58  ;;  %v5892_v42 = vmul.f32 0.0625, %v4564_v2  ;;  %v5416_v16 = vrot.slane %v5415_v15, 2  ;;  %v3364_v8 = vadd.f32 %v10501_v53, %v3363_v24 }
 0x285   : > { %7224 = vst.msk [vmem:[%s9614_s12 + $0x14] sm:$0xf] %vm7218_vm11, %v7175_v23  ;;  %v2607_v10 = vadd.f32 %v10501_v53, %v8408_v43  ;;  %v5988_v55 = vmul.f32 0.0625, %v5428_v11  ;;  %v4554_v0 = vrot.slane %v4553_v60, 1  ;;  %v3830_v12 = vmax.f32 %v2596_v28, 0.0  ;;  %v3379_v43 = vpop.f32.mrf.mxu1 }
 0x286   : > { %7236 = vst.msk [vmem:[%s9614_s12 + $0x44] sm:$0xf] %vm7218_vm11, %v7187_v20  ;;  %v3375_v44 = vadd.f32 %v10501_v53, %v8600_v61  ;;  %v7964_v33 = vpack.c.bf16 %v5892_v42, %v5892_v42  ;;  %v5417_v57 = vadd.f32 %v5416_v16, %v5415_v15  ;;  %v4574_v9 = vsel %vm4114_vm3, %v3832_v36, 0.0 }
 0x287   : > { %v3833_v59 = vmax.f32 %v2607_v10, 0.0  ;;  %v4555_v52 = vadd.f32 %v4554_v0, %v4553_v60  ;;  %v5438_v29 = vsel %vm4114_vm3, %v4024_v37, 0.0  ;;  %v4022_v35 = vmax.f32 %v3364_v8, 0.0 }
 0x288   : > { %v4025_v63 = vmax.f32 %v3375_v44, 0.0  ;;  %v8060_v1 = vpack.c.bf16 %v5988_v55, %v5988_v55  ;;  %v5418_v17 = vrot.slane %v5417_v57, 1  ;;  %v4565_v38 = vsel %vm4114_vm3, %v3830_v12, 0.0 }
 0x289   : > { %v4575_v41 = vsel %vm4114_vm3, %v3833_v59, 0.0  ;;  %v6852_v47 = vunpack.c.l.b16 %v7964_v33  ;;  %v5891_v25 = vmul.f32 0.0625, %v4555_v52  ;;  %v2599_v21 = vadd.f32 %v10501_v53, %v2598_v13  ;;  %v8604_v13 = vpop.f32.mrf.mxu1 }
 0x28a   : > { %v4576_v40 = vadd.f32 %v4575_v41, %v4574_v9  ;;  %v5439_v56 = vsel %vm4114_vm3, %v4025_v63, 0.0  ;;  %v5419_v32 = vadd.f32 %v5418_v17, %v5417_v57  ;;  %v3367_v3 = vadd.f32 %v10501_v53, %v3366_v45  ;;  %v2614_v63 = vpop.f32.mrf.mxu0 }
 0x28b   : > { %v5440_v39 = vadd.f32 %v5439_v56, %v5438_v29  ;;  %v7963_v24 = vpack.c.bf16 %v5891_v25, %v5891_v25  ;;  %v2620_v14 = vadd.f32 %v10501_v53, %v8411_v49  ;;  %v3388_v62 = vadd.f32 %v10501_v53, %v8603_v51  ;;  %v3382_v49 = vpop.f32.mrf.mxu1 }
 0x28c   : > { %v4577_v30 = vrot.slane %v4576_v40, 4  ;;  %v5987_v18 = vmul.f32 0.0625, %v5419_v32  ;;  %v3831_v54 = vmax.f32 %v2599_v21, 0.0  ;;  %v4023_v48 = vmax.f32 %v3367_v3, 0.0 }
 0x28d   : > { %v5441_v4 = vrot.slane %v5440_v39, 4  ;;  %v6851_v26 = vunpack.c.l.b16 %v7963_v24  ;;  %v5429_v19 = vsel %vm4114_vm3, %v4022_v35, 0.0  ;;  %v3836_v7 = vmax.f32 %v2620_v14, 0.0 }
 0x28e   : > { %v4578_v50 = vadd.f32 %v4577_v30, %v4576_v40  ;;  %v8059_v27 = vpack.c.bf16 %v5987_v18, %v5987_v18  ;;  %v4566_v36 = vsel %vm4114_vm3, %v3831_v54, 0.0  ;;  %v5430_v37 = vsel %vm4114_vm3, %v4023_v48, 0.0 }
 0x28f   : > { %v5442_v22 = vadd.f32 %v5441_v4, %v5440_v39  ;;  %v4567_v46 = vadd.f32 %v4566_v36, %v4565_v38  ;;  %v5431_v6 = vadd.f32 %v5430_v37, %v5429_v19  ;;  %v4028_v31 = vmax.f32 %v3388_v62, 0.0  ;;  %v8415_v62 = vpop.f32.mrf.mxu0 }
 0x290   : > { %v4579_v61 = vrot.slane %v4578_v50, 2  ;;  %v6948_v23 = vunpack.c.l.b16 %v8060_v1  ;;  %v10524_v58 = vsel %vm6995_vm4, %v6852_v47, %v6851_v26  ;;  %v6947_v2 = vunpack.c.l.b16 %v8059_v27 }
 0x291   : > { %v5443_v15 = vrot.slane %v5442_v22, 2  ;;  %v4568_v11 = vrot.slane %v4567_v46, 4  ;;  %v5432_v60 = vrot.slane %v5431_v6, 4  ;;  %v2612_v28 = vadd.f32 %v10501_v53, %v2611_v34 }
 0x292   : > { %v4580_v20 = vadd.f32 %v4579_v61, %v4578_v50  ;;  %v4592_v16 = vsel %vm4114_vm3, %v3836_v7, 0.0  ;;  %v3380_v8 = vadd.f32 %v10501_v53, %v3379_v43  ;;  %v2623_v10 = vadd.f32 %v10501_v53, %v8412_v5  ;;  %v8607_v7 = vpop.f32.mrf.mxu1 }
 0x293   : > { %v5444_v42 = vadd.f32 %v5443_v15, %v5442_v22  ;;  %v4569_v55 = vadd.f32 %v4568_v11, %v4567_v46  ;;  %v5433_v0 = vadd.f32 %v5432_v60, %v5431_v6  ;;  %v5456_v12 = vsel %vm4114_vm3, %v4028_v31, 0.0  ;;  %v2627_v31 = vpop.f32.mrf.mxu0 }
 0x294   : > { %v4581_v45 = vrot.slane %v4580_v20, 1  ;;  %v10532_v44 = vsel %vm6995_vm4, %v6948_v23, %v6947_v2  ;;  %v3837_v57 = vmax.f32 %v2623_v10, 0.0  ;;  %v3391_v9 = vadd.f32 %v10501_v53, %v8604_v13  ;;  %v3395_v13 = vpop.f32.mrf.mxu1 }
 0x295   : > { %v5445_v33 = vrot.slane %v5444_v42, 1  ;;  %v4570_v52 = vrot.slane %v4569_v55, 2  ;;  %v5434_v29 = vrot.slane %v5433_v0, 2  ;;  %v3834_v35 = vmax.f32 %v2612_v28, 0.0 }
 0x296   : > { %v4582_v59 = vadd.f32 %v4581_v45, %v4580_v20  ;;  %v4026_v17 = vmax.f32 %v3380_v8, 0.0  ;;  %v4593_v38 = vsel %vm4114_vm3, %v3837_v57, 0.0  ;;  %v4029_v41 = vmax.f32 %v3391_v9, 0.0 }
 0x297   : > { %v5446_v1 = vadd.f32 %v5445_v33, %v5444_v42  ;;  %v4571_v47 = vadd.f32 %v4570_v52, %v4569_v55  ;;  %v5435_v25 = vadd.f32 %v5434_v29, %v5433_v0  ;;  %v4594_v40 = vadd.f32 %v4593_v38, %v4592_v16  ;;  %v8416_v33 = vpop.f32.mrf.mxu0 }
 0x298   : > { %v5894_v51 = vmul.f32 0.0625, %v4582_v59  ;;  %v5457_v32 = vsel %vm4114_vm3, %v4029_v41, 0.0  ;;  %v2615_v39 = vadd.f32 %v10501_v53, %v2614_v63  ;;  %v3383_v21 = vadd.f32 %v10501_v53, %v3382_v49 }
 0x299   : > { %v5990_v56 = vmul.f32 0.0625, %v5446_v1  ;;  %v4572_v3 = vrot.slane %v4571_v47, 1  ;;  %v5436_v24 = vrot.slane %v5435_v25, 1  ;;  %v4583_v30 = vsel %vm4114_vm3, %v3834_v35, 0.0  ;;  %v8608_v1 = vpop.f32.mrf.mxu1 }
 0x29a   : > { %v4595_v14 = vrot.slane %v4594_v40, 4  ;;  %v5447_v34 = vsel %vm4114_vm3, %v4026_v17, 0.0  ;;  %v5458_v18 = vadd.f32 %v5457_v32, %v5456_v12  ;;  %v3835_v4 = vmax.f32 %v2615_v39, 0.0  ;;  %v2630_v32 = vpop.f32.mrf.mxu0 }
 0x29b   : > { %v4027_v54 = vmax.f32 %v3383_v21, 0.0  ;;  %v7966_v48 = vpack.c.bf16 %v5894_v51, %v5894_v51  ;;  %v4573_v26 = vadd.f32 %v4572_v3, %v4571_v47  ;;  %v5437_v19 = vadd.f32 %v5436_v24, %v5435_v25 }
 0x29c   : > { %v4596_v50 = vadd.f32 %v4595_v14, %v4594_v40  ;;  %v8062_v43 = vpack.c.bf16 %v5990_v56, %v5990_v56  ;;  %v5459_v27 = vrot.slane %v5458_v18, 4  ;;  %v4584_v22 = vsel %vm4114_vm3, %v3835_v4, 0.0 }
 0x29d   : > { %v5448_v36 = vsel %vm4114_vm3, %v4027_v54, 0.0  ;;  %v5893_v37 = vmul.f32 0.0625, %v4573_v26  ;;  %v5989_v61 = vmul.f32 0.0625, %v5437_v19  ;;  %v4585_v6 = vadd.f32 %v4584_v22, %v4583_v30 }
 0x29e   : > { %v4597_v46 = vrot.slane %v4596_v50, 2  ;;  %v5460_v5 = vadd.f32 %v5459_v27, %v5458_v18  ;;  %v5449_v23 = vadd.f32 %v5448_v36, %v5447_v34  ;;  %v2636_v2 = vadd.f32 %v10501_v53, %v8415_v62  ;;  %v3398_v62 = vpop.f32.mrf.mxu1 }
 0x29f   : > { %v3404_v15 = vadd.f32 %v10501_v53, %v8607_v7  ;;  %v7965_v20 = vpack.c.bf16 %v5893_v37, %v5893_v37  ;;  %v8061_v11 = vpack.c.bf16 %v5989_v61, %v5989_v61  ;;  %v4586_v28 = vrot.slane %v4585_v6, 4  ;;  %v8419_v7 = vpop.f32.mrf.mxu0 }
 0x2a0   : > { %v4598_v60 = vadd.f32 %v4597_v46, %v4596_v50  ;;  %v5461_v42 = vrot.slane %v5460_v5, 2  ;;  %v5450_v16 = vrot.slane %v5449_v23, 4  ;;  %v3840_v8 = vmax.f32 %v2636_v2, 0.0 }
 0x2a1   : > { %v4032_v10 = vmax.f32 %v3404_v15, 0.0  ;;  %v6853_v45 = vunpack.c.l.b16 %v7965_v20  ;;  %v6949_v55 = vunpack.c.l.b16 %v8061_v11  ;;  %v4587_v12 = vadd.f32 %v4586_v28, %v4585_v6 }
 0x2a2   : > { %v4599_v0 = vrot.slane %v4598_v60, 1  ;;  %v6854_v57 = vunpack.c.l.b16 %v7966_v48  ;;  %v6950_v9 = vunpack.c.l.b16 %v8062_v43  ;;  %v5462_v59 = vadd.f32 %v5461_v42, %v5460_v5 }
 0x2a3   : > { %v5451_v52 = vadd.f32 %v5450_v16, %v5449_v23  ;;  %v4588_v35 = vrot.slane %v4587_v12, 2  ;;  %v4610_v63 = vsel %vm4114_vm3, %v3840_v8, 0.0  ;;  %v5474_v49 = vsel %vm4114_vm3, %v4032_v10, 0.0  ;;  %v2643_v10 = vpop.f32.mrf.mxu0 }
 0x2a4   : > { %v4600_v29 = vadd.f32 %v4599_v0, %v4598_v60  ;;  %v7045_v17 = vsel %vm6997_vm5, %v6853_v45, %v10524_v58  ;;  %v7129_v38 = vsel %vm6997_vm5, %v6949_v55, %v10532_v44  ;;  %v5463_v41 = vrot.slane %v5462_v59, 1 }
 0x2a5   : > { %v5452_v51 = vrot.slane %v5451_v52, 2  ;;  %v4589_v25 = vadd.f32 %v4588_v35, %v4587_v12  ;;  %v2628_v40 = vadd.f32 %v10501_v53, %v2627_v31  ;;  %v3396_v56 = vadd.f32 %v10501_v53, %v3395_v13  ;;  %v8611_v31 = vpop.f32.mrf.mxu1 }
 0x2a6   : > { %v5896_v47 = vmul.f32 0.0625, %v4600_v29  ;;  %v5464_v39 = vadd.f32 %v5463_v41, %v5462_v59  ;;  %v2639_v3 = vadd.f32 %v10501_v53, %v8416_v33  ;;  %v3407_v24 = vadd.f32 %v10501_v53, %v8608_v1 }
 0x2a7   : > { %v5453_v21 = vadd.f32 %v5452_v51, %v5451_v52  ;;  %v4590_v58 = vrot.slane %v4589_v25, 1  ;;  %v7046_v14 = vsel %vm6999_vm6, %v6854_v57, %v7045_v17  ;;  %v3838_v44 = vmax.f32 %v2628_v40, 0.0  ;;  %v3411_v33 = vpop.f32.mrf.mxu1  ;;  %v8420_v51 = vpop.f32.mrf.mxu0 }
 0x2a8   : > { %v7968_v30 = vpack.c.bf16 %v5896_v47, %v5896_v47  ;;  %v4030_v18 = vmax.f32 %v3396_v56, 0.0  ;;  %v3841_v4 = vmax.f32 %v2639_v3, 0.0  ;;  %v4033_v54 = vmax.f32 %v3407_v24, 0.0 }
 0x2a9   : > { %v5454_v34 = vrot.slane %v5453_v21, 1  ;;  %v5992_v26 = vmul.f32 0.0625, %v5464_v39  ;;  %v4591_v19 = vadd.f32 %v4590_v58, %v4589_v25  ;;  %v7130_v50 = vsel %vm6999_vm6, %v6950_v9, %v7129_v38 }
 0x2aa   : > { %v6856_v48 = vunpack.c.l.b16 %v7968_v30  ;;  %v4601_v27 = vsel %vm4114_vm3, %v3838_v44, 0.0  ;;  %v4611_v22 = vsel %vm4114_vm3, %v3841_v4, 0.0  ;;  %v5475_v36 = vsel %vm4114_vm3, %v4033_v54, 0.0 }
 0x2ab   : > { %v5455_v43 = vadd.f32 %v5454_v34, %v5453_v21  ;;  %v5895_v37 = vmul.f32 0.0625, %v4591_v19  ;;  %v4612_v61 = vadd.f32 %v4611_v22, %v4610_v63  ;;  %v5476_v46 = vadd.f32 %v5475_v36, %v5474_v49 }
 0x2ac   : > { %v2631_v6 = vadd.f32 %v10501_v53, %v2630_v32  ;;  %v5465_v23 = vsel %vm4114_vm3, %v4030_v18, 0.0  ;;  %v3399_v2 = vadd.f32 %v10501_v53, %v3398_v62  ;;  %v2652_v15 = vadd.f32 %v10501_v53, %v8419_v7  ;;  %v8612_v32 = vpop.f32.mrf.mxu1 }
 0x2ad   : > { %v5991_v5 = vmul.f32 0.0625, %v5455_v43  ;;  %v7967_v20 = vpack.c.bf16 %v5895_v37, %v5895_v37  ;;  %v4613_v11 = vrot.slane %v4612_v61, 4  ;;  %v5477_v60 = vrot.slane %v5476_v46, 4 }
 0x2ae   : > { %v3839_v28 = vmax.f32 %v2631_v6, 0.0  ;;  %v8064_v13 = vpack.c.bf16 %v5992_v26, %v5992_v26  ;;  %v4031_v16 = vmax.f32 %v3399_v2, 0.0  ;;  %v3844_v8 = vmax.f32 %v2652_v15, 0.0  ;;  %v3414_v36 = vpop.f32.mrf.mxu1 }
 0x2af   : > { %v8063_v42 = vpack.c.bf16 %v5991_v5, %v5991_v5  ;;  %v6855_v45 = vunpack.c.l.b16 %v7967_v20  ;;  %v4614_v55 = vadd.f32 %v4613_v11, %v4612_v61  ;;  %v5478_v0 = vadd.f32 %v5477_v60, %v5476_v46 }
 0x2b0   : > { %v4602_v12 = vsel %vm4114_vm3, %v3839_v28, 0.0  ;;  %v5466_v59 = vsel %vm4114_vm3, %v4031_v16, 0.0  ;;  %v3420_v52 = vadd.f32 %v10501_v53, %v8611_v31  ;;  %v6952_v1 = vunpack.c.l.b16 %v8064_v13 }
 0x2b1   : > { %v6951_v57 = vunpack.c.l.b16 %v8063_v42  ;;  %v4603_v9 = vadd.f32 %v4602_v12, %v4601_v27  ;;  %v7047_v29 = vsel %vm7001_vm7, %v6855_v45, %v7046_v14  ;;  %v4615_v35 = vrot.slane %v4614_v55, 2 }
 0x2b2   : > { %v5479_v63 = vrot.slane %v5478_v0, 2  ;;  %v5467_v49 = vadd.f32 %v5466_v59, %v5465_v23  ;;  %v4628_v41 = vsel %vm4114_vm3, %v3844_v8, 0.0  ;;  %v10571_v40 = vsel %vm7003_vm8, %v6856_v48, %v7047_v29 }
 0x2b3   : > { %v7131_v17 = vsel %vm7001_vm7, %v6951_v57, %v7130_v50  ;;  %v4604_v38 = vrot.slane %v4603_v9, 4  ;;  %v4616_v47 = vadd.f32 %v4615_v35, %v4614_v55  ;;  %v4036_v21 = vmax.f32 %v3420_v52, 0.0  ;;  %v2646_v50 = vpop.f32.mrf.mxu0 }
 0x2b4   : > { %v5480_v25 = vadd.f32 %v5479_v63, %v5478_v0  ;;  %v5468_v56 = vrot.slane %v5467_v49, 4  ;;  %v2644_v3 = vadd.f32 %v10501_v53, %v2643_v10  ;;  %v3412_v24 = vadd.f32 %v10501_v53, %v3411_v33  ;;  %v8615_v10 = vpop.f32.mrf.mxu1 }
 0x2b5   : > { %v4605_v39 = vadd.f32 %v4604_v38, %v4603_v9  ;;  %v4617_v30 = vrot.slane %v4616_v47, 1  ;;  %v2655_v44 = vadd.f32 %v10501_v53, %v8420_v51  ;;  %v3423_v4 = vadd.f32 %v10501_v53, %v8612_v32  ;;  %v8423_v28 = vpop.f32.mrf.mxu0 }
 0x2b6   : > { %v5481_v58 = vrot.slane %v5480_v25, 1  ;;  %v5469_v14 = vadd.f32 %v5468_v56, %v5467_v49  ;;  %v3842_v34 = vmax.f32 %v2644_v3, 0.0  ;;  %v4034_v18 = vmax.f32 %v3412_v24, 0.0  ;;  %v3427_v51 = vpop.f32.mrf.mxu1 }
 0x2b7   : > { %v4606_v62 = vrot.slane %v4605_v39, 2  ;;  %v4618_v54 = vadd.f32 %v4617_v30, %v4616_v47  ;;  %v3845_v19 = vmax.f32 %v2655_v44, 0.0  ;;  %v7132_v43 = vsel %vm7003_vm8, %v6952_v1, %v7131_v17  ;;  %v2659_v49 = vpop.f32.mrf.mxu0 }
 0x2b8   : > { %v5482_v48 = vadd.f32 %v5481_v58, %v5480_v25  ;;  %v5470_v26 = vrot.slane %v5469_v14, 2  ;;  %v5492_v27 = vsel %vm4114_vm3, %v4036_v21, 0.0  ;;  %v4037_v22 = vmax.f32 %v3423_v4, 0.0 }
 0x2b9   : > { %v4607_v7 = vadd.f32 %v4606_v62, %v4605_v39  ;;  %v5898_v37 = vmul.f32 0.0625, %v4618_v54  ;;  %v4629_v6 = vsel %vm4114_vm3, %v3845_v19, 0.0  ;;  %v2647_v2 = vadd.f32 %v10501_v53, %v2646_v50  ;;  %v8424_v62 = vpop.f32.mrf.mxu0 }
 0x2ba   : > { %v5994_v61 = vmul.f32 0.0625, %v5482_v48  ;;  %v5471_v46 = vadd.f32 %v5470_v26, %v5469_v14  ;;  %v4630_v5 = vadd.f32 %v4629_v6, %v4628_v41  ;;  %v5493_v23 = vsel %vm4114_vm3, %v4037_v22, 0.0  ;;  %v8616_v48 = vpop.f32.mrf.mxu1 }
 0x2bb   : > { %v4608_v31 = vrot.slane %v4607_v7, 1  ;;  %v4619_v20 = vsel %vm4114_vm3, %v3842_v34, 0.0  ;;  %v5483_v11 = vsel %vm4114_vm3, %v4034_v18, 0.0  ;;  %v5494_v60 = vadd.f32 %v5493_v23, %v5492_v27 }
 0x2bc   : > { %v5472_v15 = vrot.slane %v5471_v46, 1  ;;  %v4631_v42 = vrot.slane %v4630_v5, 4  ;;  %v3843_v16 = vmax.f32 %v2647_v2, 0.0  ;;  %v3415_v8 = vadd.f32 %v10501_v53, %v3414_v36 }
 0x2bd   : > { %v4609_v13 = vadd.f32 %v4608_v31, %v4607_v7  ;;  %v7970_v45 = vpack.c.bf16 %v5898_v37, %v5898_v37  ;;  %v8066_v55 = vpack.c.bf16 %v5994_v61, %v5994_v61  ;;  %v5495_v12 = vrot.slane %v5494_v60, 4  ;;  %v2662_v31 = vpop.f32.mrf.mxu0 }
 0x2be   : > { %v5473_v0 = vadd.f32 %v5472_v15, %v5471_v46  ;;  %v4632_v57 = vadd.f32 %v4631_v42, %v4630_v5  ;;  %v4620_v9 = vsel %vm4114_vm3, %v3843_v16, 0.0  ;;  %v4035_v59 = vmax.f32 %v3415_v8, 0.0  ;;  %v3430_v15 = vpop.f32.mrf.mxu1 }
 0x2bf   : > { %v5897_v33 = vmul.f32 0.0625, %v4609_v13  ;;  %v5496_v29 = vadd.f32 %v5495_v12, %v5494_v60  ;;  %v4621_v35 = vadd.f32 %v4620_v9, %v4619_v20  ;;  %v2668_v63 = vadd.f32 %v10501_v53, %v8423_v28  ;;  %v8427_v12 = vpop.f32.mrf.mxu0 }
 0x2c0   : > { %v5993_v52 = vmul.f32 0.0625, %v5473_v0  ;;  %v4633_v17 = vrot.slane %v4632_v57, 2  ;;  %v5484_v38 = vsel %vm4114_vm3, %v4035_v59, 0.0  ;;  %v3436_v41 = vadd.f32 %v10501_v53, %v8615_v10 }
 0x2c1   : > { %v7969_v1 = vpack.c.bf16 %v5897_v33, %v5897_v33  ;;  %v5497_v25 = vrot.slane %v5496_v29, 2  ;;  %v4622_v56 = vrot.slane %v4621_v35, 4  ;;  %v5485_v32 = vadd.f32 %v5484_v38, %v5483_v11 }
 0x2c2   : > { %v8065_v47 = vpack.c.bf16 %v5993_v52, %v5993_v52  ;;  %v6858_v39 = vunpack.c.l.b16 %v7970_v45  ;;  %v6954_v21 = vunpack.c.l.b16 %v8066_v55  ;;  %v4634_v24 = vadd.f32 %v4633_v17, %v4632_v57  ;;  %v8619_v52 = vpop.f32.mrf.mxu1 }
 0x2c3   : > { %v6857_v3 = vunpack.c.l.b16 %v7969_v1  ;;  %v5498_v58 = vadd.f32 %v5497_v25, %v5496_v29  ;;  %v4623_v14 = vadd.f32 %v4622_v56, %v4621_v35  ;;  %v5486_v44 = vrot.slane %v5485_v32, 4 }
 0x2c4   : > { %v6953_v30 = vunpack.c.l.b16 %v8065_v47  ;;  %v4635_v18 = vrot.slane %v4634_v24, 1  ;;  %v3848_v4 = vmax.f32 %v2668_v63, 0.0  ;;  %v4040_v54 = vmax.f32 %v3436_v41, 0.0 }
 0x2c5   : > { %v7049_v34 = vsel %vm7005_vm9, %v6857_v3, %v10571_v40  ;;  %v5499_v50 = vrot.slane %v5498_v58, 1  ;;  %v4624_v7 = vrot.slane %v4623_v14, 2  ;;  %v5487_v37 = vadd.f32 %v5486_v44, %v5485_v32  ;;  %v2675_v32 = vpop.f32.mrf.mxu0 }
 0x2c6   : > { %v7050_v26 = vsel %vm7007_vm10, %v6858_v39, %v7049_v34  ;;  %v7133_v19 = vsel %vm7005_vm9, %v6953_v30, %v7132_v43  ;;  %v4636_v36 = vadd.f32 %v4635_v18, %v4634_v24  ;;  %v2660_v6 = vadd.f32 %v10501_v53, %v2659_v49 }
 0x2c7   : > { %v7176_v27 = vpack.c.b16 %v7050_v26, %v7050_v26  ;;  %v7134_v22 = vsel %vm7007_vm10, %v6954_v21, %v7133_v19  ;;  %v5500_v46 = vadd.f32 %v5499_v50, %v5498_v58  ;;  %v4625_v40 = vadd.f32 %v4624_v7, %v4623_v14  ;;  %v8428_v7 = vpop.f32.mrf.mxu0 }
 0x2c8   : > { %v7188_v61 = vpack.c.b16 %v7134_v22, %v7134_v22  ;;  %v5900_v5 = vmul.f32 0.0625, %v4636_v36  ;;  %v5488_v23 = vrot.slane %v5487_v37, 2  ;;  %v3428_v43 = vadd.f32 %v10501_v53, %v3427_v51 }
 0x2c9   : > { %7225 = vst.msk [vmem:[%s9614_s12 + $0x18] sm:$0xf] %vm7218_vm11, %v7176_v27  ;;  %v2671_v2 = vadd.f32 %v10501_v53, %v8424_v62  ;;  %v5996_v20 = vmul.f32 0.0625, %v5500_v46  ;;  %v4626_v11 = vrot.slane %v4625_v40, 1  ;;  %v3846_v60 = vmax.f32 %v2660_v6, 0.0  ;;  %v3443_v62 = vpop.f32.mrf.mxu1 }
 0x2ca   : > { %7237 = vst.msk [vmem:[%s9614_s12 + $0x48] sm:$0xf] %vm7218_vm11, %v7188_v61  ;;  %v3439_v28 = vadd.f32 %v10501_v53, %v8616_v48  ;;  %v7972_v13 = vpack.c.bf16 %v5900_v5, %v5900_v5  ;;  %v5489_v42 = vadd.f32 %v5488_v23, %v5487_v37  ;;  %v4646_v16 = vsel %vm4114_vm3, %v3848_v4, 0.0 }
 0x2cb   : > { %v3849_v8 = vmax.f32 %v2671_v2, 0.0  ;;  %v4627_v10 = vadd.f32 %v4626_v11, %v4625_v40  ;;  %v5510_v45 = vsel %vm4114_vm3, %v4040_v54, 0.0  ;;  %v4038_v55 = vmax.f32 %v3428_v43, 0.0 }
 0x2cc   : > { %v4041_v0 = vmax.f32 %v3439_v28, 0.0  ;;  %v8068_v33 = vpack.c.bf16 %v5996_v20, %v5996_v20  ;;  %v5490_v57 = vrot.slane %v5489_v42, 1  ;;  %v4637_v9 = vsel %vm4114_vm3, %v3846_v60, 0.0 }
 0x2cd   : > { %v4647_v59 = vsel %vm4114_vm3, %v3849_v8, 0.0  ;;  %v6860_v29 = vunpack.c.l.b16 %v7972_v13  ;;  %v5899_v35 = vmul.f32 0.0625, %v4627_v10  ;;  %v2663_v38 = vadd.f32 %v10501_v53, %v2662_v31  ;;  %v8620_v31 = vpop.f32.mrf.mxu1 }
 0x2ce   : > { %v4648_v63 = vadd.f32 %v4647_v59, %v4646_v16  ;;  %v5511_v49 = vsel %vm4114_vm3, %v4041_v0, 0.0  ;;  %v5491_v1 = vadd.f32 %v5490_v57, %v5489_v42  ;;  %v3431_v41 = vadd.f32 %v10501_v53, %v3430_v15  ;;  %v2678_v0 = vpop.f32.mrf.mxu0 }
 0x2cf   : > { %v5512_v17 = vadd.f32 %v5511_v49, %v5510_v45  ;;  %v7971_v51 = vpack.c.bf16 %v5899_v35, %v5899_v35  ;;  %v2684_v25 = vadd.f32 %v10501_v53, %v8427_v12  ;;  %v3452_v56 = vadd.f32 %v10501_v53, %v8619_v52  ;;  %v3446_v12 = vpop.f32.mrf.mxu1 }
 0x2d0   : > { %v4649_v47 = vrot.slane %v4648_v63, 4  ;;  %v5995_v39 = vmul.f32 0.0625, %v5491_v1  ;;  %v3847_v3 = vmax.f32 %v2663_v38, 0.0  ;;  %v4039_v24 = vmax.f32 %v3431_v41, 0.0 }
 0x2d1   : > { %v5513_v21 = vrot.slane %v5512_v17, 4  ;;  %v6859_v30 = vunpack.c.l.b16 %v7971_v51  ;;  %v5501_v58 = vsel %vm4114_vm3, %v4038_v55, 0.0  ;;  %v3852_v44 = vmax.f32 %v2684_v25, 0.0 }
 0x2d2   : > { %v4650_v14 = vadd.f32 %v4649_v47, %v4648_v63  ;;  %v8067_v34 = vpack.c.bf16 %v5995_v39, %v5995_v39  ;;  %v4638_v4 = vsel %vm4114_vm3, %v3847_v3, 0.0  ;;  %v5502_v54 = vsel %vm4114_vm3, %v4039_v24, 0.0 }
 0x2d3   : > { %v5514_v18 = vadd.f32 %v5513_v21, %v5512_v17  ;;  %v4639_v26 = vadd.f32 %v4638_v4, %v4637_v9  ;;  %v5503_v19 = vadd.f32 %v5502_v54, %v5501_v58  ;;  %v4044_v50 = vmax.f32 %v3452_v56, 0.0  ;;  %v8431_v56 = vpop.f32.mrf.mxu0 }
 0x2d4   : > { %v4651_v48 = vrot.slane %v4650_v14, 2  ;;  %v6956_v27 = vunpack.c.l.b16 %v8068_v33  ;;  %v10615_v22 = vsel %vm6995_vm4, %v6860_v29, %v6859_v30  ;;  %v6955_v36 = vunpack.c.l.b16 %v8067_v34 }
 0x2d5   : > { %v5515_v37 = vrot.slane %v5514_v18, 2  ;;  %v4640_v46 = vrot.slane %v4639_v26, 4  ;;  %v5504_v40 = vrot.slane %v5503_v19, 4  ;;  %v2676_v6 = vadd.f32 %v10501_v53, %v2675_v32 }
 0x2d6   : > { %v4652_v61 = vadd.f32 %v4651_v48, %v4650_v14  ;;  %v4664_v23 = vsel %vm4114_vm3, %v3852_v44, 0.0  ;;  %v3444_v43 = vadd.f32 %v10501_v53, %v3443_v62  ;;  %v2687_v2 = vadd.f32 %v10501_v53, %v8428_v7  ;;  %v8623_v44 = vpop.f32.mrf.mxu1 }
 0x2d7   : > { %v5516_v5 = vadd.f32 %v5515_v37, %v5514_v18  ;;  %v4641_v20 = vadd.f32 %v4640_v46, %v4639_v26  ;;  %v5505_v11 = vadd.f32 %v5504_v40, %v5503_v19  ;;  %v5528_v60 = vsel %vm4114_vm3, %v4044_v50, 0.0  ;;  %v2691_v50 = vpop.f32.mrf.mxu0 }
 0x2d8   : > { %v4653_v15 = vrot.slane %v4652_v61, 1  ;;  %v10623_v28 = vsel %vm6995_vm4, %v6956_v27, %v6955_v36  ;;  %v3853_v42 = vmax.f32 %v2687_v2, 0.0  ;;  %v3455_v16 = vadd.f32 %v10501_v53, %v8620_v31  ;;  %v3459_v31 = vpop.f32.mrf.mxu1 }
 0x2d9   : > { %v5517_v13 = vrot.slane %v5516_v5, 1  ;;  %v4642_v10 = vrot.slane %v4641_v20, 2  ;;  %v5506_v45 = vrot.slane %v5505_v11, 2  ;;  %v3850_v55 = vmax.f32 %v2676_v6, 0.0 }
 0x2da   : > { %v4654_v8 = vadd.f32 %v4653_v15, %v4652_v61  ;;  %v4042_v57 = vmax.f32 %v3444_v43, 0.0  ;;  %v4665_v9 = vsel %vm4114_vm3, %v3853_v42, 0.0  ;;  %v4045_v59 = vmax.f32 %v3455_v16, 0.0 }
 0x2db   : > { %v5518_v33 = vadd.f32 %v5517_v13, %v5516_v5  ;;  %v4643_v29 = vadd.f32 %v4642_v10, %v4641_v20  ;;  %v5507_v35 = vadd.f32 %v5506_v45, %v5505_v11  ;;  %v4666_v63 = vadd.f32 %v4665_v9, %v4664_v23  ;;  %v8432_v13 = vpop.f32.mrf.mxu0 }
 0x2dc   : > { %v5902_v52 = vmul.f32 0.0625, %v4654_v8  ;;  %v5529_v1 = vsel %vm4114_vm3, %v4045_v59, 0.0  ;;  %v2679_v17 = vadd.f32 %v10501_v53, %v2678_v0  ;;  %v3447_v38 = vadd.f32 %v10501_v53, %v3446_v12 }
 0x2dd   : > { %v5998_v49 = vmul.f32 0.0625, %v5518_v33  ;;  %v4644_v41 = vrot.slane %v4643_v29, 1  ;;  %v5508_v51 = vrot.slane %v5507_v35, 1  ;;  %v4655_v47 = vsel %vm4114_vm3, %v3850_v55, 0.0  ;;  %v8624_v33 = vpop.f32.mrf.mxu1 }
 0x2de   : > { %v4667_v25 = vrot.slane %v4666_v63, 4  ;;  %v5519_v32 = vsel %vm4114_vm3, %v4042_v57, 0.0  ;;  %v5530_v39 = vadd.f32 %v5529_v1, %v5528_v60  ;;  %v3851_v21 = vmax.f32 %v2679_v17, 0.0  ;;  %v2694_v1 = vpop.f32.mrf.mxu0 }
 0x2df   : > { %v4043_v3 = vmax.f32 %v3447_v38, 0.0  ;;  %v7974_v24 = vpack.c.bf16 %v5902_v52, %v5902_v52  ;;  %v4645_v30 = vadd.f32 %v4644_v41, %v4643_v29  ;;  %v5509_v58 = vadd.f32 %v5508_v51, %v5507_v35 }
 0x2e0   : > { %v4668_v14 = vadd.f32 %v4667_v25, %v4666_v63  ;;  %v8070_v62 = vpack.c.bf16 %v5998_v49, %v5998_v49  ;;  %v5531_v34 = vrot.slane %v5530_v39, 4  ;;  %v4656_v18 = vsel %vm4114_vm3, %v3851_v21, 0.0 }
 0x2e1   : > { %v5520_v4 = vsel %vm4114_vm3, %v4043_v3, 0.0  ;;  %v5901_v54 = vmul.f32 0.0625, %v4645_v30  ;;  %v5997_v48 = vmul.f32 0.0625, %v5509_v58  ;;  %v4657_v19 = vadd.f32 %v4656_v18, %v4655_v47 }
 0x2e2   : > { %v4669_v26 = vrot.slane %v4668_v14, 2  ;;  %v5532_v7 = vadd.f32 %v5531_v34, %v5530_v39  ;;  %v5521_v27 = vadd.f32 %v5520_v4, %v5519_v32  ;;  %v2700_v36 = vadd.f32 %v10501_v53, %v8431_v56  ;;  %v3462_v56 = vpop.f32.mrf.mxu1 }
 0x2e3   : > { %v3468_v37 = vadd.f32 %v10501_v53, %v8623_v44  ;;  %v7973_v61 = vpack.c.bf16 %v5901_v54, %v5901_v54  ;;  %v8069_v46 = vpack.c.bf16 %v5997_v48, %v5997_v48  ;;  %v4658_v6 = vrot.slane %v4657_v19, 4  ;;  %v8435_v44 = vpop.f32.mrf.mxu0 }
 0x2e4   : > { %v4670_v40 = vadd.f32 %v4669_v26, %v4668_v14  ;;  %v5533_v5 = vrot.slane %v5532_v7, 2  ;;  %v5522_v23 = vrot.slane %v5521_v27, 4  ;;  %v3856_v43 = vmax.f32 %v2700_v36, 0.0 }
 0x2e5   : > { %v4048_v2 = vmax.f32 %v3468_v37, 0.0  ;;  %v6861_v15 = vunpack.c.l.b16 %v7973_v61  ;;  %v6957_v20 = vunpack.c.l.b16 %v8069_v46  ;;  %v4659_v60 = vadd.f32 %v4658_v6, %v4657_v19 }
 0x2e6   : > { %v4671_v11 = vrot.slane %v4670_v40, 1  ;;  %v6862_v42 = vunpack.c.l.b16 %v7974_v24  ;;  %v6958_v16 = vunpack.c.l.b16 %v8070_v62  ;;  %v5534_v8 = vadd.f32 %v5533_v5, %v5532_v7 }
 0x2e7   : > { %v5523_v10 = vadd.f32 %v5522_v23, %v5521_v27  ;;  %v4660_v55 = vrot.slane %v4659_v60, 2  ;;  %v4682_v0 = vsel %vm4114_vm3, %v3856_v43, 0.0  ;;  %v5546_v12 = vsel %vm4114_vm3, %v4048_v2, 0.0  ;;  %v2707_v2 = vpop.f32.mrf.mxu0 }
 0x2e8   : > { %v4672_v45 = vadd.f32 %v4671_v11, %v4670_v40  ;;  %v7052_v57 = vsel %vm6997_vm5, %v6861_v15, %v10615_v22  ;;  %v7136_v9 = vsel %vm6997_vm5, %v6957_v20, %v10623_v28  ;;  %v5535_v59 = vrot.slane %v5534_v8, 1 }
 0x2e9   : > { %v5524_v52 = vrot.slane %v5523_v10, 2  ;;  %v4661_v35 = vadd.f32 %v4660_v55, %v4659_v60  ;;  %v2692_v63 = vadd.f32 %v10501_v53, %v2691_v50  ;;  %v3460_v49 = vadd.f32 %v10501_v53, %v3459_v31  ;;  %v8627_v50 = vpop.f32.mrf.mxu1 }
 0x2ea   : > { %v5904_v29 = vmul.f32 0.0625, %v4672_v45  ;;  %v5536_v17 = vadd.f32 %v5535_v59, %v5534_v8  ;;  %v2703_v41 = vadd.f32 %v10501_v53, %v8432_v13  ;;  %v3471_v51 = vadd.f32 %v10501_v53, %v8624_v33 }
 0x2eb   : > { %v5525_v38 = vadd.f32 %v5524_v52, %v5523_v10  ;;  %v4662_v22 = vrot.slane %v4661_v35, 1  ;;  %v7053_v25 = vsel %vm6999_vm6, %v6862_v42, %v7052_v57  ;;  %v3854_v28 = vmax.f32 %v2692_v63, 0.0  ;;  %v3475_v13 = vpop.f32.mrf.mxu1  ;;  %v8436_v52 = vpop.f32.mrf.mxu0 }
 0x2ec   : > { %v7976_v47 = vpack.c.bf16 %v5904_v29, %v5904_v29  ;;  %v4046_v39 = vmax.f32 %v3460_v49, 0.0  ;;  %v3857_v21 = vmax.f32 %v2703_v41, 0.0  ;;  %v4049_v3 = vmax.f32 %v3471_v51, 0.0 }
 0x2ed   : > { %v5526_v32 = vrot.slane %v5525_v38, 1  ;;  %v6000_v30 = vmul.f32 0.0625, %v5536_v17  ;;  %v4663_v58 = vadd.f32 %v4662_v22, %v4661_v35  ;;  %v7137_v14 = vsel %vm6999_vm6, %v6958_v16, %v7136_v9 }
 0x2ee   : > { %v6864_v24 = vunpack.c.l.b16 %v7976_v47  ;;  %v4673_v34 = vsel %vm4114_vm3, %v3854_v28, 0.0  ;;  %v4683_v18 = vsel %vm4114_vm3, %v3857_v21, 0.0  ;;  %v5547_v4 = vsel %vm4114_vm3, %v4049_v3, 0.0 }
 0x2ef   : > { %v5527_v62 = vadd.f32 %v5526_v32, %v5525_v38  ;;  %v5903_v54 = vmul.f32 0.0625, %v4663_v58  ;;  %v4684_v48 = vadd.f32 %v4683_v18, %v4682_v0  ;;  %v5548_v26 = vadd.f32 %v5547_v4, %v5546_v12  ;;  %v10667_v38 = vld [vmem:[%s11113_s2] ss:$0 sm:$0xff] }
 0x2f0   : > { %v2695_v19 = vadd.f32 %v10501_v53, %v2694_v1  ;;  %v5537_v27 = vsel %vm4114_vm3, %v4046_v39, 0.0  ;;  %v3463_v36 = vadd.f32 %v10501_v53, %v3462_v56  ;;  %v2716_v37 = vadd.f32 %v10501_v53, %v8435_v44  ;;  %v8628_v1 = vpop.f32.mrf.mxu1 }
 0x2f1   : > { %v5999_v7 = vmul.f32 0.0625, %v5527_v62  ;;  %v7975_v61 = vpack.c.bf16 %v5903_v54, %v5903_v54  ;;  %v4685_v46 = vrot.slane %v4684_v48, 4  ;;  %v5549_v40 = vrot.slane %v5548_v26, 4 }
 0x2f2   : > { %v3855_v6 = vmax.f32 %v2695_v19, 0.0  ;;  %v8072_v31 = vpack.c.bf16 %v6000_v30, %v6000_v30  ;;  %v4047_v23 = vmax.f32 %v3463_v36, 0.0  ;;  %v3860_v43 = vmax.f32 %v2716_v37, 0.0  ;;  %v3478_v4 = vpop.f32.mrf.mxu1 }
 0x2f3   : > { %v8071_v5 = vpack.c.bf16 %v5999_v7, %v5999_v7  ;;  %v6863_v15 = vunpack.c.l.b16 %v7975_v61  ;;  %v4686_v20 = vadd.f32 %v4685_v46, %v4684_v48  ;;  %v5550_v11 = vadd.f32 %v5549_v40, %v5548_v26 }
 0x2f4   : > { %v4674_v60 = vsel %vm4114_vm3, %v3855_v6, 0.0  ;;  %v5538_v8 = vsel %vm4114_vm3, %v4047_v23, 0.0  ;;  %v3484_v10 = vadd.f32 %v10501_v53, %v8627_v50  ;;  %v6960_v33 = vunpack.c.l.b16 %v8072_v31 }
 0x2f5   : > { %v6959_v42 = vunpack.c.l.b16 %v8071_v5  ;;  %v4675_v16 = vadd.f32 %v4674_v60, %v4673_v34  ;;  %v7054_v45 = vsel %vm7001_vm7, %v6863_v15, %v7053_v25  ;;  %v4687_v55 = vrot.slane %v4686_v20, 2 }
 0x2f6   : > { %v5551_v0 = vrot.slane %v5550_v11, 2  ;;  %v5539_v12 = vadd.f32 %v5538_v8, %v5537_v27  ;;  %v4700_v59 = vsel %vm4114_vm3, %v3860_v43, 0.0  ;;  %v10662_v63 = vsel %vm7003_vm8, %v6864_v24, %v7054_v45 }
 0x2f7   : > { %v7138_v57 = vsel %vm7001_vm7, %v6959_v42, %v7137_v14  ;;  %v4676_v9 = vrot.slane %v4675_v16, 4  ;;  %v4688_v29 = vadd.f32 %v4687_v55, %v4686_v20  ;;  %v4052_v17 = vmax.f32 %v3484_v10, 0.0  ;;  %v2710_v14 = vpop.f32.mrf.mxu0 }
 0x2f8   : > { %v5552_v35 = vadd.f32 %v5551_v0, %v5550_v11  ;;  %v5540_v49 = vrot.slane %v5539_v12, 4  ;;  %v2708_v41 = vadd.f32 %v10667_v38, %v2707_v2  ;;  %v3476_v51 = vadd.f32 %v10667_v38, %v3475_v13  ;;  %v8631_v2 = vpop.f32.mrf.mxu1 }
 0x2f9   : > { %v4677_v53 = vadd.f32 %v4676_v9, %v4675_v16  ;;  %v4689_v47 = vrot.slane %v4688_v29, 1  ;;  %v2719_v28 = vadd.f32 %v10667_v38, %v8436_v52  ;;  %v3487_v21 = vadd.f32 %v10667_v38, %v8628_v1  ;;  %v8439_v6 = vpop.f32.mrf.mxu0 }
 0x2fa   : > { %v5553_v22 = vrot.slane %v5552_v35, 1  ;;  %v5541_v25 = vadd.f32 %v5540_v49, %v5539_v12  ;;  %v3858_v32 = vmax.f32 %v2708_v41, 0.0  ;;  %v4050_v39 = vmax.f32 %v3476_v51, 0.0  ;;  %v3491_v52 = vpop.f32.mrf.mxu1 }
 0x2fb   : > { %v4678_v56 = vrot.slane %v4677_v53, 2  ;;  %v4690_v3 = vadd.f32 %v4689_v47, %v4688_v29  ;;  %v3861_v58 = vmax.f32 %v2719_v28, 0.0  ;;  %v7139_v62 = vsel %vm7003_vm8, %v6960_v33, %v7138_v57  ;;  %v2723_v12 = vpop.f32.mrf.mxu0 }
 0x2fc   : > { %v5554_v24 = vadd.f32 %v5553_v22, %v5552_v35  ;;  %v5542_v30 = vrot.slane %v5541_v25, 2  ;;  %v5564_v34 = vsel %vm4114_vm3, %v4052_v17, 0.0  ;;  %v4053_v18 = vmax.f32 %v3487_v21, 0.0 }
 0x2fd   : > { %v4679_v44 = vadd.f32 %v4678_v56, %v4677_v53  ;;  %v5906_v54 = vmul.f32 0.0625, %v4690_v3  ;;  %v4701_v19 = vsel %vm4114_vm3, %v3861_v58, 0.0  ;;  %v2711_v36 = vadd.f32 %v10667_v38, %v2710_v14  ;;  %v8440_v56 = vpop.f32.mrf.mxu0 }
 0x2fe   : > { %v6002_v48 = vmul.f32 0.0625, %v5554_v24  ;;  %v5543_v26 = vadd.f32 %v5542_v30, %v5541_v25  ;;  %v4702_v7 = vadd.f32 %v4701_v19, %v4700_v59  ;;  %v5565_v27 = vsel %vm4114_vm3, %v4053_v18, 0.0  ;;  %v8632_v24 = vpop.f32.mrf.mxu1 }
 0x2ff   : > { %v4680_v50 = vrot.slane %v4679_v44, 1  ;;  %v4691_v61 = vsel %vm4114_vm3, %v3858_v32, 0.0  ;;  %v5555_v46 = vsel %vm4114_vm3, %v4050_v39, 0.0  ;;  %v5566_v40 = vadd.f32 %v5565_v27, %v5564_v34 }
 0x300   : > { %v5544_v37 = vrot.slane %v5543_v26, 1  ;;  %v4703_v5 = vrot.slane %v4702_v7, 4  ;;  %v3859_v23 = vmax.f32 %v2711_v36, 0.0  ;;  %v3479_v43 = vadd.f32 %v10667_v38, %v3478_v4 }
 0x301   : > { %v4681_v31 = vadd.f32 %v4680_v50, %v4679_v44  ;;  %v7978_v15 = vpack.c.bf16 %v5906_v54, %v5906_v54  ;;  %v8074_v20 = vpack.c.bf16 %v6002_v48, %v6002_v48  ;;  %v5567_v60 = vrot.slane %v5566_v40, 4  ;;  %v2726_v50 = vpop.f32.mrf.mxu0 }
 0x302   : > { %v5545_v11 = vadd.f32 %v5544_v37, %v5543_v26  ;;  %v4704_v42 = vadd.f32 %v4703_v5, %v4702_v7  ;;  %v4692_v16 = vsel %vm4114_vm3, %v3859_v23, 0.0  ;;  %v4051_v8 = vmax.f32 %v3479_v43, 0.0  ;;  %v3494_v37 = vpop.f32.mrf.mxu1 }
 0x303   : > { %v5905_v13 = vmul.f32 0.0625, %v4681_v31  ;;  %v5568_v45 = vadd.f32 %v5567_v60, %v5566_v40  ;;  %v4693_v55 = vadd.f32 %v4692_v16, %v4691_v61  ;;  %v2732_v0 = vadd.f32 %v10667_v38, %v8439_v6 }
 0x304   : > { %v6001_v10 = vmul.f32 0.0625, %v5545_v11  ;;  %v4705_v57 = vrot.slane %v4704_v42, 2  ;;  %v5556_v9 = vsel %vm4114_vm3, %v4051_v8, 0.0  ;;  %v3500_v59 = vadd.f32 %v10667_v38, %v8631_v2  ;;  %v8635_v16 = vpop.f32.mrf.mxu1 }
 0x305   : > { %v7977_v33 = vpack.c.bf16 %v5905_v13, %v5905_v13  ;;  %v5569_v35 = vrot.slane %v5568_v45, 2  ;;  %v4694_v49 = vrot.slane %v4693_v55, 4  ;;  %v5557_v1 = vadd.f32 %v5556_v9, %v5555_v46 }
 0x306   : > { %v8073_v29 = vpack.c.bf16 %v6001_v10, %v6001_v10  ;;  %v6866_v53 = vunpack.c.l.b16 %v7978_v15  ;;  %v6962_v17 = vunpack.c.l.b16 %v8074_v20  ;;  %v4706_v51 = vadd.f32 %v4705_v57, %v4704_v42  ;;  %v8443_v20 = vpop.f32.mrf.mxu0 }
 0x307   : > { %v6865_v41 = vunpack.c.l.b16 %v7977_v33  ;;  %v5570_v22 = vadd.f32 %v5569_v35, %v5568_v45  ;;  %v4695_v25 = vadd.f32 %v4694_v49, %v4693_v55  ;;  %v5558_v28 = vrot.slane %v5557_v1, 4 }
 0x308   : > { %v6961_v47 = vunpack.c.l.b16 %v8073_v29  ;;  %v4707_v39 = vrot.slane %v4706_v51, 1  ;;  %v3864_v21 = vmax.f32 %v2732_v0, 0.0  ;;  %v4056_v3 = vmax.f32 %v3500_v59, 0.0  ;;  %v2739_v35 = vpop.f32.mrf.mxu0 }
 0x309   : > { %v7056_v32 = vsel %vm7005_vm9, %v6865_v41, %v10662_v63  ;;  %v5571_v14 = vrot.slane %v5570_v22, 1  ;;  %v4696_v44 = vrot.slane %v4695_v25, 2  ;;  %v5559_v54 = vadd.f32 %v5558_v28, %v5557_v1 }
 0x30a   : > { %v7057_v30 = vsel %vm7007_vm10, %v6866_v53, %v7056_v32  ;;  %v7140_v58 = vsel %vm7005_vm9, %v6961_v47, %v7139_v62  ;;  %v4708_v4 = vadd.f32 %v4707_v39, %v4706_v51  ;;  %v2724_v19 = vadd.f32 %v10667_v38, %v2723_v12 }
 0x30b   : > { %v7177_v34 = vpack.c.b16 %v7057_v30, %v7057_v30  ;;  %v7141_v18 = vsel %vm7007_vm10, %v6962_v17, %v7140_v58  ;;  %v5572_v26 = vadd.f32 %v5571_v14, %v5570_v22  ;;  %v4697_v63 = vadd.f32 %v4696_v44, %v4695_v25  ;;  %v3507_v25 = vpop.f32.mrf.mxu1  ;;  %v8444_v58 = vpop.f32.mrf.mxu0 }
 0x30c   : > { %v7189_v48 = vpack.c.b16 %v7141_v18, %v7141_v18  ;;  %v5908_v7 = vmul.f32 0.0625, %v4708_v4  ;;  %v5560_v27 = vrot.slane %v5559_v54, 2  ;;  %v3492_v62 = vadd.f32 %v10667_v38, %v3491_v52 }
 0x30d   : > { %7226 = vst.msk [vmem:[%s9614_s12 + $0x1c] sm:$0xf] %vm7218_vm11, %v7177_v34  ;;  %v2735_v36 = vadd.f32 %v10667_v38, %v8440_v56  ;;  %v6004_v61 = vmul.f32 0.0625, %v5572_v26  ;;  %v4698_v46 = vrot.slane %v4697_v63, 1  ;;  %v3503_v40 = vadd.f32 %v10667_v38, %v8632_v24 }
 0x30e   : > { %7238 = vst.msk [vmem:[%s9614_s12 + $0x4c] sm:$0xf] %vm7218_vm11, %v7189_v48  ;;  %v5561_v6 = vadd.f32 %v5560_v27, %v5559_v54  ;;  %v4718_v31 = vsel %vm4114_vm3, %v3864_v21, 0.0  ;;  %v5582_v43 = vsel %vm4114_vm3, %v4056_v3, 0.0  ;;  %v3862_v2 = vmax.f32 %v2724_v19, 0.0 }
 0x30f   : > { %v3865_v5 = vmax.f32 %v2735_v36, 0.0  ;;  %v4699_v23 = vadd.f32 %v4698_v46, %v4697_v63  ;;  %v4057_v15 = vmax.f32 %v3503_v40, 0.0  ;;  %v7980_v11 = vpack.c.bf16 %v5908_v7, %v5908_v7  ;;  %v8636_v63 = vpop.f32.mrf.mxu1 }
 0x310   : > { %v5562_v60 = vrot.slane %v5561_v6, 1  ;;  %v4054_v13 = vmax.f32 %v3492_v62, 0.0  ;;  %v8076_v8 = vpack.c.bf16 %v6004_v61, %v6004_v61  ;;  %v2727_v33 = vadd.f32 %v10667_v38, %v2726_v50 }
 0x311   : > { %v4719_v42 = vsel %vm4114_vm3, %v3865_v5, 0.0  ;;  %v5907_v10 = vmul.f32 0.0625, %v4699_v23  ;;  %v5583_v55 = vsel %vm4114_vm3, %v4057_v15, 0.0  ;;  %v3495_v57 = vadd.f32 %v10667_v38, %v3494_v37  ;;  %v2742_v15 = vpop.f32.mrf.mxu0 }
 0x312   : > { %v4720_v45 = vadd.f32 %v4719_v42, %v4718_v31  ;;  %v5563_v0 = vadd.f32 %v5562_v60, %v5561_v6  ;;  %v5584_v12 = vadd.f32 %v5583_v55, %v5582_v43  ;;  %v2748_v52 = vadd.f32 %v10667_v38, %v8443_v20  ;;  %v3510_v20 = vpop.f32.mrf.mxu1 }
 0x313   : > { %v7979_v9 = vpack.c.bf16 %v5907_v10, %v5907_v10  ;;  %v3516_v29 = vadd.f32 %v10667_v38, %v8635_v16  ;;  %v3863_v53 = vmax.f32 %v2727_v33, 0.0  ;;  %v4055_v17 = vmax.f32 %v3495_v57, 0.0 }
 0x314   : > { %v4721_v59 = vrot.slane %v4720_v45, 4  ;;  %v6003_v49 = vmul.f32 0.0625, %v5563_v0  ;;  %v5585_v1 = vrot.slane %v5584_v12, 4  ;;  %v10706_v41 = vunpack.c.l.b16 %v7980_v11 }
 0x315   : > { %v4709_v51 = vsel %vm4114_vm3, %v3862_v2, 0.0  ;;  %v5573_v47 = vsel %vm4114_vm3, %v4054_v13, 0.0  ;;  %v4710_v32 = vsel %vm4114_vm3, %v3863_v53, 0.0  ;;  %v5574_v39 = vsel %vm4114_vm3, %v4055_v17, 0.0 }
 0x316   : > { %v4722_v22 = vadd.f32 %v4721_v59, %v4720_v45  ;;  %v8075_v28 = vpack.c.bf16 %v6003_v49, %v6003_v49  ;;  %v5586_v56 = vadd.f32 %v5585_v1, %v5584_v12  ;;  %v4711_v3 = vadd.f32 %v4710_v32, %v4709_v51 }
 0x317   : > { %v5575_v24 = vadd.f32 %v5574_v39, %v5573_v47  ;;  %v3868_v30 = vmax.f32 %v2748_v52, 0.0  ;;  %v10712_v14 = vunpack.c.l.b16 %v8076_v8  ;;  %v10714_v44 = vunpack.c.l.b16 %v7979_v9 }
 0x318   : > { %v4723_v21 = vrot.slane %v4722_v22, 2  ;;  %v5587_v34 = vrot.slane %v5586_v56, 2  ;;  %v4060_v18 = vmax.f32 %v3516_v29, 0.0  ;;  %v4712_v54 = vrot.slane %v4711_v3, 4  ;;  %v8447_v29 = vpop.f32.mrf.mxu0 }
 0x319   : > { %v5576_v48 = vrot.slane %v5575_v24, 4  ;;  %v2740_v26 = vadd.f32 %v10667_v38, %v2739_v35  ;;  %v10717_v19 = vunpack.c.l.b16 %v8075_v28  ;;  %v3508_v7 = vadd.f32 %v10667_v38, %v3507_v25  ;;  %v8639_v25 = vpop.f32.mrf.mxu1 }
 0x31a   : > { %v4724_v4 = vadd.f32 %v4723_v21, %v4722_v22  ;;  %v5588_v50 = vadd.f32 %v5587_v34, %v5586_v56  ;;  %v2751_v27 = vadd.f32 %v10667_v38, %v8444_v58  ;;  %v4713_v36 = vadd.f32 %v4712_v54, %v4711_v3  ;;  %v2755_v58 = vpop.f32.mrf.mxu0 }
 0x31b   : > { %v5577_v37 = vadd.f32 %v5576_v48, %v5575_v24  ;;  %v4736_v61 = vsel %vm4114_vm3, %v3868_v30, 0.0  ;;  %v5600_v40 = vsel %vm4114_vm3, %v4060_v18, 0.0  ;;  %v3519_v31 = vadd.f32 %v10667_v38, %v8636_v63 }
 0x31c   : > { %v4725_v62 = vrot.slane %v4724_v4, 1  ;;  %v5589_v46 = vrot.slane %v5588_v50, 1  ;;  %v3869_v6 = vmax.f32 %v2751_v27, 0.0  ;;  %v4714_v23 = vrot.slane %v4713_v36, 2 }
 0x31d   : > { %v5578_v43 = vrot.slane %v5577_v37, 2  ;;  %v3866_v2 = vmax.f32 %v2740_v26, 0.0  ;;  %v4058_v60 = vmax.f32 %v3508_v7, 0.0  ;;  %v4061_v42 = vmax.f32 %v3519_v31, 0.0  ;;  %v3523_v7 = vpop.f32.mrf.mxu1  ;;  %v8448_v31 = vpop.f32.mrf.mxu0 }
 0x31e   : > { %v4726_v5 = vadd.f32 %v4725_v62, %v4724_v4  ;;  %v5590_v11 = vadd.f32 %v5589_v46, %v5588_v50  ;;  %v4737_v13 = vsel %vm4114_vm3, %v3869_v6, 0.0  ;;  %v4715_v8 = vadd.f32 %v4714_v23, %v4713_v36 }
 0x31f   : > { %v5579_v10 = vadd.f32 %v5578_v43, %v5577_v37  ;;  %v4738_v45 = vadd.f32 %v4737_v13, %v4736_v61  ;;  %v5601_v0 = vsel %vm4114_vm3, %v4061_v42, 0.0  ;;  %v2743_v12 = vadd.f32 %v10667_v38, %v2742_v15 }
 0x320   : > { %v5910_v16 = vmul.f32 0.0625, %v4726_v5  ;;  %v6006_v55 = vmul.f32 0.0625, %v5590_v11  ;;  %v3511_v33 = vadd.f32 %v10667_v38, %v3510_v20  ;;  %v4716_v57 = vrot.slane %v4715_v8, 1 }
 0x321   : > { %v5580_v9 = vrot.slane %v5579_v10, 1  ;;  %v4727_v59 = vsel %vm4114_vm3, %v3866_v2, 0.0  ;;  %v4739_v52 = vrot.slane %v4738_v45, 4  ;;  %v5591_v35 = vsel %vm4114_vm3, %v4058_v60, 0.0 }
 0x322   : > { %v5602_v49 = vadd.f32 %v5601_v0, %v5600_v40  ;;  %v3867_v1 = vmax.f32 %v2743_v12, 0.0  ;;  %v4059_v53 = vmax.f32 %v3511_v33, 0.0  ;;  %v7982_v17 = vpack.c.bf16 %v5910_v16, %v5910_v16 }
 0x323   : > { %v4717_v51 = vadd.f32 %v4716_v57, %v4715_v8  ;;  %v5581_v47 = vadd.f32 %v5580_v9, %v5579_v10  ;;  %v4740_v22 = vadd.f32 %v4739_v52, %v4738_v45  ;;  %v8078_v28 = vpack.c.bf16 %v6006_v55, %v6006_v55  ;;  %v2758_v45 = vpop.f32.mrf.mxu0 }
 0x324   : > { %v5603_v56 = vrot.slane %v5602_v49, 4  ;;  %v4728_v32 = vsel %vm4114_vm3, %v3867_v1, 0.0  ;;  %v5592_v39 = vsel %vm4114_vm3, %v4059_v53, 0.0  ;;  %v2764_v4 = vadd.f32 %v10667_v38, %v8447_v29 }
 0x325   : > { %v5909_v21 = vmul.f32 0.0625, %v4717_v51  ;;  %v6005_v3 = vmul.f32 0.0625, %v5581_v47  ;;  %v4741_v24 = vrot.slane %v4740_v22, 2  ;;  %v4729_v30 = vadd.f32 %v4728_v32, %v4727_v59 }
 0x326   : > { %v5604_v34 = vadd.f32 %v5603_v56, %v5602_v49  ;;  %v5593_v18 = vadd.f32 %v5592_v39, %v5591_v35  ;;  %v3532_v54 = vadd.f32 %v10667_v38, %v8639_v25  ;;  %v7058_v27 = vsel %vm6995_vm4, %v10706_v41, %v10714_v44  ;;  %v8640_v41 = vpop.f32.mrf.mxu1  ;;  %v8451_v25 = vpop.f32.mrf.mxu0 }
 0x327   : > { %v7981_v48 = vpack.c.bf16 %v5909_v21, %v5909_v21  ;;  %v8077_v26 = vpack.c.bf16 %v6005_v3, %v6005_v3  ;;  %v4742_v63 = vadd.f32 %v4741_v24, %v4740_v22  ;;  %v4730_v50 = vrot.slane %v4729_v30, 4 }
 0x328   : > { %v7142_v62 = vsel %vm6995_vm4, %v10712_v14, %v10717_v19  ;;  %v5605_v36 = vrot.slane %v5604_v34, 2  ;;  %v5594_v37 = vrot.slane %v5593_v18, 4  ;;  %v6870_v5 = vunpack.c.l.b16 %v7982_v17  ;;  %v3526_v29 = vpop.f32.mrf.mxu1 }
 0x329   : > { %v6869_v61 = vunpack.c.l.b16 %v7981_v48  ;;  %v6965_v46 = vunpack.c.l.b16 %v8077_v26  ;;  %v4743_v40 = vrot.slane %v4742_v63, 1  ;;  %v4731_v6 = vadd.f32 %v4730_v50, %v4729_v30 }
 0x32a   : > { %v6966_v23 = vunpack.c.l.b16 %v8078_v28  ;;  %v5606_v43 = vadd.f32 %v5605_v36, %v5604_v34  ;;  %v5595_v2 = vadd.f32 %v5594_v37, %v5593_v18  ;;  %v3872_v11 = vmax.f32 %v2764_v4, 0.0  ;;  %v2771_v37 = vpop.f32.mrf.mxu0 }
 0x32b   : > { %v4744_v15 = vadd.f32 %v4743_v40, %v4742_v63  ;;  %v4732_v20 = vrot.slane %v4731_v6, 2  ;;  %v4064_v60 = vmax.f32 %v3532_v54, 0.0  ;;  %v7059_v44 = vsel %vm6997_vm5, %v6869_v61, %v7058_v27 }
 0x32c   : > { %v7143_v14 = vsel %vm6997_vm5, %v6965_v46, %v7142_v62  ;;  %v5607_v19 = vrot.slane %v5606_v43, 1  ;;  %v5596_v13 = vrot.slane %v5595_v2, 2  ;;  %v2756_v8 = vadd.f32 %v10667_v38, %v2755_v58  ;;  %v8643_v58 = vpop.f32.mrf.mxu1 }
 0x32d   : > { %v5912_v42 = vmul.f32 0.0625, %v4744_v15  ;;  %v4733_v16 = vadd.f32 %v4732_v20, %v4731_v6  ;;  %v3524_v10 = vadd.f32 %v10667_v38, %v3523_v7  ;;  %v2767_v12 = vadd.f32 %v10667_v38, %v8448_v31 }
 0x32e   : > { %v5608_v55 = vadd.f32 %v5607_v19, %v5606_v43  ;;  %v5597_v0 = vadd.f32 %v5596_v13, %v5595_v2  ;;  %v3535_v33 = vadd.f32 %v10667_v38, %v8640_v41  ;;  %v7060_v9 = vsel %vm6999_vm6, %v6870_v5, %v7059_v44  ;;  %v3539_v31 = vpop.f32.mrf.mxu1  ;;  %v8452_v13 = vpop.f32.mrf.mxu0 }
 0x32f   : > { %v4734_v57 = vrot.slane %v4733_v16, 1  ;;  %v4754_v59 = vsel %vm4114_vm3, %v3872_v11, 0.0  ;;  %v5618_v52 = vsel %vm4114_vm3, %v4064_v60, 0.0  ;;  %v3870_v49 = vmax.f32 %v2756_v8, 0.0 }
 0x330   : > { %v5598_v35 = vrot.slane %v5597_v0, 1  ;;  %v3873_v1 = vmax.f32 %v2767_v12, 0.0  ;;  %v4065_v53 = vmax.f32 %v3535_v33, 0.0  ;;  %v7984_v17 = vpack.c.bf16 %v5912_v42, %v5912_v42 }
 0x331   : > { %v4735_v51 = vadd.f32 %v4734_v57, %v4733_v16  ;;  %v7144_v47 = vsel %vm6999_vm6, %v6966_v23, %v7143_v14  ;;  %v4062_v22 = vmax.f32 %v3524_v10, 0.0  ;;  %v6008_v28 = vmul.f32 0.0625, %v5608_v55 }
 0x332   : > { %v5599_v56 = vadd.f32 %v5598_v35, %v5597_v0  ;;  %v4755_v32 = vsel %vm4114_vm3, %v3873_v1, 0.0  ;;  %v5619_v39 = vsel %vm4114_vm3, %v4065_v53, 0.0  ;;  %v2759_v30 = vadd.f32 %v10667_v38, %v2758_v45  ;;  %v8644_v45 = vpop.f32.mrf.mxu1 }
 0x333   : > { %v5911_v21 = vmul.f32 0.0625, %v4735_v51  ;;  %v4756_v3 = vadd.f32 %v4755_v32, %v4754_v59  ;;  %v5620_v24 = vadd.f32 %v5619_v39, %v5618_v52  ;;  %v4745_v18 = vsel %vm4114_vm3, %v3870_v49, 0.0 }
 0x334   : > { %v6007_v34 = vmul.f32 0.0625, %v5599_v56  ;;  %v3527_v4 = vadd.f32 %v10667_v38, %v3526_v29  ;;  %v2780_v54 = vadd.f32 %v10667_v38, %v8451_v25  ;;  %v3871_v50 = vmax.f32 %v2759_v30, 0.0  ;;  %v2774_v25 = vpop.f32.mrf.mxu0  ;;  %v3542_v30 = vpop.f32.mrf.mxu1 }
 0x335   : > { %v7983_v48 = vpack.c.bf16 %v5911_v21, %v5911_v21  ;;  %v4757_v26 = vrot.slane %v4756_v3, 4  ;;  %v5621_v63 = vrot.slane %v5620_v24, 4  ;;  %v8080_v7 = vpack.c.bf16 %v6008_v28, %v6008_v28 }
 0x336   : > { %v8079_v27 = vpack.c.bf16 %v6007_v34, %v6007_v34  ;;  %v4063_v62 = vmax.f32 %v3527_v4, 0.0  ;;  %v3876_v36 = vmax.f32 %v2780_v54, 0.0  ;;  %v4746_v6 = vsel %vm4114_vm3, %v3871_v50, 0.0  ;;  %v8455_v50 = vpop.f32.mrf.mxu0 }
 0x337   : > { %v6871_v61 = vunpack.c.l.b16 %v7983_v48  ;;  %v4758_v46 = vadd.f32 %v4757_v26, %v4756_v3  ;;  %v5622_v40 = vadd.f32 %v5621_v63, %v5620_v24  ;;  %v5609_v5 = vsel %vm4114_vm3, %v4062_v22, 0.0 }
 0x338   : > { %v4747_v23 = vadd.f32 %v4746_v6, %v4745_v18  ;;  %v5610_v43 = vsel %vm4114_vm3, %v4063_v62, 0.0  ;;  %v3548_v2 = vadd.f32 %v10667_v38, %v8643_v58  ;;  %v6872_v15 = vunpack.c.l.b16 %v7984_v17  ;;  %v8647_v6 = vpop.f32.mrf.mxu1 }
 0x339   : > { %v4759_v20 = vrot.slane %v4758_v46, 2  ;;  %v5623_v11 = vrot.slane %v5622_v40, 2  ;;  %v5611_v60 = vadd.f32 %v5610_v43, %v5609_v5  ;;  %v10760_v41 = vunpack.c.l.b16 %v8080_v7 }
 0x33a   : > { %v6967_v44 = vunpack.c.l.b16 %v8079_v27  ;;  %v4748_v14 = vrot.slane %v4747_v23, 4  ;;  %v4772_v19 = vsel %vm4114_vm3, %v3876_v36, 0.0  ;;  %v7061_v42 = vsel %vm7001_vm7, %v6871_v61, %v7060_v9 }
 0x33b   : > { %v4760_v16 = vadd.f32 %v4759_v20, %v4758_v46  ;;  %v5624_v8 = vadd.f32 %v5623_v11, %v5622_v40  ;;  %v5612_v10 = vrot.slane %v5611_v60, 4  ;;  %v4068_v0 = vmax.f32 %v3548_v2, 0.0 }
 0x33c   : > { %v4749_v55 = vadd.f32 %v4748_v14, %v4747_v23  ;;  %v2772_v12 = vadd.f32 %v10667_v38, %v2771_v37  ;;  %v3540_v33 = vadd.f32 %v10667_v38, %v3539_v31  ;;  %v2783_v29 = vadd.f32 %v10667_v38, %v8452_v13 }
 0x33d   : > { %v4761_v57 = vrot.slane %v4760_v16, 1  ;;  %v5625_v59 = vrot.slane %v5624_v8, 1  ;;  %v5613_v52 = vadd.f32 %v5612_v10, %v5611_v60  ;;  %v10768_v35 = vsel %vm7001_vm7, %v6967_v44, %v7144_v47  ;;  %v2787_v60 = vpop.f32.mrf.mxu0 }
 0x33e   : > { %v4750_v49 = vrot.slane %v4749_v55, 2  ;;  %v10771_v9 = vsel %vm7003_vm8, %v6872_v15, %v7061_v42  ;;  %v3551_v1 = vadd.f32 %v10667_v38, %v8644_v45  ;;  %v3877_v22 = vmax.f32 %v2783_v29, 0.0  ;;  %v3555_v45 = vpop.f32.mrf.mxu1 }
 0x33f   : > { %v4762_v53 = vadd.f32 %v4761_v57, %v4760_v16  ;;  %v5626_v17 = vadd.f32 %v5625_v59, %v5624_v8  ;;  %v5614_v51 = vrot.slane %v5613_v52, 2  ;;  %v5636_v56 = vsel %vm4114_vm3, %v4068_v0, 0.0 }
 0x340   : > { %v4751_v28 = vadd.f32 %v4750_v49, %v4749_v55  ;;  %v3874_v32 = vmax.f32 %v2772_v12, 0.0  ;;  %v4069_v39 = vmax.f32 %v3551_v1, 0.0  ;;  %v4066_v47 = vmax.f32 %v3540_v33, 0.0  ;;  %v8456_v49 = vpop.f32.mrf.mxu0 }
 0x341   : > { %v5914_v21 = vmul.f32 0.0625, %v4762_v53  ;;  %v5615_v3 = vadd.f32 %v5614_v51, %v5613_v52  ;;  %v4773_v24 = vsel %vm4114_vm3, %v3877_v22, 0.0  ;;  %v2775_v4 = vadd.f32 %v10667_v38, %v2774_v25 }
 0x342   : > { %v4752_v58 = vrot.slane %v4751_v28, 1  ;;  %v4774_v34 = vadd.f32 %v4773_v24, %v4772_v19  ;;  %v5637_v18 = vsel %vm4114_vm3, %v4069_v39, 0.0  ;;  %v6010_v48 = vmul.f32 0.0625, %v5626_v17 }
 0x343   : > { %v7986_v54 = vpack.c.bf16 %v5914_v21, %v5914_v21  ;;  %v5616_v26 = vrot.slane %v5615_v3, 1  ;;  %v5638_v63 = vadd.f32 %v5637_v18, %v5636_v56  ;;  %v3875_v62 = vmax.f32 %v2775_v4, 0.0 }
 0x344   : > { %v4753_v7 = vadd.f32 %v4752_v58, %v4751_v28  ;;  %v4775_v27 = vrot.slane %v4774_v34, 4  ;;  %v3543_v36 = vadd.f32 %v10667_v38, %v3542_v30  ;;  %v4763_v61 = vsel %vm4114_vm3, %v3874_v32, 0.0  ;;  %v8648_v32 = vpop.f32.mrf.mxu1 }
 0x345   : > { %v5617_v37 = vadd.f32 %v5616_v26, %v5615_v3  ;;  %v5627_v46 = vsel %vm4114_vm3, %v4066_v47, 0.0  ;;  %v5639_v40 = vrot.slane %v5638_v63, 4  ;;  %v4764_v23 = vsel %vm4114_vm3, %v3875_v62, 0.0 }
 0x346   : > { %v5913_v31 = vmul.f32 0.0625, %v4753_v7  ;;  %v4776_v5 = vadd.f32 %v4775_v27, %v4774_v34  ;;  %v4067_v43 = vmax.f32 %v3543_v36, 0.0  ;;  %v8082_v2 = vpack.c.bf16 %v6010_v48, %v6010_v48 }
 0x347   : > { %v6009_v15 = vmul.f32 0.0625, %v5617_v37  ;;  %v5640_v20 = vadd.f32 %v5639_v40, %v5638_v63  ;;  %v4765_v11 = vadd.f32 %v4764_v23, %v4763_v61  ;;  %v6874_v44 = vunpack.c.l.b16 %v7986_v54  ;;  %v3558_v63 = vpop.f32.mrf.mxu1 }
 0x348   : > { %v7985_v14 = vpack.c.bf16 %v5913_v31, %v5913_v31  ;;  %v4777_v19 = vrot.slane %v4776_v5, 2  ;;  %v5628_v13 = vsel %vm4114_vm3, %v4067_v43, 0.0  ;;  %v2796_v12 = vadd.f32 %v10667_v38, %v8455_v50 }
 0x349   : > { %v8081_v42 = vpack.c.bf16 %v6009_v15, %v6009_v15  ;;  %v5641_v16 = vrot.slane %v5640_v20, 2  ;;  %v4766_v8 = vrot.slane %v4765_v11, 4  ;;  %v5629_v10 = vadd.f32 %v5628_v13, %v5627_v46 }
 0x34a   : > { %v6873_v55 = vunpack.c.l.b16 %v7985_v14  ;;  %v4778_v0 = vadd.f32 %v4777_v19, %v4776_v5  ;;  %v3564_v33 = vadd.f32 %v10667_v38, %v8647_v6  ;;  %v6970_v1 = vunpack.c.l.b16 %v8082_v2 }
 0x34b   : > { %v6969_v57 = vunpack.c.l.b16 %v8081_v42  ;;  %v5642_v59 = vadd.f32 %v5641_v16, %v5640_v20  ;;  %v4767_v52 = vadd.f32 %v4766_v8, %v4765_v11  ;;  %v5630_v29 = vrot.slane %v5629_v10, 4  ;;  %v8651_v20 = vpop.f32.mrf.mxu1 }
 0x34c   : > { %v7063_v53 = vsel %vm7005_vm9, %v6873_v55, %v10771_v9  ;;  %v7146_v17 = vsel %vm7003_vm8, %v10760_v41, %v10768_v35  ;;  %v4779_v51 = vrot.slane %v4778_v0, 1  ;;  %v3880_v47 = vmax.f32 %v2796_v12, 0.0  ;;  %v2790_v41 = vpop.f32.mrf.mxu0 }
 0x34d   : > { %v7064_v22 = vsel %vm7007_vm10, %v6874_v44, %v7063_v53  ;;  %v7147_v25 = vsel %vm7005_vm9, %v6969_v57, %v7146_v17  ;;  %v5643_v28 = vrot.slane %v5642_v59, 1  ;;  %v4768_v56 = vrot.slane %v4767_v52, 2 }
 0x34e   : > { %v7178_v39 = vpack.c.b16 %v7064_v22, %v7064_v22  ;;  %v7148_v21 = vsel %vm7007_vm10, %v6970_v1, %v7147_v25  ;;  %v5631_v3 = vadd.f32 %v5630_v29, %v5629_v10  ;;  %v4780_v24 = vadd.f32 %v4779_v51, %v4778_v0  ;;  %v8459_v46 = vpop.f32.mrf.mxu0 }
 0x34f   : > { %v7190_v9 = vpack.c.b16 %v7148_v21, %v7148_v21  ;;  %v4769_v30 = vadd.f32 %v4768_v56, %v4767_v52  ;;  %v4072_v58 = vmax.f32 %v3564_v33, 0.0  ;;  %v5644_v35 = vadd.f32 %v5643_v28, %v5642_v59  ;;  %v3571_v52 = vpop.f32.mrf.mxu1 }
 0x350   : > { %7227 = vst.msk [vmem:[%s9614_s12 + $0x20] sm:$0xf] %vm7218_vm11, %v7178_v39  ;;  %v5632_v34 = vrot.slane %v5631_v3, 2  ;;  %v2788_v18 = vadd.f32 %v10667_v38, %v2787_v60  ;;  %v2799_v4 = vadd.f32 %v10667_v38, %v8456_v49  ;;  %v3556_v48 = vadd.f32 %v10667_v38, %v3555_v45  ;;  %v2803_v8 = vpop.f32.mrf.mxu0 }
 0x351   : > { %7239 = vst.msk [vmem:[%s9614_s12 + $0x50] sm:$0xf] %vm7218_vm11, %v7190_v9  ;;  %v4770_v54 = vrot.slane %v4769_v30, 1  ;;  %v3567_v26 = vadd.f32 %v10667_v38, %v8648_v32  ;;  %v4790_v7 = vsel %vm4114_vm3, %v3880_v47, 0.0  ;;  %v5916_v62 = vmul.f32 0.0625, %v4780_v24 }
 0x352   : > { %v5633_v50 = vadd.f32 %v5632_v34, %v5631_v3  ;;  %v3881_v27 = vmax.f32 %v2799_v4, 0.0  ;;  %v5654_v37 = vsel %vm4114_vm3, %v4072_v58, 0.0  ;;  %v10803_v40 = vmul.f32 0.0625, %v5644_v35  ;;  %v8460_v28 = vpop.f32.mrf.mxu0 }
 0x353   : > { %v4771_v36 = vadd.f32 %v4770_v54, %v4769_v30  ;;  %v4073_v61 = vmax.f32 %v3567_v26, 0.0  ;;  %v3878_v31 = vmax.f32 %v2788_v18, 0.0  ;;  %v4070_v43 = vmax.f32 %v3556_v48, 0.0  ;;  %v8652_v30 = vpop.f32.mrf.mxu1 }
 0x354   : > { %v5634_v6 = vrot.slane %v5633_v50, 1  ;;  %v4791_v5 = vsel %vm4114_vm3, %v3881_v27, 0.0  ;;  %v2791_v44 = vadd.f32 %v10667_v38, %v2790_v41  ;;  %v3559_v14 = vadd.f32 %v10667_v38, %v3558_v63 }
 0x355   : > { %v5915_v23 = vmul.f32 0.0625, %v4771_v36  ;;  %v4792_v2 = vadd.f32 %v4791_v5, %v4790_v7  ;;  %v5655_v15 = vsel %vm4114_vm3, %v4073_v61, 0.0  ;;  %v7988_v19 = vpack.c.bf16 %v5916_v62, %v5916_v62  ;;  %v2806_v61 = vpop.f32.mrf.mxu0 }
 0x356   : > { %v5635_v11 = vadd.f32 %v5634_v6, %v5633_v50  ;;  %v5656_v60 = vadd.f32 %v5655_v15, %v5654_v37  ;;  %v2812_v16 = vadd.f32 %v10667_v38, %v8459_v46  ;;  %v3879_v55 = vmax.f32 %v2791_v44, 0.0  ;;  %v3574_v46 = vpop.f32.mrf.mxu1 }
 0x357   : > { %v7987_v13 = vpack.c.bf16 %v5915_v23, %v5915_v23  ;;  %v4793_v42 = vrot.slane %v4792_v2, 4  ;;  %v4071_v0 = vmax.f32 %v3559_v14, 0.0  ;;  %v8084_v12 = vpack.c.bf16 %v10803_v40, %v10803_v40 }
 0x358   : > { %v6011_v10 = vmul.f32 0.0625, %v5635_v11  ;;  %v5657_v45 = vrot.slane %v5656_v60, 4  ;;  %v4781_v33 = vsel %vm4114_vm3, %v3878_v31, 0.0  ;;  %v5645_v57 = vsel %vm4114_vm3, %v4070_v43, 0.0 }
 0x359   : > { %v4794_v59 = vadd.f32 %v4793_v42, %v4792_v2  ;;  %v4782_v49 = vsel %vm4114_vm3, %v3879_v55, 0.0  ;;  %v5646_v1 = vsel %vm4114_vm3, %v4071_v0, 0.0  ;;  %v3580_v53 = vadd.f32 %v10667_v38, %v8651_v20 }
 0x35a   : > { %v5658_v29 = vadd.f32 %v5657_v45, %v5656_v60  ;;  %v8083_v17 = vpack.c.bf16 %v6011_v10, %v6011_v10  ;;  %v4783_v22 = vadd.f32 %v4782_v49, %v4781_v33  ;;  %v5647_v25 = vadd.f32 %v5646_v1, %v5645_v57 }
 0x35b   : > { %v4795_v51 = vrot.slane %v4794_v59, 2  ;;  %v10817_v56 = vunpack.c.l.b16 %v7988_v19  ;;  %v10819_v32 = vunpack.c.l.b16 %v7987_v13  ;;  %v3884_v21 = vmax.f32 %v2812_v16, 0.0 }
 0x35c   : > { %v5659_v39 = vrot.slane %v5658_v29, 2  ;;  %v4784_v47 = vrot.slane %v4783_v22, 4  ;;  %v5648_v9 = vrot.slane %v5647_v25, 4  ;;  %v2804_v24 = vadd.f32 %v10667_v38, %v2803_v8  ;;  %v8463_v8 = vpop.f32.mrf.mxu0 }
 0x35d   : > { %v4796_v3 = vadd.f32 %v4795_v51, %v4794_v59  ;;  %v4076_v41 = vmax.f32 %v3580_v53, 0.0  ;;  %v3572_v35 = vadd.f32 %v10667_v38, %v3571_v52  ;;  %v2815_v34 = vadd.f32 %v10667_v38, %v8460_v28 }
 0x35e   : > { %v5660_v58 = vadd.f32 %v5659_v39, %v5658_v29  ;;  %v10824_v18 = vunpack.c.l.b16 %v8083_v17  ;;  %v4785_v54 = vadd.f32 %v4784_v47, %v4783_v22  ;;  %v5649_v48 = vadd.f32 %v5648_v9, %v5647_v25  ;;  %v8655_v29 = vpop.f32.mrf.mxu1  ;;  %v2819_v39 = vpop.f32.mrf.mxu0 }
 0x35f   : > { %v4797_v4 = vrot.slane %v4796_v3, 1  ;;  %v4808_v63 = vsel %vm4114_vm3, %v3884_v21, 0.0  ;;  %v3885_v50 = vmax.f32 %v2815_v34, 0.0  ;;  %v3583_v7 = vadd.f32 %v10667_v38, %v8652_v30 }
 0x360   : > { %v5661_v26 = vrot.slane %v5660_v58, 1  ;;  %v4786_v62 = vrot.slane %v4785_v54, 2  ;;  %v5650_v36 = vrot.slane %v5649_v48, 2  ;;  %v3882_v37 = vmax.f32 %v2804_v24, 0.0 }
 0x361   : > { %v4798_v27 = vadd.f32 %v4797_v4, %v4796_v3  ;;  %v5672_v6 = vsel %vm4114_vm3, %v4076_v41, 0.0  ;;  %v4074_v31 = vmax.f32 %v3572_v35, 0.0  ;;  %v4809_v5 = vsel %vm4114_vm3, %v3885_v50, 0.0  ;;  %v3587_v35 = vpop.f32.mrf.mxu1 }
 0x362   : > { %v4077_v23 = vmax.f32 %v3583_v7, 0.0  ;;  %v5662_v43 = vadd.f32 %v5661_v26, %v5660_v58  ;;  %v4787_v2 = vadd.f32 %v4786_v62, %v4785_v54  ;;  %v5651_v15 = vadd.f32 %v5650_v36, %v5649_v48 }
 0x363   : > { %v4810_v20 = vadd.f32 %v4809_v5, %v4808_v63  ;;  %v5918_v11 = vmul.f32 0.0625, %v4798_v27  ;;  %v2807_v44 = vadd.f32 %v10667_v38, %v2806_v61  ;;  %v3575_v14 = vadd.f32 %v10667_v38, %v3574_v46 }
 0x364   : > { %v5673_v60 = vsel %vm4114_vm3, %v4077_v23, 0.0  ;;  %v4788_v19 = vrot.slane %v4787_v2, 1  ;;  %v5652_v13 = vrot.slane %v5651_v15, 1  ;;  %v4799_v42 = vsel %vm4114_vm3, %v3882_v37, 0.0 }
 0x365   : > { %v4811_v16 = vrot.slane %v4810_v20, 4  ;;  %v5663_v10 = vsel %vm4114_vm3, %v4074_v31, 0.0  ;;  %v5674_v45 = vadd.f32 %v5673_v60, %v5672_v6  ;;  %v3883_v55 = vmax.f32 %v2807_v44, 0.0  ;;  %v8656_v6 = vpop.f32.mrf.mxu1 }
 0x366   : > { %v4075_v0 = vmax.f32 %v3575_v14, 0.0  ;;  %v6014_v33 = vmul.f32 0.0625, %v5662_v43  ;;  %v4789_v57 = vadd.f32 %v4788_v19, %v4787_v2  ;;  %v5653_v59 = vadd.f32 %v5652_v13, %v5651_v15  ;;  %v10851_v2 = vld [vmem:[%s11113_s2] ss:$0 sm:$0xff] }
 0x367   : > { %v4812_v52 = vadd.f32 %v4811_v16, %v4810_v20  ;;  %v7990_v49 = vpack.c.bf16 %v5918_v11, %v5918_v11  ;;  %v5675_v1 = vrot.slane %v5674_v45, 4  ;;  %v4800_v53 = vsel %vm4114_vm3, %v3883_v55, 0.0 }
 0x368   : > { %v5664_v17 = vsel %vm4114_vm3, %v4075_v0, 0.0  ;;  %v5917_v51 = vmul.f32 0.0625, %v4789_v57  ;;  %v6013_v22 = vmul.f32 0.0625, %v5653_v59  ;;  %v4801_v28 = vadd.f32 %v4800_v53, %v4799_v42 }
 0x369   : > { %v4813_v25 = vrot.slane %v4812_v52, 2  ;;  %v5676_v21 = vadd.f32 %v5675_v1, %v5674_v45  ;;  %v5665_v3 = vadd.f32 %v5664_v17, %v5663_v10  ;;  %v2828_v47 = vadd.f32 %v10667_v38, %v8463_v8  ;;  %v3590_v8 = vpop.f32.mrf.mxu1 }
 0x36a   : > { %v3596_v9 = vadd.f32 %v10667_v38, %v8655_v29  ;;  %v7989_v24 = vpack.c.bf16 %v5917_v51, %v5917_v51  ;;  %v8085_v30 = vpack.c.bf16 %v6013_v22, %v6013_v22  ;;  %v4802_v41 = vrot.slane %v4801_v28, 4  ;;  %v8464_v38 = vpop.f32.mrf.mxu0 }
 0x36b   : > { %v4814_v58 = vadd.f32 %v4813_v25, %v4812_v52  ;;  %v6972_v34 = vunpack.c.l.b16 %v8084_v12  ;;  %v8086_v4 = vpack.c.bf16 %v6014_v33, %v6014_v33  ;;  %v5677_v54 = vrot.slane %v5676_v21, 2 }
 0x36c   : > { %v5666_v48 = vrot.slane %v5665_v3, 4  ;;  %v7065_v26 = vsel %vm6995_vm4, %v10817_v56, %v10819_v32  ;;  %v6877_v63 = vunpack.c.l.b16 %v7989_v24  ;;  %v4803_v7 = vadd.f32 %v4802_v41, %v4801_v28  ;;  %v2822_v20 = vpop.f32.mrf.mxu0 }
 0x36d   : > { %v4815_v50 = vrot.slane %v4814_v58, 1  ;;  %v7149_v27 = vsel %vm6995_vm4, %v6972_v34, %v10824_v18  ;;  %v6878_v62 = vunpack.c.l.b16 %v7990_v49  ;;  %v5678_v36 = vadd.f32 %v5677_v54, %v5676_v21 }
 0x36e   : > { %v5667_v37 = vadd.f32 %v5666_v48, %v5665_v3  ;;  %v6973_v61 = vunpack.c.l.b16 %v8085_v30  ;;  %v4804_v40 = vrot.slane %v4803_v7, 2  ;;  %v3888_v12 = vmax.f32 %v2828_v47, 0.0  ;;  %v8467_v29 = vpop.f32.mrf.mxu0 }
 0x36f   : > { %v4080_v46 = vmax.f32 %v3596_v9, 0.0  ;;  %v6974_v31 = vunpack.c.l.b16 %v8086_v4  ;;  %v4816_v5 = vadd.f32 %v4815_v50, %v4814_v58  ;;  %v5679_v23 = vrot.slane %v5678_v36, 1 }
 0x370   : > { %v5668_v43 = vrot.slane %v5667_v37, 2  ;;  %v7066_v56 = vsel %vm6997_vm5, %v6877_v63, %v7065_v26  ;;  %v4805_v32 = vadd.f32 %v4804_v40, %v4803_v7  ;;  %v2820_v18 = vadd.f32 %v10851_v2, %v2819_v39  ;;  %v8659_v39 = vpop.f32.mrf.mxu1  ;;  %v2835_v48 = vpop.f32.mrf.mxu0 }
 0x371   : > { %v3588_v15 = vadd.f32 %v10851_v2, %v3587_v35  ;;  %v5680_v11 = vadd.f32 %v5679_v23, %v5678_v36  ;;  %v2831_v44 = vadd.f32 %v10851_v2, %v8464_v38  ;;  %v3599_v14 = vadd.f32 %v10851_v2, %v8656_v6 }
 0x372   : > { %v5669_v60 = vadd.f32 %v5668_v43, %v5667_v37  ;;  %v7150_v19 = vsel %vm6997_vm5, %v6973_v61, %v7149_v27  ;;  %v4806_v13 = vrot.slane %v4805_v32, 1  ;;  %v4826_v42 = vsel %vm4114_vm3, %v3888_v12, 0.0  ;;  %v3603_v38 = vpop.f32.mrf.mxu1 }
 0x373   : > { %v5690_v16 = vsel %vm4114_vm3, %v4080_v46, 0.0  ;;  %v5920_v10 = vmul.f32 0.0625, %v4816_v5  ;;  %v3889_v55 = vmax.f32 %v2831_v44, 0.0  ;;  %v4081_v0 = vmax.f32 %v3599_v14, 0.0 }
 0x374   : > { %v5670_v45 = vrot.slane %v5669_v60, 1  ;;  %v4807_v33 = vadd.f32 %v4806_v13, %v4805_v32  ;;  %v7067_v57 = vsel %vm6999_vm6, %v6878_v62, %v7066_v56  ;;  %v3886_v59 = vmax.f32 %v2820_v18, 0.0  ;;  %v8468_v56 = vpop.f32.mrf.mxu0 }
 0x375   : > { %v4078_v52 = vmax.f32 %v3588_v15, 0.0  ;;  %v6016_v49 = vmul.f32 0.0625, %v5680_v11  ;;  %v4827_v53 = vsel %vm4114_vm3, %v3889_v55, 0.0  ;;  %v5691_v17 = vsel %vm4114_vm3, %v4081_v0, 0.0  ;;  %v8660_v11 = vpop.f32.mrf.mxu1 }
 0x376   : > { %v5671_v1 = vadd.f32 %v5670_v45, %v5669_v60  ;;  %v5919_v51 = vmul.f32 0.0625, %v4807_v33  ;;  %v4828_v22 = vadd.f32 %v4827_v53, %v4826_v42  ;;  %v5692_v25 = vadd.f32 %v5691_v17, %v5690_v16 }
 0x377   : > { %v2823_v28 = vadd.f32 %v10851_v2, %v2822_v20  ;;  %v7992_v21 = vpack.c.bf16 %v5920_v10, %v5920_v10  ;;  %v3591_v47 = vadd.f32 %v10851_v2, %v3590_v8  ;;  %v2844_v9 = vadd.f32 %v10851_v2, %v8467_v29  ;;  %v2838_v29 = vpop.f32.mrf.mxu0 }
 0x378   : > { %v6015_v3 = vmul.f32 0.0625, %v5671_v1  ;;  %v4817_v24 = vsel %vm4114_vm3, %v3886_v59, 0.0  ;;  %v4829_v30 = vrot.slane %v4828_v22, 4  ;;  %v5693_v58 = vrot.slane %v5692_v25, 4 }
 0x379   : > { %v3887_v41 = vmax.f32 %v2823_v28, 0.0  ;;  %v8088_v35 = vpack.c.bf16 %v6016_v49, %v6016_v49  ;;  %v7991_v34 = vpack.c.bf16 %v5919_v51, %v5919_v51  ;;  %v5681_v4 = vsel %vm4114_vm3, %v4078_v52, 0.0  ;;  %v3606_v28 = vpop.f32.mrf.mxu1 }
 0x37a   : > { %v4079_v54 = vmax.f32 %v3591_v47, 0.0  ;;  %v8087_v26 = vpack.c.bf16 %v6015_v3, %v6015_v3  ;;  %v4830_v63 = vadd.f32 %v4829_v30, %v4828_v22  ;;  %v5694_v50 = vadd.f32 %v5693_v58, %v5692_v25 }
 0x37b   : > { %v4818_v7 = vsel %vm4114_vm3, %v3887_v41, 0.0  ;;  %v3892_v36 = vmax.f32 %v2844_v9, 0.0  ;;  %v3612_v37 = vadd.f32 %v10851_v2, %v8659_v39  ;;  %v7151_v61 = vsel %vm6999_vm6, %v6974_v31, %v7150_v19  ;;  %v8471_v41 = vpop.f32.mrf.mxu0 }
 0x37c   : > { %v4819_v27 = vadd.f32 %v4818_v7, %v4817_v24  ;;  %v5682_v62 = vsel %vm4114_vm3, %v4079_v54, 0.0  ;;  %v4831_v40 = vrot.slane %v4830_v63, 2  ;;  %v5695_v12 = vrot.slane %v5694_v50, 2  ;;  %v8663_v7 = vpop.f32.mrf.mxu1 }
 0x37d   : > { %v5683_v46 = vadd.f32 %v5682_v62, %v5681_v4  ;;  %v10872_v6 = vunpack.c.l.b16 %v7992_v21  ;;  %v10874_v5 = vunpack.c.l.b16 %v8088_v35  ;;  %v6879_v23 = vunpack.c.l.b16 %v7991_v34 }
 0x37e   : > { %v4820_v43 = vrot.slane %v4819_v27, 4  ;;  %v6975_v32 = vunpack.c.l.b16 %v8087_v26  ;;  %v4832_v18 = vadd.f32 %v4831_v40, %v4830_v63  ;;  %v5696_v15 = vadd.f32 %v5695_v12, %v5694_v50 }
 0x37f   : > { %v5684_v20 = vrot.slane %v5683_v46, 4  ;;  %v4844_v44 = vsel %vm4114_vm3, %v3892_v36, 0.0  ;;  %v4084_v14 = vmax.f32 %v3612_v37, 0.0  ;;  %v2836_v31 = vadd.f32 %v10851_v2, %v2835_v48 }
 0x380   : > { %v4821_v60 = vadd.f32 %v4820_v43, %v4819_v27  ;;  %v4833_v19 = vrot.slane %v4832_v18, 1  ;;  %v5697_v13 = vrot.slane %v5696_v15, 1  ;;  %v2847_v16 = vadd.f32 %v10851_v2, %v8468_v56 }
 0x381   : > { %v5685_v42 = vadd.f32 %v5684_v20, %v5683_v46  ;;  %v7068_v8 = vsel %vm7001_vm7, %v6879_v23, %v7067_v57  ;;  %v3604_v45 = vadd.f32 %v10851_v2, %v3603_v38  ;;  %v3615_v55 = vadd.f32 %v10851_v2, %v8660_v11  ;;  %v2851_v46 = vpop.f32.mrf.mxu0 }
 0x382   : > { %v4822_v10 = vrot.slane %v4821_v60, 2  ;;  %v4834_v0 = vadd.f32 %v4833_v19, %v4832_v18  ;;  %v5698_v33 = vadd.f32 %v5697_v13, %v5696_v15  ;;  %v3893_v52 = vmax.f32 %v2847_v16, 0.0 }
 0x383   : > { %v5686_v59 = vrot.slane %v5685_v42, 2  ;;  %v7152_v49 = vsel %vm7001_vm7, %v6975_v32, %v7151_v61  ;;  %v5708_v53 = vsel %vm4114_vm3, %v4084_v14, 0.0  ;;  %v4085_v17 = vmax.f32 %v3615_v55, 0.0 }
 0x384   : > { %v4823_v1 = vadd.f32 %v4822_v10, %v4821_v60  ;;  %v5922_v51 = vmul.f32 0.0625, %v4834_v0  ;;  %v3890_v25 = vmax.f32 %v2836_v31, 0.0  ;;  %v4845_v57 = vsel %vm4114_vm3, %v3893_v52, 0.0  ;;  %v3619_v60 = vpop.f32.mrf.mxu1 }
 0x385   : > { %v5687_v22 = vadd.f32 %v5686_v59, %v5685_v42  ;;  %v4846_v21 = vadd.f32 %v4845_v57, %v4844_v44  ;;  %v5709_v3 = vsel %vm4114_vm3, %v4085_v17, 0.0  ;;  %v2839_v47 = vadd.f32 %v10851_v2, %v2838_v29 }
 0x386   : > { %v4824_v39 = vrot.slane %v4823_v1, 1  ;;  %v6018_v9 = vmul.f32 0.0625, %v5698_v33  ;;  %v4082_v30 = vmax.f32 %v3604_v45, 0.0  ;;  %v5710_v58 = vadd.f32 %v5709_v3, %v5708_v53  ;;  %v8472_v45 = vpop.f32.mrf.mxu0  ;;  %v8664_v29 = vpop.f32.mrf.mxu1 }
 0x387   : > { %v5688_v24 = vrot.slane %v5687_v22, 1  ;;  %v4847_v34 = vrot.slane %v4846_v21, 4  ;;  %v3891_v4 = vmax.f32 %v2839_v47, 0.0  ;;  %v3607_v54 = vadd.f32 %v10851_v2, %v3606_v28 }
 0x388   : > { %v4825_v35 = vadd.f32 %v4824_v39, %v4823_v1  ;;  %v7994_v48 = vpack.c.bf16 %v5922_v51, %v5922_v51  ;;  %v4835_v63 = vsel %vm4114_vm3, %v3890_v25, 0.0  ;;  %v5711_v50 = vrot.slane %v5710_v58, 4  ;;  %v2854_v25 = vpop.f32.mrf.mxu0 }
 0x389   : > { %v5689_v26 = vadd.f32 %v5688_v24, %v5687_v22  ;;  %v4848_v27 = vadd.f32 %v4847_v34, %v4846_v21  ;;  %v4836_v62 = vsel %vm4114_vm3, %v3891_v4, 0.0  ;;  %v4083_v36 = vmax.f32 %v3607_v54, 0.0  ;;  %v3622_v24 = vpop.f32.mrf.mxu1 }
 0x38a   : > { %v5921_v38 = vmul.f32 0.0625, %v4825_v35  ;;  %v5699_v61 = vsel %vm4114_vm3, %v4082_v30, 0.0  ;;  %v5712_v40 = vadd.f32 %v5711_v50, %v5710_v58  ;;  %v4837_v12 = vadd.f32 %v4836_v62, %v4835_v63  ;;  %v8475_v54 = vpop.f32.mrf.mxu0 }
 0x38b   : > { %v6017_v37 = vmul.f32 0.0625, %v5689_v26  ;;  %v8090_v23 = vpack.c.bf16 %v6018_v9, %v6018_v9  ;;  %v4849_v56 = vrot.slane %v4848_v27, 2  ;;  %v5700_v32 = vsel %vm4114_vm3, %v4083_v36, 0.0  ;;  %v8667_v36 = vpop.f32.mrf.mxu1 }
 0x38c   : > { %v7993_v43 = vpack.c.bf16 %v5921_v38, %v5921_v38  ;;  %v5713_v15 = vrot.slane %v5712_v40, 2  ;;  %v4838_v20 = vrot.slane %v4837_v12, 4  ;;  %v5701_v11 = vadd.f32 %v5700_v32, %v5699_v61 }
 0x38d   : > { %v8089_v18 = vpack.c.bf16 %v6017_v37, %v6017_v37  ;;  %v6882_v44 = vunpack.c.l.b16 %v7994_v48  ;;  %v7069_v31 = vsel %vm7003_vm8, %v10872_v6, %v7068_v8  ;;  %v7153_v19 = vsel %vm7003_vm8, %v10874_v5, %v7152_v49 }
 0x38e   : > { %v6881_v14 = vunpack.c.l.b16 %v7993_v43  ;;  %v4850_v42 = vadd.f32 %v4849_v56, %v4848_v27  ;;  %v4839_v16 = vadd.f32 %v4838_v20, %v4837_v12  ;;  %v5702_v10 = vrot.slane %v5701_v11, 4  ;;  %v2867_v56 = vpop.f32.mrf.mxu0 }
 0x38f   : > { %v6977_v13 = vunpack.c.l.b16 %v8089_v18  ;;  %v6978_v55 = vunpack.c.l.b16 %v8090_v23  ;;  %v2860_v33 = vadd.f32 %v10851_v2, %v8471_v41  ;;  %v3628_v59 = vadd.f32 %v10851_v2, %v8663_v7 }
 0x390   : > { %v7070_v0 = vsel %vm7005_vm9, %v6881_v14, %v7069_v31  ;;  %v5714_v8 = vadd.f32 %v5713_v15, %v5712_v40  ;;  %v4840_v5 = vrot.slane %v4839_v16, 2  ;;  %v5703_v53 = vadd.f32 %v5702_v10, %v5701_v11  ;;  %v3635_v31 = vpop.f32.mrf.mxu1 }
 0x391   : > { %v7071_v52 = vsel %vm7007_vm10, %v6882_v44, %v7070_v0  ;;  %v7154_v6 = vsel %vm7005_vm9, %v6977_v13, %v7153_v19  ;;  %v4851_v51 = vrot.slane %v4850_v42, 1  ;;  %v3896_v28 = vmax.f32 %v2860_v33, 0.0  ;;  %v8476_v33 = vpop.f32.mrf.mxu0 }
 0x392   : > { %v7179_v49 = vpack.c.b16 %v7071_v52, %v7071_v52  ;;  %v7155_v1 = vsel %vm7007_vm10, %v6978_v55, %v7154_v6  ;;  %v4841_v22 = vadd.f32 %v4840_v5, %v4839_v16  ;;  %v5704_v57 = vrot.slane %v5703_v53, 2 }
 0x393   : > { %v7191_v17 = vpack.c.b16 %v7155_v1, %v7155_v1  ;;  %v4088_v39 = vmax.f32 %v3628_v59, 0.0  ;;  %v2863_v21 = vadd.f32 %v10851_v2, %v8472_v45  ;;  %v5715_v3 = vrot.slane %v5714_v8, 1  ;;  %v8668_v1 = vpop.f32.mrf.mxu1 }
 0x394   : > { %7228 = vst.msk [vmem:[%s9614_s12 + $0x24] sm:$0xf] %vm7218_vm11, %v7179_v49  ;;  %v2852_v47 = vadd.f32 %v10851_v2, %v2851_v46  ;;  %v3631_v9 = vadd.f32 %v10851_v2, %v8664_v29  ;;  %v5705_v30 = vadd.f32 %v5704_v57, %v5703_v53  ;;  %v3620_v58 = vadd.f32 %v10851_v2, %v3619_v60 }
 0x395   : > { %7240 = vst.msk [vmem:[%s9614_s12 + $0x54] sm:$0xf] %vm7218_vm11, %v7191_v17  ;;  %v3897_v41 = vmax.f32 %v2863_v21, 0.0  ;;  %v4852_v35 = vadd.f32 %v4851_v51, %v4850_v42  ;;  %v4842_v34 = vrot.slane %v4841_v22, 1  ;;  %v4862_v26 = vsel %vm4114_vm3, %v3896_v28, 0.0 }
 0x396   : > { %v4089_v4 = vmax.f32 %v3631_v9, 0.0  ;;  %v5706_v48 = vrot.slane %v5705_v30, 1  ;;  %v5726_v63 = vsel %vm4114_vm3, %v4088_v39, 0.0  ;;  %v5716_v7 = vadd.f32 %v5715_v3, %v5714_v8 }
 0x397   : > { %v4863_v50 = vsel %vm4114_vm3, %v3897_v41, 0.0  ;;  %v3894_v38 = vmax.f32 %v2852_v47, 0.0  ;;  %v4086_v37 = vmax.f32 %v3620_v58, 0.0  ;;  %v2855_v40 = vadd.f32 %v10851_v2, %v2854_v25 }
 0x398   : > { %v4864_v27 = vadd.f32 %v4863_v50, %v4862_v26  ;;  %v5727_v62 = vsel %vm4114_vm3, %v4089_v4, 0.0  ;;  %v3623_v12 = vadd.f32 %v10851_v2, %v3622_v24  ;;  %v10916_v46 = vmul.f32 0.0625, %v4852_v35  ;;  %v2870_v35 = vpop.f32.mrf.mxu0 }
 0x399   : > { %v5728_v61 = vadd.f32 %v5727_v62, %v5726_v63  ;;  %v4843_v23 = vadd.f32 %v4842_v34, %v4841_v22  ;;  %v5707_v32 = vadd.f32 %v5706_v48, %v5705_v30  ;;  %v3895_v15 = vmax.f32 %v2855_v40, 0.0  ;;  %v3638_v34 = vpop.f32.mrf.mxu1 }
 0x39a   : > { %v4865_v43 = vrot.slane %v4864_v27, 4  ;;  %v4087_v20 = vmax.f32 %v3623_v12, 0.0  ;;  %v10918_v11 = vmul.f32 0.0625, %v5716_v7  ;;  %v4853_v60 = vsel %vm4114_vm3, %v3894_v38, 0.0 }
 0x39b   : > { %v5729_v18 = vrot.slane %v5728_v61, 4  ;;  %v2876_v14 = vadd.f32 %v10851_v2, %v8475_v54  ;;  %v5717_v19 = vsel %vm4114_vm3, %v4086_v37, 0.0  ;;  %v4854_v42 = vsel %vm4114_vm3, %v3895_v15, 0.0 }
 0x39c   : > { %v4866_v44 = vadd.f32 %v4865_v43, %v4864_v27  ;;  %v5718_v16 = vsel %vm4114_vm3, %v4087_v20, 0.0  ;;  %v10925_v10 = vmul.f32 0.0625, %v4843_v23  ;;  %v4855_v55 = vadd.f32 %v4854_v42, %v4853_v60 }
 0x39d   : > { %v5730_v13 = vadd.f32 %v5729_v18, %v5728_v61  ;;  %v5719_v0 = vadd.f32 %v5718_v16, %v5717_v19  ;;  %v6019_v59 = vmul.f32 0.0625, %v5707_v32  ;;  %v3644_v6 = vadd.f32 %v10851_v2, %v8667_v36  ;;  %v8479_v18 = vpop.f32.mrf.mxu0 }
 0x39e   : > { %v4867_v45 = vrot.slane %v4866_v44, 2  ;;  %v7996_v8 = vpack.c.bf16 %v10916_v46, %v10916_v46  ;;  %v4856_v5 = vrot.slane %v4855_v55, 4  ;;  %v3900_v49 = vmax.f32 %v2876_v14, 0.0  ;;  %v8671_v14 = vpop.f32.mrf.mxu1 }
 0x39f   : > { %v5731_v52 = vrot.slane %v5730_v13, 2  ;;  %v5720_v29 = vrot.slane %v5719_v0, 4  ;;  %v8092_v53 = vpack.c.bf16 %v10918_v11, %v10918_v11  ;;  %v2868_v51 = vadd.f32 %v10851_v2, %v2867_v56 }
 0x3a0   : > { %v4868_v17 = vadd.f32 %v4867_v45, %v4866_v44  ;;  %v2879_v22 = vadd.f32 %v10851_v2, %v8476_v33  ;;  %v7995_v25 = vpack.c.bf16 %v10925_v10, %v10925_v10  ;;  %v4857_v28 = vadd.f32 %v4856_v5, %v4855_v55 }
 0x3a1   : > { %v5732_v57 = vadd.f32 %v5731_v52, %v5730_v13  ;;  %v5721_v39 = vadd.f32 %v5720_v29, %v5719_v0  ;;  %v8091_v21 = vpack.c.bf16 %v6019_v59, %v6019_v59  ;;  %v4092_v3 = vmax.f32 %v3644_v6, 0.0  ;;  %v2883_v6 = vpop.f32.mrf.mxu0 }
 0x3a2   : > { %v3901_v47 = vmax.f32 %v2879_v22, 0.0  ;;  %v3647_v9 = vadd.f32 %v10851_v2, %v8668_v1  ;;  %v4858_v24 = vrot.slane %v4857_v28, 2  ;;  %v4880_v58 = vsel %vm4114_vm3, %v3900_v49, 0.0 }
 0x3a3   : > { %v5722_v30 = vrot.slane %v5721_v39, 2  ;;  %v3636_v41 = vadd.f32 %v10851_v2, %v3635_v31  ;;  %v4869_v4 = vrot.slane %v4868_v17, 1  ;;  %v3898_v54 = vmax.f32 %v2868_v51, 0.0 }
 0x3a4   : > { %v4881_v48 = vsel %vm4114_vm3, %v3901_v47, 0.0  ;;  %v4093_v26 = vmax.f32 %v3647_v9, 0.0  ;;  %v5733_v63 = vrot.slane %v5732_v57, 1  ;;  %v4859_v50 = vadd.f32 %v4858_v24, %v4857_v28  ;;  %v8480_v24 = vpop.f32.mrf.mxu0 }
 0x3a5   : > { %v5723_v7 = vadd.f32 %v5722_v30, %v5721_v39  ;;  %v4882_v38 = vadd.f32 %v4881_v48, %v4880_v58  ;;  %v5744_v27 = vsel %vm4114_vm3, %v4092_v3, 0.0  ;;  %v2871_v36 = vadd.f32 %v10851_v2, %v2870_v35 }
 0x3a6   : > { %v5745_v62 = vsel %vm4114_vm3, %v4093_v26, 0.0  ;;  %v3639_v37 = vadd.f32 %v10851_v2, %v3638_v34  ;;  %v4860_v61 = vrot.slane %v4859_v50, 1  ;;  %v4090_v12 = vmax.f32 %v3636_v41, 0.0 }
 0x3a7   : > { %v5724_v40 = vrot.slane %v5723_v7, 1  ;;  %v4883_v46 = vrot.slane %v4882_v38, 4  ;;  %v4870_v23 = vadd.f32 %v4869_v4, %v4868_v17  ;;  %v5746_v43 = vadd.f32 %v5745_v62, %v5744_v27  ;;  %v3651_v17 = vpop.f32.mrf.mxu1 }
 0x3a8   : > { %v3899_v56 = vmax.f32 %v2871_v36, 0.0  ;;  %v4091_v32 = vmax.f32 %v3639_v37, 0.0  ;;  %v5734_v15 = vadd.f32 %v5733_v63, %v5732_v57  ;;  %v4861_v20 = vadd.f32 %v4860_v61, %v4859_v50  ;;  %v2886_v36 = vpop.f32.mrf.mxu0 }
 0x3a9   : > { %v4871_v60 = vsel %vm4114_vm3, %v3898_v54, 0.0  ;;  %v4884_v44 = vadd.f32 %v4883_v46, %v4882_v38  ;;  %v5725_v31 = vadd.f32 %v5724_v40, %v5723_v7  ;;  %v5747_v19 = vrot.slane %v5746_v43, 4  ;;  %v8672_v34 = vpop.f32.mrf.mxu1 }
 0x3aa   : > { %v4872_v13 = vsel %vm4114_vm3, %v3899_v56, 0.0  ;;  %v5736_v42 = vsel %vm4114_vm3, %v4091_v32, 0.0  ;;  %v6884_v16 = vunpack.c.l.b16 %v7996_v8  ;;  %v5735_v10 = vsel %vm4114_vm3, %v4090_v12, 0.0 }
 0x3ab   : > { %v4885_v45 = vrot.slane %v4884_v44, 2  ;;  %v4873_v55 = vadd.f32 %v4872_v13, %v4871_v60  ;;  %v6883_v0 = vunpack.c.l.b16 %v7995_v25  ;;  %v6979_v33 = vunpack.c.l.b16 %v8091_v21  ;;  %v3654_v46 = vpop.f32.mrf.mxu1  ;;  %v8483_v13 = vpop.f32.mrf.mxu0 }
 0x3ac   : > { %v5748_v59 = vadd.f32 %v5747_v19, %v5746_v43  ;;  %v5737_v52 = vadd.f32 %v5736_v42, %v5735_v10  ;;  %v5926_v5 = vmul.f32 0.0625, %v4870_v23  ;;  %v6022_v29 = vmul.f32 0.0625, %v5734_v15 }
 0x3ad   : > { %v5925_v49 = vmul.f32 0.0625, %v4861_v20  ;;  %v4874_v1 = vrot.slane %v4873_v55, 4  ;;  %v6021_v51 = vmul.f32 0.0625, %v5725_v31  ;;  %v2892_v28 = vadd.f32 %v10851_v2, %v8479_v18 }
 0x3ae   : > { %v5749_v22 = vrot.slane %v5748_v59, 2  ;;  %v5738_v57 = vrot.slane %v5737_v52, 4  ;;  %v4886_v8 = vadd.f32 %v4885_v45, %v4884_v44  ;;  %v3660_v3 = vadd.f32 %v10851_v2, %v8671_v14 }
 0x3af   : > { %v4875_v39 = vadd.f32 %v4874_v1, %v4873_v55  ;;  %v6980_v25 = vunpack.c.l.b16 %v8092_v53  ;;  %v7072_v21 = vsel %vm6995_vm4, %v6884_v16, %v6883_v0  ;;  %v7998_v30 = vpack.c.bf16 %v5926_v5, %v5926_v5  ;;  %v8675_v55 = vpop.f32.mrf.mxu1 }
 0x3b0   : > { %v5750_v47 = vadd.f32 %v5749_v22, %v5748_v59  ;;  %v5739_v9 = vadd.f32 %v5738_v57, %v5737_v52  ;;  %v8094_v58 = vpack.c.bf16 %v6022_v29, %v6022_v29  ;;  %v7997_v41 = vpack.c.bf16 %v5925_v49, %v5925_v49  ;;  %v2899_v57 = vpop.f32.mrf.mxu0 }
 0x3b1   : > { %v4876_v35 = vrot.slane %v4875_v39, 2  ;;  %v7156_v4 = vsel %vm6995_vm4, %v6980_v25, %v6979_v33  ;;  %v8093_v54 = vpack.c.bf16 %v6021_v51, %v6021_v51  ;;  %v3904_v26 = vmax.f32 %v2892_v28, 0.0  ;;  %v3667_v25 = vpop.f32.mrf.mxu1 }
 0x3b2   : > { %v5740_v48 = vrot.slane %v5739_v9, 2  ;;  %v4887_v63 = vrot.slane %v4886_v8, 1  ;;  %v5751_v50 = vrot.slane %v5750_v47, 1  ;;  %v4096_v11 = vmax.f32 %v3660_v3, 0.0 }
 0x3b3   : > { %v4877_v7 = vadd.f32 %v4876_v35, %v4875_v39  ;;  %v2884_v38 = vadd.f32 %v10851_v2, %v2883_v6  ;;  %v2895_v27 = vadd.f32 %v10851_v2, %v8480_v24  ;;  %v3663_v62 = vadd.f32 %v10851_v2, %v8672_v34 }
 0x3b4   : > { %v5741_v53 = vadd.f32 %v5740_v48, %v5739_v9  ;;  %v6886_v37 = vunpack.c.l.b16 %v7998_v30  ;;  %v6982_v61 = vunpack.c.l.b16 %v8094_v58  ;;  %v6885_v40 = vunpack.c.l.b16 %v7997_v41  ;;  %v8484_v48 = vpop.f32.mrf.mxu0 }
 0x3b5   : > { %v3652_v12 = vadd.f32 %v10851_v2, %v3651_v17  ;;  %v4878_v23 = vrot.slane %v4877_v7, 1  ;;  %v3905_v56 = vmax.f32 %v2895_v27, 0.0  ;;  %v4097_v32 = vmax.f32 %v3663_v62, 0.0 }
 0x3b6   : > { %v5742_v43 = vrot.slane %v5741_v53, 1  ;;  %v6981_v18 = vunpack.c.l.b16 %v8093_v54  ;;  %v4888_v15 = vadd.f32 %v4887_v63, %v4886_v8  ;;  %v4898_v20 = vsel %vm4114_vm3, %v3904_v26, 0.0 }
 0x3b7   : > { %v5762_v60 = vsel %vm4114_vm3, %v4096_v11, 0.0  ;;  %v5752_v44 = vadd.f32 %v5751_v50, %v5750_v47  ;;  %v3902_v14 = vmax.f32 %v2884_v38, 0.0  ;;  %v4899_v31 = vsel %vm4114_vm3, %v3905_v56, 0.0  ;;  %v8676_v11 = vpop.f32.mrf.mxu1 }
 0x3b8   : > { %v5763_v19 = vsel %vm4114_vm3, %v4097_v32, 0.0  ;;  %v4094_v42 = vmax.f32 %v3652_v12, 0.0  ;;  %v4900_v16 = vadd.f32 %v4899_v31, %v4898_v20  ;;  %v2887_v45 = vadd.f32 %v10851_v2, %v2886_v36  ;;  %v2902_v20 = vpop.f32.mrf.mxu0 }
 0x3b9   : > { %v5764_v10 = vadd.f32 %v5763_v19, %v5762_v60  ;;  %v7073_v0 = vsel %vm6997_vm5, %v6885_v40, %v7072_v21  ;;  %v4879_v33 = vadd.f32 %v4878_v23, %v4877_v7  ;;  %v5743_v59 = vadd.f32 %v5742_v43, %v5741_v53 }
 0x3ba   : > { %v3655_v52 = vadd.f32 %v10851_v2, %v3654_v46  ;;  %v7157_v6 = vsel %vm6997_vm5, %v6981_v18, %v7156_v4  ;;  %v4901_v5 = vrot.slane %v4900_v16, 4  ;;  %v3903_v49 = vmax.f32 %v2887_v45, 0.0 }
 0x3bb   : > { %v5765_v29 = vrot.slane %v5764_v10, 4  ;;  %v5928_v1 = vmul.f32 0.0625, %v4888_v15  ;;  %v6024_v17 = vmul.f32 0.0625, %v5752_v44  ;;  %v4889_v51 = vsel %vm4114_vm3, %v3902_v14, 0.0 }
 0x3bc   : > { %v4095_v22 = vmax.f32 %v3655_v52, 0.0  ;;  %v5753_v28 = vsel %vm4114_vm3, %v4094_v42, 0.0  ;;  %v4902_v8 = vadd.f32 %v4901_v5, %v4900_v16  ;;  %v4890_v3 = vsel %vm4114_vm3, %v3903_v49, 0.0 }
 0x3bd   : > { %v5766_v39 = vadd.f32 %v5765_v29, %v5764_v10  ;;  %v5927_v21 = vmul.f32 0.0625, %v4879_v33  ;;  %v6023_v47 = vmul.f32 0.0625, %v5743_v59  ;;  %v4891_v9 = vadd.f32 %v4890_v3, %v4889_v51  ;;  %v3670_v10 = vpop.f32.mrf.mxu1  ;;  %v8487_v29 = vpop.f32.mrf.mxu0 }
 0x3be   : > { %v5754_v24 = vsel %vm4114_vm3, %v4095_v22, 0.0  ;;  %v4903_v30 = vrot.slane %v4902_v8, 2  ;;  %v7074_v35 = vsel %vm6999_vm6, %v6886_v37, %v7073_v0  ;;  %v7158_v34 = vsel %vm6999_vm6, %v6982_v61, %v7157_v6 }
 0x3bf   : > { %v5767_v58 = vrot.slane %v5766_v39, 2  ;;  %v5755_v41 = vadd.f32 %v5754_v24, %v5753_v28  ;;  %v4892_v4 = vrot.slane %v4891_v9, 4  ;;  %v2908_v54 = vadd.f32 %v10851_v2, %v8483_v13  ;;  %v8679_v3 = vpop.f32.mrf.mxu1 }
 0x3c0   : > { %v8000_v26 = vpack.c.bf16 %v5928_v1, %v5928_v1  ;;  %v4904_v63 = vadd.f32 %v4903_v30, %v4902_v8  ;;  %v8096_v53 = vpack.c.bf16 %v6024_v17, %v6024_v17  ;;  %v7999_v38 = vpack.c.bf16 %v5927_v21, %v5927_v21 }
 0x3c1   : > { %v5768_v50 = vadd.f32 %v5767_v58, %v5766_v39  ;;  %v5756_v7 = vrot.slane %v5755_v41, 4  ;;  %v8095_v27 = vpack.c.bf16 %v6023_v47, %v6023_v47  ;;  %v4893_v62 = vadd.f32 %v4892_v4, %v4891_v9 }
 0x3c2   : > { %v4905_v36 = vrot.slane %v4904_v63, 1  ;;  %v2911_v37 = vadd.f32 %v10851_v2, %v8484_v48  ;;  %v3908_v61 = vmax.f32 %v2908_v54, 0.0  ;;  %v3676_v23 = vadd.f32 %v10851_v2, %v8675_v55 }
 0x3c3   : > { %v5769_v40 = vrot.slane %v5768_v50, 1  ;;  %v5757_v12 = vadd.f32 %v5756_v7, %v5755_v41  ;;  %v4894_v46 = vrot.slane %v4893_v62, 2  ;;  %v3679_v43 = vadd.f32 %v10851_v2, %v8676_v11  ;;  %v2915_v41 = vpop.f32.mrf.mxu0 }
 0x3c4   : > { %v6888_v56 = vunpack.c.l.b16 %v8000_v26  ;;  %v4906_v32 = vadd.f32 %v4905_v36, %v4904_v63  ;;  %v3909_v15 = vmax.f32 %v2911_v37, 0.0  ;;  %v6984_v60 = vunpack.c.l.b16 %v8096_v53  ;;  %v3683_v63 = vpop.f32.mrf.mxu1 }
 0x3c5   : > { %v5758_v18 = vrot.slane %v5757_v12, 2  ;;  %v6887_v44 = vunpack.c.l.b16 %v7999_v38  ;;  %v5770_v14 = vadd.f32 %v5769_v40, %v5768_v50  ;;  %v4895_v31 = vadd.f32 %v4894_v46, %v4893_v62  ;;  %v8488_v40 = vpop.f32.mrf.mxu0 }
 0x3c6   : > { %v6983_v19 = vunpack.c.l.b16 %v8095_v27  ;;  %v4917_v42 = vsel %vm4114_vm3, %v3909_v15, 0.0  ;;  %v4101_v16 = vmax.f32 %v3679_v43, 0.0  ;;  %v4916_v55 = vsel %vm4114_vm3, %v3908_v61, 0.0 }
 0x3c7   : > { %v5759_v13 = vadd.f32 %v5758_v18, %v5757_v12  ;;  %v4896_v45 = vrot.slane %v4895_v31, 1  ;;  %v4100_v0 = vmax.f32 %v3676_v23, 0.0  ;;  %v2903_v33 = vadd.f32 %v10851_v2, %v2902_v20  ;;  %v8680_v18 = vpop.f32.mrf.mxu1 }
 0x3c8   : > { %v5930_v59 = vmul.f32 0.0625, %v4906_v32  ;;  %v2900_v6 = vadd.f32 %v10851_v2, %v2899_v57  ;;  %v3668_v5 = vadd.f32 %v10851_v2, %v3667_v25  ;;  %v6026_v49 = vmul.f32 0.0625, %v5770_v14 }
 0x3c9   : > { %v5760_v52 = vrot.slane %v5759_v13, 1  ;;  %v4897_v1 = vadd.f32 %v4896_v45, %v4895_v31  ;;  %v4918_v17 = vadd.f32 %v4917_v42, %v4916_v55  ;;  %v3671_v51 = vadd.f32 %v10851_v2, %v3670_v10  ;;  %v3686_v10 = vpop.f32.mrf.mxu1 }
 0x3ca   : > { %v7075_v22 = vsel %vm7001_vm7, %v6887_v44, %v7074_v35  ;;  %v7159_v28 = vsel %vm7001_vm7, %v6983_v19, %v7158_v34  ;;  %v5781_v39 = vsel %vm4114_vm3, %v4101_v16, 0.0  ;;  %v5780_v47 = vsel %vm4114_vm3, %v4100_v0, 0.0  ;;  %v2918_v44 = vpop.f32.mrf.mxu0 }
 0x3cb   : > { %v5761_v8 = vadd.f32 %v5760_v52, %v5759_v13  ;;  %v5929_v21 = vmul.f32 0.0625, %v4897_v1  ;;  %v3907_v57 = vmax.f32 %v2903_v33, 0.0  ;;  %v4099_v9 = vmax.f32 %v3671_v51, 0.0  ;;  %v8683_v51 = vpop.f32.mrf.mxu1 }
 0x3cc   : > { %v8002_v25 = vpack.c.bf16 %v5930_v59, %v5930_v59  ;;  %v3906_v30 = vmax.f32 %v2900_v6, 0.0  ;;  %v4098_v58 = vmax.f32 %v3668_v5, 0.0  ;;  %v8098_v4 = vpack.c.bf16 %v6026_v49, %v6026_v49  ;;  %v8491_v59 = vpop.f32.mrf.mxu0 }
 0x3cd   : > { %v6025_v24 = vmul.f32 0.0625, %v5761_v8  ;;  %v8001_v54 = vpack.c.bf16 %v5929_v21, %v5929_v21  ;;  %v4919_v48 = vrot.slane %v4918_v17, 4  ;;  %v5782_v35 = vadd.f32 %v5781_v39, %v5780_v47 }
 0x3ce   : > { %v7076_v34 = vsel %vm7003_vm8, %v6888_v56, %v7075_v22  ;;  %v7160_v7 = vsel %vm7003_vm8, %v6984_v60, %v7159_v28  ;;  %v4908_v11 = vsel %vm4114_vm3, %v3907_v57, 0.0  ;;  %v5772_v53 = vsel %vm4114_vm3, %v4099_v9, 0.0  ;;  %v2931_v47 = vpop.f32.mrf.mxu0 }
 0x3cf   : > { %v8097_v26 = vpack.c.bf16 %v6025_v24, %v6025_v24  ;;  %v6889_v50 = vunpack.c.l.b16 %v8001_v54  ;;  %v6890_v38 = vunpack.c.l.b16 %v8002_v25  ;;  %v4907_v62 = vsel %vm4114_vm3, %v3906_v30, 0.0 }
 0x3d0   : > { %v5771_v36 = vsel %vm4114_vm3, %v4098_v58, 0.0  ;;  %v6986_v12 = vunpack.c.l.b16 %v8098_v4  ;;  %v4920_v46 = vadd.f32 %v4919_v48, %v4918_v17  ;;  %v5783_v61 = vrot.slane %v5782_v35, 4  ;;  %v3699_v4 = vpop.f32.mrf.mxu1 }
 0x3d1   : > { %v6985_v27 = vunpack.c.l.b16 %v8097_v26  ;;  %v7077_v37 = vsel %vm7005_vm9, %v6889_v50, %v7076_v34  ;;  %v4909_v56 = vadd.f32 %v4908_v11, %v4907_v62  ;;  %v5773_v32 = vadd.f32 %v5772_v53, %v5771_v36  ;;  %v8492_v11 = vpop.f32.mrf.mxu0 }
 0x3d2   : > { %v7078_v23 = vsel %vm7007_vm10, %v6890_v38, %v7077_v37  ;;  %v5784_v14 = vadd.f32 %v5783_v61, %v5782_v35  ;;  %v2927_v31 = vadd.f32 %v10851_v2, %v8488_v40  ;;  %v4921_v19 = vrot.slane %v4920_v46, 2  ;;  %v8684_v40 = vpop.f32.mrf.mxu1 }
 0x3d3   : > { %v7161_v43 = vsel %vm7005_vm9, %v6985_v27, %v7160_v7  ;;  %v7180_v15 = vpack.c.b16 %v7078_v23, %v7078_v23  ;;  %v4910_v13 = vrot.slane %v4909_v56, 4  ;;  %v5774_v42 = vrot.slane %v5773_v32, 4 }
 0x3d4   : > { %v7162_v20 = vsel %vm7007_vm10, %v6986_v12, %v7161_v43  ;;  %v2924_v16 = vadd.f32 %v10851_v2, %v8487_v29  ;;  %v2916_v45 = vadd.f32 %v10851_v2, %v2915_v41  ;;  %v3684_v55 = vadd.f32 %v10851_v2, %v3683_v63 }
 0x3d5   : > { %v7192_v60 = vpack.c.b16 %v7162_v20, %v7162_v20  ;;  %7229 = vst.msk [vmem:[%s9614_s12 + $0x28] sm:$0xf] %vm7218_vm11, %v7180_v15  ;;  %v3692_v0 = vadd.f32 %v10851_v2, %v8679_v3  ;;  %v3695_v33 = vadd.f32 %v10851_v2, %v8680_v18  ;;  %v5785_v52 = vrot.slane %v5784_v14, 2 }
 0x3d6   : > { %v3913_v6 = vmax.f32 %v2927_v31, 0.0  ;;  %v4922_v5 = vadd.f32 %v4921_v19, %v4920_v46  ;;  %v4911_v49 = vadd.f32 %v4910_v13, %v4909_v56  ;;  %v5775_v1 = vadd.f32 %v5774_v42, %v5773_v32  ;;  %v2934_v19 = vpop.f32.mrf.mxu0  ;;  %v3702_v13 = vpop.f32.mrf.mxu1 }
 0x3d7   : > { %7241 = vst.msk [vmem:[%s9614_s12 + $0x58] sm:$0xf] %vm7218_vm11, %v7192_v60  ;;  %v3912_v17 = vmax.f32 %v2924_v16, 0.0  ;;  %v3910_v22 = vmax.f32 %v2916_v45, 0.0  ;;  %v4102_v28 = vmax.f32 %v3684_v55, 0.0  ;;  %v2919_v29 = vadd.f32 %v10851_v2, %v2918_v44 }
 0x3d8   : > { %v3687_v8 = vadd.f32 %v10851_v2, %v3686_v10  ;;  %v4104_v39 = vmax.f32 %v3692_v0, 0.0  ;;  %v4105_v21 = vmax.f32 %v3695_v33, 0.0  ;;  %v5786_v3 = vadd.f32 %v5785_v52, %v5784_v14 }
 0x3d9   : > { %v4935_v57 = vsel %vm4114_vm3, %v3913_v6, 0.0  ;;  %v3911_v9 = vmax.f32 %v2919_v29, 0.0  ;;  %v4923_v24 = vrot.slane %v4922_v5, 1  ;;  %v4912_v30 = vrot.slane %v4911_v49, 2 }
 0x3da   : > { %v4103_v25 = vmax.f32 %v3687_v8, 0.0  ;;  %v5776_v58 = vrot.slane %v5775_v1, 2  ;;  %v4934_v41 = vsel %vm4114_vm3, %v3912_v17, 0.0  ;;  %v4925_v54 = vsel %vm4114_vm3, %v3910_v22, 0.0 }
 0x3db   : > { %v5789_v48 = vsel %vm4114_vm3, %v4102_v28, 0.0  ;;  %v4926_v35 = vsel %vm4114_vm3, %v3911_v9, 0.0  ;;  %v4936_v26 = vadd.f32 %v4935_v57, %v4934_v41  ;;  %v5799_v63 = vsel %vm4114_vm3, %v4105_v21, 0.0  ;;  %v8495_v9 = vpop.f32.mrf.mxu0 }
 0x3dc   : > { %v5790_v34 = vsel %vm4114_vm3, %v4103_v25, 0.0  ;;  %v4927_v50 = vadd.f32 %v4926_v35, %v4925_v54  ;;  %v2940_v7 = vadd.f32 %v10851_v2, %v8491_v59  ;;  %v4924_v38 = vadd.f32 %v4923_v24, %v4922_v5  ;;  %v11028_v5 = vld [vmem:[%s11113_s2] ss:$0 sm:$0xff]  ;;  %v8687_v25 = vpop.f32.mrf.mxu1 }
 0x3dd   : > { %v5791_v53 = vadd.f32 %v5790_v34, %v5789_v48  ;;  %v5787_v27 = vrot.slane %v5786_v3, 1  ;;  %v4913_v62 = vadd.f32 %v4912_v30, %v4911_v49  ;;  %v5798_v36 = vsel %vm4114_vm3, %v4104_v39, 0.0 }
 0x3de   : > { %v5777_v12 = vadd.f32 %v5776_v58, %v5775_v1  ;;  %v5800_v37 = vadd.f32 %v5799_v63, %v5798_v36  ;;  %v2943_v46 = vadd.f32 %v10851_v2, %v8492_v11  ;;  %v4937_v61 = vrot.slane %v4936_v26, 4 }
 0x3df   : > { %v4928_v23 = vrot.slane %v4927_v50, 4  ;;  %v3916_v43 = vmax.f32 %v2940_v7, 0.0  ;;  %v3708_v56 = vadd.f32 %v10851_v2, %v8683_v51  ;;  %v5792_v32 = vrot.slane %v5791_v53, 4 }
 0x3e0   : > { %v2932_v18 = vadd.f32 %v10851_v2, %v2931_v47  ;;  %v3917_v15 = vmax.f32 %v2943_v46, 0.0  ;;  %v3711_v20 = vadd.f32 %v10851_v2, %v8684_v40  ;;  %v5932_v60 = vmul.f32 0.0625, %v4924_v38  ;;  %v3715_v38 = vpop.f32.mrf.mxu1 }
 0x3e1   : > { %v5788_v44 = vadd.f32 %v5787_v27, %v5786_v3  ;;  %v4914_v14 = vrot.slane %v4913_v62, 1  ;;  %v3700_v31 = vadd.f32 %v10851_v2, %v3699_v4  ;;  %v5778_v42 = vrot.slane %v5777_v12, 1 }
 0x3e2   : > { %v5801_v16 = vrot.slane %v5800_v37, 4  ;;  %v4953_v10 = vsel %vm4114_vm3, %v3917_v15, 0.0  ;;  %v4109_v45 = vmax.f32 %v3711_v20, 0.0  ;;  %v4938_v55 = vadd.f32 %v4937_v61, %v4936_v26 }
 0x3e3   : > { %v4929_v0 = vadd.f32 %v4928_v23, %v4927_v50  ;;  %v4952_v33 = vsel %vm4114_vm3, %v3916_v43, 0.0  ;;  %v4108_v59 = vmax.f32 %v3708_v56, 0.0  ;;  %v5793_v52 = vadd.f32 %v5792_v32, %v5791_v53  ;;  %v2947_v53 = vpop.f32.mrf.mxu0 }
 0x3e4   : > { %v3914_v6 = vmax.f32 %v2932_v18, 0.0  ;;  %v2935_v2 = vadd.f32 %v11028_v5, %v2934_v19  ;;  %v3703_v49 = vadd.f32 %v11028_v5, %v3702_v13  ;;  %v6028_v1 = vmul.f32 0.0625, %v5788_v44  ;;  %v8688_v44 = vpop.f32.mrf.mxu1 }
 0x3e5   : > { %v4915_v17 = vadd.f32 %v4914_v14, %v4913_v62  ;;  %v4106_v51 = vmax.f32 %v3700_v31, 0.0  ;;  %v4954_v22 = vadd.f32 %v4953_v10, %v4952_v33  ;;  %v5779_v28 = vadd.f32 %v5778_v42, %v5777_v12 }
 0x3e6   : > { %v5817_v29 = vsel %vm4114_vm3, %v4109_v45, 0.0  ;;  %v3915_v8 = vmax.f32 %v2935_v2, 0.0  ;;  %v4107_v39 = vmax.f32 %v3703_v49, 0.0  ;;  %v4939_v21 = vrot.slane %v4938_v55, 2 }
 0x3e7   : > { %v5802_v47 = vadd.f32 %v5801_v16, %v5800_v37  ;;  %v4930_v3 = vrot.slane %v4929_v0, 2  ;;  %v5816_v57 = vsel %vm4114_vm3, %v4108_v59, 0.0  ;;  %v5794_v24 = vrot.slane %v5793_v52, 2 }
 0x3e8   : > { %v4943_v30 = vsel %vm4114_vm3, %v3914_v6, 0.0  ;;  %v4944_v58 = vsel %vm4114_vm3, %v3915_v8, 0.0  ;;  %v5808_v41 = vsel %vm4114_vm3, %v4107_v39, 0.0  ;;  %v5807_v4 = vsel %vm4114_vm3, %v4106_v51, 0.0 }
 0x3e9   : > { %v4955_v54 = vrot.slane %v4954_v22, 4  ;;  %v5818_v48 = vadd.f32 %v5817_v29, %v5816_v57  ;;  %v4945_v35 = vadd.f32 %v4944_v58, %v4943_v30  ;;  %v8004_v34 = vpack.c.bf16 %v5932_v60, %v5932_v60  ;;  %v8496_v60 = vpop.f32.mrf.mxu0 }
 0x3ea   : > { %v5809_v26 = vadd.f32 %v5808_v41, %v5807_v4  ;;  %v4940_v63 = vadd.f32 %v4939_v21, %v4938_v55  ;;  %v5803_v50 = vrot.slane %v5802_v47, 2  ;;  %v4931_v7 = vadd.f32 %v4930_v3, %v4929_v0 }
 0x3eb   : > { %v4946_v11 = vrot.slane %v4945_v35, 4  ;;  %v8100_v27 = vpack.c.bf16 %v6028_v1, %v6028_v1  ;;  %v11038_v62 = vmul.f32 0.0625, %v4915_v17  ;;  %v11040_v36 = vmul.f32 0.0625, %v5779_v28  ;;  %v2950_v28 = vpop.f32.mrf.mxu0 }
 0x3ec   : > { %v5810_v40 = vrot.slane %v5809_v26, 4  ;;  %v5795_v12 = vadd.f32 %v5794_v24, %v5793_v52  ;;  %v4956_v37 = vadd.f32 %v4955_v54, %v4954_v22  ;;  %v5819_v46 = vrot.slane %v5818_v48, 4 }
 0x3ed   : > { %v4947_v61 = vadd.f32 %v4946_v11, %v4945_v35  ;;  %v2956_v43 = vadd.f32 %v11028_v5, %v8495_v9  ;;  %v3724_v56 = vadd.f32 %v11028_v5, %v8687_v25  ;;  %v11044_v32 = vunpack.c.l.b16 %v8004_v34 }
 0x3ee   : > { %v5811_v23 = vadd.f32 %v5810_v40, %v5809_v26  ;;  %v4941_v18 = vrot.slane %v4940_v63, 1  ;;  %v11046_v15 = vadd.f32 %v5803_v50, %v5802_v47  ;;  %v4932_v20 = vrot.slane %v4931_v7, 1  ;;  %v3718_v47 = vpop.f32.mrf.mxu1 }
 0x3ef   : > { %v11048_v14 = vunpack.c.l.b16 %v8100_v27  ;;  %v8003_v31 = vpack.c.bf16 %v11038_v62, %v11038_v62  ;;  %v8099_v19 = vpack.c.bf16 %v11040_v36, %v11040_v36  ;;  %v4948_v13 = vrot.slane %v4947_v61, 2 }
 0x3f0   : > { %v5796_v42 = vrot.slane %v5795_v12, 1  ;;  %v4957_v16 = vrot.slane %v4956_v37, 2  ;;  %v5820_v10 = vadd.f32 %v5819_v46, %v5818_v48  ;;  %v5812_v45 = vrot.slane %v5811_v23, 2 }
 0x3f1   : > { %v3920_v55 = vmax.f32 %v2956_v43, 0.0  ;;  %v4112_v0 = vmax.f32 %v3724_v56, 0.0  ;;  %v2959_v33 = vadd.f32 %v11028_v5, %v8496_v60  ;;  %v3727_v59 = vadd.f32 %v11028_v5, %v8688_v44 }
 0x3f2   : > { %v4942_v52 = vadd.f32 %v4941_v18, %v4940_v63  ;;  %v5805_v6 = vrot.slane %v11046_v15, 1  ;;  %v4933_v2 = vadd.f32 %v4932_v20, %v4931_v7  ;;  %v2948_v49 = vadd.f32 %v11028_v5, %v2947_v53 }
 0x3f3   : > { %v4949_v1 = vadd.f32 %v4948_v13, %v4947_v61  ;;  %v3716_v17 = vadd.f32 %v11028_v5, %v3715_v38  ;;  %v3921_v51 = vmax.f32 %v2959_v33, 0.0  ;;  %v4113_v22 = vmax.f32 %v3727_v59, 0.0 }
 0x3f4   : > { %v5797_v29 = vadd.f32 %v5796_v42, %v5795_v12  ;;  %v4958_v8 = vadd.f32 %v4957_v16, %v4956_v37  ;;  %v5821_v39 = vrot.slane %v5820_v10, 2  ;;  %v5813_v21 = vadd.f32 %v5812_v45, %v5811_v23 }
 0x3f5   : > { %v4970_v3 = vsel %vm4114_vm3, %v3920_v55, 0.0  ;;  %v5834_v57 = vsel %vm4114_vm3, %v4112_v0, 0.0  ;;  %v4971_v9 = vsel %vm4114_vm3, %v3921_v51, 0.0  ;;  %v5835_v25 = vsel %vm4114_vm3, %v4113_v22, 0.0 }
 0x3f6   : > { %v3918_v24 = vmax.f32 %v2948_v49, 0.0  ;;  %v4972_v30 = vadd.f32 %v4971_v9, %v4970_v3  ;;  %v5836_v58 = vadd.f32 %v5835_v25, %v5834_v57  ;;  %v2951_v41 = vadd.f32 %v11028_v5, %v2950_v28 }
 0x3f7   : > { %v5933_v4 = vmul.f32 0.0625, %v4933_v2  ;;  %v4950_v54 = vrot.slane %v4949_v1, 1  ;;  %v4110_v48 = vmax.f32 %v3716_v17, 0.0  ;;  %v3719_v35 = vadd.f32 %v11028_v5, %v3718_v47 }
 0x3f8   : > { %v5814_v34 = vrot.slane %v5813_v21, 1  ;;  %v4973_v26 = vrot.slane %v4972_v30, 4  ;;  %v5837_v63 = vrot.slane %v5836_v58, 4  ;;  %v3919_v50 = vmax.f32 %v2951_v41, 0.0 }
 0x3f9   : > { %v6029_v7 = vmul.f32 0.0625, %v5797_v29  ;;  %v4959_v11 = vrot.slane %v4958_v8, 1  ;;  %v5822_v53 = vadd.f32 %v5821_v39, %v5820_v10  ;;  %v4111_v38 = vmax.f32 %v3719_v35, 0.0 }
 0x3fa   : > { %v4961_v27 = vsel %vm4114_vm3, %v3918_v24, 0.0  ;;  %v4974_v40 = vadd.f32 %v4973_v26, %v4972_v30  ;;  %v5838_v12 = vadd.f32 %v5837_v63, %v5836_v58  ;;  %v4962_v37 = vsel %vm4114_vm3, %v3919_v50, 0.0 }
 0x3fb   : > { %v4951_v46 = vadd.f32 %v4950_v54, %v4949_v1  ;;  %v5825_v61 = vsel %vm4114_vm3, %v4110_v48, 0.0  ;;  %v4963_v23 = vadd.f32 %v4962_v37, %v4961_v27  ;;  %v5826_v5 = vsel %vm4114_vm3, %v4111_v38, 0.0 }
 0x3fc   : > { %v5815_v43 = vadd.f32 %v5814_v34, %v5813_v21  ;;  %v4975_v56 = vrot.slane %v4974_v40, 2  ;;  %v5839_v18 = vrot.slane %v5838_v12, 2  ;;  %v5827_v20 = vadd.f32 %v5826_v5, %v5825_v61 }
 0x3fd   : > { %v5934_v60 = vmul.f32 0.0625, %v4942_v52  ;;  %v5806_v44 = vadd.f32 %v5805_v6, %v11046_v15  ;;  %v5823_v13 = vrot.slane %v5822_v53, 1  ;;  %v4964_v42 = vrot.slane %v4963_v23, 4 }
 0x3fe   : > { %v8005_v16 = vpack.c.bf16 %v5933_v4, %v5933_v4  ;;  %v4976_v10 = vadd.f32 %v4975_v56, %v4974_v40  ;;  %v5840_v45 = vadd.f32 %v5839_v18, %v5838_v12  ;;  %v5828_v55 = vrot.slane %v5827_v20, 4 }
 0x3ff   : > { %v8101_v0 = vpack.c.bf16 %v6029_v7, %v6029_v7  ;;  %v4960_v33 = vadd.f32 %v4959_v11, %v4958_v8  ;;  %v5935_v59 = vmul.f32 0.0625, %v4951_v46  ;;  %v4965_v2 = vadd.f32 %v4964_v42, %v4963_v23 }
 0x400   : > { %v6031_v49 = vmul.f32 0.0625, %v5815_v43  ;;  %v4977_v1 = vrot.slane %v4976_v10, 1  ;;  %v5841_v17 = vrot.slane %v5840_v45, 1  ;;  %v5829_v51 = vadd.f32 %v5828_v55, %v5827_v20 }
 0x401   : > { %v6891_v52 = vunpack.c.l.b16 %v8003_v31  ;;  %v6030_v22 = vmul.f32 0.0625, %v5806_v44  ;;  %v5824_v15 = vadd.f32 %v5823_v13, %v5822_v53  ;;  %v4966_v6 = vrot.slane %v4965_v2, 2 }
 0x402   : > { %v6987_v28 = vunpack.c.l.b16 %v8099_v19  ;;  %v8006_v29 = vpack.c.bf16 %v5934_v60, %v5934_v60  ;;  %v4978_v39 = vadd.f32 %v4977_v1, %v4976_v10  ;;  %v5830_v8 = vrot.slane %v5829_v51, 2 }
 0x403   : > { %v6893_v21 = vunpack.c.l.b16 %v8005_v16  ;;  %v8007_v47 = vpack.c.bf16 %v5935_v59, %v5935_v59  ;;  %v5842_v3 = vadd.f32 %v5841_v17, %v5840_v45  ;;  %v4967_v57 = vadd.f32 %v4966_v6, %v4965_v2 }
 0x404   : > { %v6989_v9 = vunpack.c.l.b16 %v8101_v0  ;;  %v5936_v25 = vmul.f32 0.0625, %v4960_v33  ;;  %v8103_v24 = vpack.c.bf16 %v6031_v49, %v6031_v49  ;;  %v5831_v30 = vadd.f32 %v5830_v8, %v5829_v51 }
 0x405   : > { %v7079_v62 = vsel %vm6995_vm4, %v11044_v32, %v6891_v52  ;;  %v8102_v31 = vpack.c.bf16 %v6030_v22, %v6030_v22  ;;  %v6032_v58 = vmul.f32 0.0625, %v5824_v15  ;;  %v4968_v41 = vrot.slane %v4967_v57, 1 }
 0x406   : > { %v7163_v36 = vsel %vm6995_vm4, %v11048_v14, %v6987_v28  ;;  %v6894_v19 = vunpack.c.l.b16 %v8006_v29  ;;  %v5938_v4 = vmul.f32 0.0625, %v4978_v39  ;;  %v5832_v54 = vrot.slane %v5831_v30, 1 }
 0x407   : > { %v7080_v48 = vsel %vm6997_vm5, %v6893_v21, %v7079_v62  ;;  %v6895_v35 = vunpack.c.l.b16 %v8007_v47  ;;  %v6034_v34 = vmul.f32 0.0625, %v5842_v3  ;;  %v4969_v26 = vadd.f32 %v4968_v41, %v4967_v57 }
 0x408   : > { %v7164_v63 = vsel %vm6997_vm5, %v6989_v9, %v7163_v36  ;;  %v8008_v50 = vpack.c.bf16 %v5936_v25, %v5936_v25  ;;  %v6991_v7 = vunpack.c.l.b16 %v8103_v24  ;;  %v5833_v11 = vadd.f32 %v5832_v54, %v5831_v30 }
 0x409   : > { %v6990_v32 = vunpack.c.l.b16 %v8102_v31  ;;  %v8104_v53 = vpack.c.bf16 %v6032_v58, %v6032_v58  ;;  %v5937_v38 = vmul.f32 0.0625, %v4969_v26  ;;  %v7081_v27 = vsel %vm6999_vm6, %v6894_v19, %v7080_v48 }
 0x40a   : > { %v8010_v40 = vpack.c.bf16 %v5938_v4, %v5938_v4  ;;  %v6033_v14 = vmul.f32 0.0625, %v5833_v11  ;;  %v7082_v12 = vsel %vm7001_vm7, %v6895_v35, %v7081_v27  ;;  %v8106_v46 = vpack.c.bf16 %v6034_v34, %v6034_v34 }
 0x40b   : > { %v7165_v37 = vsel %vm6999_vm6, %v6990_v32, %v7164_v63  ;;  %v8009_v61 = vpack.c.bf16 %v5937_v38, %v5937_v38  ;;  %v6896_v23 = vunpack.c.l.b16 %v8008_v50  ;;  %v6992_v56 = vunpack.c.l.b16 %v8104_v53 }
 0x40c   : > { %v7166_v5 = vsel %vm7001_vm7, %v6991_v7, %v7165_v37  ;;  %v8105_v43 = vpack.c.bf16 %v6033_v14, %v6033_v14  ;;  %v6898_v20 = vunpack.c.l.b16 %v8010_v40  ;;  %v6994_v13 = vunpack.c.l.b16 %v8106_v46 }
 0x40d   : > { %v6897_v18 = vunpack.c.l.b16 %v8009_v61  ;;  %v7083_v60 = vsel %vm7003_vm8, %v6896_v23, %v7082_v12  ;;  %v7167_v16 = vsel %vm7003_vm8, %v6992_v56, %v7166_v5 }
 0x40e   : > { %v6993_v44 = vunpack.c.l.b16 %v8105_v43 }
 0x40f   : > { %v7084_v42 = vsel %vm7005_vm9, %v6897_v18, %v7083_v60 }
 0x410   : > { %v7085_v10 = vsel %vm7007_vm10, %v6898_v20, %v7084_v42  ;;  %v7168_v45 = vsel %vm7005_vm9, %v6993_v44, %v7167_v16 }
 0x411   : > { %v7181_v55 = vpack.c.b16 %v7085_v10, %v7085_v10  ;;  %v7169_v0 = vsel %vm7007_vm10, %v6994_v13, %v7168_v45 }
 0x412   : > { %v7193_v33 = vpack.c.b16 %v7169_v0, %v7169_v0 }
 0x413   : > { %7230 = vst.msk [vmem:[%s9614_s12 + $0x2c] sm:$0xf] %vm7218_vm11, %v7181_v55 }
 0x414   : > { %7242 = vst.msk [vmem:[%s9614_s12 + $0x5c] sm:$0xf] %vm7218_vm11, %v7193_v33 }
 0x415 PF: > { %s13_s16 = sadd.s32 1, %s8974_s16   ;;  %s11132_s12 = smov %s8966_s14 }
 0x416   : > { %p10_p8 = scmp.ge.s32.totalorder %s13_s16, 8   ;;  %s11133_s13 = smov %s8970_s15 }
 0x417   : > { %s11134_s14 = smov %s11137_s17  ;;  %s11135_s15 = smov %s11141_s18 }
 0x418   :  { %12 = sbr.rel (!%p10_p8) target bundleno = 3 (0x3), region = 62 }

// kernel: conv_model_forward.4
= control target key start
LH: loop header
LB: loop body
LE: loop exit
PB: predicated region body
PF: predicated region fallthrough
CT: control target
= control target key end

     0   :  { %s4175_s12 = smov 0   ;;  %s4177_s13 = smov 0   ;;  %s5198_s0 = inlined_call_operand.vmem [shape: bf16[1152,576], index: 0, kind: input, shape index: {}]   ;;  %s5199_s1 = inlined_call_operand.vmem [shape: bf16[576,128], index: 1, kind: input, shape index: {}]   ;;  %s5200_s2 = inlined_call_operand.vmem [shape: f32[1,128], index: 2, kind: input, shape index: {}]   ;;  %s5201_s3 = inlined_call_operand.vmem [shape: bf16[2,36,128], index: 3, kind: output, shape index: {}]  }
   0x1   :  { %s4179_s14 = smov 0  }
   0x2 LB: > { %s25_s15 = sadd.s32 1, %s4148_s13  ;;  %p3332_p0 = scmp.ge.s32.totalorder %s4152_s14, 1  ;;  %s4152_s14 = sphi %s4179_s14, %s13_s14   ;;  %s4148_s13 = sphi %s4177_s13, %s5265_s13   ;;  %s4144_s12 = sphi %s4175_s12, %s5264_s12  }
   0x3   : > { %p27_p1 = scmp.ge.s32.totalorder %s25_s15, 2  ;;  %p157_p2 = scmp.lt.s32.totalorder %s4152_s14, 3 }
   0x5   : > { %s5267_s15 = smov (%p27_p1, %s25_s15), 0  ;;  %p158_p3 = pnand %p3332_p0, %p157_p2 }
   0x7   : > { %161 = sbr.rel (%p158_p3) target bundleno = 656 (0x290), region = 32 }
   0xc   : > { %v3841_v0 = vld [vmem:[%s5199_s1 + $0x38] sm:$0xff]   ;;  %v4154_v1 = vmov 0   ;;  %s188_s18 = smul.u32 72, %s4144_s12  ;;  %v3842_v2 = vld [vmem:[%s5199_s1 + $0x30] sm:$0xff]   ;;  %v3843_v3 = vld [vmem:[%s5199_s1 + $0x28] sm:$0xff]   ;;  %vm1618_vm0 = vcmask 523264  }
   0xd   : > { %1727 = vmatprep.subr.bf16.mxu0 %v4154_v1  ;;  %3782 = vmatprep.subr.bf16.mxu1 %v4154_v1  ;;  %v3844_v4 = vld [vmem:[%s5199_s1 + $0x20] sm:$0xff]   ;;  %v3845_v5 = vld [vmem:[%s5199_s1 + $0x18] sm:$0xff]   ;;  %v3846_v7 = vld [vmem:[%s5199_s1 + $0x10] sm:$0xff]   ;;  %vm3194_vm1 = vcmask 1041409   ;;  %vm3196_vm2 = vcmask 1042434   ;;  %vm3198_vm3 = vcmask 1043459  }
   0xe   : > { %1728 = vmatpush1.bf16.msra.mxu0 %v3841_v0  ;;  %3798 = vmatpush1.bf16.msra.mxu1 %v3841_v0  ;;  %p189_p4 = scmp.lt.s32.totalorder %s188_s18, 143  ;;  %v3847_v9 = vld [vmem:[%s5199_s1 + $0x8] sm:$0xff]   ;;  %v3848_v10 = vld [vmem:[%s5199_s1] sm:$0xff]   ;;  %v3849_v11 = vld [vmem:[%s5199_s1 + $0x78] sm:$0xff]   ;;  %vm3200_vm4 = vcmask 1044484   ;;  %p197_p5 = scmp.lt.s32.totalorder %s4144_s12, 1 }
   0xf   : > { %1729 = vmatprep.subr.bf16.mxu0 %v4154_v1  ;;  %3783 = vmatprep.subr.bf16.mxu1 %v4154_v1  ;;  %v3850_v12 = vld [vmem:[%s5199_s1 + $0x70] sm:$0xff]   ;;  %v3851_v13 = vld [vmem:[%s5199_s1 + $0x68] sm:$0xff]   ;;  %v3852_v14 = vld [vmem:[%s5199_s1 + $0x60] sm:$0xff]   ;;  %vm3202_vm5 = vcmask 1045509   ;;  %vm3204_vm6 = vcmask 1046534   ;;  %vm3206_vm7 = vcmask 1047559  }
  0x10   : > { %s5269_s18 = smov (!%p189_p4, %s188_s18), 143  ;;  %v3853_v15 = vld [vmem:[%s5199_s1 + $0x58] sm:$0xff]   ;;  %v3854_v16 = vld [vmem:[%s5199_s1 + $0x50] sm:$0xff]   ;;  %v3855_v17 = vld [vmem:[%s5199_s1 + $0x48] sm:$0xff]   ;;  %s5271_s12 = smov (!%p197_p5, %s4144_s12), 1 }
  0x11   : > { %s3814_s25 = smul.u32 20, %s5269_s18  ;;  %v3856_v18 = vld [vmem:[%s5199_s1 + $0x40] sm:$0xff]   ;;  %v3863_v19 = vld [vmem:[%s5199_s1 + $0x118] sm:$0xff]   ;;  %v3912_v25 = vld [vmem:[%s5199_s1 + $0x110] sm:$0xff]  }
  0x12   : > { %1730 = vmatpush1.bf16.msra.mxu0 %v3842_v2  ;;  %3799 = vmatpush1.bf16.msra.mxu1 %v3842_v2  ;;  %v3864_v22 = vld [vmem:[%s5199_s1 + $0xb8] sm:$0xff]   ;;  %v3869_v26 = vld [vmem:[%s5199_s1 + $0xb0] sm:$0xff]   ;;  %v3872_v29 = vld [vmem:[%s5199_s1 + $0xa8] sm:$0xff]   ;;  %s3815_s29 = smul.u32 20, %s5271_s12 }
  0x13   : > { %1731 = vmatprep.subr.bf16.mxu0 %v4154_v1  ;;  %3784 = vmatprep.subr.bf16.mxu1 %v4154_v1  ;;  %s4222_s30 = scalar_lea.vmem %s5198_s0, %s3814_s25  ;;  %v3959_v32 = vld [vmem:[%s5199_s1 + $0x108] sm:$0xff]   ;;  %v3879_v33 = vld [vmem:[%s5199_s1 + $0xa0] sm:$0xff]   ;;  %v3880_v36 = vld [vmem:[%s5199_s1 + $0x98] sm:$0xff]  }
  0x14   : > { %v3859_v6 = vld [vmem:[%s4222_s30 + $0x4] ss:$20 sps:$4 sm:$0xff]   ;;  %v3862_v8 = vld [vmem:[%s4222_s30 + $0x43c] ss:$20 sps:$4 sm:$0xff]   ;;  %v3857_v20 = vld [vmem:[%s4222_s30] ss:$20 sps:$4 sm:$0xff]   ;;  %s4996_s5 = scalar_lea.vmem %s5201_s3, %s3815_s29 }
  0x15   : > { %1759 = vmatprep.mubr.bf16.mxu0 %v3859_v6  ;;  %1975 = vmatprep.mubr.bf16.mxu1 %v3862_v8  ;;  %v3860_v21 = vld [vmem:[%s4222_s30 + $0x438] ss:$20 sps:$4 sm:$0xff]   ;;  %v3870_v27 = vld [vmem:[%s4222_s30 + $0x28] ss:$20 sps:$4 sm:$0xff]   ;;  %v3871_v28 = vld [vmem:[%s4222_s30 + $0x460] ss:$20 sps:$4 sm:$0xff]  }
  0x16   : > { %1732 = vmatpush1.bf16.msra.mxu0 %v3843_v3  ;;  %3800 = vmatpush1.bf16.msra.mxu1 %v3843_v3  ;;  %v3865_v23 = vld [vmem:[%s4222_s30 + $0x2c] ss:$20 sps:$4 sm:$0xff]   ;;  %v3867_v24 = vld [vmem:[%s4222_s30 + $0x464] ss:$20 sps:$4 sm:$0xff]   ;;  %v3873_v30 = vld [vmem:[%s4222_s30 + $0x54] ss:$20 sps:$4 sm:$0xff]  }
  0x17   : > { %1733 = vmatprep.subr.bf16.mxu0 %v4154_v1  ;;  %3785 = vmatprep.subr.bf16.mxu1 %v4154_v1  ;;  %v3875_v31 = vld [vmem:[%s4222_s30 + $0x48c] ss:$20 sps:$4 sm:$0xff]   ;;  %v3877_v34 = vld [vmem:[%s4222_s30 + $0x50] ss:$20 sps:$4 sm:$0xff]   ;;  %v3878_v35 = vld [vmem:[%s4222_s30 + $0x488] ss:$20 sps:$4 sm:$0xff]  }
  0x18   : > { %v3881_v37 = vld [vmem:[%s4222_s30 + $0x7c] ss:$20 sps:$4 sm:$0xff]   ;;  %v3883_v38 = vld [vmem:[%s4222_s30 + $0x4b4] ss:$20 sps:$4 sm:$0xff]   ;;  %v3885_v40 = vld [vmem:[%s4222_s30 + $0x78] ss:$20 sps:$4 sm:$0xff]  }
  0x19   : > { %v3887_v39 = vld [vmem:[%s5199_s1 + $0x90] sm:$0xff]   ;;  %v3888_v42 = vld [vmem:[%s5199_s1 + $0x88] sm:$0xff]   ;;  %v3889_v43 = vld [vmem:[%s4222_s30 + $0xa4] ss:$20 sps:$4 sm:$0xff]  }
  0x1a   : > { %1734 = vmatpush1.bf16.msra.mxu0 %v3844_v4  ;;  %3801 = vmatpush1.bf16.msra.mxu1 %v3844_v4  ;;  %v3886_v41 = vld [vmem:[%s4222_s30 + $0x4b0] ss:$20 sps:$4 sm:$0xff]   ;;  %v3893_v46 = vld [vmem:[%s4222_s30 + $0xa0] ss:$20 sps:$4 sm:$0xff]   ;;  %v3894_v47 = vld [vmem:[%s4222_s30 + $0x4d8] ss:$20 sps:$4 sm:$0xff]  }
  0x1b   : > { %1735 = vmatprep.subr.bf16.mxu0 %v4154_v1  ;;  %3786 = vmatprep.subr.bf16.mxu1 %v4154_v1  ;;  %v3891_v44 = vld [vmem:[%s4222_s30 + $0x4dc] ss:$20 sps:$4 sm:$0xff]   ;;  %v3895_v45 = vld [vmem:[%s5199_s1 + $0x80] sm:$0xff]   ;;  %v3904_v55 = vld [vmem:[%s4222_s30 + $0xf4] ss:$20 sps:$4 sm:$0xff]  }
  0x1c   : > { %v3896_v48 = vld [vmem:[%s5199_s1 + $0xf8] sm:$0xff]   ;;  %v3897_v49 = vld [vmem:[%s4222_s30 + $0xcc] ss:$20 sps:$4 sm:$0xff]   ;;  %v3903_v52 = vld [vmem:[%s5199_s1 + $0xf0] sm:$0xff]  }
  0x1d   : > { %v3899_v50 = vld [vmem:[%s4222_s30 + $0x504] ss:$20 sps:$4 sm:$0xff]   ;;  %v3901_v53 = vld [vmem:[%s4222_s30 + $0xc8] ss:$20 sps:$4 sm:$0xff]   ;;  %v3902_v54 = vld [vmem:[%s4222_s30 + $0x500] ss:$20 sps:$4 sm:$0xff]  }
  0x1e   : > { %1736 = vmatpush1.bf16.msra.mxu0 %v3845_v5  ;;  %3802 = vmatpush1.bf16.msra.mxu1 %v3845_v5  ;;  %v4002_v51 = vld [vmem:[%s5199_s1 + $0x100] sm:$0xff]   ;;  %v3908_v57 = vld [vmem:[%s5199_s1 + $0xe8] sm:$0xff]   ;;  %v3913_v61 = vld [vmem:[%s4222_s30 + $0x11c] ss:$20 sps:$4 sm:$0xff]  }
  0x1f   : > { %1737 = vmatprep.subr.bf16.mxu0 %v4154_v1  ;;  %3787 = vmatprep.subr.bf16.mxu1 %v4154_v1  ;;  %v3906_v56 = vld [vmem:[%s4222_s30 + $0x52c] ss:$20 sps:$4 sm:$0xff]   ;;  %v3909_v59 = vld [vmem:[%s4222_s30 + $0xf0] ss:$20 sps:$4 sm:$0xff]   ;;  %v3910_v60 = vld [vmem:[%s4222_s30 + $0x528] ss:$20 sps:$4 sm:$0xff]  }
  0x20   : > { %v3911_v58 = vld [vmem:[%s5199_s1 + $0xe0] sm:$0xff]   ;;  %v3915_v62 = vld [vmem:[%s4222_s30 + $0x554] ss:$20 sps:$4 sm:$0xff]   ;;  %v3919_v63 = vld [vmem:[%s5199_s1 + $0xd8] sm:$0xff]  }
  0x21   : > { %v3920_v0 = vld [vmem:[%s5199_s1 + $0xd0] sm:$0xff]   ;;  %v3917_v2 = vld [vmem:[%s4222_s30 + $0x118] ss:$20 sps:$4 sm:$0xff]  }
  0x22   : > { %1738 = vmatpush1.bf16.msra.mxu0 %v3846_v7  ;;  %3803 = vmatpush1.bf16.msra.mxu1 %v3846_v7  ;;  %v3918_v3 = vld [vmem:[%s4222_s30 + $0x550] ss:$20 sps:$4 sm:$0xff]   ;;  %v3927_v6 = vld [vmem:[%s5199_s1 + $0xc8] sm:$0xff]   ;;  %v3925_v8 = vld [vmem:[%s4222_s30 + $0x140] ss:$20 sps:$4 sm:$0xff]  }
  0x23   : > { %1739 = vmatprep.subr.bf16.mxu0 %v4154_v1  ;;  %3788 = vmatprep.subr.bf16.mxu1 %v4154_v1  ;;  %v3921_v4 = vld [vmem:[%s4222_s30 + $0x144] ss:$20 sps:$4 sm:$0xff]   ;;  %v3923_v5 = vld [vmem:[%s4222_s30 + $0x57c] ss:$20 sps:$4 sm:$0xff]  }
  0x24   : > { %v3928_v7 = vld [vmem:[%s5199_s1 + $0xc0] sm:$0xff]  }
  0x26   : > { %1740 = vmatpush1.bf16.msra.mxu0 %v3847_v9  ;;  %3804 = vmatpush1.bf16.msra.mxu1 %v3847_v9  ;;  %v3926_v9 = vld [vmem:[%s4222_s30 + $0x578] ss:$20 sps:$4 sm:$0xff]  }
  0x27   : > { %1741 = vmatprep.subr.bf16.mxu0 %v4154_v1  ;;  %3789 = vmatprep.subr.bf16.mxu1 %v4154_v1 }
  0x2a   : > { %1742 = vmatpush1.bf16.msra.mxu0 %v3848_v10  ;;  %3805 = vmatpush1.bf16.msra.mxu1 %v3848_v10  ;;  %v3929_v10 = vld [vmem:[%s4222_s30 + $0x16c] ss:$20 sps:$4 sm:$0xff]  }
  0x2b   : > { %1743 = vmatprep.subr.bf16.mxu0 %v4154_v1  ;;  %3790 = vmatprep.subr.bf16.mxu1 %v4154_v1 }
  0x2e   : > { %1744 = vmatpush2.bf16.msra.mxu0 %v3849_v11  ;;  %3806 = vmatpush2.bf16.msra.mxu1 %v3849_v11  ;;  %v3933_v11 = vld [vmem:[%s4222_s30 + $0xc] ss:$20 sps:$4 sm:$0xff]  }
  0x2f   : > { %1745 = vmatprep.subr.bf16.mxu0 %v4154_v1  ;;  %3791 = vmatprep.subr.bf16.mxu1 %v4154_v1 }
  0x32   : > { %1746 = vmatpush2.bf16.msra.mxu0 %v3850_v12  ;;  %3807 = vmatpush2.bf16.msra.mxu1 %v3850_v12  ;;  %v3931_v12 = vld [vmem:[%s4222_s30 + $0x8] ss:$20 sps:$4 sm:$0xff]  }
  0x33   : > { %1747 = vmatprep.subr.bf16.mxu0 %v4154_v1  ;;  %3792 = vmatprep.subr.bf16.mxu1 %v4154_v1 }
  0x36   : > { %1748 = vmatpush2.bf16.msra.mxu0 %v3851_v13  ;;  %3808 = vmatpush2.bf16.msra.mxu1 %v3851_v13  ;;  %v3934_v13 = vld [vmem:[%s4222_s30 + $0x168] ss:$20 sps:$4 sm:$0xff]  }
  0x37   : > { %1749 = vmatprep.subr.bf16.mxu0 %v4154_v1  ;;  %3793 = vmatprep.subr.bf16.mxu1 %v4154_v1 }
  0x3a   : > { %1750 = vmatpush2.bf16.msra.mxu0 %v3852_v14  ;;  %3809 = vmatpush2.bf16.msra.mxu1 %v3852_v14  ;;  %v3935_v14 = vld [vmem:[%s4222_s30 + $0x194] ss:$20 sps:$4 sm:$0xff]  }
  0x3b   : > { %1751 = vmatprep.subr.bf16.mxu0 %v4154_v1  ;;  %3794 = vmatprep.subr.bf16.mxu1 %v4154_v1 }
  0x3e   : > { %1752 = vmatpush2.bf16.msra.mxu0 %v3853_v15  ;;  %3810 = vmatpush2.bf16.msra.mxu1 %v3853_v15  ;;  %v3937_v15 = vld [vmem:[%s4222_s30 + $0x34] ss:$20 sps:$4 sm:$0xff]  }
  0x3f   : > { %1753 = vmatprep.subr.bf16.mxu0 %v4154_v1  ;;  %3795 = vmatprep.subr.bf16.mxu1 %v4154_v1 }
  0x42   : > { %1754 = vmatpush2.bf16.msra.mxu0 %v3854_v16  ;;  %3811 = vmatpush2.bf16.msra.mxu1 %v3854_v16  ;;  %v3940_v16 = vld [vmem:[%s4222_s30 + $0x30] ss:$20 sps:$4 sm:$0xff]  }
  0x43   : > { %1755 = vmatprep.subr.bf16.mxu0 %v4154_v1  ;;  %3796 = vmatprep.subr.bf16.mxu1 %v4154_v1 }
  0x46   : > { %1756 = vmatpush2.bf16.msra.mxu0 %v3855_v17  ;;  %3812 = vmatpush2.bf16.msra.mxu1 %v3855_v17  ;;  %v3941_v17 = vld [vmem:[%s4222_s30 + $0x1bc] ss:$20 sps:$4 sm:$0xff]  }
  0x47   : > { %1757 = vmatprep.subr.bf16.mxu0 %v4154_v1  ;;  %3797 = vmatprep.subr.bf16.mxu1 %v4154_v1 }
  0x4a   : > { %1758 = vmatpush2.bf16.msra.mxu0 %v3856_v18  ;;  %3813 = vmatpush2.bf16.msra.mxu1 %v3856_v18  ;;  %v3943_v18 = vld [vmem:[%s4222_s30 + $0x5c] ss:$20 sps:$4 sm:$0xff]  }
  0x4b   : > { %3702 = vmatprep.subr.bf16.mxu0 %v3863_v19  ;;  %2048 = vmatprep.subr.bf16.mxu1 %v4154_v1 }
  0x4d   : > { %1760 = vmatmul.mubr.bf16.vlgmr.msra.gmra.mxu0 %v3857_v20  ;;  %1976 = vmatmul.mubr.bf16.vlgmr.msra.gmra.mxu1 %v3860_v21  ;;  %v3946_v20 = vld [vmem:[%s4222_s30 + $0x58] ss:$20 sps:$4 sm:$0xff]  }
  0x4e   : > { %3703 = vmatpush3.bf16.msra.mxu0 %v3863_v19  ;;  %2049 = vmatpush1.bf16.msra.mxu1 %v3864_v22  ;;  %v3945_v19 = vld [vmem:[%s4222_s30 + $0x1b8] ss:$20 sps:$4 sm:$0xff]  }
  0x4f   : > { %2050 = vmatprep.subr.bf16.mxu1 %v4154_v1  ;;  %1767 = vmatprep.mubr.bf16.mxu0 %v3865_v23  ;;  %v3947_v21 = vld [vmem:[%s4222_s30 + $0x1e4] ss:$20 sps:$4 sm:$0xff]   ;;  %v3951_v23 = vld [vmem:[%s4222_s30 + $0x1e0] ss:$20 sps:$4 sm:$0xff]  }
  0x50   : > { %1983 = vmatprep.mubr.bf16.mxu1 %v3867_v24  ;;  %3704 = vmatprep.subr.bf16.mxu0 %v3912_v25  ;;  %v3949_v22 = vld [vmem:[%s4222_s30 + $0x84] ss:$20 sps:$4 sm:$0xff]   ;;  %v3952_v24 = vld [vmem:[%s4222_s30 + $0x80] ss:$20 sps:$4 sm:$0xff]  }
  0x52   : > { %2051 = vmatpush1.bf16.msra.mxu1 %v3869_v26  ;;  %3705 = vmatpush3.bf16.msra.mxu0 %v3912_v25  ;;  %v3953_v25 = vld [vmem:[%s4222_s30 + $0x20c] ss:$20 sps:$4 sm:$0xff]  }
  0x53   : > { %2052 = vmatprep.subr.bf16.mxu1 %v4154_v1  ;;  %3706 = vmatprep.subr.bf16.mxu0 %v3959_v32  ;;  %v3955_v26 = vld [vmem:[%s4222_s30 + $0xac] ss:$20 sps:$4 sm:$0xff]  }
  0x55   : > { %1768 = vmatmul.mubr.bf16.gmra.mxu0 %v3870_v27  ;;  %1984 = vmatmul.mubr.bf16.gmra.mxu1 %v3871_v28  ;;  %v3957_v27 = vld [vmem:[%s4222_s30 + $0x208] ss:$20 sps:$4 sm:$0xff]  }
  0x56   : > { %2053 = vmatpush1.bf16.msra.mxu1 %v3872_v29  ;;  %1775 = vmatprep.mubr.bf16.mxu0 %v3873_v30  ;;  %v3958_v28 = vld [vmem:[%s4222_s30 + $0xa8] ss:$20 sps:$4 sm:$0xff]  }
  0x57   : > { %1991 = vmatprep.mubr.bf16.mxu1 %v3875_v31  ;;  %2054 = vmatprep.subr.bf16.mxu1 %v4154_v1  ;;  %v3960_v29 = vld [vmem:[%s4222_s30 + $0x234] ss:$20 sps:$4 sm:$0xff]   ;;  %v3964_v31 = vld [vmem:[%s4222_s30 + $0x230] ss:$20 sps:$4 sm:$0xff]  }
  0x58   : > { %3707 = vmatpush3.bf16.msra.mxu0 %v3959_v32  ;;  %v3962_v30 = vld [vmem:[%s4222_s30 + $0xd4] ss:$20 sps:$4 sm:$0xff]   ;;  %v3965_v32 = vld [vmem:[%s4222_s30 + $0xd0] ss:$20 sps:$4 sm:$0xff]  }
  0x59   : > { %3708 = vmatprep.subr.bf16.mxu0 %v4002_v51 }
  0x5a   : > { %2055 = vmatpush1.bf16.msra.mxu1 %v3879_v33  ;;  %v3966_v33 = vld [vmem:[%s4222_s30 + $0x25c] ss:$20 sps:$4 sm:$0xff]  }
  0x5b   : > { %2056 = vmatprep.subr.bf16.mxu1 %v4154_v1 }
  0x5c   : > { %3709 = vmatpush3.bf16.msra.mxu0 %v4002_v51  ;;  %v3994_v51 = vld [vmem:[%s4222_s30 + $0x2f8] ss:$20 sps:$4 sm:$0xff]  }
  0x5d   : > { %1776 = vmatmul.mubr.bf16.gmra.mxu0 %v3877_v34  ;;  %1992 = vmatmul.mubr.bf16.gmra.mxu1 %v3878_v35  ;;  %v3968_v34 = vld [vmem:[%s4222_s30 + $0xfc] ss:$20 sps:$4 sm:$0xff]   ;;  %v3970_v35 = vld [vmem:[%s4222_s30 + $0x258] ss:$20 sps:$4 sm:$0xff]  }
  0x5e   : > { %2057 = vmatpush1.bf16.msra.mxu1 %v3880_v36  ;;  %1783 = vmatprep.mubr.bf16.mxu0 %v3881_v37  ;;  %v3971_v36 = vld [vmem:[%s4222_s30 + $0xf8] ss:$20 sps:$4 sm:$0xff]  }
  0x5f   : > { %1999 = vmatprep.mubr.bf16.mxu1 %v3883_v38  ;;  %2058 = vmatprep.subr.bf16.mxu1 %v4154_v1  ;;  %v3972_v37 = vld [vmem:[%s4222_s30 + $0x284] ss:$20 sps:$4 sm:$0xff]  }
  0x60   : > { %v3974_v38 = vld [vmem:[%s4222_s30 + $0x124] ss:$20 sps:$4 sm:$0xff]  }
  0x62   : > { %2059 = vmatpush1.bf16.msra.mxu1 %v3887_v39  ;;  %v3976_v39 = vld [vmem:[%s4222_s30 + $0x280] ss:$20 sps:$4 sm:$0xff]  }
  0x63   : > { %2060 = vmatprep.subr.bf16.mxu1 %v4154_v1 }
  0x65   : > { %1784 = vmatmul.mubr.bf16.gmra.mxu0 %v3885_v40  ;;  %2000 = vmatmul.mubr.bf16.gmra.mxu1 %v3886_v41  ;;  %v3977_v40 = vld [vmem:[%s4222_s30 + $0x120] ss:$20 sps:$4 sm:$0xff]  }
  0x66   : > { %2061 = vmatpush1.bf16.msra.mxu1 %v3888_v42  ;;  %1791 = vmatprep.mubr.bf16.mxu0 %v3889_v43  ;;  %v3978_v41 = vld [vmem:[%s4222_s30 + $0x2ac] ss:$20 sps:$4 sm:$0xff]   ;;  %v3982_v43 = vld [vmem:[%s4222_s30 + $0x2a8] ss:$20 sps:$4 sm:$0xff]  }
  0x67   : > { %2007 = vmatprep.mubr.bf16.mxu1 %v3891_v44  ;;  %2062 = vmatprep.subr.bf16.mxu1 %v4154_v1  ;;  %v3980_v42 = vld [vmem:[%s4222_s30 + $0x14c] ss:$20 sps:$4 sm:$0xff]   ;;  %v3983_v44 = vld [vmem:[%s4222_s30 + $0x148] ss:$20 sps:$4 sm:$0xff]  }
  0x6a   : > { %2063 = vmatpush1.bf16.msra.mxu1 %v3895_v45  ;;  %v3984_v45 = vld [vmem:[%s4222_s30 + $0x2d4] ss:$20 sps:$4 sm:$0xff]  }
  0x6b   : > { %2064 = vmatprep.subr.bf16.mxu1 %v4154_v1 }
  0x6d   : > { %1792 = vmatmul.mubr.bf16.gmra.mxu0 %v3893_v46  ;;  %2008 = vmatmul.mubr.bf16.gmra.mxu1 %v3894_v47  ;;  %v3986_v46 = vld [vmem:[%s4222_s30 + $0x174] ss:$20 sps:$4 sm:$0xff]   ;;  %v3988_v47 = vld [vmem:[%s4222_s30 + $0x2d0] ss:$20 sps:$4 sm:$0xff]  }
  0x6e   : > { %2065 = vmatpush2.bf16.msra.mxu1 %v3896_v48  ;;  %1799 = vmatprep.mubr.bf16.mxu0 %v3897_v49  ;;  %v3989_v48 = vld [vmem:[%s4222_s30 + $0x170] ss:$20 sps:$4 sm:$0xff]  }
  0x6f   : > { %2015 = vmatprep.mubr.bf16.mxu1 %v3899_v50  ;;  %2066 = vmatprep.subr.bf16.mxu1 %v4154_v1  ;;  %v3990_v49 = vld [vmem:[%s4222_s30 + $0x2fc] ss:$20 sps:$4 sm:$0xff]  }
  0x70   : > { %v3992_v50 = vld [vmem:[%s4222_s30 + $0x19c] ss:$20 sps:$4 sm:$0xff]  }
  0x72   : > { %2067 = vmatpush2.bf16.msra.mxu1 %v3903_v52  ;;  %v3995_v52 = vld [vmem:[%s4222_s30 + $0x198] ss:$20 sps:$4 sm:$0xff]  }
  0x73   : > { %2068 = vmatprep.subr.bf16.mxu1 %v4154_v1 }
  0x75   : > { %1800 = vmatmul.mubr.bf16.gmra.mxu0 %v3901_v53  ;;  %2016 = vmatmul.mubr.bf16.gmra.mxu1 %v3902_v54  ;;  %v3996_v53 = vld [vmem:[%s4222_s30 + $0x324] ss:$20 sps:$4 sm:$0xff]  }
  0x76   : > { %1807 = vmatprep.mubr.bf16.mxu0 %v3904_v55  ;;  %2023 = vmatprep.mubr.bf16.mxu1 %v3906_v56  ;;  %v3998_v54 = vld [vmem:[%s4222_s30 + $0x1c4] ss:$20 sps:$4 sm:$0xff]   ;;  %v4000_v55 = vld [vmem:[%s4222_s30 + $0x320] ss:$20 sps:$4 sm:$0xff]  }
  0x77   : > { %2069 = vmatpush2.bf16.msra.mxu1 %v3908_v57  ;;  %v4001_v56 = vld [vmem:[%s4222_s30 + $0x1c0] ss:$20 sps:$4 sm:$0xff]  }
  0x78   : > { %2070 = vmatprep.subr.bf16.mxu1 %v4154_v1  ;;  %v4003_v57 = vld [vmem:[%s4222_s30 + $0x34c] ss:$20 sps:$4 sm:$0xff]  }
  0x7b   : > { %2071 = vmatpush2.bf16.msra.mxu1 %v3911_v58  ;;  %v4005_v58 = vld [vmem:[%s4222_s30 + $0x1ec] ss:$20 sps:$4 sm:$0xff]  }
  0x7c   : > { %2072 = vmatprep.subr.bf16.mxu1 %v4154_v1 }
  0x7d   : > { %1808 = vmatmul.mubr.bf16.gmra.mxu0 %v3909_v59  ;;  %2024 = vmatmul.mubr.bf16.gmra.mxu1 %v3910_v60  ;;  %v4007_v59 = vld [vmem:[%s4222_s30 + $0x348] ss:$20 sps:$4 sm:$0xff]  }
  0x7e   : > { %1815 = vmatprep.mubr.bf16.mxu0 %v3913_v61  ;;  %2031 = vmatprep.mubr.bf16.mxu1 %v3915_v62  ;;  %v4008_v60 = vld [vmem:[%s4222_s30 + $0x1e8] ss:$20 sps:$4 sm:$0xff]  }
  0x7f   : > { %2073 = vmatpush2.bf16.msra.mxu1 %v3919_v63  ;;  %v4009_v61 = vld [vmem:[%s4222_s30 + $0x374] ss:$20 sps:$4 sm:$0xff]   ;;  %v4013_v63 = vld [vmem:[%s4222_s30 + $0x370] ss:$20 sps:$4 sm:$0xff]  }
  0x80   : > { %2074 = vmatprep.subr.bf16.mxu1 %v4154_v1  ;;  %v4011_v62 = vld [vmem:[%s4222_s30 + $0x214] ss:$20 sps:$4 sm:$0xff]  }
  0x83   : > { %2075 = vmatpush2.bf16.msra.mxu1 %v3920_v0  ;;  %v4014_v0 = vld [vmem:[%s4222_s30 + $0x210] ss:$20 sps:$4 sm:$0xff]  }
  0x84   : > { %2076 = vmatprep.subr.bf16.mxu1 %v4154_v1 }
  0x85   : > { %1816 = vmatmul.mubr.bf16.gmra.mxu0 %v3917_v2  ;;  %2032 = vmatmul.mubr.bf16.gmra.mxu1 %v3918_v3  ;;  %v4015_v2 = vld [vmem:[%s4222_s30 + $0x39c] ss:$20 sps:$4 sm:$0xff]  }
  0x86   : > { %1823 = vmatprep.mubr.bf16.mxu0 %v3921_v4  ;;  %2039 = vmatprep.mubr.bf16.mxu1 %v3923_v5  ;;  %v4017_v3 = vld [vmem:[%s4222_s30 + $0x23c] ss:$20 sps:$4 sm:$0xff]   ;;  %v4019_v4 = vld [vmem:[%s4222_s30 + $0x398] ss:$20 sps:$4 sm:$0xff]  }
  0x87   : > { %2077 = vmatpush2.bf16.msra.mxu1 %v3927_v6  ;;  %v4020_v5 = vld [vmem:[%s4222_s30 + $0x238] ss:$20 sps:$4 sm:$0xff]  }
  0x88   : > { %2078 = vmatprep.subr.bf16.mxu1 %v4154_v1  ;;  %v3939_v1 = vld [vmem:[%s4222_s30 + $0x190] ss:$20 sps:$4 sm:$0xff]  }
  0x89   : > { %v4021_v6 = vld [vmem:[%s4222_s30 + $0x3c4] ss:$20 sps:$4 sm:$0xff]  }
  0x8b   : > { %2079 = vmatpush2.bf16.msra.mxu1 %v3928_v7  ;;  %v4023_v7 = vld [vmem:[%s4222_s30 + $0x264] ss:$20 sps:$4 sm:$0xff]  }
  0x8d   : > { %1824 = vmatmul.mubr.bf16.gmra.mxu0 %v3925_v8  ;;  %2040 = vmatmul.mubr.bf16.gmra.mxu1 %v3926_v9  ;;  %v4025_v8 = vld [vmem:[%s4222_s30 + $0x3c0] ss:$20 sps:$4 sm:$0xff]  }
  0x8e   : > { %1831 = vmatprep.mubr.bf16.mxu0 %v3929_v10  ;;  %2080 = vmatprep.mubr.bf16.mxu1 %v3933_v11  ;;  %v4026_v9 = vld [vmem:[%s4222_s30 + $0x260] ss:$20 sps:$4 sm:$0xff]  }
  0x8f   : > { %v4027_v10 = vld [vmem:[%s4222_s30 + $0x3ec] ss:$20 sps:$4 sm:$0xff]  }
  0x90   : > { %v4029_v11 = vld [vmem:[%s4222_s30 + $0x28c] ss:$20 sps:$4 sm:$0xff]  }
  0x95   : > { %1832 = vmatmul.mubr.bf16.gmra.mxu0 %v3934_v13  ;;  %2081 = vmatmul.mubr.bf16.vlgmr.msra.gmra.mxu1 %v3931_v12 }
  0x96   : > { %1839 = vmatprep.mubr.bf16.mxu0 %v3935_v14  ;;  %2088 = vmatprep.mubr.bf16.mxu1 %v3937_v15 }
  0x9d   : > { %1840 = vmatmul.mubr.bf16.gmra.mxu0 %v3939_v1  ;;  %2089 = vmatmul.mubr.bf16.gmra.mxu1 %v3940_v16 }
  0x9e   : > { %1847 = vmatprep.mubr.bf16.mxu0 %v3941_v17  ;;  %2096 = vmatprep.mubr.bf16.mxu1 %v3943_v18  ;;  %v4031_v17 = vld [vmem:[%s4222_s30 + $0x3e8] ss:$20 sps:$4 sm:$0xff]  }
  0x9f   : > { %v4032_v18 = vld [vmem:[%s4222_s30 + $0x288] ss:$20 sps:$4 sm:$0xff]  }
  0xa5   : > { %1848 = vmatmul.mubr.bf16.gmra.mxu0 %v3945_v19  ;;  %2097 = vmatmul.mubr.bf16.gmra.mxu1 %v3946_v20  ;;  %v4033_v19 = vld [vmem:[%s4222_s30 + $0x414] ss:$20 sps:$4 sm:$0xff]  }
  0xa6   : > { %1855 = vmatprep.mubr.bf16.mxu0 %v3947_v21  ;;  %2104 = vmatprep.mubr.bf16.mxu1 %v3949_v22  ;;  %v4035_v20 = vld [vmem:[%s4222_s30 + $0x2b4] ss:$20 sps:$4 sm:$0xff]  }
  0xad   : > { %1856 = vmatmul.mubr.bf16.gmra.mxu0 %v3951_v23  ;;  %2105 = vmatmul.mubr.bf16.gmra.mxu1 %v3952_v24 }
  0xae   : > { %1863 = vmatprep.mubr.bf16.mxu0 %v3953_v25  ;;  %2112 = vmatprep.mubr.bf16.mxu1 %v3955_v26 }
  0xb5   : > { %1864 = vmatmul.mubr.bf16.gmra.mxu0 %v3957_v27  ;;  %2113 = vmatmul.mubr.bf16.gmra.mxu1 %v3958_v28 }
  0xb6   : > { %1871 = vmatprep.mubr.bf16.mxu0 %v3960_v29  ;;  %2120 = vmatprep.mubr.bf16.mxu1 %v3962_v30  ;;  %v4037_v29 = vld [vmem:[%s4222_s30 + $0x410] ss:$20 sps:$4 sm:$0xff]  }
  0xb7   : > { %v4038_v30 = vld [vmem:[%s4222_s30 + $0x2b0] ss:$20 sps:$4 sm:$0xff]  }
  0xbd   : > { %1872 = vmatmul.mubr.bf16.gmra.mxu0 %v3964_v31  ;;  %2121 = vmatmul.mubr.bf16.gmra.mxu1 %v3965_v32  ;;  %v4039_v31 = vld [vmem:[%s4222_s30 + $0x2dc] ss:$20 sps:$4 sm:$0xff]  }
  0xbe   : > { %1879 = vmatprep.mubr.bf16.mxu0 %v3966_v33  ;;  %2128 = vmatprep.mubr.bf16.mxu1 %v3968_v34  ;;  %v4041_v32 = vld [vmem:[%s4222_s30 + $0x10] ss:$20 sps:$4 sm:$0xff]  }
  0xc5   : > { %1880 = vmatmul.mubr.bf16.gmra.mxu0 %v3970_v35  ;;  %2129 = vmatmul.mubr.bf16.gmra.mxu1 %v3971_v36 }
  0xc6   : > { %1887 = vmatprep.mubr.bf16.mxu0 %v3972_v37  ;;  %2136 = vmatprep.mubr.bf16.mxu1 %v3974_v38 }
  0xcd   : > { %1888 = vmatmul.mubr.bf16.gmra.mxu0 %v3976_v39  ;;  %2137 = vmatmul.mubr.bf16.gmra.mxu1 %v3977_v40 }
  0xce   : > { %1895 = vmatprep.mubr.bf16.mxu0 %v3978_v41  ;;  %2144 = vmatprep.mubr.bf16.mxu1 %v3980_v42  ;;  %v4042_v41 = vld [vmem:[%s4222_s30 + $0x2d8] ss:$20 sps:$4 sm:$0xff]  }
  0xcf   : > { %v4043_v42 = vld [vmem:[%s4222_s30 + $0x38] ss:$20 sps:$4 sm:$0xff]  }
  0xd5   : > { %1896 = vmatmul.mubr.bf16.gmra.mxu0 %v3982_v43  ;;  %2145 = vmatmul.mubr.bf16.gmra.mxu1 %v3983_v44  ;;  %v4046_v43 = vld [vmem:[%s4222_s30 + $0x304] ss:$20 sps:$4 sm:$0xff]   ;;  %v4047_v44 = vld [vmem:[%s4222_s30 + $0x60] ss:$20 sps:$4 sm:$0xff]  }
  0xd6   : > { %1903 = vmatprep.mubr.bf16.mxu0 %v3984_v45  ;;  %2152 = vmatprep.mubr.bf16.mxu1 %v3986_v46 }
  0xdd   : > { %1904 = vmatmul.mubr.bf16.gmra.mxu0 %v3988_v47  ;;  %2153 = vmatmul.mubr.bf16.gmra.mxu1 %v3989_v48 }
  0xde   : > { %1911 = vmatprep.mubr.bf16.mxu0 %v3990_v49  ;;  %2160 = vmatprep.mubr.bf16.mxu1 %v3992_v50 }
  0xe5   : > { %1912 = vmatmul.mubr.bf16.gmra.mxu0 %v3994_v51  ;;  %2161 = vmatmul.mubr.bf16.gmra.mxu1 %v3995_v52 }
  0xe6   : > { %1919 = vmatprep.mubr.bf16.mxu0 %v3996_v53  ;;  %2168 = vmatprep.mubr.bf16.mxu1 %v3998_v54  ;;  %v4044_v53 = vld [vmem:[%s4222_s30 + $0x300] ss:$20 sps:$4 sm:$0xff]   ;;  %v4048_v54 = vld [vmem:[%s4222_s30 + $0x88] ss:$20 sps:$4 sm:$0xff]  }
  0xed   : > { %1920 = vmatmul.mubr.bf16.gmra.mxu0 %v4000_v55  ;;  %2169 = vmatmul.mubr.bf16.gmra.mxu1 %v4001_v56  ;;  %v4051_v55 = vld [vmem:[%s4222_s30 + $0x32c] ss:$20 sps:$4 sm:$0xff]   ;;  %v4052_v56 = vld [vmem:[%s4222_s30 + $0xb0] ss:$20 sps:$4 sm:$0xff]  }
  0xee   : > { %1927 = vmatprep.mubr.bf16.mxu0 %v4003_v57  ;;  %2176 = vmatprep.mubr.bf16.mxu1 %v4005_v58 }
  0xf5   : > { %1928 = vmatmul.mubr.bf16.gmra.mxu0 %v4007_v59  ;;  %2177 = vmatmul.mubr.bf16.gmra.mxu1 %v4008_v60 }
  0xf6   : > { %1935 = vmatprep.mubr.bf16.mxu0 %v4009_v61  ;;  %2184 = vmatprep.mubr.bf16.mxu1 %v4011_v62 }
  0xfd   : > { %1936 = vmatmul.mubr.bf16.gmra.mxu0 %v4013_v63  ;;  %2185 = vmatmul.mubr.bf16.gmra.mxu1 %v4014_v0 }
  0xfe   : > { %1943 = vmatprep.mubr.bf16.mxu0 %v4015_v2  ;;  %2192 = vmatprep.mubr.bf16.mxu1 %v4017_v3  ;;  %v4049_v2 = vld [vmem:[%s4222_s30 + $0x328] ss:$20 sps:$4 sm:$0xff]   ;;  %v4053_v3 = vld [vmem:[%s4222_s30 + $0xd8] ss:$20 sps:$4 sm:$0xff]  }
 0x105   : > { %1944 = vmatmul.mubr.bf16.gmra.mxu0 %v4019_v4  ;;  %2193 = vmatmul.mubr.bf16.gmra.mxu1 %v4020_v5  ;;  %v4056_v4 = vld [vmem:[%s4222_s30 + $0x354] ss:$20 sps:$4 sm:$0xff]  }
 0x106   : > { %1951 = vmatprep.mubr.bf16.mxu0 %v4021_v6  ;;  %2200 = vmatprep.mubr.bf16.mxu1 %v4023_v7  ;;  %v4057_v5 = vld [vmem:[%s4222_s30 + $0x100] ss:$20 sps:$4 sm:$0xff]  }
 0x10d   : > { %v4459_v12 = vpop.f32.mrf.mxu0  ;;  %1952 = vmatmul.mubr.bf16.gmra.mxu0 %v4025_v8  ;;  %v4461_v13 = vpop.f32.mrf.mxu1  ;;  %2201 = vmatmul.mubr.bf16.gmra.mxu1 %v4026_v9 }
 0x10e   : > { %1959 = vmatprep.mubr.bf16.mxu0 %v4027_v10  ;;  %2208 = vmatprep.mubr.bf16.mxu1 %v4029_v11 }
 0x10f   : > { %v1763_v14 = vpop.f32.mrf.mxu0  ;;  %v1979_v15 = vpop.f32.mrf.mxu1 }
 0x111   : > { %v4463_v1 = vpop.f32.mrf.mxu0  ;;  %v4465_v16 = vpop.f32.mrf.mxu1 }
 0x113   : > { %v1766_v21 = vpop.f32.mrf.mxu0  ;;  %v1982_v22 = vpop.f32.mrf.mxu1 }
 0x115   : > { %v4471_v23 = vpop.f32.mrf.mxu0  ;;  %1960 = vmatmul.mubr.bf16.gmra.mxu0 %v4031_v17  ;;  %v4473_v24 = vpop.f32.mrf.mxu1  ;;  %2209 = vmatmul.mubr.bf16.gmra.mxu1 %v4032_v18  ;;  %v4054_v17 = vld [vmem:[%s4222_s30 + $0x350] ss:$20 sps:$4 sm:$0xff]   ;;  %v4058_v18 = vld [vmem:[%s4222_s30 + $0x128] ss:$20 sps:$4 sm:$0xff]  }
 0x116   : > { %1967 = vmatprep.mubr.bf16.mxu0 %v4033_v19  ;;  %2216 = vmatprep.mubr.bf16.mxu1 %v4035_v20  ;;  %v4061_v19 = vld [vmem:[%s4222_s30 + $0x37c] ss:$20 sps:$4 sm:$0xff]  }
 0x117   : > { %v1771_v25 = vpop.f32.mrf.mxu0  ;;  %v1987_v26 = vpop.f32.mrf.mxu1  ;;  %v4062_v20 = vld [vmem:[%s4222_s30 + $0x150] ss:$20 sps:$4 sm:$0xff]  }
 0x119   : > { %v4475_v27 = vpop.f32.mrf.mxu0  ;;  %v4477_v28 = vpop.f32.mrf.mxu1 }
 0x11b   : > { %v1774_v33 = vpop.f32.mrf.mxu0  ;;  %v1990_v34 = vpop.f32.mrf.mxu1 }
 0x11c   : > { %v4059_v33 = vld [vmem:[%s4222_s30 + $0x378] ss:$20 sps:$4 sm:$0xff]  }
 0x11d   : > { %v4483_v35 = vpop.f32.mrf.mxu0  ;;  %1968 = vmatmul.mubr.bf16.gmra.mxu0 %v4037_v29  ;;  %v4485_v36 = vpop.f32.mrf.mxu1  ;;  %2217 = vmatmul.mubr.bf16.gmra.mxu1 %v4038_v30  ;;  %v4063_v34 = vld [vmem:[%s4222_s30 + $0x178] ss:$20 sps:$4 sm:$0xff]  }
 0x11e   : > { %2224 = vmatprep.mubr.bf16.mxu1 %v4039_v31  ;;  %3710 = vmatprep.mubr.msk.bf16.mxu0 %vm1618_vm0, %v4041_v32 }
 0x11f   : > { %v1779_v37 = vpop.f32.mrf.mxu0  ;;  %v1995_v38 = vpop.f32.mrf.mxu1 }
 0x120   : > { %v4066_v37 = vld [vmem:[%s4222_s30 + $0x3a4] ss:$20 sps:$4 sm:$0xff]   ;;  %v4067_v38 = vld [vmem:[%s4222_s30 + $0x1a0] ss:$20 sps:$4 sm:$0xff]  }
 0x121   : > { %v4488_v39 = vpop.f32.mrf.mxu0  ;;  %v4490_v40 = vpop.f32.mrf.mxu1 }
 0x123   : > { %v1782_v45 = vpop.f32.mrf.mxu0  ;;  %v1998_v46 = vpop.f32.mrf.mxu1 }
 0x125   : > { %v4496_v47 = vpop.f32.mrf.mxu0  ;;  %v4498_v48 = vpop.f32.mrf.mxu1  ;;  %2225 = vmatmul.mubr.bf16.gmra.mxu1 %v4042_v41  ;;  %3711 = vmatmul.mubr.msk.bf16.vlgmr.msra.gmra.mxu0 %vm1618_vm0, %v4043_v42 }
 0x126   : > { %2232 = vmatprep.mubr.bf16.mxu1 %v4046_v43  ;;  %3714 = vmatprep.mubr.msk.bf16.mxu0 %vm1618_vm0, %v4047_v44 }
 0x127   : > { %v1787_v49 = vpop.f32.mrf.mxu0  ;;  %v2003_v50 = vpop.f32.mrf.mxu1 }
 0x129   : > { %v4502_v51 = vpop.f32.mrf.mxu0  ;;  %v4504_v52 = vpop.f32.mrf.mxu1 }
 0x12b   : > { %v1790_v57 = vpop.f32.mrf.mxu0  ;;  %v2006_v58 = vpop.f32.mrf.mxu1 }
 0x12d   : > { %v4510_v59 = vpop.f32.mrf.mxu0  ;;  %v4512_v60 = vpop.f32.mrf.mxu1  ;;  %2233 = vmatmul.mubr.bf16.gmra.mxu1 %v4044_v53  ;;  %3715 = vmatmul.mubr.msk.bf16.gmra.mxu0 %vm1618_vm0, %v4048_v54  ;;  %v4064_v53 = vld [vmem:[%s4222_s30 + $0x3a0] ss:$20 sps:$4 sm:$0xff]   ;;  %v4068_v54 = vld [vmem:[%s4222_s30 + $0x1c8] ss:$20 sps:$4 sm:$0xff]  }
 0x12e   : > { %2240 = vmatprep.mubr.bf16.mxu1 %v4051_v55  ;;  %3718 = vmatprep.mubr.msk.bf16.mxu0 %vm1618_vm0, %v4052_v56  ;;  %v4071_v55 = vld [vmem:[%s4222_s30 + $0x3cc] ss:$20 sps:$4 sm:$0xff]   ;;  %v4072_v56 = vld [vmem:[%s4222_s30 + $0x1f0] ss:$20 sps:$4 sm:$0xff]  }
 0x12f   : > { %v1795_v61 = vpop.f32.mrf.mxu0  ;;  %v2011_v62 = vpop.f32.mrf.mxu1 }
 0x131   : > { %v4516_v63 = vpop.f32.mrf.mxu0  ;;  %v4518_v0 = vpop.f32.mrf.mxu1 }
 0x132   : > { %5202 = vst [vmem:[#allocation2_spill] sm:$0xff] %v4518_v0 }
 0x133   : > { %v1798_v6 = vpop.f32.mrf.mxu0  ;;  %v2014_v7 = vpop.f32.mrf.mxu1 }
 0x134   : > { %v4069_v7 = vld [vmem:[%s4222_s30 + $0x3c8] ss:$20 sps:$4 sm:$0xff]  }
 0x135   : > { %v4524_v8 = vpop.f32.mrf.mxu0  ;;  %v4526_v9 = vpop.f32.mrf.mxu1  ;;  %2241 = vmatmul.mubr.bf16.gmra.mxu1 %v4049_v2  ;;  %3719 = vmatmul.mubr.msk.bf16.gmra.mxu0 %vm1618_vm0, %v4053_v3 }
 0x136   : > { %5203 = vst [vmem:[#allocation3_spill] sm:$0xff] %v4526_v9  ;;  %2248 = vmatprep.mubr.bf16.mxu1 %v4056_v4  ;;  %3722 = vmatprep.mubr.msk.bf16.mxu0 %vm1618_vm0, %v4057_v5  ;;  %v4575_v4 = vld [vmem:[%s5200_s2] ss:$0 sm:$0xff] }
 0x137   : > { %v1803_v10 = vpop.f32.mrf.mxu0  ;;  %v2019_v11 = vpop.f32.mrf.mxu1 }
 0x138   : > { %v4073_v10 = vld [vmem:[%s4222_s30 + $0x218] ss:$20 sps:$4 sm:$0xff]   ;;  %v4076_v11 = vld [vmem:[%s4222_s30 + $0x3f4] ss:$20 sps:$4 sm:$0xff]  }
 0x139   : > { %v4530_v14 = vpop.f32.mrf.mxu0  ;;  %v4532_v15 = vpop.f32.mrf.mxu1 }
 0x13a   : > { %5204 = vst [vmem:[#allocation4_spill] sm:$0xff] %v4532_v15  ;;  %v4127_v15 = vld [vmem:[%s4222_s30 + $0x560] ss:$20 sps:$4 sm:$0xff]  }
 0x13b   : > { %v1806_v21 = vpop.f32.mrf.mxu0  ;;  %v2022_v22 = vpop.f32.mrf.mxu1 }
 0x13d   : > { %v4538_v25 = vpop.f32.mrf.mxu0  ;;  %v4540_v26 = vpop.f32.mrf.mxu1  ;;  %2249 = vmatmul.mubr.bf16.gmra.mxu1 %v4054_v17  ;;  %3723 = vmatmul.mubr.msk.bf16.gmra.mxu0 %vm1618_vm0, %v4058_v18  ;;  %v4077_v17 = vld [vmem:[%s4222_s30 + $0x240] ss:$20 sps:$4 sm:$0xff]  }
 0x13e   : > { %5205 = vst [vmem:[#allocation5_spill] sm:$0xff] %v4540_v26  ;;  %2256 = vmatprep.mubr.bf16.mxu1 %v4061_v19  ;;  %3726 = vmatprep.mubr.msk.bf16.mxu0 %vm1618_vm0, %v4062_v20  ;;  %v1762_v20 = vadd.f32 %v4575_v4, %v4459_v12 }
 0x13f   : > { %v1811_v29 = vpop.f32.mrf.mxu0  ;;  %v2027_v30 = vpop.f32.mrf.mxu1 }
 0x141   : > { %v4544_v31 = vpop.f32.mrf.mxu0  ;;  %v4546_v32 = vpop.f32.mrf.mxu1 }
 0x142   : > { %5206 = vst [vmem:[#allocation6_spill] sm:$0xff] %v4546_v32  ;;  %v4122_v32 = vld [vmem:[%s4222_s30 + $0x510] ss:$20 sps:$4 sm:$0xff]  }
 0x143   : > { %v1814_v41 = vpop.f32.mrf.mxu0  ;;  %v2030_v42 = vpop.f32.mrf.mxu1 }
 0x144   : > { %v4078_v41 = vld [vmem:[%s4222_s30 + $0x268] ss:$20 sps:$4 sm:$0xff]  }
 0x145   : > { %v4552_v43 = vpop.f32.mrf.mxu0  ;;  %v4554_v44 = vpop.f32.mrf.mxu1  ;;  %2257 = vmatmul.mubr.bf16.gmra.mxu1 %v4059_v33  ;;  %3727 = vmatmul.mubr.msk.bf16.gmra.mxu0 %vm1618_vm0, %v4063_v34  ;;  %v1765_v34 = vadd.f32 %v4575_v4, %v4463_v1 }
 0x146   : > { %5207 = vst [vmem:[#allocation7_spill] sm:$0xff] %v4554_v44  ;;  %2264 = vmatprep.mubr.bf16.mxu1 %v4066_v37  ;;  %3730 = vmatprep.mubr.msk.bf16.mxu0 %vm1618_vm0, %v4067_v38  ;;  %v4074_v38 = vld [vmem:[%s4222_s30 + $0x3f0] ss:$20 sps:$4 sm:$0xff]  }
 0x147   : > { %v1819_v45 = vpop.f32.mrf.mxu0  ;;  %v2035_v46 = vpop.f32.mrf.mxu1 }
 0x148   : > { %v4081_v45 = vld [vmem:[%s4222_s30 + $0x41c] ss:$20 sps:$4 sm:$0xff]  }
 0x149   : > { %v4558_v49 = vpop.f32.mrf.mxu0  ;;  %v4560_v50 = vpop.f32.mrf.mxu1  ;;  %v4082_v46 = vld [vmem:[%s4222_s30 + $0x290] ss:$20 sps:$4 sm:$0xff]  }
 0x14a   : > { %5208 = vst [vmem:[#allocation8_spill] sm:$0xff] %v4560_v50  ;;  %v4117_v50 = vld [vmem:[%s4222_s30 + $0x4c0] ss:$20 sps:$4 sm:$0xff]  }
 0x14b   : > { %v1822_v57 = vpop.f32.mrf.mxu0  ;;  %v2038_v58 = vpop.f32.mrf.mxu1 }
 0x14d   : > { %v4566_v61 = vpop.f32.mrf.mxu0  ;;  %v4568_v62 = vpop.f32.mrf.mxu1  ;;  %2265 = vmatmul.mubr.bf16.gmra.mxu1 %v4064_v53  ;;  %3731 = vmatmul.mubr.msk.bf16.gmra.mxu0 %vm1618_vm0, %v4068_v54 }
 0x14e   : > { %5209 = vst [vmem:[#allocation9_spill] sm:$0xff] %v4568_v62  ;;  %2272 = vmatprep.mubr.bf16.mxu1 %v4071_v55  ;;  %3734 = vmatprep.mubr.msk.bf16.mxu0 %vm1618_vm0, %v4072_v56  ;;  %v1770_v55 = vadd.f32 %v4575_v4, %v4471_v23 }
 0x14f   : > { %v1827_v2 = vpop.f32.mrf.mxu0  ;;  %v2043_v3 = vpop.f32.mrf.mxu1 }
 0x150   : > { %v1773_v3 = vadd.f32 %v4575_v4, %v4475_v27 }
 0x151   : > { %v4577_v5 = vpop.f32.mrf.mxu0  ;;  %v4579_v6 = vpop.f32.mrf.mxu1 }
 0x152   : > { %5210 = vst [vmem:[#allocation10_spill] sm:$0xff] %v4579_v6  ;;  %v4112_v6 = vld [vmem:[%s4222_s30 + $0x470] ss:$20 sps:$4 sm:$0xff]  }
 0x153   : > { %v1830_v18 = vpop.f32.mrf.mxu0  ;;  %v2046_v19 = vpop.f32.mrf.mxu1 }
 0x154   : > { %v4086_v18 = vld [vmem:[%s4222_s30 + $0x444] ss:$20 sps:$4 sm:$0xff]   ;;  %v4087_v19 = vld [vmem:[%s4222_s30 + $0x2e0] ss:$20 sps:$4 sm:$0xff]  }
 0x155   : > { %v4587_v21 = vpop.f32.mrf.mxu0  ;;  %v2082_v22 = vpop.f32.mrf.mxu1  ;;  %2273 = vmatmul.mubr.bf16.gmra.mxu1 %v4069_v7  ;;  %3735 = vmatmul.mubr.msk.bf16.gmra.mxu0 %vm1618_vm0, %v4073_v10  ;;  %v4079_v10 = vld [vmem:[%s4222_s30 + $0x418] ss:$20 sps:$4 sm:$0xff]  }
 0x156   : > { %v4590_v29 = vadd.f32 %v2082_v22, %v1762_v20  ;;  %2280 = vmatprep.mubr.bf16.mxu1 %v4076_v11  ;;  %3738 = vmatprep.mubr.msk.bf16.mxu0 %vm1618_vm0, %v4077_v17  ;;  %v4083_v11 = vld [vmem:[%s4222_s30 + $0x2b8] ss:$20 sps:$4 sm:$0xff]  }
 0x157   : > { %v1835_v30 = vpop.f32.mrf.mxu0  ;;  %v2084_v33 = vpop.f32.mrf.mxu1 }
 0x158   : > { %v1778_v30 = vadd.f32 %v4575_v4, %v4483_v35 }
 0x159   : > { %v4595_v37 = vpop.f32.mrf.mxu0  ;;  %v2085_v12 = vpop.f32.mrf.mxu1 }
 0x15a   : > { %v4599_v42 = vadd.f32 %v2085_v12, %v1765_v34 }
 0x15b   : > { %v1838_v53 = vpop.f32.mrf.mxu0  ;;  %v2087_v54 = vpop.f32.mrf.mxu1 }
 0x15c   : > { %v4088_v53 = vld [vmem:[%s4222_s30 + $0x308] ss:$20 sps:$4 sm:$0xff]  }
 0x15d   : > { %v4605_v56 = vpop.f32.mrf.mxu0  ;;  %v2090_v1 = vpop.f32.mrf.mxu1  ;;  %2281 = vmatmul.mubr.bf16.gmra.mxu1 %v4074_v38  ;;  %3739 = vmatmul.mubr.msk.bf16.gmra.mxu0 %vm1618_vm0, %v4078_v41  ;;  %v1781_v41 = vadd.f32 %v4575_v4, %v4488_v39 }
 0x15e   : > { %v4608_v57 = vadd.f32 %v2090_v1, %v1770_v55  ;;  %2288 = vmatprep.mubr.bf16.mxu1 %v4081_v45  ;;  %3742 = vmatprep.mubr.msk.bf16.mxu0 %vm1618_vm0, %v4082_v46  ;;  %v4084_v46 = vld [vmem:[%s4222_s30 + $0x440] ss:$20 sps:$4 sm:$0xff]   ;;  %v4092_v1 = vld [vmem:[%s4222_s30 + $0x330] ss:$20 sps:$4 sm:$0xff]  }
 0x15f   : > { %v1843_v58 = vpop.f32.mrf.mxu0  ;;  %v2092_v2 = vpop.f32.mrf.mxu1  ;;  %v4091_v55 = vld [vmem:[%s4222_s30 + $0x46c] ss:$20 sps:$4 sm:$0xff]  }
 0x161   : > { %v4613_v7 = vpop.f32.mrf.mxu0  ;;  %v2093_v23 = vpop.f32.mrf.mxu1 }
 0x162   : > { %v4617_v17 = vadd.f32 %v2093_v23, %v1773_v3  ;;  %v1786_v3 = vadd.f32 %v4575_v4, %v4496_v47 }
 0x163   : > { %v1846_v20 = vpop.f32.mrf.mxu0  ;;  %v2095_v22 = vpop.f32.mrf.mxu1 }
 0x164   : > { %v4089_v22 = vld [vmem:[%s4222_s30 + $0x468] ss:$20 sps:$4 sm:$0xff]  }
 0x165   : > { %v4623_v33 = vpop.f32.mrf.mxu0  ;;  %v2098_v27 = vpop.f32.mrf.mxu1  ;;  %2289 = vmatmul.mubr.bf16.gmra.mxu1 %v4079_v10  ;;  %3743 = vmatmul.mubr.msk.bf16.gmra.mxu0 %vm1618_vm0, %v4083_v11 }
 0x166   : > { %v4626_v34 = vadd.f32 %v2098_v27, %v1778_v30  ;;  %2296 = vmatprep.mubr.bf16.mxu1 %v4086_v18  ;;  %3746 = vmatprep.mubr.msk.bf16.mxu0 %vm1618_vm0, %v4087_v19  ;;  %v1789_v19 = vadd.f32 %v4575_v4, %v4502_v51  ;;  %v4093_v30 = vld [vmem:[%s4222_s30 + $0x358] ss:$20 sps:$4 sm:$0xff]  }
 0x167   : > { %v1851_v12 = vpop.f32.mrf.mxu0  ;;  %v2100_v38 = vpop.f32.mrf.mxu1 }
 0x168   : > { %v4096_v12 = vld [vmem:[%s4222_s30 + $0x494] ss:$20 sps:$4 sm:$0xff]  }
 0x169   : > { %v4631_v45 = vpop.f32.mrf.mxu0  ;;  %v2101_v35 = vpop.f32.mrf.mxu1  ;;  %v4097_v38 = vld [vmem:[%s4222_s30 + $0x380] ss:$20 sps:$4 sm:$0xff]  }
 0x16a   : > { %v4635_v54 = vadd.f32 %v2101_v35, %v1781_v41 }
 0x16b   : > { %v1854_v58 = vpop.f32.mrf.mxu0  ;;  %v2103_v2 = vpop.f32.mrf.mxu1 }
 0x16c   : > { %v1797_v2 = vadd.f32 %v4575_v4, %v4516_v63 }
 0x16d   : > { %v4641_v23 = vpop.f32.mrf.mxu0  ;;  %v2106_v39 = vpop.f32.mrf.mxu1  ;;  %2297 = vmatmul.mubr.bf16.gmra.mxu1 %v4084_v46  ;;  %3747 = vmatmul.mubr.msk.bf16.gmra.mxu0 %vm1618_vm0, %v4088_v53  ;;  %v1794_v46 = vadd.f32 %v4575_v4, %v4510_v59 }
 0x16e   : > { %v4644_v10 = vadd.f32 %v2106_v39, %v1786_v3  ;;  %2304 = vmatprep.mubr.bf16.mxu1 %v4091_v55  ;;  %3750 = vmatprep.mubr.msk.bf16.mxu0 %vm1618_vm0, %v4092_v1  ;;  %v4094_v39 = vld [vmem:[%s4222_s30 + $0x490] ss:$20 sps:$4 sm:$0xff]  }
 0x16f   : > { %v1859_v11 = vpop.f32.mrf.mxu0  ;;  %v2108_v18 = vpop.f32.mrf.mxu1 }
 0x170   : > { %v4098_v11 = vld [vmem:[%s4222_s30 + $0x3a8] ss:$20 sps:$4 sm:$0xff]  }
 0x171   : > { %v4649_v20 = vpop.f32.mrf.mxu0  ;;  %v2109_v47 = vpop.f32.mrf.mxu1 }
 0x172   : > { %v4653_v27 = vadd.f32 %v2109_v47, %v1789_v19  ;;  %v4101_v19 = vld [vmem:[%s4222_s30 + $0x4bc] ss:$20 sps:$4 sm:$0xff]  }
 0x173   : > { %v1862_v41 = vpop.f32.mrf.mxu0  ;;  %v2111_v35 = vpop.f32.mrf.mxu1  ;;  %v4102_v47 = vld [vmem:[%s4222_s30 + $0x3d0] ss:$20 sps:$4 sm:$0xff]  }
 0x175   : > { %v4659_v53 = vpop.f32.mrf.mxu0  ;;  %v2114_v51 = vpop.f32.mrf.mxu1  ;;  %2305 = vmatmul.mubr.bf16.gmra.mxu1 %v4089_v22  ;;  %3751 = vmatmul.mubr.msk.bf16.gmra.mxu0 %vm1618_vm0, %v4093_v30 }
 0x176   : > { %v4662_v55 = vadd.f32 %v2114_v51, %v1794_v46  ;;  %2312 = vmatprep.mubr.bf16.mxu1 %v4096_v12  ;;  %3754 = vmatprep.mubr.msk.bf16.mxu0 %vm1618_vm0, %v4097_v38  ;;  %v1802_v12 = vadd.f32 %v4575_v4, %v4524_v8  ;;  %v1805_v51 = vadd.f32 %v4575_v4, %v4530_v14 }
 0x177   : > { %v1867_v1 = vpop.f32.mrf.mxu0  ;;  %v2116_v58 = vpop.f32.mrf.mxu1 }
 0x178   : > { %v4099_v58 = vld [vmem:[%s4222_s30 + $0x4b8] ss:$20 sps:$4 sm:$0xff]  }
 0x179   : > { %v4667_v3 = vpop.f32.mrf.mxu0  ;;  %v2117_v59 = vpop.f32.mrf.mxu1 }
 0x17a   : > { %v4671_v18 = vadd.f32 %v2117_v59, %v1797_v2  ;;  %v4103_v2 = vld [vmem:[%s4222_s30 + $0x3f8] ss:$20 sps:$4 sm:$0xff]  }
 0x17b   : > { %v1870_v22 = vpop.f32.mrf.mxu0  ;;  %v2119_v30 = vpop.f32.mrf.mxu1 }
 0x17c   : > { %v4107_v22 = vld [vmem:[%s4222_s30 + $0x420] ss:$20 sps:$4 sm:$0xff]  }
 0x17d   : > { %v4677_v38 = vpop.f32.mrf.mxu0  ;;  %v2122_v63 = vpop.f32.mrf.mxu1  ;;  %2313 = vmatmul.mubr.bf16.gmra.mxu1 %v4094_v39  ;;  %3755 = vmatmul.mubr.msk.bf16.gmra.mxu0 %vm1618_vm0, %v4098_v11  ;;  %v4106_v39 = vld [vmem:[%s4222_s30 + $0x4e4] ss:$20 sps:$4 sm:$0xff]  }
 0x17e   : > { %v4680_v41 = vadd.f32 %v2122_v63, %v1802_v12  ;;  %2320 = vmatprep.mubr.bf16.mxu1 %v4101_v19  ;;  %3758 = vmatprep.mubr.msk.bf16.mxu0 %vm1618_vm0, %v4102_v47  ;;  %v1810_v47 = vadd.f32 %v4575_v4, %v4538_v25 }
 0x17f   : > { %v1875_v35 = vpop.f32.mrf.mxu0  ;;  %v2124_v46 = vpop.f32.mrf.mxu1 }
 0x180   : > { %v1813_v46 = vadd.f32 %v4575_v4, %v4544_v31 }
 0x181   : > { %v4685_v1 = vpop.f32.mrf.mxu0  ;;  %v2125_v8 = vpop.f32.mrf.mxu1 }
 0x182   : > { %v4689_v59 = vadd.f32 %v2125_v8, %v1805_v51  ;;  %v4104_v8 = vld [vmem:[%s4222_s30 + $0x4e0] ss:$20 sps:$4 sm:$0xff]  }
 0x183   : > { %v1878_v11 = vpop.f32.mrf.mxu0  ;;  %v2127_v19 = vpop.f32.mrf.mxu1 }
 0x184   : > { %v4108_v11 = vld [vmem:[%s4222_s30 + $0x448] ss:$20 sps:$4 sm:$0xff]  }
 0x185   : > { %v4695_v30 = vpop.f32.mrf.mxu0  ;;  %v2130_v14 = vpop.f32.mrf.mxu1  ;;  %2321 = vmatmul.mubr.bf16.gmra.mxu1 %v4099_v58  ;;  %3759 = vmatmul.mubr.msk.bf16.gmra.mxu0 %vm1618_vm0, %v4103_v2  ;;  %v4111_v58 = vld [vmem:[%s4222_s30 + $0x50c] ss:$20 sps:$4 sm:$0xff]  }
 0x186   : > { %v4698_v12 = vadd.f32 %v2130_v14, %v1810_v47  ;;  %2328 = vmatprep.mubr.bf16.mxu1 %v4106_v39  ;;  %3762 = vmatprep.mubr.msk.bf16.mxu0 %vm1618_vm0, %v4107_v22  ;;  %v1818_v22 = vadd.f32 %v4575_v4, %v4552_v43 }
 0x187   : > { %v1883_v63 = vpop.f32.mrf.mxu0  ;;  %v2132_v35 = vpop.f32.mrf.mxu1 }
 0x189   : > { %v4703_v51 = vpop.f32.mrf.mxu0  ;;  %v2133_v25 = vpop.f32.mrf.mxu1 }
 0x18a   : > { %v4707_v19 = vadd.f32 %v2133_v25, %v1813_v46  ;;  %v1821_v46 = vadd.f32 %v4575_v4, %v4558_v49 }
 0x18b   : > { %v1886_v2 = vpop.f32.mrf.mxu0  ;;  %v2135_v39 = vpop.f32.mrf.mxu1 }
 0x18c   : > { %v4109_v2 = vld [vmem:[%s4222_s30 + $0x508] ss:$20 sps:$4 sm:$0xff]   ;;  %v4113_v39 = vld [vmem:[%s4222_s30 + $0x498] ss:$20 sps:$4 sm:$0xff]  }
 0x18d   : > { %v4713_v47 = vpop.f32.mrf.mxu0  ;;  %v2138_v31 = vpop.f32.mrf.mxu1  ;;  %2329 = vmatmul.mubr.bf16.gmra.mxu1 %v4104_v8  ;;  %3763 = vmatmul.mubr.msk.bf16.gmra.mxu0 %vm1618_vm0, %v4108_v11  ;;  %v4116_v8 = vld [vmem:[%s4222_s30 + $0x534] ss:$20 sps:$4 sm:$0xff]  }
 0x18e   : > { %v4716_v14 = vadd.f32 %v2138_v31, %v1818_v22  ;;  %2336 = vmatprep.mubr.bf16.mxu1 %v4111_v58  ;;  %3766 = vmatprep.mubr.msk.bf16.mxu0 %vm1618_vm0, %v4112_v6  ;;  %v1826_v6 = vadd.f32 %v4575_v4, %v4566_v61 }
 0x18f   : > { %v1891_v63 = vpop.f32.mrf.mxu0  ;;  %v2140_v35 = vpop.f32.mrf.mxu1 }
 0x191   : > { %v4721_v25 = vpop.f32.mrf.mxu0  ;;  %v2141_v43 = vpop.f32.mrf.mxu1 }
 0x192   : > { %v4725_v62 = vadd.f32 %v2141_v43, %v1821_v46  ;;  %v1829_v46 = vadd.f32 %v4575_v4, %v4577_v5 }
 0x193   : > { %v1894_v11 = vpop.f32.mrf.mxu0  ;;  %v2143_v58 = vpop.f32.mrf.mxu1 }
 0x194   : > { %v4114_v11 = vld [vmem:[%s4222_s30 + $0x530] ss:$20 sps:$4 sm:$0xff]   ;;  %v4118_v58 = vld [vmem:[%s4222_s30 + $0x4e8] ss:$20 sps:$4 sm:$0xff]  }
 0x195   : > { %v4731_v22 = vpop.f32.mrf.mxu0  ;;  %v2146_v49 = vpop.f32.mrf.mxu1  ;;  %2337 = vmatmul.mubr.bf16.gmra.mxu1 %v4109_v2  ;;  %3767 = vmatmul.mubr.msk.bf16.gmra.mxu0 %vm1618_vm0, %v4113_v39  ;;  %v4121_v2 = vld [vmem:[%s4222_s30 + $0x55c] ss:$20 sps:$4 sm:$0xff]  }
 0x196   : > { %v4734_v31 = vadd.f32 %v2146_v49, %v1826_v6  ;;  %2344 = vmatprep.mubr.bf16.mxu1 %v4116_v8  ;;  %3770 = vmatprep.mubr.msk.bf16.mxu0 %vm1618_vm0, %v4117_v50  ;;  %v1834_v50 = vadd.f32 %v4575_v4, %v4587_v21 }
 0x197   : > { %v1899_v63 = vpop.f32.mrf.mxu0  ;;  %v2148_v35 = vpop.f32.mrf.mxu1 }
 0x199   : > { %v4739_v43 = vpop.f32.mrf.mxu0  ;;  %v2149_v61 = vpop.f32.mrf.mxu1 }
 0x19a   : > { %v4743_v44 = vadd.f32 %v2149_v61, %v1829_v46  ;;  %v1837_v46 = vadd.f32 %v4575_v4, %v4595_v37 }
 0x19b   : > { %v1902_v39 = vpop.f32.mrf.mxu0  ;;  %v2151_v8 = vpop.f32.mrf.mxu1 }
 0x19c   : > { %v4119_v39 = vld [vmem:[%s4222_s30 + $0x558] ss:$20 sps:$4 sm:$0xff]  }
 0x19d   : > { %v4749_v6 = vpop.f32.mrf.mxu0  ;;  %v2154_v5 = vpop.f32.mrf.mxu1  ;;  %2345 = vmatmul.mubr.bf16.gmra.mxu1 %v4114_v11  ;;  %3771 = vmatmul.mubr.msk.bf16.gmra.mxu0 %vm1618_vm0, %v4118_v58  ;;  %v4123_v8 = vld [vmem:[%s4222_s30 + $0x538] ss:$20 sps:$4 sm:$0xff]  }
 0x19e   : > { %v4752_v49 = vadd.f32 %v2154_v5, %v1834_v50  ;;  %2352 = vmatprep.mubr.bf16.mxu1 %v4121_v2  ;;  %3774 = vmatprep.mubr.msk.bf16.mxu0 %vm1618_vm0, %v4122_v32  ;;  %v4126_v11 = vld [vmem:[%s4222_s30 + $0x584] ss:$20 sps:$4 sm:$0xff]   ;;  %v1842_v32 = vadd.f32 %v4575_v4, %v4605_v56  ;;  %v4124_v56 = vld [vmem:[%s4222_s30 + $0x580] ss:$20 sps:$4 sm:$0xff]  }
 0x19f   : > { %v1907_v63 = vpop.f32.mrf.mxu0  ;;  %v2156_v35 = vpop.f32.mrf.mxu1 }
 0x1a1   : > { %v4757_v61 = vpop.f32.mrf.mxu0  ;;  %v2157_v21 = vpop.f32.mrf.mxu1 }
 0x1a2   : > { %v4761_v26 = vadd.f32 %v2157_v21, %v1837_v46  ;;  %v1845_v46 = vadd.f32 %v4575_v4, %v4613_v7 }
 0x1a3   : > { %v1910_v58 = vpop.f32.mrf.mxu0  ;;  %v2159_v2 = vpop.f32.mrf.mxu1 }
 0x1a4   : > { %v4128_v2 = vld [vmem:[%s4222_s30 + $0x588] ss:$20 sps:$4 sm:$0xff]  }
 0x1a5   : > { %v4767_v50 = vpop.f32.mrf.mxu0  ;;  %v2162_v5 = vpop.f32.mrf.mxu1  ;;  %2353 = vmatmul.mubr.bf16.gmra.mxu1 %v4119_v39  ;;  %3775 = vmatmul.mubr.msk.bf16.gmra.mxu0 %vm1618_vm0, %v4123_v8  ;;  %v1850_v8 = vadd.f32 %v4575_v4, %v4623_v33 }
 0x1a6   : > { %v4770_v37 = vadd.f32 %v2162_v5, %v1842_v32  ;;  %2360 = vmatprep.mubr.bf16.mxu1 %v4126_v11  ;;  %3778 = vmatprep.mubr.msk.bf16.mxu0 %vm1618_vm0, %v4127_v15 }
 0x1a7   : > { %v1915_v63 = vpop.f32.mrf.mxu0  ;;  %v2164_v35 = vpop.f32.mrf.mxu1 }
 0x1a8   : > { %v1853_v63 = vadd.f32 %v4575_v4, %v4631_v45  ;;  %v1861_v45 = vadd.f32 %v4575_v4, %v4649_v20  ;;  %v1869_v20 = vadd.f32 %v4575_v4, %v4667_v3  ;;  %v1877_v3 = vadd.f32 %v4575_v4, %v4685_v1 }
 0x1a9   : > { %v4775_v21 = vpop.f32.mrf.mxu0  ;;  %v2165_v58 = vpop.f32.mrf.mxu1  ;;  %v1885_v1 = vadd.f32 %v4575_v4, %v4703_v51  ;;  %v1893_v51 = vadd.f32 %v4575_v4, %v4721_v25  ;;  %v1901_v25 = vadd.f32 %v4575_v4, %v4739_v43 }
 0x1aa   : > { %v4779_v9 = vadd.f32 %v2165_v58, %v1845_v46 }
 0x1ab   : > { %v1918_v39 = vpop.f32.mrf.mxu0  ;;  %v2167_v0 = vpop.f32.mrf.mxu1 }
 0x1ac   : > { %5211 = vst [vmem:[#allocation11_spill] sm:$0xff] %v4779_v9  ;;  %v1858_v39 = vadd.f32 %v4575_v4, %v4641_v23  ;;  %v1866_v23 = vadd.f32 %v4575_v4, %v4659_v53  ;;  %v1874_v53 = vadd.f32 %v4575_v4, %v4677_v38  ;;  %v1882_v38 = vadd.f32 %v4575_v4, %v4695_v30 }
 0x1ad   : > { %v4783_v11 = vpop.f32.mrf.mxu0  ;;  %v2170_v15 = vpop.f32.mrf.mxu1  ;;  %2361 = vmatmul.mubr.bf16.gmra.mxu1 %v4124_v56  ;;  %3779 = vmatmul.mubr.msk.bf16.gmra.mxu0 %vm1618_vm0, %v4128_v2  ;;  %v1890_v30 = vadd.f32 %v4575_v4, %v4713_v47  ;;  %v1898_v47 = vadd.f32 %v4575_v4, %v4731_v22  ;;  %v1906_v22 = vadd.f32 %v4575_v4, %v4749_v6 }
 0x1ae   : > { %v4786_v32 = vadd.f32 %v2170_v15, %v1850_v8 }
 0x1af   : > { %v1923_v7 = vpop.f32.mrf.mxu0  ;;  %v2172_v5 = vpop.f32.mrf.mxu1 }
 0x1b1   : > { %v4790_v35 = vpop.f32.mrf.mxu0  ;;  %v2173_v46 = vpop.f32.mrf.mxu1 }
 0x1b2   : > { %v4792_v0 = vadd.f32 %v2173_v46, %v1853_v63 }
 0x1b3   : > { %v1926_v58 = vpop.f32.mrf.mxu0  ;;  %v2175_v33 = vpop.f32.mrf.mxu1 }
 0x1b4   : > { %5212 = vst [vmem:[#allocation12_spill] sm:$0xff] %v4792_v0 }
 0x1b5   : > { %v4796_v56 = vpop.f32.mrf.mxu0  ;;  %v2178_v2 = vpop.f32.mrf.mxu1 }
 0x1b6   : > { %v4798_v8 = vadd.f32 %v2178_v2, %v1858_v39 }
 0x1b7   : > { %v1931_v15 = vpop.f32.mrf.mxu0  ;;  %v2180_v7 = vpop.f32.mrf.mxu1 }
 0x1b9   : > { %v4802_v5 = vpop.f32.mrf.mxu0  ;;  %v2181_v9 = vpop.f32.mrf.mxu1 }
 0x1ba   : > { %5213 = vst [vmem:[#allocation13_spill] sm:$0xff] %v4802_v5  ;;  %v4804_v63 = vadd.f32 %v2181_v9, %v1861_v45 }
 0x1bb   : > { %v1934_v46 = vpop.f32.mrf.mxu0  ;;  %v2183_v58 = vpop.f32.mrf.mxu1 }
 0x1bd   : > { %v4808_v33 = vpop.f32.mrf.mxu0  ;;  %v2186_v0 = vpop.f32.mrf.mxu1 }
 0x1be   : > { %5214 = vst [vmem:[#allocation14_spill] sm:$0xff] %v4808_v33  ;;  %v4810_v39 = vadd.f32 %v2186_v0, %v1866_v23 }
 0x1bf   : > { %v1939_v2 = vpop.f32.mrf.mxu0  ;;  %v2188_v15 = vpop.f32.mrf.mxu1 }
 0x1c1   : > { %v4814_v7 = vpop.f32.mrf.mxu0  ;;  %v2189_v5 = vpop.f32.mrf.mxu1 }
 0x1c2   : > { %5215 = vst [vmem:[#allocation15_spill] sm:$0xff] %v4814_v7  ;;  %v4816_v9 = vadd.f32 %v2189_v5, %v1869_v20 }
 0x1c3   : > { %v1942_v45 = vpop.f32.mrf.mxu0  ;;  %v2191_v46 = vpop.f32.mrf.mxu1 }
 0x1c5   : > { %v4820_v58 = vpop.f32.mrf.mxu0  ;;  %v2194_v33 = vpop.f32.mrf.mxu1 }
 0x1c6   : > { %5216 = vst [vmem:[#allocation16_spill] sm:$0xff] %v4820_v58  ;;  %v4822_v0 = vadd.f32 %v2194_v33, %v1874_v53 }
 0x1c7   : > { %v1947_v23 = vpop.f32.mrf.mxu0  ;;  %v2196_v2 = vpop.f32.mrf.mxu1 }
 0x1c8   : > { %5217 = vst [vmem:[#allocation17_spill] sm:$0xff] %v4822_v0 }
 0x1c9   : > { %v4826_v15 = vpop.f32.mrf.mxu0  ;;  %v2197_v7 = vpop.f32.mrf.mxu1 }
 0x1ca   : > { %5218 = vst [vmem:[#allocation18_spill] sm:$0xff] %v4826_v15  ;;  %v4828_v5 = vadd.f32 %v2197_v7, %v1877_v3 }
 0x1cb   : > { %v1950_v20 = vpop.f32.mrf.mxu0  ;;  %v2199_v45 = vpop.f32.mrf.mxu1 }
 0x1cc   : > { %5219 = vst [vmem:[#allocation19_spill] sm:$0xff] %v4828_v5 }
 0x1cd   : > { %v4832_v46 = vpop.f32.mrf.mxu0  ;;  %v2202_v58 = vpop.f32.mrf.mxu1 }
 0x1ce   : > { %v4834_v33 = vadd.f32 %v2202_v58, %v1882_v38 }
 0x1cf   : > { %v1955_v53 = vpop.f32.mrf.mxu0  ;;  %v2204_v23 = vpop.f32.mrf.mxu1 }
 0x1d1   : > { %v4838_v2 = vpop.f32.mrf.mxu0  ;;  %v2205_v15 = vpop.f32.mrf.mxu1 }
 0x1d2   : > { %v4840_v7 = vadd.f32 %v2205_v15, %v1885_v1 }
 0x1d3   : > { %v1958_v3 = vpop.f32.mrf.mxu0  ;;  %v2207_v20 = vpop.f32.mrf.mxu1 }
 0x1d5   : > { %v4844_v45 = vpop.f32.mrf.mxu0  ;;  %v2210_v5 = vpop.f32.mrf.mxu1 }
 0x1d6   : > { %5220 = vst [vmem:[#allocation20_spill] sm:$0xff] %v4844_v45  ;;  %v4846_v58 = vadd.f32 %v2210_v5, %v1890_v30 }
 0x1d7   : > { %v1963_v38 = vpop.f32.mrf.mxu0  ;;  %v2212_v53 = vpop.f32.mrf.mxu1 }
 0x1d8   : > { %5221 = vst [vmem:[#allocation21_spill] sm:$0xff] %v4846_v58 }
 0x1d9   : > { %v4850_v23 = vpop.f32.mrf.mxu0  ;;  %v2213_v0 = vpop.f32.mrf.mxu1 }
 0x1da   : > { %5222 = vst [vmem:[#allocation22_spill] sm:$0xff] %v4850_v23  ;;  %v4852_v15 = vadd.f32 %v2213_v0, %v1893_v51 }
 0x1db   : > { %v1966_v1 = vpop.f32.mrf.mxu0  ;;  %v2215_v3 = vpop.f32.mrf.mxu1 }
 0x1dc   : > { %5223 = vst [vmem:[#allocation23_spill] sm:$0xff] %v4852_v15 }
 0x1dd   : > { %v4856_v20 = vpop.f32.mrf.mxu0  ;;  %v2218_v45 = vpop.f32.mrf.mxu1 }
 0x1de   : > { %5224 = vst [vmem:[#allocation24_spill] sm:$0xff] %v4856_v20  ;;  %v4858_v5 = vadd.f32 %v2218_v45, %v1898_v47 }
 0x1df   : > { %v1971_v30 = vpop.f32.mrf.mxu0  ;;  %v2220_v38 = vpop.f32.mrf.mxu1 }
 0x1e0   : > { %5225 = vst [vmem:[#allocation25_spill] sm:$0xff] %v4858_v5  ;;  %v1909_v30 = vadd.f32 %v4575_v4, %v4757_v61 }
 0x1e1   : > { %v4862_v53 = vpop.f32.mrf.mxu0  ;;  %v2221_v23 = vpop.f32.mrf.mxu1 }
 0x1e2   : > { %5226 = vst [vmem:[#allocation26_spill] sm:$0xff] %v4862_v53  ;;  %v4864_v0 = vadd.f32 %v2221_v23, %v1901_v25 }
 0x1e3   : > { %v1974_v51 = vpop.f32.mrf.mxu0  ;;  %v2223_v1 = vpop.f32.mrf.mxu1 }
 0x1e4   : > { %5227 = vst [vmem:[#allocation27_spill] sm:$0xff] %v4864_v0 }
 0x1e5   : > { %v2226_v3 = vpop.f32.mrf.mxu1  ;;  %v3712_v20 = vpop.f32.mrf.mxu0 }
 0x1e6   : > { %v4868_v15 = vadd.f32 %v2226_v3, %v1906_v22  ;;  %v2412_v43 = vadd.f32 %v3712_v20, %v4608_v57  ;;  %v1914_v22 = vadd.f32 %v4575_v4, %v4767_v50 }
 0x1e7   : > { %v2228_v45 = vpop.f32.mrf.mxu1  ;;  %v2403_v47 = vpop.f32.mrf.mxu0 }
 0x1e8   : > { %5228 = vst [vmem:[#allocation28_spill] sm:$0xff] %v4868_v15  ;;  %v2404_v23 = vadd.f32 %v2403_v47, %v4590_v29  ;;  %v2692_v3 = vmax.f32 %v2412_v43, 0.0 }
 0x1e9   : > { %v2229_v38 = vpop.f32.mrf.mxu1  ;;  %v3713_v53 = vpop.f32.mrf.mxu0 }
 0x1ea   : > { %v4874_v25 = vadd.f32 %v2229_v38, %v1909_v30  ;;  %v2415_v51 = vadd.f32 %v3713_v53, %v4617_v17  ;;  %v2690_v57 = vmax.f32 %v2404_v23, 0.0  ;;  %v1917_v17 = vadd.f32 %v4575_v4, %v4775_v21 }
 0x1eb   : > { %v2231_v6 = vpop.f32.mrf.mxu1  ;;  %v2406_v1 = vpop.f32.mrf.mxu0 }
 0x1ec   : > { %v2693_v45 = vmax.f32 %v2415_v51, 0.0  ;;  %v2407_v15 = vadd.f32 %v2406_v1, %v4599_v42 }
 0x1ed   : > { %v2234_v61 = vpop.f32.mrf.mxu1  ;;  %v3716_v0 = vpop.f32.mrf.mxu0 }
 0x1ee   : > { %v2769_v20 = vmax.f32 %v2692_v3, %v2693_v45  ;;  %v2691_v58 = vmax.f32 %v2407_v15, 0.0  ;;  %v4880_v5 = vadd.f32 %v2234_v61, %v1914_v22  ;;  %v2428_v50 = vadd.f32 %v3716_v0, %v4644_v10 }
 0x1ef   : > { %v2236_v29 = vpop.f32.mrf.mxu1  ;;  %v2419_v47 = vpop.f32.mrf.mxu0  ;;  %v1922_v3 = vadd.f32 %v4575_v4, %v4783_v11  ;;  %v4896_v11 = vadd.f32 %v4575_v4, %v4461_v13 }
 0x1f0   : > { %v2770_v53 = vrot.slane %v2769_v20, 4  ;;  %v2762_v30 = vmax.f32 %v2690_v57, %v2691_v58  ;;  %v2420_v43 = vadd.f32 %v2419_v47, %v4626_v34  ;;  %v2696_v10 = vmax.f32 %v2428_v50, 0.0 }
 0x1f1   : > { %v2237_v38 = vpop.f32.mrf.mxu1  ;;  %v3717_v42 = vpop.f32.mrf.mxu0  ;;  %v4900_v50 = vadd.f32 %v4575_v4, %v4465_v16 }
 0x1f2   : > { %v2771_v51 = vmax.f32 %v2769_v20, %v2770_v53  ;;  %v2763_v6 = vrot.slane %v2762_v30, 4  ;;  %v4886_v23 = vadd.f32 %v2237_v38, %v1917_v17  ;;  %v2431_v15 = vadd.f32 %v3717_v42, %v4653_v27 }
 0x1f3   : > { %v2239_v1 = vpop.f32.mrf.mxu1  ;;  %v2422_v22 = vpop.f32.mrf.mxu0  ;;  %v2694_v0 = vmax.f32 %v2420_v43, 0.0  ;;  %v1925_v43 = vadd.f32 %v4575_v4, %v4790_v35 }
 0x1f4   : > { %v2772_v21 = vrot.slane %v2771_v51, 2  ;;  %v2764_v45 = vmax.f32 %v2762_v30, %v2763_v6  ;;  %v2423_v58 = vadd.f32 %v2422_v22, %v4635_v54  ;;  %v2697_v34 = vmax.f32 %v2431_v15, 0.0 }
 0x1f5   : > { %v2242_v61 = vpop.f32.mrf.mxu1  ;;  %v3720_v57 = vpop.f32.mrf.mxu0 }
 0x1f6   : > { %v2773_v20 = vmax.f32 %v2771_v51, %v2772_v21  ;;  %v2765_v29 = vrot.slane %v2764_v45, 2  ;;  %v2695_v47 = vmax.f32 %v2423_v58, 0.0  ;;  %v4892_v17 = vadd.f32 %v2242_v61, %v1922_v3 }
 0x1f7   : > { %v2783_v27 = vmax.f32 %v2696_v10, %v2697_v34  ;;  %v2244_v53 = vpop.f32.mrf.mxu1  ;;  %v2435_v38 = vpop.f32.mrf.mxu0  ;;  %v2444_v6 = vadd.f32 %v3720_v57, %v4680_v41 }
 0x1f8   : > { %v2774_v30 = vrot.slane %v2773_v20, 1  ;;  %v2766_v42 = vmax.f32 %v2764_v45, %v2765_v29  ;;  %v2776_v54 = vmax.f32 %v2694_v0, %v2695_v47  ;;  %v2436_v13 = vadd.f32 %v2435_v38, %v4662_v55 }
 0x1f9   : > { %v2784_v51 = vrot.slane %v2783_v27, 4  ;;  %v2245_v15 = vpop.f32.mrf.mxu1  ;;  %v3721_v1 = vpop.f32.mrf.mxu0  ;;  %v4908_v45 = vadd.f32 %v4575_v4, %v4473_v24  ;;  %v2700_v29 = vmax.f32 %v2444_v6, 0.0  ;;  %v4920_v6 = vadd.f32 %v4575_v4, %v4477_v28 }
 0x1fa   : > { %v2775_v22 = vmax.f32 %v2773_v20, %v2774_v30  ;;  %v2767_v3 = vrot.slane %v2766_v42, 1  ;;  %v2777_v21 = vrot.slane %v2776_v54, 4  ;;  %v4910_v16 = vadd.f32 %v2245_v15, %v1925_v43 }
 0x1fb   : > { %v2785_v58 = vmax.f32 %v2783_v27, %v2784_v51  ;;  %v2447_v10 = vadd.f32 %v3721_v1, %v4689_v59  ;;  %v2247_v35 = vpop.f32.mrf.mxu1  ;;  %v2438_v0 = vpop.f32.mrf.mxu0  ;;  %v1930_v20 = vadd.f32 %v4575_v4, %v4796_v56  ;;  %v2698_v30 = vmax.f32 %v2436_v13, 0.0 }
 0x1fc   : > { %v3627_v34 = vpack.c.bf16 %v2775_v22, %v2775_v22  ;;  %v2768_v41 = vmax.f32 %v2766_v42, %v2767_v3  ;;  %v2778_v61 = vmax.f32 %v2776_v54, %v2777_v21  ;;  %v2439_v57 = vadd.f32 %v2438_v0, %v4671_v18 }
 0x1fd   : > { %v2786_v55 = vrot.slane %v2785_v58, 2  ;;  %v2701_v47 = vmax.f32 %v2447_v10, 0.0  ;;  %v2250_v24 = vpop.f32.mrf.mxu1  ;;  %v3724_v53 = vpop.f32.mrf.mxu0 }
 0x1fe   : > { %v3626_v27 = vpack.c.bf16 %v2768_v41, %v2768_v41  ;;  %v2779_v38 = vrot.slane %v2778_v61, 2  ;;  %v2699_v43 = vmax.f32 %v2439_v57, 0.0  ;;  %v4916_v15 = vadd.f32 %v2250_v24, %v1930_v20 }
 0x1ff   : > { %v2787_v59 = vmax.f32 %v2785_v58, %v2786_v55  ;;  %v2797_v51 = vmax.f32 %v2700_v29, %v2701_v47  ;;  %v2252_v42 = vpop.f32.mrf.mxu1  ;;  %v2451_v54 = vpop.f32.mrf.mxu0  ;;  %v3159_v18 = vunpack.c.l.b16 %v3627_v34  ;;  %v2460_v13 = vadd.f32 %v3724_v53, %v4716_v14 }
 0x200   : > { %v3158_v1 = vunpack.c.l.b16 %v3626_v27  ;;  %v2780_v22 = vmax.f32 %v2778_v61, %v2779_v38  ;;  %v2790_v56 = vmax.f32 %v2698_v30, %v2699_v43  ;;  %v2452_v34 = vadd.f32 %v2451_v54, %v4698_v12 }
 0x201   : > { %v2788_v3 = vrot.slane %v2787_v59, 1  ;;  %v2798_v21 = vrot.slane %v2797_v51, 4  ;;  %v4923_v10 = vpop.f32.mrf.mxu1  ;;  %v3725_v58 = vpop.f32.mrf.mxu0  ;;  %v4929_v61 = vadd.f32 %v4575_v4, %v4485_v36  ;;  %v4934_v14 = vadd.f32 %v4575_v4, %v4490_v40 }
 0x202   : > { %v3195_v35 = vsel %vm3194_vm1, %v3159_v18, %v3158_v1  ;;  %v2781_v0 = vrot.slane %v2780_v22, 1  ;;  %v2791_v41 = vrot.slane %v2790_v56, 4  ;;  %v2463_v20 = vadd.f32 %v3725_v58, %v4725_v62 }
 0x203   : > { %v2789_v57 = vmax.f32 %v2787_v59, %v2788_v3  ;;  %v2799_v28 = vmax.f32 %v2797_v51, %v2798_v21  ;;  %v2255_v55 = vpop.f32.mrf.mxu1  ;;  %v2454_v29 = vpop.f32.mrf.mxu0  ;;  %v2704_v38 = vmax.f32 %v2460_v13, 0.0  ;;  %v2702_v62 = vmax.f32 %v2452_v34, 0.0 }
 0x204   : > { %v2782_v47 = vmax.f32 %v2780_v22, %v2781_v0  ;;  %v2792_v24 = vmax.f32 %v2790_v56, %v2791_v41  ;;  %v2455_v53 = vadd.f32 %v2454_v29, %v4707_v19  ;;  %v2705_v30 = vmax.f32 %v2463_v20, 0.0 }
 0x205   : > { %v3629_v27 = vpack.c.bf16 %v2789_v57, %v2789_v57  ;;  %v2800_v12 = vrot.slane %v2799_v28, 2  ;;  %v4937_v36 = vpop.f32.mrf.mxu1  ;;  %v3728_v43 = vpop.f32.mrf.mxu0  ;;  %v4945_v57 = vadd.f32 %v4575_v4, %v4498_v48  ;;  %v4950_v29 = vadd.f32 %v4575_v4, %v4504_v52 }
 0x206   : > { %v3628_v59 = vpack.c.bf16 %v2782_v47, %v2782_v47  ;;  %v2793_v51 = vrot.slane %v2792_v24, 2  ;;  %v2703_v42 = vmax.f32 %v2455_v53, 0.0  ;;  %v2811_v40 = vmax.f32 %v2704_v38, %v2705_v30 }
 0x207   : > { %v2801_v54 = vmax.f32 %v2799_v28, %v2800_v12  ;;  %v2260_v18 = vpop.f32.mrf.mxu1  ;;  %v2467_v1 = vpop.f32.mrf.mxu0  ;;  %v3161_v22 = vunpack.c.l.b16 %v3629_v27  ;;  %v2476_v58 = vadd.f32 %v3728_v43, %v4752_v49 }
 0x208   : > { %v3160_v56 = vunpack.c.l.b16 %v3628_v59  ;;  %v2794_v19 = vmax.f32 %v2792_v24, %v2793_v51  ;;  %v2804_v3 = vmax.f32 %v2702_v62, %v2703_v42  ;;  %v2812_v13 = vrot.slane %v2811_v40, 4 }
 0x209   : > { %v2802_v21 = vrot.slane %v2801_v54, 1  ;;  %v2468_v0 = vadd.f32 %v2467_v1, %v4734_v31  ;;  %v4941_v41 = vpop.f32.mrf.mxu1  ;;  %v3729_v34 = vpop.f32.mrf.mxu0  ;;  %v2708_v43 = vmax.f32 %v2476_v58, 0.0  ;;  %v4959_v18 = vadd.f32 %v4575_v4, %v4512_v60 }
 0x20a   : > { %v3197_v28 = vsel %vm3196_vm2, %v3160_v56, %v3195_v35  ;;  %v2795_v20 = vrot.slane %v2794_v19, 1  ;;  %v2805_v55 = vrot.slane %v2804_v3, 4  ;;  %v2813_v24 = vmax.f32 %v2811_v40, %v2812_v13 }
 0x20b   : > { %v2803_v47 = vmax.f32 %v2801_v54, %v2802_v21  ;;  %v3199_v49 = vsel %vm3198_vm3, %v3161_v22, %v3197_v28  ;;  %v2263_v31 = vpop.f32.mrf.mxu1  ;;  %v2470_v53 = vpop.f32.mrf.mxu0  ;;  %v2479_v48 = vadd.f32 %v3729_v34, %v4761_v26  ;;  %v2706_v59 = vmax.f32 %v2468_v0, 0.0  ;;  %v5229_v21 = vld [vmem:[#allocation2_spill] sm:$0xff] }
 0x20c   : > { %v2796_v27 = vmax.f32 %v2794_v19, %v2795_v20  ;;  %v2806_v12 = vmax.f32 %v2804_v3, %v2805_v55  ;;  %v2471_v38 = vadd.f32 %v2470_v53, %v4743_v44  ;;  %v2814_v30 = vrot.slane %v2813_v24, 2 }
 0x20d   : > { %v3631_v35 = vpack.c.bf16 %v2803_v47, %v2803_v47  ;;  %v4955_v51 = vpop.f32.mrf.mxu1  ;;  %v3732_v52 = vpop.f32.mrf.mxu0  ;;  %v2709_v54 = vmax.f32 %v2479_v48, 0.0  ;;  %v4964_v13 = vadd.f32 %v4575_v4, %v5229_v21 }
 0x20e   : > { %v3630_v62 = vpack.c.bf16 %v2796_v27, %v2796_v27  ;;  %v2807_v42 = vrot.slane %v2806_v12, 2  ;;  %v2707_v40 = vmax.f32 %v2471_v38, 0.0  ;;  %v2815_v1 = vmax.f32 %v2813_v24, %v2814_v30  ;;  %v4981_v30 = vld [vmem:[%s5200_s2] ss:$0 sm:$0xff] }
 0x20f   : > { %v2268_v26 = vpop.f32.mrf.mxu1  ;;  %v2483_v44 = vpop.f32.mrf.mxu0  ;;  %v2825_v19 = vmax.f32 %v2708_v43, %v2709_v54  ;;  %v3163_v58 = vunpack.c.l.b16 %v3631_v35  ;;  %v2492_v60 = vadd.f32 %v3732_v52, %v4786_v32  ;;  %v5230_v35 = vld [vmem:[#allocation12_spill] sm:$0xff]  ;;  %v1954_v43 = vadd.f32 %v4981_v30, %v4832_v46 }
 0x210   : > { %v3162_v22 = vunpack.c.l.b16 %v3630_v62  ;;  %v2808_v56 = vmax.f32 %v2806_v12, %v2807_v42  ;;  %v2818_v3 = vmax.f32 %v2706_v59, %v2707_v40  ;;  %v2816_v0 = vrot.slane %v2815_v1, 1  ;;  %v5231_v62 = vld [vmem:[#allocation11_spill] sm:$0xff] }
 0x211   : > { %v4967_v34 = vpop.f32.mrf.mxu1  ;;  %v3733_v28 = vpop.f32.mrf.mxu0  ;;  %v2826_v47 = vrot.slane %v2825_v19, 4  ;;  %v2484_v4 = vadd.f32 %v2483_v44, %v4770_v37  ;;  %v2712_v52 = vmax.f32 %v2492_v60, 0.0 }
 0x212   : > { %v3201_v20 = vsel %vm3200_vm4, %v3162_v22, %v3199_v49  ;;  %v2809_v55 = vrot.slane %v2808_v56, 1  ;;  %v2819_v24 = vrot.slane %v2818_v3, 4  ;;  %v2817_v31 = vmax.f32 %v2815_v1, %v2816_v0 }
 0x213   : > { %v3203_v53 = vsel %vm3202_vm5, %v3163_v58, %v3201_v20  ;;  %v2271_v27 = vpop.f32.mrf.mxu1  ;;  %v2486_v12 = vpop.f32.mrf.mxu0  ;;  %v2827_v48 = vmax.f32 %v2825_v19, %v2826_v47  ;;  %v2495_v49 = vadd.f32 %v3733_v28, %v5230_v35  ;;  %v2710_v22 = vmax.f32 %v2484_v4, 0.0 }
 0x214   : > { %v2810_v32 = vmax.f32 %v2808_v56, %v2809_v55  ;;  %v2820_v38 = vmax.f32 %v2818_v3, %v2819_v24  ;;  %v3633_v59 = vpack.c.bf16 %v2817_v31, %v2817_v31  ;;  %v2487_v37 = vadd.f32 %v2486_v12, %v5231_v62  ;;  %v5232_v62 = vld [vmem:[#allocation3_spill] sm:$0xff] }
 0x215   : > { %v2274_v42 = vpop.f32.mrf.mxu1  ;;  %v3736_v54 = vpop.f32.mrf.mxu0  ;;  %v2828_v1 = vrot.slane %v2827_v48, 2  ;;  %v2713_v44 = vmax.f32 %v2495_v49, 0.0  ;;  %v1957_v28 = vadd.f32 %v4981_v30, %v4838_v2 }
 0x216   : > { %v3632_v40 = vpack.c.bf16 %v2810_v32, %v2810_v32  ;;  %v2821_v26 = vrot.slane %v2820_v38, 2  ;;  %v2711_v56 = vmax.f32 %v2487_v37, 0.0  ;;  %v4987_v19 = vadd.f32 %v2274_v42, %v1954_v43 }
 0x217   : > { %v2276_v3 = vpop.f32.mrf.mxu1  ;;  %v2499_v21 = vpop.f32.mrf.mxu0  ;;  %v2829_v46 = vmax.f32 %v2827_v48, %v2828_v1  ;;  %v2839_v60 = vmax.f32 %v2712_v52, %v2713_v44  ;;  %v3165_v20 = vunpack.c.l.b16 %v3633_v59  ;;  %v2508_v47 = vadd.f32 %v3736_v54, %v4810_v39 }
 0x218   : > { %v3164_v58 = vunpack.c.l.b16 %v3632_v40  ;;  %v2822_v0 = vmax.f32 %v2820_v38, %v2821_v26  ;;  %v2832_v55 = vmax.f32 %v2710_v22, %v2711_v56  ;;  %v2500_v38 = vadd.f32 %v2499_v21, %v4798_v8 }
 0x219   : > { %v2277_v24 = vpop.f32.mrf.mxu1  ;;  %v3737_v31 = vpop.f32.mrf.mxu0  ;;  %v2830_v27 = vrot.slane %v2829_v46, 1  ;;  %v2840_v32 = vrot.slane %v2839_v60, 4  ;;  %v5004_v37 = vadd.f32 %v4981_v30, %v5232_v62  ;;  %v2716_v56 = vmax.f32 %v2508_v47, 0.0 }
 0x21a   : > { %v3205_v4 = vsel %vm3204_vm6, %v3164_v58, %v3203_v53  ;;  %v2823_v12 = vrot.slane %v2822_v0, 1  ;;  %v2833_v2 = vrot.slane %v2832_v55, 4  ;;  %v5000_v35 = vadd.f32 %v2277_v24, %v1957_v28 }
 0x21b   : > { %v3207_v48 = vsel %vm3206_vm7, %v3165_v20, %v3205_v4  ;;  %v2279_v39 = vpop.f32.mrf.mxu1  ;;  %v2502_v49 = vpop.f32.mrf.mxu0  ;;  %v2831_v53 = vmax.f32 %v2829_v46, %v2830_v27  ;;  %v2841_v52 = vmax.f32 %v2839_v60, %v2840_v32  ;;  %v2511_v54 = vadd.f32 %v3737_v31, %v4816_v9  ;;  %v5235_v32 = vld [vmem:[#allocation5_spill] sm:$0xff] }
 0x21c   : > { %v3232_v43 = vpack.c.b16 %v3207_v48, %v3207_v48  ;;  %v2824_v59 = vmax.f32 %v2822_v0, %v2823_v12  ;;  %v2834_v42 = vmax.f32 %v2832_v55, %v2833_v2  ;;  %v2503_v40 = vadd.f32 %v2502_v49, %v4804_v63  ;;  %v5233_v63 = vld [vmem:[#allocation4_spill] sm:$0xff]  ;;  %v5237_v39 = vld [vmem:[#allocation17_spill] sm:$0xff] }
 0x21d   : > { %v5008_v1 = vpop.f32.mrf.mxu1  ;;  %v3740_v8 = vpop.f32.mrf.mxu0  ;;  %v3635_v26 = vpack.c.bf16 %v2831_v53, %v2831_v53  ;;  %v2842_v22 = vrot.slane %v2841_v52, 2  ;;  %v2714_v21 = vmax.f32 %v2500_v38, 0.0  ;;  %v2717_v58 = vmax.f32 %v2511_v54, 0.0 }
 0x21e   : > { %3242 = vst [vmem:[%s4996_s5] sm:$0xf] %v3232_v43  ;;  %v3634_v44 = vpack.c.bf16 %v2824_v59, %v2824_v59  ;;  %v2835_v3 = vrot.slane %v2834_v42, 2  ;;  %v2715_v46 = vmax.f32 %v2503_v40, 0.0  ;;  %v2524_v9 = vadd.f32 %v3740_v8, %v4834_v33 }
 0x21f   : > { %v2284_v0 = vpop.f32.mrf.mxu1  ;;  %v2515_v60 = vpop.f32.mrf.mxu0  ;;  %v3167_v28 = vunpack.c.l.b16 %v3635_v26  ;;  %v2843_v55 = vmax.f32 %v2841_v52, %v2842_v22  ;;  %v5014_v24 = vadd.f32 %v4981_v30, %v5233_v63  ;;  %v2853_v4 = vmax.f32 %v2716_v56, %v2717_v58  ;;  %v5240_v26 = vld [vmem:[#allocation19_spill] sm:$0xff] }
 0x220   : > { %v3166_v20 = vunpack.c.l.b16 %v3634_v44  ;;  %v2836_v31 = vmax.f32 %v2834_v42, %v2835_v3  ;;  %v2846_v27 = vmax.f32 %v2714_v21, %v2715_v46  ;;  %v5020_v48 = vadd.f32 %v4981_v30, %v5235_v32  ;;  %v5238_v42 = vld [vmem:[#allocation6_spill] sm:$0xff] }
 0x221   : > { %5234 = vst [vmem:[#allocation2_spill] sm:$0xff] %v5014_v24  ;;  %v5016_v12 = vpop.f32.mrf.mxu1  ;;  %v3741_v47 = vpop.f32.mrf.mxu0  ;;  %v2844_v38 = vrot.slane %v2843_v55, 1  ;;  %v2516_v49 = vadd.f32 %v2515_v60, %v5237_v39  ;;  %v2854_v43 = vrot.slane %v2853_v4, 4  ;;  %v5027_v54 = vadd.f32 %v4981_v30, %v5238_v42 }
 0x222   : > { %5236 = vst [vmem:[#allocation12_spill] sm:$0xff] %v5020_v48  ;;  %v3208_v2 = vsel %vm3194_vm1, %v3167_v28, %v3166_v20  ;;  %v2837_v33 = vrot.slane %v2836_v31, 1  ;;  %v2847_v53 = vrot.slane %v2846_v27, 4  ;;  %v2527_v59 = vadd.f32 %v3741_v47, %v4840_v7  ;;  %v5241_v28 = vld [vmem:[#allocation25_spill] sm:$0xff] }
 0x223   : > { %v2287_v52 = vpop.f32.mrf.mxu1  ;;  %v2518_v62 = vpop.f32.mrf.mxu0  ;;  %5239 = vst [vmem:[#allocation11_spill] sm:$0xff] %v5027_v54  ;;  %v2845_v40 = vmax.f32 %v2843_v55, %v2844_v38  ;;  %v2720_v8 = vmax.f32 %v2524_v9, 0.0  ;;  %v2855_v56 = vmax.f32 %v2853_v4, %v2854_v43  ;;  %v2718_v60 = vmax.f32 %v2516_v49, 0.0  ;;  %v5242_v38 = vld [vmem:[#allocation7_spill] sm:$0xff]  ;;  %v5244_v4 = vld [vmem:[#allocation13_spill] sm:$0xff] }
 0x224   : > { %v2519_v44 = vadd.f32 %v2518_v62, %v5240_v26  ;;  %v2838_v22 = vmax.f32 %v2836_v31, %v2837_v33  ;;  %v2848_v3 = vmax.f32 %v2846_v27, %v2847_v53  ;;  %v2721_v21 = vmax.f32 %v2527_v59, 0.0  ;;  %v5245_v26 = vld [vmem:[#allocation21_spill] sm:$0xff] }
 0x225   : > { %v5030_v58 = vpop.f32.mrf.mxu1  ;;  %v3744_v46 = vpop.f32.mrf.mxu0  ;;  %v3637_v0 = vpack.c.bf16 %v2845_v40, %v2845_v40  ;;  %v2856_v47 = vrot.slane %v2855_v56, 2  ;;  %v5035_v31 = vadd.f32 %v4981_v30, %v5242_v38  ;;  %v5039_v27 = vadd.f32 %v4981_v30, %v5244_v4 }
 0x226   : > { %v2719_v7 = vmax.f32 %v2519_v44, 0.0  ;;  %v2540_v20 = vadd.f32 %v3744_v46, %v5241_v28  ;;  %v3636_v63 = vpack.c.bf16 %v2838_v22, %v2838_v22  ;;  %v2849_v32 = vrot.slane %v2848_v3, 2  ;;  %v5246_v22 = vld [vmem:[#allocation27_spill] sm:$0xff] }
 0x227   : > { %v2867_v39 = vmax.f32 %v2720_v8, %v2721_v21  ;;  %v2292_v55 = vpop.f32.mrf.mxu1  ;;  %v2531_v9 = vpop.f32.mrf.mxu0  ;;  %5243 = vst [vmem:[#allocation3_spill] sm:$0xff] %v5035_v31  ;;  %v3169_v33 = vunpack.c.l.b16 %v3637_v0  ;;  %v2857_v53 = vmax.f32 %v2855_v56, %v2856_v47 }
 0x228   : > { %v2860_v43 = vmax.f32 %v2718_v60, %v2719_v7  ;;  %v3168_v49 = vunpack.c.l.b16 %v3636_v63  ;;  %v2850_v59 = vmax.f32 %v2848_v3, %v2849_v32  ;;  %v2724_v8 = vmax.f32 %v2540_v20, 0.0  ;;  %v5247_v63 = vld [vmem:[#allocation23_spill] sm:$0xff]  ;;  %v5248_v32 = vld [vmem:[#allocation14_spill] sm:$0xff] }
 0x229   : > { %v2868_v52 = vrot.slane %v2867_v39, 4  ;;  %v5041_v62 = vpop.f32.mrf.mxu1  ;;  %v3745_v42 = vpop.f32.mrf.mxu0  ;;  %v2532_v44 = vadd.f32 %v2531_v9, %v5245_v26  ;;  %v2858_v28 = vrot.slane %v2857_v53, 1  ;;  %v5050_v20 = vadd.f32 %v4981_v30, %v5248_v32  ;;  %v5251_v32 = vld [vmem:[#allocation18_spill] sm:$0xff] }
 0x22a   : > { %v2861_v40 = vrot.slane %v2860_v43, 4  ;;  %v2543_v21 = vadd.f32 %v3745_v42, %v5246_v22  ;;  %v3209_v46 = vsel %vm3196_vm2, %v3168_v49, %v3208_v2  ;;  %v2851_v55 = vrot.slane %v2850_v59, 1 }
 0x22b   : > { %v2869_v38 = vmax.f32 %v2867_v39, %v2868_v52  ;;  %v2295_v0 = vpop.f32.mrf.mxu1  ;;  %v2534_v60 = vpop.f32.mrf.mxu0  ;;  %v3210_v56 = vsel %vm3198_vm3, %v3169_v33, %v3209_v46  ;;  %v2859_v9 = vmax.f32 %v2857_v53, %v2858_v28  ;;  %v2722_v39 = vmax.f32 %v2532_v44, 0.0 }
 0x22c   : > { %v2862_v3 = vmax.f32 %v2860_v43, %v2861_v40  ;;  %v2725_v7 = vmax.f32 %v2543_v21, 0.0  ;;  %v2535_v47 = vadd.f32 %v2534_v60, %v5247_v63  ;;  %v2852_v4 = vmax.f32 %v2850_v59, %v2851_v55  ;;  %v5249_v0 = vld [vmem:[#allocation15_spill] sm:$0xff]  ;;  %v5250_v63 = vld [vmem:[#allocation16_spill] sm:$0xff] }
 0x22d   : > { %v2870_v42 = vrot.slane %v2869_v38, 2  ;;  %v5052_v26 = vpop.f32.mrf.mxu1  ;;  %v3748_v2 = vpop.f32.mrf.mxu0  ;;  %v5056_v33 = vadd.f32 %v4981_v30, %v5249_v0  ;;  %v3639_v43 = vpack.c.bf16 %v2859_v9, %v2859_v9  ;;  %v5060_v53 = vadd.f32 %v4981_v30, %v5250_v63 }
 0x22e   : > { %v2863_v49 = vrot.slane %v2862_v3, 2  ;;  %v2881_v52 = vmax.f32 %v2724_v8, %v2725_v7  ;;  %v2723_v22 = vmax.f32 %v2535_v47, 0.0  ;;  %v3638_v40 = vpack.c.bf16 %v2852_v4, %v2852_v4 }
 0x22f   : > { %v2871_v21 = vmax.f32 %v2869_v38, %v2870_v42  ;;  %v2300_v46 = vpop.f32.mrf.mxu1  ;;  %v2547_v60 = vpop.f32.mrf.mxu0  ;;  %v5064_v8 = vadd.f32 %v4981_v30, %v5251_v32  ;;  %v2556_v47 = vadd.f32 %v3748_v2, %v4880_v5  ;;  %v3171_v4 = vunpack.c.l.b16 %v3639_v43 }
 0x230   : > { %v2864_v59 = vmax.f32 %v2862_v3, %v2863_v49  ;;  %v2882_v28 = vrot.slane %v2881_v52, 4  ;;  %v2874_v55 = vmax.f32 %v2722_v39, %v2723_v22  ;;  %v3170_v44 = vunpack.c.l.b16 %v3638_v40  ;;  %v5252_v49 = vld [vmem:[#allocation28_spill] sm:$0xff] }
 0x231   : > { %v2872_v7 = vrot.slane %v2871_v21, 1  ;;  %v5067_v9 = vpop.f32.mrf.mxu1  ;;  %v3749_v38 = vpop.f32.mrf.mxu0  ;;  %v2548_v39 = vadd.f32 %v2547_v60, %v5252_v49  ;;  %v2728_v24 = vmax.f32 %v2556_v47, 0.0 }
 0x232   : > { %v2865_v42 = vrot.slane %v2864_v59, 1  ;;  %v2883_v0 = vmax.f32 %v2881_v52, %v2882_v28  ;;  %v2875_v46 = vrot.slane %v2874_v55, 4  ;;  %v3211_v63 = vsel %vm3200_vm4, %v3170_v44, %v3210_v56 }
 0x233   : > { %v2873_v3 = vmax.f32 %v2871_v21, %v2872_v7  ;;  %v2559_v22 = vadd.f32 %v3749_v38, %v4886_v23  ;;  %v2303_v32 = vpop.f32.mrf.mxu1  ;;  %v2550_v31 = vpop.f32.mrf.mxu0  ;;  %v3212_v54 = vsel %vm3202_vm5, %v3171_v4, %v3211_v63  ;;  %v5253_v21 = vld [vmem:[#allocation20_spill] sm:$0xff] }
 0x234   : > { %v2866_v40 = vmax.f32 %v2864_v59, %v2865_v42  ;;  %v2884_v5 = vrot.slane %v2883_v0, 2  ;;  %v2876_v2 = vmax.f32 %v2874_v55, %v2875_v46  ;;  %v2551_v52 = vadd.f32 %v2550_v31, %v4874_v25  ;;  %v5254_v59 = vld [vmem:[#allocation22_spill] sm:$0xff]  ;;  %v5255_v25 = vld [vmem:[#allocation24_spill] sm:$0xff] }
 0x235   : > { %v3641_v48 = vpack.c.bf16 %v2873_v3, %v2873_v3  ;;  %v2729_v43 = vmax.f32 %v2559_v22, 0.0  ;;  %v5074_v28 = vpop.f32.mrf.mxu1  ;;  %v3752_v56 = vpop.f32.mrf.mxu0  ;;  %v5078_v60 = vadd.f32 %v4981_v30, %v5253_v21  ;;  %v5082_v38 = vadd.f32 %v4981_v30, %v5254_v59 }
 0x236   : > { %v3640_v23 = vpack.c.bf16 %v2866_v40, %v2866_v40  ;;  %v2885_v44 = vmax.f32 %v2883_v0, %v2884_v5  ;;  %v2877_v7 = vrot.slane %v2876_v2, 2  ;;  %v2726_v55 = vmax.f32 %v2548_v39, 0.0 }
 0x237   : > { %v2895_v4 = vmax.f32 %v2728_v24, %v2729_v43  ;;  %v2727_v47 = vmax.f32 %v2551_v52, 0.0  ;;  %v2308_v42 = vpop.f32.mrf.mxu1  ;;  %v2563_v46 = vpop.f32.mrf.mxu0  ;;  %v5086_v31 = vadd.f32 %v4981_v30, %v5255_v25  ;;  %v2254_v0 = vadd.f32 %v4923_v10, %v5039_v27 }
 0x238   : > { %v3172_v63 = vunpack.c.l.b16 %v3640_v23  ;;  %v2886_v3 = vrot.slane %v2885_v44, 1  ;;  %v2878_v49 = vmax.f32 %v2876_v2, %v2877_v7  ;;  %v3173_v22 = vunpack.c.l.b16 %v3641_v48 }
 0x239   : > { %v2896_v32 = vrot.slane %v2895_v4, 4  ;;  %v2888_v40 = vmax.f32 %v2726_v55, %v2727_v47  ;;  %v5090_v5 = vpop.f32.mrf.mxu1  ;;  %v3753_v39 = vpop.f32.mrf.mxu0  ;;  %v2572_v21 = vadd.f32 %v3752_v56, %v4916_v15  ;;  %v2564_v7 = vadd.f32 %v2563_v46, %v4892_v17 }
 0x23a   : > { %v3213_v24 = vsel %vm3204_vm6, %v3172_v63, %v3212_v54  ;;  %v2887_v43 = vmax.f32 %v2885_v44, %v2886_v3  ;;  %v2879_v52 = vrot.slane %v2878_v49, 1  ;;  %v2575_v42 = vadd.f32 %v3753_v39, %v2254_v0 }
 0x23b   : > { %v3214_v59 = vsel %vm3206_vm7, %v3173_v22, %v3213_v24  ;;  %v2897_v23 = vmax.f32 %v2895_v4, %v2896_v32  ;;  %v2889_v2 = vrot.slane %v2888_v40, 4  ;;  %v2311_v10 = vpop.f32.mrf.mxu1  ;;  %v2566_v48 = vpop.f32.mrf.mxu0  ;;  %v2259_v54 = vadd.f32 %v4937_v36, %v5050_v20 }
 0x23c   : > { %v3233_v27 = vpack.c.b16 %v3214_v59, %v3214_v59  ;;  %v3643_v55 = vpack.c.bf16 %v2887_v43, %v2887_v43  ;;  %v2880_v47 = vmax.f32 %v2878_v49, %v2879_v52  ;;  %v2567_v15 = vadd.f32 %v2566_v48, %v4910_v16 }
 0x23d   : > { %v2898_v44 = vrot.slane %v2897_v23, 2  ;;  %v2890_v25 = vmax.f32 %v2888_v40, %v2889_v2  ;;  %v5099_v56 = vpop.f32.mrf.mxu1  ;;  %v3756_v4 = vpop.f32.mrf.mxu0  ;;  %v2267_v63 = vadd.f32 %v4955_v51, %v5060_v53  ;;  %v2732_v46 = vmax.f32 %v2572_v21, 0.0 }
 0x23e   : > { %3243 = vst [vmem:[%s4996_s5 + $0x4] sm:$0xf] %v3233_v27  ;;  %v3642_v17 = vpack.c.bf16 %v2880_v47, %v2880_v47  ;;  %v2733_v3 = vmax.f32 %v2575_v42, 0.0  ;;  %v2730_v0 = vmax.f32 %v2564_v7, 0.0  ;;  %v2731_v32 = vmax.f32 %v2567_v15, 0.0  ;;  %v5256_v42 = vld [vmem:[#allocation26_spill] sm:$0xff] }
 0x23f   : > { %v2899_v22 = vmax.f32 %v2897_v23, %v2898_v44  ;;  %v2891_v49 = vrot.slane %v2890_v25, 2  ;;  %v2316_v39 = vpop.f32.mrf.mxu1  ;;  %v2579_v36 = vpop.f32.mrf.mxu0  ;;  %v2270_v20 = vadd.f32 %v4967_v34, %v5064_v8  ;;  %v3175_v16 = vunpack.c.l.b16 %v3643_v55 }
 0x240   : > { %v3174_v40 = vunpack.c.l.b16 %v3642_v17  ;;  %v2909_v24 = vmax.f32 %v2732_v46, %v2733_v3  ;;  %v2902_v59 = vmax.f32 %v2730_v0, %v2731_v32  ;;  %v2588_v51 = vadd.f32 %v3756_v4, %v2267_v63 }
 0x241   : > { %v2900_v43 = vrot.slane %v2899_v22, 1  ;;  %v2892_v52 = vmax.f32 %v2890_v25, %v2891_v49  ;;  %v5106_v53 = vpop.f32.mrf.mxu1  ;;  %v3757_v21 = vpop.f32.mrf.mxu0  ;;  %v2262_v23 = vadd.f32 %v4941_v41, %v5056_v33  ;;  %v2580_v10 = vadd.f32 %v2579_v36, %v2259_v54 }
 0x242   : > { %v3215_v2 = vsel %vm3194_vm1, %v3175_v16, %v3174_v40  ;;  %v2910_v7 = vrot.slane %v2909_v24, 4  ;;  %v2903_v34 = vrot.slane %v2902_v59, 4  ;;  %v2591_v8 = vadd.f32 %v3757_v21, %v2270_v20 }
 0x243   : > { %v2901_v48 = vmax.f32 %v2899_v22, %v2900_v43  ;;  %v2893_v27 = vrot.slane %v2892_v52, 1  ;;  %v2319_v55 = vpop.f32.mrf.mxu1  ;;  %v2582_v47 = vpop.f32.mrf.mxu0  ;;  %v1973_v44 = vadd.f32 %v4981_v30, %v5256_v42  ;;  %v2283_v25 = vadd.f32 %v5008_v1, %v5078_v60 }
 0x244   : > { %v2911_v15 = vmax.f32 %v2909_v24, %v2910_v7  ;;  %v2583_v4 = vadd.f32 %v2582_v47, %v2262_v23  ;;  %v2904_v41 = vmax.f32 %v2902_v59, %v2903_v34  ;;  %v2736_v33 = vmax.f32 %v2588_v51, 0.0 }
 0x245   : > { %v2894_v63 = vmax.f32 %v2892_v52, %v2893_v27  ;;  %v2737_v17 = vmax.f32 %v2591_v8, 0.0  ;;  %v5115_v46 = vpop.f32.mrf.mxu1  ;;  %v3760_v54 = vpop.f32.mrf.mxu0  ;;  %v3645_v3 = vpack.c.bf16 %v2901_v48, %v2901_v48  ;;  %v2734_v49 = vmax.f32 %v2580_v10, 0.0 }
 0x246   : > { %v2912_v22 = vrot.slane %v2911_v15, 2  ;;  %v2735_v0 = vmax.f32 %v2583_v4, 0.0  ;;  %v2286_v32 = vadd.f32 %v5016_v12, %v5082_v38  ;;  %v2905_v36 = vrot.slane %v2904_v41, 2 }
 0x247   : > { %v3644_v39 = vpack.c.bf16 %v2894_v63, %v2894_v63  ;;  %v2923_v20 = vmax.f32 %v2736_v33, %v2737_v17  ;;  %v2324_v1 = vpop.f32.mrf.mxu1  ;;  %v2595_v60 = vpop.f32.mrf.mxu0  ;;  %v2291_v16 = vadd.f32 %v5030_v58, %v5086_v31  ;;  %v2294_v40 = vadd.f32 %v5041_v62, %v1973_v44 }
 0x248   : > { %v2913_v24 = vmax.f32 %v2911_v15, %v2912_v22  ;;  %v2916_v43 = vmax.f32 %v2734_v49, %v2735_v0  ;;  %v2906_v59 = vmax.f32 %v2904_v41, %v2905_v36  ;;  %v2604_v21 = vadd.f32 %v3760_v54, %v2283_v25 }
 0x249   : > { %v3176_v52 = vunpack.c.l.b16 %v3644_v39  ;;  %v2924_v51 = vrot.slane %v2923_v20, 4  ;;  %v5122_v23 = vpop.f32.mrf.mxu1  ;;  %v3761_v7 = vpop.f32.mrf.mxu0  ;;  %v3177_v12 = vunpack.c.l.b16 %v3645_v3  ;;  %v2596_v48 = vadd.f32 %v2595_v60, %v4987_v19 }
 0x24a   : > { %v2914_v38 = vrot.slane %v2913_v24, 1  ;;  %v2917_v10 = vrot.slane %v2916_v43, 4  ;;  %v2907_v34 = vrot.slane %v2906_v59, 1  ;;  %v2607_v31 = vadd.f32 %v3761_v7, %v2286_v32 }
 0x24b   : > { %v3216_v27 = vsel %vm3196_vm2, %v3176_v52, %v3215_v2  ;;  %v2925_v58 = vmax.f32 %v2923_v20, %v2924_v51  ;;  %v2327_v62 = vpop.f32.mrf.mxu1  ;;  %v2598_v8 = vpop.f32.mrf.mxu0  ;;  %v2740_v4 = vmax.f32 %v2604_v21, 0.0  ;;  %v2738_v17 = vmax.f32 %v2596_v48, 0.0 }
 0x24c   : > { %v2915_v55 = vmax.f32 %v2913_v24, %v2914_v38  ;;  %v3217_v47 = vsel %vm3198_vm3, %v3177_v12, %v3216_v27  ;;  %v2918_v42 = vmax.f32 %v2916_v43, %v2917_v10  ;;  %v2599_v44 = vadd.f32 %v2598_v8, %v5000_v35 }
 0x24d   : > { %v2908_v25 = vmax.f32 %v2906_v59, %v2907_v34  ;;  %v2926_v15 = vrot.slane %v2925_v58, 2  ;;  %v2741_v63 = vmax.f32 %v2607_v31, 0.0  ;;  %v5128_v41 = vpop.f32.mrf.mxu1  ;;  %v3764_v19 = vpop.f32.mrf.mxu0  ;;  %v2299_v3 = vadd.f32 %v5052_v26, %v4896_v11 }
 0x24e   : > { %v3647_v33 = vpack.c.bf16 %v2915_v55, %v2915_v55  ;;  %v2919_v2 = vrot.slane %v2918_v42, 2  ;;  %v2739_v54 = vmax.f32 %v2599_v44, 0.0  ;;  %v2302_v35 = vadd.f32 %v5067_v9, %v4900_v50 }
 0x24f   : > { %v3646_v22 = vpack.c.bf16 %v2908_v25, %v2908_v25  ;;  %v2927_v49 = vmax.f32 %v2925_v58, %v2926_v15  ;;  %v2937_v0 = vmax.f32 %v2740_v4, %v2741_v63  ;;  %v2332_v32 = vpop.f32.mrf.mxu1  ;;  %v2611_v39 = vpop.f32.mrf.mxu0  ;;  %v2307_v36 = vadd.f32 %v5074_v28, %v4908_v45 }
 0x250   : > { %v2920_v20 = vmax.f32 %v2918_v42, %v2919_v2  ;;  %v2930_v1 = vmax.f32 %v2738_v17, %v2739_v54  ;;  %v2620_v52 = vadd.f32 %v3764_v19, %v2299_v3  ;;  %v3179_v26 = vunpack.c.l.b16 %v3647_v33 }
 0x251   : > { %v3178_v60 = vunpack.c.l.b16 %v3646_v22  ;;  %v2928_v24 = vrot.slane %v2927_v49, 1  ;;  %v2938_v43 = vrot.slane %v2937_v0, 4  ;;  %v5136_v59 = vpop.f32.mrf.mxu1  ;;  %v3765_v11 = vpop.f32.mrf.mxu0  ;;  %v2612_v7 = vadd.f32 %v2611_v39, %v2291_v16 }
 0x252   : > { %v2921_v51 = vrot.slane %v2920_v20, 1  ;;  %v2931_v21 = vrot.slane %v2930_v1, 4  ;;  %v2623_v9 = vadd.f32 %v3765_v11, %v2302_v35  ;;  %v2744_v62 = vmax.f32 %v2620_v52, 0.0 }
 0x253   : > { %v3218_v12 = vsel %vm3200_vm4, %v3178_v60, %v3217_v47  ;;  %v2929_v38 = vmax.f32 %v2927_v49, %v2928_v24  ;;  %v2939_v50 = vmax.f32 %v2937_v0, %v2938_v43  ;;  %v2335_v10 = vpop.f32.mrf.mxu1  ;;  %v2614_v45 = vpop.f32.mrf.mxu0  ;;  %v2742_v47 = vmax.f32 %v2612_v7, 0.0 }
 0x254   : > { %v2922_v28 = vmax.f32 %v2920_v20, %v2921_v51  ;;  %v3219_v48 = vsel %vm3202_vm5, %v3179_v26, %v3218_v12  ;;  %v2932_v27 = vmax.f32 %v2930_v1, %v2931_v21  ;;  %v2615_v34 = vadd.f32 %v2614_v45, %v2294_v40 }
 0x255   : > { %v3649_v58 = vpack.c.bf16 %v2929_v38, %v2929_v38  ;;  %v2940_v31 = vrot.slane %v2939_v50, 2  ;;  %v2745_v8 = vmax.f32 %v2623_v9, 0.0  ;;  %v5140_v55 = vpop.f32.mrf.mxu1  ;;  %v3768_v42 = vpop.f32.mrf.mxu0  ;;  %v2310_v15 = vadd.f32 %v5090_v5, %v4920_v6 }
 0x256   : > { %v3648_v16 = vpack.c.bf16 %v2922_v28, %v2922_v28  ;;  %v2933_v44 = vrot.slane %v2932_v27, 2  ;;  %v2743_v25 = vmax.f32 %v2615_v34, 0.0  ;;  %v2315_v4 = vadd.f32 %v5099_v56, %v4929_v61 }
 0x257   : > { %v2941_v63 = vmax.f32 %v2939_v50, %v2940_v31  ;;  %v2951_v19 = vmax.f32 %v2744_v62, %v2745_v8  ;;  %v2340_v40 = vpop.f32.mrf.mxu1  ;;  %v2627_v33 = vpop.f32.mrf.mxu0  ;;  %v2318_v2 = vadd.f32 %v5106_v53, %v4934_v14  ;;  %v3181_v22 = vunpack.c.l.b16 %v3649_v58 }
 0x258   : > { %v3180_v17 = vunpack.c.l.b16 %v3648_v16  ;;  %v2934_v54 = vmax.f32 %v2932_v27, %v2933_v44  ;;  %v2944_v3 = vmax.f32 %v2742_v47, %v2743_v25  ;;  %v2323_v49 = vadd.f32 %v5115_v46, %v4945_v57 }
 0x259   : > { %v2942_v0 = vrot.slane %v2941_v63, 1  ;;  %v2952_v32 = vrot.slane %v2951_v19, 4  ;;  %v5150_v6 = vpop.f32.mrf.mxu1  ;;  %v3769_v5 = vpop.f32.mrf.mxu0  ;;  %v2636_v35 = vadd.f32 %v3768_v42, %v2315_v4  ;;  %v2628_v1 = vadd.f32 %v2627_v33, %v2307_v36  ;;  %v5257_v4 = vld [vmem:[#allocation8_spill] sm:$0xff] }
 0x25a   : > { %v3220_v61 = vsel %vm3204_vm6, %v3180_v17, %v3219_v48  ;;  %v2935_v56 = vrot.slane %v2934_v54, 1  ;;  %v2945_v39 = vrot.slane %v2944_v3, 4  ;;  %v2639_v52 = vadd.f32 %v3769_v5, %v2318_v2 }
 0x25b   : > { %v3221_v20 = vsel %vm3206_vm7, %v3181_v22, %v3220_v61  ;;  %v2943_v14 = vmax.f32 %v2941_v63, %v2942_v0  ;;  %v2953_v53 = vmax.f32 %v2951_v19, %v2952_v32  ;;  %v2343_v60 = vpop.f32.mrf.mxu1  ;;  %v2630_v24 = vpop.f32.mrf.mxu0  ;;  %v2326_v11 = vadd.f32 %v5122_v23, %v4950_v29 }
 0x25c   : > { %v3234_v43 = vpack.c.b16 %v3221_v20, %v3221_v20  ;;  %v2936_v57 = vmax.f32 %v2934_v54, %v2935_v56  ;;  %v2946_v46 = vmax.f32 %v2944_v3, %v2945_v39  ;;  %v2631_v21 = vadd.f32 %v2630_v24, %v2310_v15  ;;  %v5259_v60 = vld [vmem:[#allocation12_spill] sm:$0xff] }
 0x25d   : > { %v3651_v26 = vpack.c.bf16 %v2943_v14, %v2943_v14  ;;  %v2954_v51 = vrot.slane %v2953_v53, 2  ;;  %v2346_v7 = vpop.f32.mrf.mxu1  ;;  %v3772_v12 = vpop.f32.mrf.mxu0  ;;  %v2748_v9 = vmax.f32 %v2636_v35, 0.0  ;;  %v2749_v10 = vmax.f32 %v2639_v52, 0.0  ;;  %v5258_v14 = vld [vmem:[#allocation2_spill] sm:$0xff] }
 0x25e   : > { %3244 = vst [vmem:[%s4996_s5 + $0x8] sm:$0xf] %v3234_v43  ;;  %v3650_v38 = vpack.c.bf16 %v2936_v57, %v2936_v57  ;;  %v2947_v50 = vrot.slane %v2946_v46, 2  ;;  %v2331_v36 = vadd.f32 %v5128_v41, %v4959_v18  ;;  %v2746_v28 = vmax.f32 %v2628_v1, 0.0 }
 0x25f   : > { %v2955_v45 = vmax.f32 %v2953_v53, %v2954_v51  ;;  %v2747_v48 = vmax.f32 %v2631_v21, 0.0  ;;  %v2348_v27 = vpop.f32.mrf.mxu1  ;;  %v2643_v34 = vpop.f32.mrf.mxu0  ;;  %v3183_v58 = vunpack.c.l.b16 %v3651_v26  ;;  %v2965_v31 = vmax.f32 %v2748_v9, %v2749_v10 }
 0x260   : > { %v3182_v29 = vunpack.c.l.b16 %v3650_v38  ;;  %v2948_v23 = vmax.f32 %v2946_v46, %v2947_v50  ;;  %v2334_v62 = vadd.f32 %v5136_v59, %v4964_v13  ;;  %v2652_v16 = vadd.f32 %v3772_v12, %v2331_v36 }
 0x261   : > { %v2956_v8 = vrot.slane %v2955_v45, 1  ;;  %v2958_v42 = vmax.f32 %v2746_v28, %v2747_v48  ;;  %v2349_v44 = vpop.f32.mrf.mxu1  ;;  %v3773_v47 = vpop.f32.mrf.mxu0  ;;  %v2966_v41 = vrot.slane %v2965_v31, 4  ;;  %v2644_v15 = vadd.f32 %v2643_v34, %v2323_v49 }
 0x262   : > { %v3222_v25 = vsel %vm3194_vm1, %v3183_v58, %v3182_v29  ;;  %v2949_v18 = vrot.slane %v2948_v23, 1  ;;  %v5164_v63 = vadd.f32 %v4981_v30, %v5257_v4  ;;  %v2655_v33 = vadd.f32 %v3773_v47, %v2334_v62 }
 0x263   : > { %v2957_v19 = vmax.f32 %v2955_v45, %v2956_v8  ;;  %v2959_v40 = vrot.slane %v2958_v42, 4  ;;  %v2351_v2 = vpop.f32.mrf.mxu1  ;;  %v2646_v17 = vpop.f32.mrf.mxu0  ;;  %v2339_v59 = vadd.f32 %v5140_v55, %v5004_v37  ;;  %v2967_v54 = vmax.f32 %v2965_v31, %v2966_v41 }
 0x264   : > { %v2950_v13 = vmax.f32 %v2948_v23, %v2949_v18  ;;  %v2647_v3 = vadd.f32 %v2646_v17, %v2326_v11  ;;  %v2752_v32 = vmax.f32 %v2652_v16, 0.0  ;;  %v2753_v5 = vmax.f32 %v2655_v33, 0.0 }
 0x265   : > { %v3653_v22 = vpack.c.bf16 %v2957_v19, %v2957_v19  ;;  %v2960_v0 = vmax.f32 %v2958_v42, %v2959_v40  ;;  %v2354_v49 = vpop.f32.mrf.mxu1  ;;  %v3776_v61 = vpop.f32.mrf.mxu0  ;;  %v2968_v39 = vrot.slane %v2967_v54, 2  ;;  %v2750_v35 = vmax.f32 %v2644_v15, 0.0  ;;  %v5262_v40 = vld [vmem:[#allocation10_spill] sm:$0xff] }
 0x266   : > { %v3652_v56 = vpack.c.bf16 %v2950_v13, %v2950_v13  ;;  %v2751_v20 = vmax.f32 %v2647_v3, 0.0  ;;  %v2342_v53 = vadd.f32 %v5150_v6, %v5258_v14  ;;  %v2347_v24 = vadd.f32 %v2346_v7, %v5259_v60  ;;  %v5260_v6 = vld [vmem:[#allocation11_spill] sm:$0xff]  ;;  %v5261_v7 = vld [vmem:[#allocation9_spill] sm:$0xff] }
 0x267   : > { %v2961_v1 = vrot.slane %v2960_v0, 2  ;;  %v2979_v43 = vmax.f32 %v2752_v32, %v2753_v5  ;;  %v2356_v37 = vpop.f32.mrf.mxu1  ;;  %v2659_v55 = vpop.f32.mrf.mxu0  ;;  %v3185_v57 = vunpack.c.l.b16 %v3653_v22  ;;  %v2969_v52 = vmax.f32 %v2967_v54, %v2968_v39  ;;  %v5263_v22 = vld [vmem:[#allocation3_spill] sm:$0xff] }
 0x268   : > { %v3184_v46 = vunpack.c.l.b16 %v3652_v56  ;;  %v2972_v11 = vmax.f32 %v2750_v35, %v2751_v20  ;;  %v2668_v21 = vadd.f32 %v3776_v61, %v2347_v24  ;;  %v2660_v12 = vadd.f32 %v2659_v55, %v2339_v59 }
 0x269   : > { %v2962_v26 = vmax.f32 %v2960_v0, %v2961_v1  ;;  %v2980_v51 = vrot.slane %v2979_v43, 4  ;;  %v2357_v38 = vpop.f32.mrf.mxu1  ;;  %v3777_v50 = vpop.f32.mrf.mxu0  ;;  %v2970_v10 = vrot.slane %v2969_v52, 1  ;;  %v2350_v36 = vadd.f32 %v2349_v44, %v5260_v6 }
 0x26a   : > { %v3223_v9 = vsel %vm3196_vm2, %v3184_v46, %v3222_v25  ;;  %v2973_v45 = vrot.slane %v2972_v11, 4  ;;  %v2042_v28 = vadd.f32 %v4981_v30, %v5261_v7  ;;  %v2756_v47 = vmax.f32 %v2668_v21, 0.0 }
 0x26b   : > { %v2963_v48 = vrot.slane %v2962_v26, 1  ;;  %v3224_v27 = vsel %vm3198_vm3, %v3185_v57, %v3223_v9  ;;  %v2981_v34 = vmax.f32 %v2979_v43, %v2980_v51  ;;  %v2359_v58 = vpop.f32.mrf.mxu1  ;;  %v2662_v29 = vpop.f32.mrf.mxu0  ;;  %v2971_v23 = vmax.f32 %v2969_v52, %v2970_v10 }
 0x26c   : > { %v2974_v31 = vmax.f32 %v2972_v11, %v2973_v45  ;;  %v2671_v62 = vadd.f32 %v3777_v50, %v2350_v36  ;;  %v2663_v8 = vadd.f32 %v2662_v29, %v2342_v53  ;;  %v2754_v25 = vmax.f32 %v2660_v12, 0.0 }
 0x26d   : > { %v2964_v42 = vmax.f32 %v2962_v26, %v2963_v48  ;;  %v2982_v16 = vrot.slane %v2981_v34, 2  ;;  %v2362_v18 = vpop.f32.mrf.mxu1  ;;  %v3780_v44 = vpop.f32.mrf.mxu0  ;;  %v3655_v41 = vpack.c.bf16 %v2971_v23, %v2971_v23  ;;  %v2045_v33 = vadd.f32 %v4981_v30, %v5262_v40 }
 0x26e   : > { %v2975_v15 = vrot.slane %v2974_v31, 2  ;;  %v2757_v4 = vmax.f32 %v2671_v62, 0.0  ;;  %v2755_v19 = vmax.f32 %v2663_v8, 0.0  ;;  %v2363_v13 = vadd.f32 %v2362_v18, %v2042_v28 }
 0x26f   : > { %v3654_v2 = vpack.c.bf16 %v2964_v42, %v2964_v42  ;;  %v2983_v17 = vmax.f32 %v2981_v34, %v2982_v16  ;;  %v2364_v59 = vpop.f32.mrf.mxu1  ;;  %v2675_v54 = vpop.f32.mrf.mxu0  ;;  %v2355_v0 = vadd.f32 %v2354_v49, %v5263_v22  ;;  %v3187_v61 = vunpack.c.l.b16 %v3655_v41 }
 0x270   : > { %v2976_v3 = vmax.f32 %v2974_v31, %v2975_v15  ;;  %v2993_v32 = vmax.f32 %v2756_v47, %v2757_v4  ;;  %v2986_v5 = vmax.f32 %v2754_v25, %v2755_v19  ;;  %v2358_v35 = vadd.f32 %v2357_v38, %v5164_v63 }
 0x271   : > { %v3186_v56 = vunpack.c.l.b16 %v3654_v2  ;;  %v2984_v39 = vrot.slane %v2983_v17, 1  ;;  %v2365_v20 = vpop.f32.mrf.mxu1  ;;  %v3781_v14 = vpop.f32.mrf.mxu0  ;;  %v2684_v37 = vadd.f32 %v3780_v44, %v2363_v13  ;;  %v2676_v55 = vadd.f32 %v2675_v54, %v2355_v0 }
 0x272   : > { %v2977_v53 = vrot.slane %v2976_v3, 1  ;;  %v2994_v1 = vrot.slane %v2993_v32, 4  ;;  %v2987_v30 = vrot.slane %v2986_v5, 4  ;;  %v2366_v60 = vadd.f32 %v2365_v20, %v2045_v33 }
 0x273   : > { %v3225_v24 = vsel %vm3200_vm4, %v3186_v56, %v3224_v27  ;;  %v2985_v43 = vmax.f32 %v2983_v17, %v2984_v39  ;;  %v2367_v57 = vpop.f32.mrf.mxu1  ;;  %v2678_v49 = vpop.f32.mrf.mxu0  ;;  %v2760_v9 = vmax.f32 %v2684_v37, 0.0  ;;  %v2758_v10 = vmax.f32 %v2676_v55, 0.0 }
 0x274   : > { %v2978_v46 = vmax.f32 %v2976_v3, %v2977_v53  ;;  %v3226_v52 = vsel %vm3202_vm5, %v3187_v61, %v3225_v24  ;;  %v2995_v11 = vmax.f32 %v2993_v32, %v2994_v1  ;;  %v2988_v26 = vmax.f32 %v2986_v5, %v2987_v30 }
 0x275   : > { %v3657_v51 = vpack.c.bf16 %v2985_v43, %v2985_v43  ;;  %v2687_v63 = vadd.f32 %v3781_v14, %v2366_v60  ;;  %v2679_v21 = vadd.f32 %v2678_v49, %v2358_v35 }
 0x276   : > { %v3656_v12 = vpack.c.bf16 %v2978_v46, %v2978_v46  ;;  %v2996_v38 = vrot.slane %v2995_v11, 2  ;;  %v2989_v50 = vrot.slane %v2988_v26, 2 }
 0x277   : > { %v2761_v6 = vmax.f32 %v2687_v63, 0.0  ;;  %v2759_v36 = vmax.f32 %v2679_v21, 0.0  ;;  %v3189_v48 = vunpack.c.l.b16 %v3657_v51 }
 0x278   : > { %v3188_v45 = vunpack.c.l.b16 %v3656_v12  ;;  %v2997_v7 = vmax.f32 %v2995_v11, %v2996_v38  ;;  %v2990_v28 = vmax.f32 %v2988_v26, %v2989_v50 }
 0x279   : > { %v3007_v27 = vmax.f32 %v2760_v9, %v2761_v6  ;;  %v3000_v34 = vmax.f32 %v2758_v10, %v2759_v36 }
 0x27a   : > { %v3227_v58 = vsel %vm3204_vm6, %v3188_v45, %v3226_v52  ;;  %v2998_v29 = vrot.slane %v2997_v7, 1  ;;  %v2991_v23 = vrot.slane %v2990_v28, 1 }
 0x27b   : > { %v3228_v31 = vsel %vm3206_vm7, %v3189_v48, %v3227_v58  ;;  %v3008_v62 = vrot.slane %v3007_v27, 4  ;;  %v3001_v8 = vrot.slane %v3000_v34, 4 }
 0x27c   : > { %v3235_v42 = vpack.c.b16 %v3228_v31, %v3228_v31  ;;  %v2999_v16 = vmax.f32 %v2997_v7, %v2998_v29  ;;  %v2992_v47 = vmax.f32 %v2990_v28, %v2991_v23 }
 0x27d   : > { %v3009_v25 = vmax.f32 %v3007_v27, %v3008_v62  ;;  %v3002_v18 = vmax.f32 %v3000_v34, %v3001_v8 }
 0x27e   : > { %3245 = vst [vmem:[%s4996_s5 + $0xc] sm:$0xf] %v3235_v42  ;;  %v3659_v44 = vpack.c.bf16 %v2999_v16, %v2999_v16  ;;  %v3658_v41 = vpack.c.bf16 %v2992_v47, %v2992_v47 }
 0x27f   : > { %v3010_v15 = vrot.slane %v3009_v25, 2  ;;  %v3003_v4 = vrot.slane %v3002_v18, 2 }
 0x280   : > { %v3191_v19 = vunpack.c.l.b16 %v3659_v44  ;;  %v3190_v40 = vunpack.c.l.b16 %v3658_v41 }
 0x281   : > { %v3011_v33 = vmax.f32 %v3009_v25, %v3010_v15  ;;  %v3004_v2 = vmax.f32 %v3002_v18, %v3003_v4 }
 0x282   : > { %v3229_v17 = vsel %vm3194_vm1, %v3191_v19, %v3190_v40 }
 0x283   : > { %v3012_v13 = vrot.slane %v3011_v33, 1  ;;  %v3005_v59 = vrot.slane %v3004_v2, 1 }
 0x285   : > { %v3013_v54 = vmax.f32 %v3011_v33, %v3012_v13  ;;  %v3006_v3 = vmax.f32 %v3004_v2, %v3005_v59 }
 0x287   : > { %v3661_v22 = vpack.c.bf16 %v3013_v54, %v3013_v54  ;;  %v3660_v0 = vpack.c.bf16 %v3006_v3, %v3006_v3 }
 0x289   : > { %v3193_v32 = vunpack.c.l.b16 %v3661_v22  ;;  %v3192_v5 = vunpack.c.l.b16 %v3660_v0 }
 0x28b   : > { %v3230_v61 = vsel %vm3196_vm2, %v3192_v5, %v3229_v17 }
 0x28c   : > { %v3231_v56 = vsel %vm3198_vm3, %v3193_v32, %v3230_v61 }
 0x28d   : > { %v3236_v39 = vpack.c.b16 %v3231_v56, %v3231_v56 }
 0x28f   : > { %3246 = vst [vmem:[%s4996_s5 + $0x10] sm:$0x3] %v3236_v39 }
 0x290 PF: > { %s13_s14 = sadd.s32 1, %s4152_s14   ;;  %s5264_s12 = smov %s4148_s13 }
 0x291   : > { %p10_p6 = scmp.ge.s32.totalorder %s13_s14, 4   ;;  %s5265_s13 = smov %s5267_s15 }
 0x293   :  { %12 = sbr.rel (!%p10_p6) target bundleno = 2 (0x2), region = 62 }

// kernel: conv_model_forward.5
= control target key start
LH: loop header
LB: loop body
LE: loop exit
PB: predicated region body
PF: predicated region fallthrough
CT: control target
= control target key end

     0   :  { %s2955_s18 = smov 0   ;;  %s3556_s0 = inlined_call_operand.vmem [shape: bf16[8,4608], index: 0, kind: input, shape index: {}]   ;;  %s3557_s1 = inlined_call_operand.vmem [shape: bf16[4608,512], index: 1, kind: input, shape index: {}]   ;;  %s3558_s2 = inlined_call_operand.vmem [shape: f32[1,512], index: 2, kind: input, shape index: {}]   ;;  %s3559_s3 = inlined_call_operand.vmem [shape: bf16[512,512], index: 3, kind: input, shape index: {}]   ;;  %s3560_s4 = inlined_call_operand.vmem [shape: f32[1,512], index: 4, kind: input, shape index: {}]   ;;  %s3561_s5 = inlined_call_operand.vmem [shape: f32[8,512], index: 5, kind: output, shape index: {}]  }
   0x1 LB: > { %s2961_s19 = sadd.s32 4294967295, %s2922_s18   ;;  %p2248_p0 = scmp.ge.s32.totalorder %s2922_s18, 1  ;;  %s2922_s18 = sphi %s2955_s18, %s15_s18  }
   0x2   : > { %p195_p1 = scmp.lt.s32.totalorder %s2922_s18, 10 }
   0x4   : > { %p196_p2 = pnand %p2248_p0, %p195_p1 }
   0x5   : > { %s2249_s20 = sshll.u32 (!%p196_p2), %s2961_s19, 2  ;;  %s2251_s21 = sshll.u32 (!%p196_p2), %s2961_s19, 6 }
   0x6   : > { %199 = sbr.rel (%p196_p2) target bundleno = 681 (0x2a9), region = 40  ;;  %p225_p3 = scmp.lt.s32.totalorder (!%p196_p2), %s2249_s20, 35 }
   0x7   : > { %p231_p4 = scmp.lt.s32.totalorder (!%p196_p2), %s2251_s21, 575  ;;  %p2254_p5 = scmp.ne.s32.totalorder (!%p196_p2), %s2961_s19, 0 }
   0xb   : > { %s3563_s20 = smov (!%p225_p3, %s2249_s20), 35  ;;  %s3565_s21 = smov (!%p231_p4, %s2251_s21), 575 }
   0xc   : > { %s2250_s22 = sshll.u32 %s3563_s20, 2  ;;  %s2518_s26 = sshll.u32 %s3565_s21, 4 }
   0xd   : > { %s2970_s25 = scalar_lea.vmem %s3556_s0, %s2250_s22  ;;  %s2975_s29 = scalar_lea.vmem %s3557_s1, %s2518_s26 }
   0xe   : > { %240 = sbr.rel (%p2254_p5) target bundleno = 22 (0x16), region = 44 }
  0x13   : > { %v2924_v0 = vmov 0.0  }
  0x14   : > { %241 = vst [vmem:[#allocation2 + $0x10] sm:$0xff] %v2924_v0  ;;  %242 = vst [vmem:[#allocation2] sm:$0xff] %v2924_v0 }
  0x15   : > { %243 = vst [vmem:[#allocation2 + $0x18] sm:$0xff] %v2924_v0  ;;  %244 = vst [vmem:[#allocation2 + $0x8] sm:$0xff] %v2924_v0 }
  0x16 PF: > { %v2528_v1 = vld [vmem:[%s2975_s29 + $0xe4] ss:$16 sps:$4 sm:$0xff]   ;;  %v2532_v3 = vld [vmem:[%s2975_s29 + $0xe0] ss:$16 sps:$4 sm:$0xff]   ;;  %v250_v49 = vld [vmem:[%s2970_s25 + $0x8] sm:$0xff]  ;;  %p2387_p6 = scmp.ne.s32.totalorder %s2961_s19, 8 }
  0x17   : > { %v2530_v2 = vld [vmem:[%s2975_s29 + $0x2e4] ss:$16 sps:$4 sm:$0xff]   ;;  %1033 = vmatprep.subr.bf16.mxu0 %v2528_v1  ;;  %v2533_v4 = vld [vmem:[%s2975_s29 + $0x2e0] ss:$16 sps:$4 sm:$0xff]   ;;  %v2258_v52 = vcombine.high %v250_v49, %v250_v49 }
  0x18   : > { %1074 = vmatprep.subr.bf16.mxu1 %v2530_v2  ;;  %v2534_v5 = vld [vmem:[%s2975_s29 + $0xc4] ss:$16 sps:$4 sm:$0xff]   ;;  %1034 = vmatpush1.bf16.msra.mxu0 %v2532_v3  ;;  %v2538_v7 = vld [vmem:[%s2975_s29 + $0xc0] ss:$16 sps:$4 sm:$0xff]  }
  0x19   : > { %1075 = vmatpush1.bf16.msra.mxu1 %v2533_v4  ;;  %v2536_v6 = vld [vmem:[%s2975_s29 + $0x2c4] ss:$16 sps:$4 sm:$0xff]   ;;  %1035 = vmatprep.subr.bf16.mxu0 %v2534_v5  ;;  %v2539_v8 = vld [vmem:[%s2975_s29 + $0x2c0] ss:$16 sps:$4 sm:$0xff]   ;;  %v2630_v5 = vld [vmem:[%s2975_s29 + $0xec] ss:$16 sps:$4 sm:$0xff]  }
  0x1a   : > { %1076 = vmatprep.subr.bf16.mxu1 %v2536_v6  ;;  %v2540_v9 = vld [vmem:[%s2975_s29 + $0xa4] ss:$16 sps:$4 sm:$0xff]   ;;  %v2544_v11 = vld [vmem:[%s2975_s29 + $0xa0] ss:$16 sps:$4 sm:$0xff]   ;;  %1106 = vmatprep.mubr.bf16.mxu1 %v2258_v52  ;;  %v2633_v6 = vld [vmem:[%s2975_s29 + $0x2ec] ss:$16 sps:$4 sm:$0xff]  }
  0x1b   : > { %v2542_v10 = vld [vmem:[%s2975_s29 + $0x2a4] ss:$16 sps:$4 sm:$0xff]   ;;  %v2545_v12 = vld [vmem:[%s2975_s29 + $0x2a0] ss:$16 sps:$4 sm:$0xff]  }
  0x1c   : > { %1036 = vmatpush1.bf16.msra.mxu0 %v2538_v7  ;;  %v2546_v13 = vld [vmem:[%s2975_s29 + $0x84] ss:$16 sps:$4 sm:$0xff]   ;;  %v2550_v15 = vld [vmem:[%s2975_s29 + $0x80] ss:$16 sps:$4 sm:$0xff]  }
  0x1d   : > { %1077 = vmatpush1.bf16.msra.mxu1 %v2539_v8  ;;  %1037 = vmatprep.subr.bf16.mxu0 %v2540_v9  ;;  %v2548_v14 = vld [vmem:[%s2975_s29 + $0x284] ss:$16 sps:$4 sm:$0xff]   ;;  %v2551_v16 = vld [vmem:[%s2975_s29 + $0x280] ss:$16 sps:$4 sm:$0xff]   ;;  %v3051_v8 = vcombine.low %v250_v49, %v250_v49  ;;  %v2628_v9 = vld [vmem:[%s2975_s29 + $0xe8] ss:$16 sps:$4 sm:$0xff]  }
  0x1e   : > { %1078 = vmatprep.subr.bf16.mxu1 %v2542_v10  ;;  %v2552_v17 = vld [vmem:[%s2975_s29 + $0x64] ss:$16 sps:$4 sm:$0xff]   ;;  %v2556_v19 = vld [vmem:[%s2975_s29 + $0x60] ss:$16 sps:$4 sm:$0xff]   ;;  %v2631_v10 = vld [vmem:[%s2975_s29 + $0x2e8] ss:$16 sps:$4 sm:$0xff]  }
  0x1f   : > { %v2554_v18 = vld [vmem:[%s2975_s29 + $0x264] ss:$16 sps:$4 sm:$0xff]   ;;  %v2557_v20 = vld [vmem:[%s2975_s29 + $0x260] ss:$16 sps:$4 sm:$0xff]   ;;  %v2688_v49 = vld [vmem:[%s2975_s29 + $0x1a8] ss:$16 sps:$4 sm:$0xff]  }
  0x20   : > { %1038 = vmatpush1.bf16.msra.mxu0 %v2544_v11  ;;  %v2558_v21 = vld [vmem:[%s2975_s29 + $0x44] ss:$16 sps:$4 sm:$0xff]   ;;  %v2562_v23 = vld [vmem:[%s2975_s29 + $0x40] ss:$16 sps:$4 sm:$0xff]   ;;  %v2636_v11 = vld [vmem:[%s2975_s29 + $0xcc] ss:$16 sps:$4 sm:$0xff]  }
  0x21   : > { %1079 = vmatpush1.bf16.msra.mxu1 %v2545_v12  ;;  %1039 = vmatprep.subr.bf16.mxu0 %v2546_v13  ;;  %v2560_v22 = vld [vmem:[%s2975_s29 + $0x244] ss:$16 sps:$4 sm:$0xff]   ;;  %v2563_v24 = vld [vmem:[%s2975_s29 + $0x240] ss:$16 sps:$4 sm:$0xff]   ;;  %v2639_v12 = vld [vmem:[%s2975_s29 + $0x2cc] ss:$16 sps:$4 sm:$0xff]  }
  0x22   : > { %1080 = vmatprep.subr.bf16.mxu1 %v2548_v14  ;;  %v2564_v25 = vld [vmem:[%s2975_s29 + $0x24] ss:$16 sps:$4 sm:$0xff]   ;;  %v2568_v27 = vld [vmem:[%s2975_s29 + $0x20] ss:$16 sps:$4 sm:$0xff]   ;;  %v2634_v13 = vld [vmem:[%s2975_s29 + $0xc8] ss:$16 sps:$4 sm:$0xff]  }
  0x23   : > { %v2566_v26 = vld [vmem:[%s2975_s29 + $0x224] ss:$16 sps:$4 sm:$0xff]   ;;  %v2569_v28 = vld [vmem:[%s2975_s29 + $0x220] ss:$16 sps:$4 sm:$0xff]   ;;  %v2637_v14 = vld [vmem:[%s2975_s29 + $0x2c8] ss:$16 sps:$4 sm:$0xff]  }
  0x24   : > { %1040 = vmatpush1.bf16.msra.mxu0 %v2550_v15  ;;  %v2570_v29 = vld [vmem:[%s2975_s29 + $0x4] ss:$16 sps:$4 sm:$0xff]   ;;  %v2574_v31 = vld [vmem:[%s2975_s29] ss:$16 sps:$4 sm:$0xff]   ;;  %v2642_v15 = vld [vmem:[%s2975_s29 + $0xac] ss:$16 sps:$4 sm:$0xff]  }
  0x25   : > { %1081 = vmatpush1.bf16.msra.mxu1 %v2551_v16  ;;  %1041 = vmatprep.subr.bf16.mxu0 %v2552_v17  ;;  %v2572_v30 = vld [vmem:[%s2975_s29 + $0x204] ss:$16 sps:$4 sm:$0xff]   ;;  %v2575_v32 = vld [vmem:[%s2975_s29 + $0x200] ss:$16 sps:$4 sm:$0xff]   ;;  %v2645_v16 = vld [vmem:[%s2975_s29 + $0x2ac] ss:$16 sps:$4 sm:$0xff]  }
  0x26   : > { %1082 = vmatprep.subr.bf16.mxu1 %v2554_v18  ;;  %v2576_v33 = vld [vmem:[%s2975_s29 + $0x1e4] ss:$16 sps:$4 sm:$0xff]   ;;  %v2580_v35 = vld [vmem:[%s2975_s29 + $0x1e0] ss:$16 sps:$4 sm:$0xff]   ;;  %v2640_v17 = vld [vmem:[%s2975_s29 + $0xa8] ss:$16 sps:$4 sm:$0xff]  }
  0x27   : > { %v2578_v34 = vld [vmem:[%s2975_s29 + $0x3e4] ss:$16 sps:$4 sm:$0xff]   ;;  %v2581_v36 = vld [vmem:[%s2975_s29 + $0x3e0] ss:$16 sps:$4 sm:$0xff]   ;;  %v2643_v18 = vld [vmem:[%s2975_s29 + $0x2a8] ss:$16 sps:$4 sm:$0xff]  }
  0x28   : > { %1042 = vmatpush1.bf16.msra.mxu0 %v2556_v19  ;;  %v2582_v37 = vld [vmem:[%s2975_s29 + $0x1c4] ss:$16 sps:$4 sm:$0xff]   ;;  %v2586_v39 = vld [vmem:[%s2975_s29 + $0x1c0] ss:$16 sps:$4 sm:$0xff]   ;;  %v2648_v19 = vld [vmem:[%s2975_s29 + $0x8c] ss:$16 sps:$4 sm:$0xff]  }
  0x29   : > { %1083 = vmatpush1.bf16.msra.mxu1 %v2557_v20  ;;  %1043 = vmatprep.subr.bf16.mxu0 %v2558_v21  ;;  %v2584_v38 = vld [vmem:[%s2975_s29 + $0x3c4] ss:$16 sps:$4 sm:$0xff]   ;;  %v2587_v40 = vld [vmem:[%s2975_s29 + $0x3c0] ss:$16 sps:$4 sm:$0xff]   ;;  %v2651_v20 = vld [vmem:[%s2975_s29 + $0x28c] ss:$16 sps:$4 sm:$0xff]  }
  0x2a   : > { %1084 = vmatprep.subr.bf16.mxu1 %v2560_v22  ;;  %v2588_v41 = vld [vmem:[%s2975_s29 + $0x1a4] ss:$16 sps:$4 sm:$0xff]   ;;  %v2592_v43 = vld [vmem:[%s2975_s29 + $0x1a0] ss:$16 sps:$4 sm:$0xff]   ;;  %v2646_v21 = vld [vmem:[%s2975_s29 + $0x88] ss:$16 sps:$4 sm:$0xff]  }
  0x2b   : > { %v2590_v42 = vld [vmem:[%s2975_s29 + $0x3a4] ss:$16 sps:$4 sm:$0xff]   ;;  %v2593_v44 = vld [vmem:[%s2975_s29 + $0x3a0] ss:$16 sps:$4 sm:$0xff]   ;;  %v2649_v22 = vld [vmem:[%s2975_s29 + $0x288] ss:$16 sps:$4 sm:$0xff]  }
  0x2c   : > { %1044 = vmatpush1.bf16.msra.mxu0 %v2562_v23  ;;  %v2594_v45 = vld [vmem:[%s2975_s29 + $0x184] ss:$16 sps:$4 sm:$0xff]   ;;  %v2598_v50 = vld [vmem:[%s2975_s29 + $0x180] ss:$16 sps:$4 sm:$0xff]   ;;  %v2654_v23 = vld [vmem:[%s2975_s29 + $0x6c] ss:$16 sps:$4 sm:$0xff]  }
  0x2d   : > { %1085 = vmatpush1.bf16.msra.mxu1 %v2563_v24  ;;  %1045 = vmatprep.subr.bf16.mxu0 %v2564_v25  ;;  %v2596_v46 = vld [vmem:[%s2975_s29 + $0x384] ss:$16 sps:$4 sm:$0xff]   ;;  %v2599_v51 = vld [vmem:[%s2975_s29 + $0x380] ss:$16 sps:$4 sm:$0xff]   ;;  %v2657_v24 = vld [vmem:[%s2975_s29 + $0x26c] ss:$16 sps:$4 sm:$0xff]  }
  0x2e   : > { %1086 = vmatprep.subr.bf16.mxu1 %v2566_v26  ;;  %v249_v47 = vld [vmem:[%s2970_s25] sm:$0xff]  ;;  %v2652_v25 = vld [vmem:[%s2975_s29 + $0x68] ss:$16 sps:$4 sm:$0xff]  }
  0x2f   : > { %v3025_v48 = vcombine.high %v249_v47, %v249_v47  ;;  %v2600_v53 = vld [vmem:[%s2975_s29 + $0x164] ss:$16 sps:$4 sm:$0xff]   ;;  %v2604_v55 = vld [vmem:[%s2975_s29 + $0x160] ss:$16 sps:$4 sm:$0xff]   ;;  %v3049_v7 = vcombine.low %v249_v47, %v249_v47  ;;  %v2655_v26 = vld [vmem:[%s2975_s29 + $0x268] ss:$16 sps:$4 sm:$0xff]  }
  0x30   : > { %1046 = vmatpush1.bf16.msra.mxu0 %v2568_v27  ;;  %v2602_v54 = vld [vmem:[%s2975_s29 + $0x364] ss:$16 sps:$4 sm:$0xff]   ;;  %v2605_v56 = vld [vmem:[%s2975_s29 + $0x360] ss:$16 sps:$4 sm:$0xff]   ;;  %v2660_v27 = vld [vmem:[%s2975_s29 + $0x4c] ss:$16 sps:$4 sm:$0xff]  }
  0x31   : > { %1087 = vmatpush1.bf16.msra.mxu1 %v2569_v28  ;;  %1047 = vmatprep.subr.bf16.mxu0 %v2570_v29  ;;  %v2606_v57 = vld [vmem:[%s2975_s29 + $0x144] ss:$16 sps:$4 sm:$0xff]   ;;  %v2610_v59 = vld [vmem:[%s2975_s29 + $0x140] ss:$16 sps:$4 sm:$0xff]   ;;  %v2663_v28 = vld [vmem:[%s2975_s29 + $0x24c] ss:$16 sps:$4 sm:$0xff]  }
  0x32   : > { %1088 = vmatprep.subr.bf16.mxu1 %v2572_v30  ;;  %1065 = vmatprep.mubr.bf16.mxu0 %v3025_v48  ;;  %v2608_v58 = vld [vmem:[%s2975_s29 + $0x344] ss:$16 sps:$4 sm:$0xff]   ;;  %v2611_v60 = vld [vmem:[%s2975_s29 + $0x340] ss:$16 sps:$4 sm:$0xff]   ;;  %v2658_v29 = vld [vmem:[%s2975_s29 + $0x48] ss:$16 sps:$4 sm:$0xff]  }
  0x33   : > { %v2612_v61 = vld [vmem:[%s2975_s29 + $0x124] ss:$16 sps:$4 sm:$0xff]   ;;  %v2616_v63 = vld [vmem:[%s2975_s29 + $0x120] ss:$16 sps:$4 sm:$0xff]   ;;  %v2661_v30 = vld [vmem:[%s2975_s29 + $0x248] ss:$16 sps:$4 sm:$0xff]  }
  0x34   : > { %1048 = vmatpush1.bf16.msra.mxu0 %v2574_v31  ;;  %v2614_v62 = vld [vmem:[%s2975_s29 + $0x324] ss:$16 sps:$4 sm:$0xff]   ;;  %v2617_v0 = vld [vmem:[%s2975_s29 + $0x320] ss:$16 sps:$4 sm:$0xff]   ;;  %v2666_v31 = vld [vmem:[%s2975_s29 + $0x2c] ss:$16 sps:$4 sm:$0xff]  }
  0x35   : > { %1089 = vmatpush1.bf16.msra.mxu1 %v2575_v32  ;;  %1049 = vmatprep.subr.bf16.mxu0 %v2576_v33  ;;  %v2618_v1 = vld [vmem:[%s2975_s29 + $0x104] ss:$16 sps:$4 sm:$0xff]   ;;  %v2622_v3 = vld [vmem:[%s2975_s29 + $0x100] ss:$16 sps:$4 sm:$0xff]   ;;  %v2669_v32 = vld [vmem:[%s2975_s29 + $0x22c] ss:$16 sps:$4 sm:$0xff]  }
  0x36   : > { %1090 = vmatprep.subr.bf16.mxu1 %v2578_v34  ;;  %v2620_v2 = vld [vmem:[%s2975_s29 + $0x304] ss:$16 sps:$4 sm:$0xff]   ;;  %v2623_v4 = vld [vmem:[%s2975_s29 + $0x300] ss:$16 sps:$4 sm:$0xff]   ;;  %v2664_v33 = vld [vmem:[%s2975_s29 + $0x28] ss:$16 sps:$4 sm:$0xff]  }
  0x37   : > { %v2667_v34 = vld [vmem:[%s2975_s29 + $0x228] ss:$16 sps:$4 sm:$0xff]   ;;  %v2690_v47 = vld [vmem:[%s2975_s29 + $0x1ac] ss:$16 sps:$4 sm:$0xff]  }
  0x38   : > { %1050 = vmatpush2.bf16.msra.mxu0 %v2580_v35  ;;  %v2672_v35 = vld [vmem:[%s2975_s29 + $0xc] ss:$16 sps:$4 sm:$0xff]  }
  0x39   : > { %1091 = vmatpush2.bf16.msra.mxu1 %v2581_v36  ;;  %1051 = vmatprep.subr.bf16.mxu0 %v2582_v37  ;;  %v2675_v36 = vld [vmem:[%s2975_s29 + $0x20c] ss:$16 sps:$4 sm:$0xff]   ;;  %v2670_v37 = vld [vmem:[%s2975_s29 + $0x8] ss:$16 sps:$4 sm:$0xff]  }
  0x3a   : > { %1092 = vmatprep.subr.bf16.mxu1 %v2584_v38  ;;  %v2673_v38 = vld [vmem:[%s2975_s29 + $0x208] ss:$16 sps:$4 sm:$0xff]  }
  0x3c   : > { %1052 = vmatpush2.bf16.msra.mxu0 %v2586_v39  ;;  %v2678_v39 = vld [vmem:[%s2975_s29 + $0x1ec] ss:$16 sps:$4 sm:$0xff]  }
  0x3d   : > { %1093 = vmatpush2.bf16.msra.mxu1 %v2587_v40  ;;  %1053 = vmatprep.subr.bf16.mxu0 %v2588_v41  ;;  %v2681_v40 = vld [vmem:[%s2975_s29 + $0x3ec] ss:$16 sps:$4 sm:$0xff]   ;;  %v2676_v41 = vld [vmem:[%s2975_s29 + $0x1e8] ss:$16 sps:$4 sm:$0xff]  }
  0x3e   : > { %1094 = vmatprep.subr.bf16.mxu1 %v2590_v42  ;;  %v2679_v42 = vld [vmem:[%s2975_s29 + $0x3e8] ss:$16 sps:$4 sm:$0xff]  }
  0x40   : > { %1054 = vmatpush2.bf16.msra.mxu0 %v2592_v43  ;;  %v2684_v43 = vld [vmem:[%s2975_s29 + $0x1cc] ss:$16 sps:$4 sm:$0xff]  }
  0x41   : > { %1095 = vmatpush2.bf16.msra.mxu1 %v2593_v44  ;;  %1055 = vmatprep.subr.bf16.mxu0 %v2594_v45  ;;  %v2687_v44 = vld [vmem:[%s2975_s29 + $0x3cc] ss:$16 sps:$4 sm:$0xff]   ;;  %v2682_v45 = vld [vmem:[%s2975_s29 + $0x1c8] ss:$16 sps:$4 sm:$0xff]  }
  0x42   : > { %1096 = vmatprep.subr.bf16.mxu1 %v2596_v46  ;;  %v2685_v46 = vld [vmem:[%s2975_s29 + $0x3c8] ss:$16 sps:$4 sm:$0xff]  }
  0x44   : > { %1056 = vmatpush2.bf16.msra.mxu0 %v2598_v50  ;;  %v2691_v50 = vld [vmem:[%s2975_s29 + $0x3a8] ss:$16 sps:$4 sm:$0xff]  }
  0x45   : > { %1097 = vmatpush2.bf16.msra.mxu1 %v2599_v51  ;;  %1057 = vmatprep.subr.bf16.mxu0 %v2600_v53  ;;  %v2696_v51 = vld [vmem:[%s2975_s29 + $0x18c] ss:$16 sps:$4 sm:$0xff]   ;;  %v2694_v53 = vld [vmem:[%s2975_s29 + $0x188] ss:$16 sps:$4 sm:$0xff]  }
  0x46   : > { %1098 = vmatprep.subr.bf16.mxu1 %v2602_v54  ;;  %v2697_v54 = vld [vmem:[%s2975_s29 + $0x388] ss:$16 sps:$4 sm:$0xff]  }
  0x48   : > { %1058 = vmatpush2.bf16.msra.mxu0 %v2604_v55  ;;  %v2702_v55 = vld [vmem:[%s2975_s29 + $0x16c] ss:$16 sps:$4 sm:$0xff]  }
  0x49   : > { %1099 = vmatpush2.bf16.msra.mxu1 %v2605_v56  ;;  %1059 = vmatprep.subr.bf16.mxu0 %v2606_v57  ;;  %v2705_v56 = vld [vmem:[%s2975_s29 + $0x36c] ss:$16 sps:$4 sm:$0xff]   ;;  %v2700_v57 = vld [vmem:[%s2975_s29 + $0x168] ss:$16 sps:$4 sm:$0xff]  }
  0x4a   : > { %1100 = vmatprep.subr.bf16.mxu1 %v2608_v58  ;;  %v2703_v58 = vld [vmem:[%s2975_s29 + $0x368] ss:$16 sps:$4 sm:$0xff]  }
  0x4c   : > { %1060 = vmatpush2.bf16.msra.mxu0 %v2610_v59  ;;  %v2708_v59 = vld [vmem:[%s2975_s29 + $0x14c] ss:$16 sps:$4 sm:$0xff]  }
  0x4d   : > { %1101 = vmatpush2.bf16.msra.mxu1 %v2611_v60  ;;  %1061 = vmatprep.subr.bf16.mxu0 %v2612_v61  ;;  %v2711_v60 = vld [vmem:[%s2975_s29 + $0x34c] ss:$16 sps:$4 sm:$0xff]   ;;  %v2706_v61 = vld [vmem:[%s2975_s29 + $0x148] ss:$16 sps:$4 sm:$0xff]  }
  0x4e   : > { %1102 = vmatprep.subr.bf16.mxu1 %v2614_v62  ;;  %v2709_v62 = vld [vmem:[%s2975_s29 + $0x348] ss:$16 sps:$4 sm:$0xff]  }
  0x50   : > { %1062 = vmatpush2.bf16.msra.mxu0 %v2616_v63  ;;  %v2714_v63 = vld [vmem:[%s2975_s29 + $0x12c] ss:$16 sps:$4 sm:$0xff]  }
  0x51   : > { %1103 = vmatpush2.bf16.msra.mxu1 %v2617_v0  ;;  %1063 = vmatprep.subr.bf16.mxu0 %v2618_v1  ;;  %v2717_v0 = vld [vmem:[%s2975_s29 + $0x32c] ss:$16 sps:$4 sm:$0xff]   ;;  %v2712_v1 = vld [vmem:[%s2975_s29 + $0x128] ss:$16 sps:$4 sm:$0xff]  }
  0x52   : > { %1104 = vmatprep.subr.bf16.mxu1 %v2620_v2  ;;  %v2715_v2 = vld [vmem:[%s2975_s29 + $0x328] ss:$16 sps:$4 sm:$0xff]  }
  0x54   : > { %1064 = vmatpush2.bf16.msra.mxu0 %v2622_v3  ;;  %v2720_v3 = vld [vmem:[%s2975_s29 + $0x10c] ss:$16 sps:$4 sm:$0xff]  }
  0x55   : > { %1105 = vmatpush2.bf16.msra.mxu1 %v2623_v4  ;;  %1115 = vmatprep.subr.bf16.mxu0 %v2630_v5  ;;  %v2723_v4 = vld [vmem:[%s2975_s29 + $0x30c] ss:$16 sps:$4 sm:$0xff]   ;;  %v2718_v5 = vld [vmem:[%s2975_s29 + $0x108] ss:$16 sps:$4 sm:$0xff]  }
  0x56   : > { %1156 = vmatprep.subr.bf16.mxu1 %v2633_v6  ;;  %v2721_v6 = vld [vmem:[%s2975_s29 + $0x308] ss:$16 sps:$4 sm:$0xff]  }
  0x57   : > { %1066 = vmatmul.mubr.bf16.vlgmr.msra.gmra.mxu0 %v3049_v7 }
  0x58   : > { %1107 = vmatmul.mubr.bf16.vlgmr.msra.gmra.mxu1 %v3051_v8  ;;  %1116 = vmatpush1.bf16.msra.mxu0 %v2628_v9 }
  0x59   : > { %1157 = vmatpush1.bf16.msra.mxu1 %v2631_v10  ;;  %1117 = vmatprep.subr.bf16.mxu0 %v2636_v11  ;;  %v245_v10 = vld [vmem:[#allocation2 + $0x10] sm:$0xff] }
  0x5a   : > { %1158 = vmatprep.subr.bf16.mxu1 %v2639_v12  ;;  %1147 = vmatprep.mubr.bf16.mxu0 %v3025_v48  ;;  %v2693_v48 = vld [vmem:[%s2975_s29 + $0x3ac] ss:$16 sps:$4 sm:$0xff]  }
  0x5b   : > { %1188 = vmatprep.mubr.bf16.mxu1 %v2258_v52  ;;  %v2699_v52 = vld [vmem:[%s2975_s29 + $0x38c] ss:$16 sps:$4 sm:$0xff]  }
  0x5c   : > { %1118 = vmatpush1.bf16.msra.mxu0 %v2634_v13 }
  0x5d   : > { %1159 = vmatpush1.bf16.msra.mxu1 %v2637_v14  ;;  %1119 = vmatprep.subr.bf16.mxu0 %v2642_v15  ;;  %v246_v14 = vld [vmem:[#allocation2] sm:$0xff] }
  0x5e   : > { %1160 = vmatprep.subr.bf16.mxu1 %v2645_v16 }
  0x60   : > { %1120 = vmatpush1.bf16.msra.mxu0 %v2640_v17 }
  0x61   : > { %1161 = vmatpush1.bf16.msra.mxu1 %v2643_v18  ;;  %1121 = vmatprep.subr.bf16.mxu0 %v2648_v19 }
  0x62   : > { %1162 = vmatprep.subr.bf16.mxu1 %v2651_v20 }
  0x64   : > { %1122 = vmatpush1.bf16.msra.mxu0 %v2646_v21 }
  0x65   : > { %1163 = vmatpush1.bf16.msra.mxu1 %v2649_v22  ;;  %1123 = vmatprep.subr.bf16.mxu0 %v2654_v23 }
  0x66   : > { %1164 = vmatprep.subr.bf16.mxu1 %v2657_v24 }
  0x68   : > { %1124 = vmatpush1.bf16.msra.mxu0 %v2652_v25 }
  0x69   : > { %1165 = vmatpush1.bf16.msra.mxu1 %v2655_v26  ;;  %1125 = vmatprep.subr.bf16.mxu0 %v2660_v27  ;;  %v248_v26 = vld [vmem:[#allocation2 + $0x8] sm:$0xff] }
  0x6a   : > { %1166 = vmatprep.subr.bf16.mxu1 %v2663_v28 }
  0x6c   : > { %1126 = vmatpush1.bf16.msra.mxu0 %v2658_v29 }
  0x6d   : > { %1167 = vmatpush1.bf16.msra.mxu1 %v2661_v30  ;;  %1127 = vmatprep.subr.bf16.mxu0 %v2666_v31 }
  0x6e   : > { %1168 = vmatprep.subr.bf16.mxu1 %v2669_v32 }
  0x70   : > { %1128 = vmatpush1.bf16.msra.mxu0 %v2664_v33 }
  0x71   : > { %1169 = vmatpush1.bf16.msra.mxu1 %v2667_v34  ;;  %1129 = vmatprep.subr.bf16.mxu0 %v2672_v35 }
  0x72   : > { %1170 = vmatprep.subr.bf16.mxu1 %v2675_v36 }
  0x74   : > { %1130 = vmatpush1.bf16.msra.mxu0 %v2670_v37 }
  0x75   : > { %1171 = vmatpush1.bf16.msra.mxu1 %v2673_v38  ;;  %1131 = vmatprep.subr.bf16.mxu0 %v2678_v39 }
  0x76   : > { %1172 = vmatprep.subr.bf16.mxu1 %v2681_v40 }
  0x78   : > { %1132 = vmatpush2.bf16.msra.mxu0 %v2676_v41 }
  0x79   : > { %1173 = vmatpush2.bf16.msra.mxu1 %v2679_v42  ;;  %1133 = vmatprep.subr.bf16.mxu0 %v2684_v43 }
  0x7a   : > { %1174 = vmatprep.subr.bf16.mxu1 %v2687_v44 }
  0x7c   : > { %1134 = vmatpush2.bf16.msra.mxu0 %v2682_v45 }
  0x7d   : > { %1175 = vmatpush2.bf16.msra.mxu1 %v2685_v46  ;;  %1135 = vmatprep.subr.bf16.mxu0 %v2690_v47 }
  0x7e   : > { %1176 = vmatprep.subr.bf16.mxu1 %v2693_v48 }
  0x80   : > { %1136 = vmatpush2.bf16.msra.mxu0 %v2688_v49 }
  0x81   : > { %1177 = vmatpush2.bf16.msra.mxu1 %v2691_v50  ;;  %1137 = vmatprep.subr.bf16.mxu0 %v2696_v51 }
  0x82   : > { %1178 = vmatprep.subr.bf16.mxu1 %v2699_v52 }
  0x84   : > { %1138 = vmatpush2.bf16.msra.mxu0 %v2694_v53 }
  0x85   : > { %1179 = vmatpush2.bf16.msra.mxu1 %v2697_v54  ;;  %1139 = vmatprep.subr.bf16.mxu0 %v2702_v55 }
  0x86   : > { %1180 = vmatprep.subr.bf16.mxu1 %v2705_v56 }
  0x88   : > { %1140 = vmatpush2.bf16.msra.mxu0 %v2700_v57 }
  0x89   : > { %1181 = vmatpush2.bf16.msra.mxu1 %v2703_v58  ;;  %1141 = vmatprep.subr.bf16.mxu0 %v2708_v59 }
  0x8a   : > { %1182 = vmatprep.subr.bf16.mxu1 %v2711_v60 }
  0x8c   : > { %1142 = vmatpush2.bf16.msra.mxu0 %v2706_v61 }
  0x8d   : > { %1183 = vmatpush2.bf16.msra.mxu1 %v2709_v62  ;;  %1143 = vmatprep.subr.bf16.mxu0 %v2714_v63 }
  0x8e   : > { %1184 = vmatprep.subr.bf16.mxu1 %v2717_v0 }
  0x90   : > { %1144 = vmatpush2.bf16.msra.mxu0 %v2712_v1 }
  0x91   : > { %1185 = vmatpush2.bf16.msra.mxu1 %v2715_v2  ;;  %1145 = vmatprep.subr.bf16.mxu0 %v2720_v3 }
  0x92   : > { %1186 = vmatprep.subr.bf16.mxu1 %v2723_v4 }
  0x94   : > { %1146 = vmatpush2.bf16.msra.mxu0 %v2718_v5 }
  0x95   : > { %1187 = vmatpush2.bf16.msra.mxu1 %v2721_v6 }
  0x97   : > { %1148 = vmatmul.mubr.bf16.vlgmr.msra.gmra.mxu0 %v3049_v7  ;;  %v247_v7 = vld [vmem:[#allocation2 + $0x18] sm:$0xff] }
  0x98   : > { %1189 = vmatmul.mubr.bf16.vlgmr.msra.gmra.mxu1 %v3051_v8 }
 0x117   : > { %v1067_v9 = vpop.f32.mrf.mxu0 }
 0x118   : > { %v1108_v11 = vpop.f32.mrf.mxu1 }
 0x119   : > { %v1109_v12 = vadd.f32 %v1108_v11, %v1067_v9  ;;  %v1069_v13 = vpop.f32.mrf.mxu0 }
 0x11a   : > { %v1110_v15 = vpop.f32.mrf.mxu1 }
 0x11b   : > { %v1197_v16 = vadd.f32 %v1109_v12, %v245_v10  ;;  %v1111_v17 = vadd.f32 %v1110_v15, %v1069_v13  ;;  %v1071_v18 = vpop.f32.mrf.mxu0 }
 0x11c   : > { %v1112_v19 = vpop.f32.mrf.mxu1 }
 0x11d   : > { %1201 = vst [vmem:[#allocation2 + $0x10] sm:$0xff] %v1197_v16  ;;  %v1198_v20 = vadd.f32 %v1111_v17, %v246_v14  ;;  %v1072_v21 = vpop.f32.mrf.mxu0 }
 0x11e   : > { %v1113_v22 = vpop.f32.mrf.mxu1 }
 0x11f   : > { %1202 = vst [vmem:[#allocation2] sm:$0xff] %v1198_v20 }
 0x157   : > { %v1149_v23 = vpop.f32.mrf.mxu0 }
 0x158   : > { %v1190_v24 = vpop.f32.mrf.mxu1 }
 0x159   : > { %v1191_v8 = vadd.f32 %v1190_v24, %v1149_v23  ;;  %v1151_v25 = vpop.f32.mrf.mxu0 }
 0x15a   : > { %v1192_v27 = vpop.f32.mrf.mxu1 }
 0x15b   : > { %v1199_v28 = vadd.f32 %v1191_v8, %v247_v7  ;;  %v1193_v29 = vadd.f32 %v1192_v27, %v1151_v25  ;;  %v1153_v30 = vpop.f32.mrf.mxu0  ;;  %1208 = sbr.rel (%p2387_p6) target bundleno = 681 (0x2a9), region = 48 }
 0x15c   : > { %v1194_v31 = vpop.f32.mrf.mxu1 }
 0x15d   : > { %1203 = vst [vmem:[#allocation2 + $0x18] sm:$0xff] %v1199_v28  ;;  %v1200_v32 = vadd.f32 %v1193_v29, %v248_v26  ;;  %v1154_v33 = vpop.f32.mrf.mxu0 }
 0x15e   : > { %v1195_v34 = vpop.f32.mrf.mxu1 }
 0x15f   : > { %1204 = vst [vmem:[#allocation2 + $0x8] sm:$0xff] %v1200_v32 }
 0x160   : > { %v2724_v35 = vld [vmem:[%s3559_s3 + $0xe4] ss:$16 sps:$4 sm:$0xff]   ;;  %v2728_v37 = vld [vmem:[%s3559_s3 + $0xe0] ss:$16 sps:$4 sm:$0xff]   ;;  %v1215_v10 = vlaneseq }
 0x161   : > { %v2726_v36 = vld [vmem:[%s3559_s3 + $0x2e4] ss:$16 sps:$4 sm:$0xff]   ;;  %2037 = vmatprep.subr.bf16.mxu0 %v2724_v35  ;;  %v2729_v38 = vld [vmem:[%s3559_s3 + $0x2e0] ss:$16 sps:$4 sm:$0xff]  }
 0x162   : > { %2078 = vmatprep.subr.bf16.mxu1 %v2726_v36  ;;  %v2730_v39 = vld [vmem:[%s3559_s3 + $0xc4] ss:$16 sps:$4 sm:$0xff]   ;;  %2038 = vmatpush1.bf16.msra.mxu0 %v2728_v37  ;;  %v2734_v41 = vld [vmem:[%s3559_s3 + $0xc0] ss:$16 sps:$4 sm:$0xff]   ;;  %v3244_v15 = vshrl.u32 %v1215_v10, 7 }
 0x163   : > { %2079 = vmatpush1.bf16.msra.mxu1 %v2729_v38  ;;  %v2732_v40 = vld [vmem:[%s3559_s3 + $0x2c4] ss:$16 sps:$4 sm:$0xff]   ;;  %2039 = vmatprep.subr.bf16.mxu0 %v2730_v39  ;;  %v2735_v42 = vld [vmem:[%s3559_s3 + $0x2c0] ss:$16 sps:$4 sm:$0xff]   ;;  %v2832_v10 = vld [vmem:[%s3559_s3 + $0xa8] ss:$16 sps:$4 sm:$0xff]  }
 0x164   : > { %2080 = vmatprep.subr.bf16.mxu1 %v2732_v40  ;;  %v2736_v43 = vld [vmem:[%s3559_s3 + $0xa4] ss:$16 sps:$4 sm:$0xff]   ;;  %v2740_v45 = vld [vmem:[%s3559_s3 + $0xa0] ss:$16 sps:$4 sm:$0xff]   ;;  %v1221_v20 = vsub.s32 1, %v3244_v15  ;;  %v1229_v21 = vsub.s32 3, %v3244_v15 }
 0x165   : > { %v2738_v44 = vld [vmem:[%s3559_s3 + $0x2a4] ss:$16 sps:$4 sm:$0xff]   ;;  %v2741_v46 = vld [vmem:[%s3559_s3 + $0x2a0] ss:$16 sps:$4 sm:$0xff]   ;;  %v1217_v33 = vsub.s32 0, %v3244_v15  ;;  %v1225_v34 = vsub.s32 2, %v3244_v15 }
 0x166   : > { %2040 = vmatpush1.bf16.msra.mxu0 %v2734_v41  ;;  %v2742_v47 = vld [vmem:[%s3559_s3 + $0x84] ss:$16 sps:$4 sm:$0xff]   ;;  %v2746_v49 = vld [vmem:[%s3559_s3 + $0x80] ss:$16 sps:$4 sm:$0xff]   ;;  %v1212_v8 = vld [vmem:[#allocation2 + $0x8] sm:$0xff] }
 0x167   : > { %2081 = vmatpush1.bf16.msra.mxu1 %v2735_v42  ;;  %2041 = vmatprep.subr.bf16.mxu0 %v2736_v43  ;;  %v2744_v48 = vld [vmem:[%s3559_s3 + $0x284] ss:$16 sps:$4 sm:$0xff]   ;;  %v2747_v50 = vld [vmem:[%s3559_s3 + $0x280] ss:$16 sps:$4 sm:$0xff]  }
 0x168   : > { %2082 = vmatprep.subr.bf16.mxu1 %v2738_v44  ;;  %v2748_v51 = vld [vmem:[%s3559_s3 + $0x64] ss:$16 sps:$4 sm:$0xff]   ;;  %v2752_v53 = vld [vmem:[%s3559_s3 + $0x60] ss:$16 sps:$4 sm:$0xff]  }
 0x169   : > { %v2750_v52 = vld [vmem:[%s3559_s3 + $0x264] ss:$16 sps:$4 sm:$0xff]   ;;  %v2753_v54 = vld [vmem:[%s3559_s3 + $0x260] ss:$16 sps:$4 sm:$0xff]  }
 0x16a   : > { %2042 = vmatpush1.bf16.msra.mxu0 %v2740_v45  ;;  %v2754_v55 = vld [vmem:[%s3559_s3 + $0x44] ss:$16 sps:$4 sm:$0xff]   ;;  %v2758_v57 = vld [vmem:[%s3559_s3 + $0x40] ss:$16 sps:$4 sm:$0xff]  }
 0x16b   : > { %2083 = vmatpush1.bf16.msra.mxu1 %v2741_v46  ;;  %2043 = vmatprep.subr.bf16.mxu0 %v2742_v47  ;;  %v2756_v56 = vld [vmem:[%s3559_s3 + $0x244] ss:$16 sps:$4 sm:$0xff]   ;;  %v2759_v58 = vld [vmem:[%s3559_s3 + $0x240] ss:$16 sps:$4 sm:$0xff]   ;;  %v1211_v47 = vld [vmem:[#allocation2 + $0x18] sm:$0xff] }
 0x16c   : > { %2084 = vmatprep.subr.bf16.mxu1 %v2744_v48  ;;  %v2760_v59 = vld [vmem:[%s3559_s3 + $0x24] ss:$16 sps:$4 sm:$0xff]   ;;  %v2764_v61 = vld [vmem:[%s3559_s3 + $0x20] ss:$16 sps:$4 sm:$0xff]  }
 0x16d   : > { %v2762_v60 = vld [vmem:[%s3559_s3 + $0x224] ss:$16 sps:$4 sm:$0xff]   ;;  %v2765_v62 = vld [vmem:[%s3559_s3 + $0x220] ss:$16 sps:$4 sm:$0xff]  }
 0x16e   : > { %2044 = vmatpush1.bf16.msra.mxu0 %v2746_v49  ;;  %v2766_v63 = vld [vmem:[%s3559_s3 + $0x4] ss:$16 sps:$4 sm:$0xff]   ;;  %v2770_v1 = vld [vmem:[%s3559_s3] ss:$16 sps:$4 sm:$0xff]  }
 0x16f   : > { %2085 = vmatpush1.bf16.msra.mxu1 %v2747_v50  ;;  %2045 = vmatprep.subr.bf16.mxu0 %v2748_v51  ;;  %v2768_v0 = vld [vmem:[%s3559_s3 + $0x204] ss:$16 sps:$4 sm:$0xff]   ;;  %v2771_v2 = vld [vmem:[%s3559_s3 + $0x200] ss:$16 sps:$4 sm:$0xff]  }
 0x170   : > { %2086 = vmatprep.subr.bf16.mxu1 %v2750_v52  ;;  %v2772_v3 = vld [vmem:[%s3559_s3 + $0x1e4] ss:$16 sps:$4 sm:$0xff]   ;;  %v2776_v5 = vld [vmem:[%s3559_s3 + $0x1e0] ss:$16 sps:$4 sm:$0xff]  }
 0x171   : > { %v2774_v4 = vld [vmem:[%s3559_s3 + $0x3e4] ss:$16 sps:$4 sm:$0xff]   ;;  %v2777_v6 = vld [vmem:[%s3559_s3 + $0x3e0] ss:$16 sps:$4 sm:$0xff]  }
 0x172   : > { %2046 = vmatpush1.bf16.msra.mxu0 %v2752_v53  ;;  %v2778_v9 = vld [vmem:[%s3559_s3 + $0x1c4] ss:$16 sps:$4 sm:$0xff]   ;;  %v2782_v12 = vld [vmem:[%s3559_s3 + $0x1c0] ss:$16 sps:$4 sm:$0xff]  }
 0x173   : > { %2087 = vmatpush1.bf16.msra.mxu1 %v2753_v54  ;;  %2047 = vmatprep.subr.bf16.mxu0 %v2754_v55  ;;  %v2780_v11 = vld [vmem:[%s3559_s3 + $0x3c4] ss:$16 sps:$4 sm:$0xff]   ;;  %v2783_v13 = vld [vmem:[%s3559_s3 + $0x3c0] ss:$16 sps:$4 sm:$0xff]  }
 0x174   : > { %2088 = vmatprep.subr.bf16.mxu1 %v2756_v56  ;;  %v2784_v14 = vld [vmem:[%s3559_s3 + $0x1a4] ss:$16 sps:$4 sm:$0xff]   ;;  %v2788_v17 = vld [vmem:[%s3559_s3 + $0x1a0] ss:$16 sps:$4 sm:$0xff]  }
 0x175   : > { %v2786_v16 = vld [vmem:[%s3559_s3 + $0x3a4] ss:$16 sps:$4 sm:$0xff]   ;;  %v2789_v18 = vld [vmem:[%s3559_s3 + $0x3a0] ss:$16 sps:$4 sm:$0xff]  }
 0x176   : > { %2048 = vmatpush1.bf16.msra.mxu0 %v2758_v57  ;;  %v2790_v19 = vld [vmem:[%s3559_s3 + $0x184] ss:$16 sps:$4 sm:$0xff]   ;;  %v2794_v23 = vld [vmem:[%s3559_s3 + $0x180] ss:$16 sps:$4 sm:$0xff]  }
 0x177   : > { %2089 = vmatpush1.bf16.msra.mxu1 %v2759_v58  ;;  %2049 = vmatprep.subr.bf16.mxu0 %v2760_v59  ;;  %v2792_v22 = vld [vmem:[%s3559_s3 + $0x384] ss:$16 sps:$4 sm:$0xff]   ;;  %v1213_v24 = vld [vmem:[%s3558_s2] sm:$0xf] }
 0x178   : > { %2090 = vmatprep.subr.bf16.mxu1 %v2762_v60  ;;  %v1210_v7 = vld [vmem:[#allocation2] sm:$0xff]  ;;  %v1222_v26 = vrot.slane %v1213_v24, %v1221_v20  ;;  %v1230_v27 = vrot.slane %v1213_v24, %v1229_v21  ;;  %v1218_v44 = vrot.slane %v1213_v24, %v1217_v33  ;;  %v1226_v45 = vrot.slane %v1213_v24, %v1225_v34  ;;  %v1209_v46 = vld [vmem:[#allocation2 + $0x10] sm:$0xff]  ;;  %v2822_v60 = vld [vmem:[%s3559_s3 + $0xec] ss:$16 sps:$4 sm:$0xff]  }
 0x179   : > { %v2795_v25 = vld [vmem:[%s3559_s3 + $0x380] ss:$16 sps:$4 sm:$0xff]   ;;  %v2796_v28 = vld [vmem:[%s3559_s3 + $0x164] ss:$16 sps:$4 sm:$0xff]   ;;  %v2850_v24 = vld [vmem:[%s3559_s3 + $0x48] ss:$16 sps:$4 sm:$0xff]  }
 0x17a   : > { %2050 = vmatpush1.bf16.msra.mxu0 %v2764_v61  ;;  %v2798_v29 = vld [vmem:[%s3559_s3 + $0x364] ss:$16 sps:$4 sm:$0xff]   ;;  %v1236_v30 = vadd.f32 %v1222_v26, %v1210_v7  ;;  %v1238_v31 = vadd.f32 %v1230_v27, %v1212_v8  ;;  %v2800_v32 = vld [vmem:[%s3559_s3 + $0x160] ss:$16 sps:$4 sm:$0xff]   ;;  %v1235_v50 = vadd.f32 %v1218_v44, %v1209_v46  ;;  %v1237_v51 = vadd.f32 %v1226_v45, %v1211_v47  ;;  %v2825_v61 = vld [vmem:[%s3559_s3 + $0x2ec] ss:$16 sps:$4 sm:$0xff]  }
 0x17b   : > { %2091 = vmatpush1.bf16.msra.mxu1 %v2765_v62  ;;  %2051 = vmatprep.subr.bf16.mxu0 %v2766_v63  ;;  %v2801_v35 = vld [vmem:[%s3559_s3 + $0x360] ss:$16 sps:$4 sm:$0xff]   ;;  %v2802_v38 = vld [vmem:[%s3559_s3 + $0x144] ss:$16 sps:$4 sm:$0xff]   ;;  %v2855_v7 = vld [vmem:[%s3559_s3 + $0x24c] ss:$16 sps:$4 sm:$0xff]  }
 0x17c   : > { %2092 = vmatprep.subr.bf16.mxu1 %v2768_v0  ;;  %v1240_v36 = vmax.f32 %v1236_v30, 0.0  ;;  %v1242_v37 = vmax.f32 %v1238_v31, 0.0  ;;  %v2804_v39 = vld [vmem:[%s3559_s3 + $0x344] ss:$16 sps:$4 sm:$0xff]   ;;  %v2806_v40 = vld [vmem:[%s3559_s3 + $0x140] ss:$16 sps:$4 sm:$0xff]  }
 0x17d   : > { %v2807_v43 = vld [vmem:[%s3559_s3 + $0x340] ss:$16 sps:$4 sm:$0xff]   ;;  %v2808_v48 = vld [vmem:[%s3559_s3 + $0x124] ss:$16 sps:$4 sm:$0xff]   ;;  %v1239_v56 = vmax.f32 %v1235_v50, 0.0  ;;  %v1241_v57 = vmax.f32 %v1237_v51, 0.0 }
 0x17e   : > { %2052 = vmatpush1.bf16.msra.mxu0 %v2770_v1  ;;  %v1244_v41 = vpack.c.bf16 %v1240_v36, %v1240_v36  ;;  %v1246_v42 = vpack.c.bf16 %v1242_v37, %v1242_v37  ;;  %v2810_v49 = vld [vmem:[%s3559_s3 + $0x324] ss:$16 sps:$4 sm:$0xff]   ;;  %v2812_v52 = vld [vmem:[%s3559_s3 + $0x120] ss:$16 sps:$4 sm:$0xff]   ;;  %v2820_v0 = vld [vmem:[%s3559_s3 + $0xe8] ss:$16 sps:$4 sm:$0xff]  }
 0x17f   : > { %2093 = vmatpush1.bf16.msra.mxu1 %v2771_v2  ;;  %2053 = vmatprep.subr.bf16.mxu0 %v2772_v3  ;;  %v2813_v53 = vld [vmem:[%s3559_s3 + $0x320] ss:$16 sps:$4 sm:$0xff]   ;;  %v2814_v54 = vld [vmem:[%s3559_s3 + $0x104] ss:$16 sps:$4 sm:$0xff]   ;;  %v3336_v62 = vpack.c.bf16 %v1239_v56, %v1239_v56  ;;  %v3338_v63 = vpack.c.bf16 %v1241_v57, %v1241_v57  ;;  %v2823_v1 = vld [vmem:[%s3559_s3 + $0x2e8] ss:$16 sps:$4 sm:$0xff]  }
 0x180   : > { %2094 = vmatprep.subr.bf16.mxu1 %v2774_v4  ;;  %2069 = vmatprep.mubr.bf16.mxu0 %v1244_v41  ;;  %v2816_v55 = vld [vmem:[%s3559_s3 + $0x304] ss:$16 sps:$4 sm:$0xff]   ;;  %v2818_v58 = vld [vmem:[%s3559_s3 + $0x100] ss:$16 sps:$4 sm:$0xff]   ;;  %v2828_v2 = vld [vmem:[%s3559_s3 + $0xcc] ss:$16 sps:$4 sm:$0xff]  }
 0x181   : > { %2110 = vmatprep.mubr.bf16.mxu1 %v1246_v42  ;;  %v2819_v59 = vld [vmem:[%s3559_s3 + $0x300] ss:$16 sps:$4 sm:$0xff]   ;;  %v2831_v3 = vld [vmem:[%s3559_s3 + $0x2cc] ss:$16 sps:$4 sm:$0xff]   ;;  %v2826_v4 = vld [vmem:[%s3559_s3 + $0xc8] ss:$16 sps:$4 sm:$0xff]  }
 0x182   : > { %2054 = vmatpush2.bf16.msra.mxu0 %v2776_v5  ;;  %v2829_v5 = vld [vmem:[%s3559_s3 + $0x2c8] ss:$16 sps:$4 sm:$0xff]   ;;  %v2861_v26 = vld [vmem:[%s3559_s3 + $0x22c] ss:$16 sps:$4 sm:$0xff]  }
 0x183   : > { %2095 = vmatpush2.bf16.msra.mxu1 %v2777_v6  ;;  %2055 = vmatprep.subr.bf16.mxu0 %v2778_v9  ;;  %v2834_v6 = vld [vmem:[%s3559_s3 + $0xac] ss:$16 sps:$4 sm:$0xff]   ;;  %v2853_v8 = vld [vmem:[%s3559_s3 + $0x248] ss:$16 sps:$4 sm:$0xff]  }
 0x184   : > { %2096 = vmatprep.subr.bf16.mxu1 %v2780_v11  ;;  %v2837_v9 = vld [vmem:[%s3559_s3 + $0x2ac] ss:$16 sps:$4 sm:$0xff]   ;;  %v2835_v11 = vld [vmem:[%s3559_s3 + $0x2a8] ss:$16 sps:$4 sm:$0xff]  }
 0x185   : > { %v2856_v27 = vld [vmem:[%s3559_s3 + $0x28] ss:$16 sps:$4 sm:$0xff]   ;;  %v2867_v30 = vld [vmem:[%s3559_s3 + $0x20c] ss:$16 sps:$4 sm:$0xff]  }
 0x186   : > { %2056 = vmatpush2.bf16.msra.mxu0 %v2782_v12  ;;  %v2840_v12 = vld [vmem:[%s3559_s3 + $0x8c] ss:$16 sps:$4 sm:$0xff]   ;;  %v2862_v31 = vld [vmem:[%s3559_s3 + $0x8] ss:$16 sps:$4 sm:$0xff]  }
 0x187   : > { %2097 = vmatpush2.bf16.msra.mxu1 %v2783_v13  ;;  %2057 = vmatprep.subr.bf16.mxu0 %v2784_v14  ;;  %v2843_v13 = vld [vmem:[%s3559_s3 + $0x28c] ss:$16 sps:$4 sm:$0xff]   ;;  %v2838_v14 = vld [vmem:[%s3559_s3 + $0x88] ss:$16 sps:$4 sm:$0xff]  }
 0x188   : > { %2098 = vmatprep.subr.bf16.mxu1 %v2786_v16  ;;  %v2841_v16 = vld [vmem:[%s3559_s3 + $0x288] ss:$16 sps:$4 sm:$0xff]   ;;  %v2873_v36 = vld [vmem:[%s3559_s3 + $0x3ec] ss:$16 sps:$4 sm:$0xff]  }
 0x189   : > { %v2868_v37 = vld [vmem:[%s3559_s3 + $0x1e8] ss:$16 sps:$4 sm:$0xff]   ;;  %v2885_v44 = vld [vmem:[%s3559_s3 + $0x3ac] ss:$16 sps:$4 sm:$0xff]  }
 0x18a   : > { %2058 = vmatpush2.bf16.msra.mxu0 %v2788_v17  ;;  %v2846_v17 = vld [vmem:[%s3559_s3 + $0x6c] ss:$16 sps:$4 sm:$0xff]   ;;  %v2880_v45 = vld [vmem:[%s3559_s3 + $0x1a8] ss:$16 sps:$4 sm:$0xff]  }
 0x18b   : > { %2099 = vmatpush2.bf16.msra.mxu1 %v2789_v18  ;;  %2059 = vmatprep.subr.bf16.mxu0 %v2790_v19  ;;  %v2849_v18 = vld [vmem:[%s3559_s3 + $0x26c] ss:$16 sps:$4 sm:$0xff]   ;;  %v2844_v19 = vld [vmem:[%s3559_s3 + $0x68] ss:$16 sps:$4 sm:$0xff]  }
 0x18c   : > { %2100 = vmatprep.subr.bf16.mxu1 %v2792_v22  ;;  %v2847_v22 = vld [vmem:[%s3559_s3 + $0x268] ss:$16 sps:$4 sm:$0xff]   ;;  %v2888_v47 = vld [vmem:[%s3559_s3 + $0x18c] ss:$16 sps:$4 sm:$0xff]  }
 0x18d   : > { %v2883_v46 = vld [vmem:[%s3559_s3 + $0x3a8] ss:$16 sps:$4 sm:$0xff]   ;;  %v2894_v51 = vld [vmem:[%s3559_s3 + $0x16c] ss:$16 sps:$4 sm:$0xff]  }
 0x18e   : > { %2060 = vmatpush2.bf16.msra.mxu0 %v2794_v23  ;;  %v2852_v23 = vld [vmem:[%s3559_s3 + $0x4c] ss:$16 sps:$4 sm:$0xff]   ;;  %v2889_v50 = vld [vmem:[%s3559_s3 + $0x388] ss:$16 sps:$4 sm:$0xff]  }
 0x18f   : > { %2101 = vmatpush2.bf16.msra.mxu1 %v2795_v25  ;;  %2061 = vmatprep.subr.bf16.mxu0 %v2796_v28  ;;  %v2858_v25 = vld [vmem:[%s3559_s3 + $0x2c] ss:$16 sps:$4 sm:$0xff]   ;;  %v2859_v28 = vld [vmem:[%s3559_s3 + $0x228] ss:$16 sps:$4 sm:$0xff]  }
 0x190   : > { %2102 = vmatprep.subr.bf16.mxu1 %v2798_v29  ;;  %v2864_v29 = vld [vmem:[%s3559_s3 + $0xc] ss:$16 sps:$4 sm:$0xff]   ;;  %v2898_v57 = vld [vmem:[%s3559_s3 + $0x148] ss:$16 sps:$4 sm:$0xff]  }
 0x191   : > { %v2903_v56 = vld [vmem:[%s3559_s3 + $0x34c] ss:$16 sps:$4 sm:$0xff]  }
 0x192   : > { %2062 = vmatpush2.bf16.msra.mxu0 %v2800_v32  ;;  %v2865_v32 = vld [vmem:[%s3559_s3 + $0x208] ss:$16 sps:$4 sm:$0xff]  }
 0x193   : > { %2103 = vmatpush2.bf16.msra.mxu1 %v2801_v35  ;;  %2063 = vmatprep.subr.bf16.mxu0 %v2802_v38  ;;  %v2870_v35 = vld [vmem:[%s3559_s3 + $0x1ec] ss:$16 sps:$4 sm:$0xff]   ;;  %v2871_v38 = vld [vmem:[%s3559_s3 + $0x3e8] ss:$16 sps:$4 sm:$0xff]  }
 0x194   : > { %2104 = vmatprep.subr.bf16.mxu1 %v2804_v39  ;;  %v2876_v39 = vld [vmem:[%s3559_s3 + $0x1cc] ss:$16 sps:$4 sm:$0xff]  }
 0x196   : > { %2064 = vmatpush2.bf16.msra.mxu0 %v2806_v40  ;;  %v2879_v40 = vld [vmem:[%s3559_s3 + $0x3cc] ss:$16 sps:$4 sm:$0xff]  }
 0x197   : > { %2105 = vmatpush2.bf16.msra.mxu1 %v2807_v43  ;;  %2065 = vmatprep.subr.bf16.mxu0 %v2808_v48  ;;  %v2882_v43 = vld [vmem:[%s3559_s3 + $0x1ac] ss:$16 sps:$4 sm:$0xff]  }
 0x198   : > { %2106 = vmatprep.subr.bf16.mxu1 %v2810_v49  ;;  %v2891_v48 = vld [vmem:[%s3559_s3 + $0x38c] ss:$16 sps:$4 sm:$0xff]   ;;  %v2886_v49 = vld [vmem:[%s3559_s3 + $0x188] ss:$16 sps:$4 sm:$0xff]  }
 0x19a   : > { %2066 = vmatpush2.bf16.msra.mxu0 %v2812_v52  ;;  %v2897_v52 = vld [vmem:[%s3559_s3 + $0x36c] ss:$16 sps:$4 sm:$0xff]  }
 0x19b   : > { %2107 = vmatpush2.bf16.msra.mxu1 %v2813_v53  ;;  %2067 = vmatprep.subr.bf16.mxu0 %v2814_v54  ;;  %v2892_v53 = vld [vmem:[%s3559_s3 + $0x168] ss:$16 sps:$4 sm:$0xff]  }
 0x19c   : > { %2108 = vmatprep.subr.bf16.mxu1 %v2816_v55  ;;  %v2895_v54 = vld [vmem:[%s3559_s3 + $0x368] ss:$16 sps:$4 sm:$0xff]   ;;  %v2900_v55 = vld [vmem:[%s3559_s3 + $0x14c] ss:$16 sps:$4 sm:$0xff]  }
 0x19e   : > { %2068 = vmatpush2.bf16.msra.mxu0 %v2818_v58  ;;  %v2901_v58 = vld [vmem:[%s3559_s3 + $0x348] ss:$16 sps:$4 sm:$0xff]  }
 0x19f   : > { %2109 = vmatpush2.bf16.msra.mxu1 %v2819_v59  ;;  %2119 = vmatprep.subr.bf16.mxu0 %v2822_v60  ;;  %v2906_v59 = vld [vmem:[%s3559_s3 + $0x12c] ss:$16 sps:$4 sm:$0xff]  }
 0x1a0   : > { %2160 = vmatprep.subr.bf16.mxu1 %v2825_v61  ;;  %v2909_v60 = vld [vmem:[%s3559_s3 + $0x32c] ss:$16 sps:$4 sm:$0xff]   ;;  %v2904_v61 = vld [vmem:[%s3559_s3 + $0x128] ss:$16 sps:$4 sm:$0xff]  }
 0x1a1   : > { %2070 = vmatmul.mubr.bf16.vlgmr.msra.gmra.mxu0 %v3336_v62 }
 0x1a2   : > { %2111 = vmatmul.mubr.bf16.vlgmr.msra.gmra.mxu1 %v3338_v63  ;;  %2120 = vmatpush1.bf16.msra.mxu0 %v2820_v0  ;;  %v2907_v0 = vld [vmem:[%s3559_s3 + $0x328] ss:$16 sps:$4 sm:$0xff]  }
 0x1a3   : > { %2161 = vmatpush1.bf16.msra.mxu1 %v2823_v1  ;;  %2121 = vmatprep.subr.bf16.mxu0 %v2828_v2  ;;  %v2912_v1 = vld [vmem:[%s3559_s3 + $0x10c] ss:$16 sps:$4 sm:$0xff]  }
 0x1a4   : > { %2162 = vmatprep.subr.bf16.mxu1 %v2831_v3  ;;  %2151 = vmatprep.mubr.bf16.mxu0 %v1244_v41  ;;  %v2874_v41 = vld [vmem:[%s3559_s3 + $0x1c8] ss:$16 sps:$4 sm:$0xff]   ;;  %v2915_v2 = vld [vmem:[%s3559_s3 + $0x30c] ss:$16 sps:$4 sm:$0xff]  }
 0x1a5   : > { %2192 = vmatprep.mubr.bf16.mxu1 %v1246_v42  ;;  %v2877_v42 = vld [vmem:[%s3559_s3 + $0x3c8] ss:$16 sps:$4 sm:$0xff]  }
 0x1a6   : > { %2122 = vmatpush1.bf16.msra.mxu0 %v2826_v4  ;;  %v2910_v3 = vld [vmem:[%s3559_s3 + $0x108] ss:$16 sps:$4 sm:$0xff]  }
 0x1a7   : > { %2163 = vmatpush1.bf16.msra.mxu1 %v2829_v5  ;;  %2123 = vmatprep.subr.bf16.mxu0 %v2834_v6  ;;  %v2913_v4 = vld [vmem:[%s3559_s3 + $0x308] ss:$16 sps:$4 sm:$0xff]   ;;  %v1375_v5 = vld [vmem:[%s3560_s4] sm:$0xf] }
 0x1a8   : > { %2164 = vmatprep.subr.bf16.mxu1 %v2837_v9  ;;  %v1380_v6 = vrot.slane %v1375_v5, %v1217_v33  ;;  %v1384_v9 = vrot.slane %v1375_v5, %v1221_v20  ;;  %v1388_v20 = vrot.slane %v1375_v5, %v1225_v34  ;;  %v1392_v33 = vrot.slane %v1375_v5, %v1229_v21 }
 0x1aa   : > { %2124 = vmatpush1.bf16.msra.mxu0 %v2832_v10 }
 0x1ab   : > { %2165 = vmatpush1.bf16.msra.mxu1 %v2835_v11  ;;  %2125 = vmatprep.subr.bf16.mxu0 %v2840_v12 }
 0x1ac   : > { %2166 = vmatprep.subr.bf16.mxu1 %v2843_v13 }
 0x1ae   : > { %2126 = vmatpush1.bf16.msra.mxu0 %v2838_v14 }
 0x1af   : > { %2167 = vmatpush1.bf16.msra.mxu1 %v2841_v16  ;;  %2127 = vmatprep.subr.bf16.mxu0 %v2846_v17 }
 0x1b0   : > { %2168 = vmatprep.subr.bf16.mxu1 %v2849_v18 }
 0x1b2   : > { %2128 = vmatpush1.bf16.msra.mxu0 %v2844_v19 }
 0x1b3   : > { %2169 = vmatpush1.bf16.msra.mxu1 %v2847_v22  ;;  %2129 = vmatprep.subr.bf16.mxu0 %v2852_v23 }
 0x1b4   : > { %2170 = vmatprep.subr.bf16.mxu1 %v2855_v7 }
 0x1b6   : > { %2130 = vmatpush1.bf16.msra.mxu0 %v2850_v24 }
 0x1b7   : > { %2171 = vmatpush1.bf16.msra.mxu1 %v2853_v8  ;;  %2131 = vmatprep.subr.bf16.mxu0 %v2858_v25 }
 0x1b8   : > { %2172 = vmatprep.subr.bf16.mxu1 %v2861_v26 }
 0x1ba   : > { %2132 = vmatpush1.bf16.msra.mxu0 %v2856_v27 }
 0x1bb   : > { %2173 = vmatpush1.bf16.msra.mxu1 %v2859_v28  ;;  %2133 = vmatprep.subr.bf16.mxu0 %v2864_v29 }
 0x1bc   : > { %2174 = vmatprep.subr.bf16.mxu1 %v2867_v30 }
 0x1be   : > { %2134 = vmatpush1.bf16.msra.mxu0 %v2862_v31 }
 0x1bf   : > { %2175 = vmatpush1.bf16.msra.mxu1 %v2865_v32  ;;  %2135 = vmatprep.subr.bf16.mxu0 %v2870_v35 }
 0x1c0   : > { %2176 = vmatprep.subr.bf16.mxu1 %v2873_v36 }
 0x1c2   : > { %2136 = vmatpush2.bf16.msra.mxu0 %v2868_v37 }
 0x1c3   : > { %2177 = vmatpush2.bf16.msra.mxu1 %v2871_v38  ;;  %2137 = vmatprep.subr.bf16.mxu0 %v2876_v39 }
 0x1c4   : > { %2178 = vmatprep.subr.bf16.mxu1 %v2879_v40 }
 0x1c6   : > { %2138 = vmatpush2.bf16.msra.mxu0 %v2874_v41 }
 0x1c7   : > { %2179 = vmatpush2.bf16.msra.mxu1 %v2877_v42  ;;  %2139 = vmatprep.subr.bf16.mxu0 %v2882_v43 }
 0x1c8   : > { %2180 = vmatprep.subr.bf16.mxu1 %v2885_v44 }
 0x1ca   : > { %2140 = vmatpush2.bf16.msra.mxu0 %v2880_v45 }
 0x1cb   : > { %2181 = vmatpush2.bf16.msra.mxu1 %v2883_v46  ;;  %2141 = vmatprep.subr.bf16.mxu0 %v2888_v47 }
 0x1cc   : > { %2182 = vmatprep.subr.bf16.mxu1 %v2891_v48 }
 0x1ce   : > { %2142 = vmatpush2.bf16.msra.mxu0 %v2886_v49 }
 0x1cf   : > { %2183 = vmatpush2.bf16.msra.mxu1 %v2889_v50  ;;  %2143 = vmatprep.subr.bf16.mxu0 %v2894_v51 }
 0x1d0   : > { %2184 = vmatprep.subr.bf16.mxu1 %v2897_v52 }
 0x1d2   : > { %2144 = vmatpush2.bf16.msra.mxu0 %v2892_v53 }
 0x1d3   : > { %2185 = vmatpush2.bf16.msra.mxu1 %v2895_v54  ;;  %2145 = vmatprep.subr.bf16.mxu0 %v2900_v55 }
 0x1d4   : > { %2186 = vmatprep.subr.bf16.mxu1 %v2903_v56 }
 0x1d6   : > { %2146 = vmatpush2.bf16.msra.mxu0 %v2898_v57 }
 0x1d7   : > { %2187 = vmatpush2.bf16.msra.mxu1 %v2901_v58  ;;  %2147 = vmatprep.subr.bf16.mxu0 %v2906_v59 }
 0x1d8   : > { %2188 = vmatprep.subr.bf16.mxu1 %v2909_v60 }
 0x1da   : > { %2148 = vmatpush2.bf16.msra.mxu0 %v2904_v61 }
 0x1db   : > { %2189 = vmatpush2.bf16.msra.mxu1 %v2907_v0  ;;  %2149 = vmatprep.subr.bf16.mxu0 %v2912_v1 }
 0x1dc   : > { %2190 = vmatprep.subr.bf16.mxu1 %v2915_v2 }
 0x1de   : > { %2150 = vmatpush2.bf16.msra.mxu0 %v2910_v3 }
 0x1df   : > { %2191 = vmatpush2.bf16.msra.mxu1 %v2913_v4 }
 0x1e1   : > { %2152 = vmatmul.mubr.bf16.vlgmr.msra.gmra.mxu0 %v3336_v62 }
 0x1e2   : > { %2193 = vmatmul.mubr.bf16.vlgmr.msra.gmra.mxu1 %v3338_v63 }
 0x261   : > { %v2071_v10 = vpop.f32.mrf.mxu0 }
 0x262   : > { %v2112_v11 = vpop.f32.mrf.mxu1  ;;  %v2072_v12 = vadd.f32 %v2071_v10, %v1380_v6 }
 0x263   : > { %v2073_v13 = vpop.f32.mrf.mxu0 }
 0x264   : > { %v2114_v14 = vpop.f32.mrf.mxu1  ;;  %v2113_v16 = vadd.f32 %v2112_v11, %v2072_v12  ;;  %v2074_v17 = vadd.f32 %v2073_v13, %v1384_v9 }
 0x265   : > { %v2075_v62 = vpop.f32.mrf.mxu0 }
 0x266   : > { %v2116_v18 = vpop.f32.mrf.mxu1  ;;  %2201 = vst [vmem:[%s3561_s5] sm:$0xff] %v2113_v16  ;;  %v2115_v63 = vadd.f32 %v2114_v14, %v2074_v17 }
 0x267   : > { %v2076_v19 = vpop.f32.mrf.mxu0 }
 0x268   : > { %v2117_v22 = vpop.f32.mrf.mxu1  ;;  %2202 = vst [vmem:[%s3561_s5 + $0x8] sm:$0xff] %v2115_v63 }
 0x2a1   : > { %v2153_v23 = vpop.f32.mrf.mxu0 }
 0x2a2   : > { %v2194_v7 = vpop.f32.mrf.mxu1  ;;  %v2154_v24 = vadd.f32 %v2153_v23, %v1388_v20 }
 0x2a3   : > { %v2155_v8 = vpop.f32.mrf.mxu0 }
 0x2a4   : > { %v2196_v25 = vpop.f32.mrf.mxu1  ;;  %v2195_v26 = vadd.f32 %v2194_v7, %v2154_v24  ;;  %v2156_v27 = vadd.f32 %v2155_v8, %v1392_v33 }
 0x2a5   : > { %v2157_v28 = vpop.f32.mrf.mxu0 }
 0x2a6   : > { %v2198_v29 = vpop.f32.mrf.mxu1  ;;  %2203 = vst [vmem:[%s3561_s5 + $0x10] sm:$0xff] %v2195_v26  ;;  %v2197_v30 = vadd.f32 %v2196_v25, %v2156_v27 }
 0x2a7   : > { %v2158_v31 = vpop.f32.mrf.mxu0 }
 0x2a8   : > { %v2199_v32 = vpop.f32.mrf.mxu1  ;;  %2204 = vst [vmem:[%s3561_s5 + $0x18] sm:$0xff] %v2197_v30 }
 0x2a9 PF: > { %s15_s18 = sadd.s32 1, %s2922_s18  }
 0x2aa   : > { %p12_p7 = scmp.ge.s32.totalorder %s15_s18, 11  }
 0x2ac   :  { %14 = sbr.rel (!%p12_p7) target bundleno = 1 (0x1), region = 77 }

</bundles_post_ra>
